<compile_context>
chip_gen: v5e
topology: v5e:2x2
jax: 0.10.0
libtpu: 0.0.40
codegen_flags: <defaults>
</compile_context>

<pallas_src>
import functools

import jax
import jax.numpy as jnp
from jax import lax
from jax.experimental import pallas as pl
from jax.experimental.pallas import tpu as pltpu

LANE = 128
SUBLANE = 8


def _round_up(x, m):
    return ((x + m - 1) // m) * m


def _pick_tile_h(h, w_tot, c1p, cmp_, c2p, *, cap=64, budget=16 << 20):
    """Largest divisor of h (<= cap) whose per-step working set fits budget."""
    def step_bytes(th):
        rp = (th + 2) * w_tot
        return (2 * rp * c1p * 2             # x block, double buffered, bf16
                + 2 * th * w_tot * c2p * 2   # out block, double buffered, bf16
                + rp * cmp_ * 4              # y1 (f32)
                + rp * 3 * cmp_ * (4 + 2)    # dx taps + concat (f32 + bf16)
                + 2 * th * w_tot * c2p * 4)  # matmul partial accumulators (f32)
    th = min(h, cap)
    while th > 1 and step_bytes(th) > budget:
        th -= 1
    while h % th:          # NOTE: prime h degrades to th == 1 (halo overhead)
        th -= 1
    return th


# ----------------------------------------------------------------------------
# Kernel: one flattened (batch, H-tile) step.
# ----------------------------------------------------------------------------
def _bottleneck_kernel(x_ref, w1_ref, s1_ref, b1_ref, w2_ref, s2_ref, b2_ref,
                       o_ref, *, add, th, ht, w_out, w_tot):
    """
    x_ref  : (1, Rp, C1p)       bf16  flattened (TH+2, Wtot) x C1p tile (halo+pad)
    w1_ref : (C1p, Cmp)         bf16  1x1 conv weight
    s1,b1  : (1, Cmp)           f32   folded BN1 scale / bias
    w2_ref : (3, 3*Cmp, C2p)    bf16  3x3 conv weight, dy-major, K = (dx, cin)
    s2,b2  : (1, C2p)           f32   folded BN2 scale / bias
    o_ref  : (1, TH, Wtot, C2p) bf16
    """
    rp = x_ref.shape[1]
    c1p = x_ref.shape[2]
    c2p = o_ref.shape[-1]
    n_int = th * w_tot                       # interior rows (rows 1..th)

    x = x_ref[...].reshape(rp, c1p)                                  # bf16

    # ---- cv1: 1x1 conv = channel matmul (bf16 MXU, f32 acc) + BN + SiLU ----
    y1 = jnp.dot(x, w1_ref[...], preferred_element_type=jnp.float32)
    y1 = y1 * s1_ref[...] + b1_ref[...]
    y1 = y1 * jax.nn.sigmoid(y1)

    # ---- zero cv2's zero-padding ring (iota-based, no integer div/mod) -----
    # left/right pad columns always; top/bottom halo rows only when this tile
    # touches the true image boundary.
    row = lax.broadcasted_iota(jnp.int32, (th + 2, w_tot, 1), 0).reshape(rp, 1)
    col = lax.broadcasted_iota(jnp.int32, (th + 2, w_tot, 1), 1).reshape(rp, 1)
    if ht == 1:
        ylo, yhi = 1, th
    else:
        j = lax.rem(pl.program_id(0), ht)    # H-tile index inside the image
        ylo = jnp.where(j == 0, 1, 0)
        yhi = jnp.where(j == ht - 1, th, th + 1)
    mask = (col >= 1) & (col <= w_out) & (row >= ylo) & (row >= ylo) & (row <= yhi)
    # Masking BEFORE the rolls is load-bearing: roll wraparound and the dx
    # wrap across row boundaries only ever read masked-zero pad columns, and
    # any output position that could still see wrapped data is a pad column
    # cropped by the wrapper.  Do not reorder mask / roll / crop.
    y1 = jnp.where(mask, y1, 0.0)                                    # (Rp, Cmp)

    # ---- cv2: 3x3 conv ------------------------------------------------------
    # dx taps via two sublane rolls (XLU) + one concat; dy taps are
    # sublane-aligned static row slices of the concat at offsets dy*w_tot.
    # TODO(synk): roll in bf16 (halves roll/concat bytes) once packed-dtype
    #             sublane rotate is confirmed on all target toolchains.
    left = pltpu.roll(y1, shift=1, axis=0)        # tap dx = -1
    right = pltpu.roll(y1, shift=rp - 1, axis=0)  # tap dx = +1
    cat = jnp.concatenate([left, y1, right], axis=-1).astype(jnp.bfloat16)

    acc = None
    for dy in range(3):                            # K = 3*Cmp per matmul
        tap = cat[dy * w_tot:(th + dy) * w_tot]    # (n_int, 3*Cmp), aligned
        part = jnp.dot(tap, w2_ref[dy], preferred_element_type=jnp.float32)
        acc = part if acc is None else acc + part

    # ---- BN2 + SiLU + residual (interior rows only) -------------------------
    y2 = acc * s2_ref[...] + b2_ref[...]
    y2 = y2 * jax.nn.sigmoid(y2)
    if add:                                        # residual shortcut
        y2 = y2 + x[w_tot:w_tot + n_int].astype(jnp.float32)

    # lane-dense (C2p = 128k), sublane-aligned (Wtot = 8k) bf16 store
    o_ref[...] = y2.reshape(1, th, w_tot, c2p).astype(o_ref.dtype)


# ----------------------------------------------------------------------------
# Wrapper: BN fold, channel/lane padding, halo windowing, pallas_call plumbing.
# ----------------------------------------------------------------------------
def bottleneck_pallas(x_nchw, params, *, shortcut=True, max_tile_h=64):
    (w1, g1, be1, m1, v1, w2, g2, be2, m2, v2) = params
    eps = 1e-5  # PyTorch BatchNorm2d default

    n, c1, hgt, wid = x_nchw.shape
    c_ = w1.shape[1]
    c2 = w2.shape[3]
    add = bool(shortcut and c1 == c2)

    c1p = _round_up(c1, LANE)
    cmp_ = _round_up(c_, LANE)
    c2p = _round_up(c2, LANE)
    if add:
        assert c1p == c2p

    w_tot = _round_up(wid + 2, SUBLANE)     # padded width, sublane aligned
    th = _pick_tile_h(hgt, w_tot, c1p, cmp_, c2p, cap=max_tile_h)
    ht = hgt // th
    rp = (th + 2) * w_tot                   # flattened padded rows per tile

    # ---- fold BN (eval mode) into scale/bias, pad to lane multiples --------
    s1 = g1 / jnp.sqrt(v1 + eps)
    b1 = be1 - m1 * s1
    s2 = g2 / jnp.sqrt(v2 + eps)
    b2 = be2 - m2 * s2
    s1p = jnp.zeros((1, cmp_), jnp.float32).at[0, :c_].set(s1)
    b1p = jnp.zeros((1, cmp_), jnp.float32).at[0, :c_].set(b1)
    s2p = jnp.zeros((1, c2p), jnp.float32).at[0, :c2].set(s2)
    b2p = jnp.zeros((1, c2p), jnp.float32).at[0, :c2].set(b2)

    # ---- weights: zero-pad channels to 128, bf16 for the MXU ---------------
    w1p = (jnp.zeros((c1p, cmp_), jnp.float32)
           .at[:c1, :c_].set(w1).astype(jnp.bfloat16))
    w2p = (jnp.zeros((3, 3, cmp_, c2p), jnp.float32)
           .at[:, :, :c_, :c2].set(w2)
           .reshape(3, 3 * cmp_, c2p).astype(jnp.bfloat16))   # dy-major, K=(dx,cin)

    # ---- activations: NCHW->NHWC bf16, one fused channel+spatial pad -------
    # TODO(synk): keep the network NHWC/bf16 so this pre/post plumbing is free.
    x = jnp.transpose(x_nchw, (0, 2, 3, 1)).astype(jnp.bfloat16)
    x = jnp.pad(x, ((0, 0), (1, 1), (1, w_tot - wid - 1), (0, c1p - c1)))
    if ht == 1:                              # whole image is one tile: no gather
        x_win = x.reshape(n, rp, c1p)
    else:
        # TODO(synk): replace with manual halo DMA (pl.ANY + make_async_copy).
        win = jnp.arange(ht)[:, None] * th + jnp.arange(th + 2)[None, :]
        x_win = x[:, win].reshape(n * ht, rp, c1p)

    kernel = functools.partial(_bottleneck_kernel, add=add, th=th, ht=ht,
                               w_out=wid, w_tot=w_tot)

    out = pl.pallas_call(
        kernel,
        out_shape=jax.ShapeDtypeStruct((n * ht, th, w_tot, c2p), jnp.bfloat16),
        grid=(n * ht,),
        in_specs=[
            pl.BlockSpec((1, rp, c1p), lambda g: (g, 0, 0)),
            # parameters: constant index maps -> stay VMEM-resident per step
            # TODO(synk): pipeline_mode=pl.Buffered(1) on these for v7x at
            #             realistic channel widths to halve their VMEM cost.
            pl.BlockSpec((c1p, cmp_), lambda g: (0, 0)),
            pl.BlockSpec((1, cmp_), lambda g: (0, 0)),
            pl.BlockSpec((1, cmp_), lambda g: (0, 0)),
            pl.BlockSpec((3, 3 * cmp_, c2p), lambda g: (0, 0, 0)),
            pl.BlockSpec((1, c2p), lambda g: (0, 0)),
            pl.BlockSpec((1, c2p), lambda g: (0, 0)),
        ],
        out_specs=pl.BlockSpec((1, th, w_tot, c2p), lambda g: (g, 0, 0, 0)),
        compiler_params=pltpu.CompilerParams(
            dimension_semantics=("parallel",),
            vmem_limit_bytes=32 * 1024 * 1024),
    )(x_win, w1p, s1p, b1p, w2p, s2p, b2p)

    # crop interior columns / real channels, back to NCHW f32 (wrapper side)
    out = out.reshape(n, hgt, w_tot, c2p)[:, :, 1:wid + 1, :c2]
    return jnp.transpose(out, (0, 3, 1, 2)).astype(jnp.float32)


# ----------------------------------------------------------------------------
# Pure-JAX reference (mirrors the bf16 matmul casts, f32 accumulation).
# ----------------------------------------------------------------------------
def bottleneck_ref(x_nchw, params, *, shortcut=True):
    (w1, g1, be1, m1, v1, w2, g2, be2, m2, v2) = params
    eps = 1e-5
    c1 = x_nchw.shape[1]
    c_ = w1.shape[1]
    c2 = w2.shape[3]
    x = jnp.transpose(x_nchw, (0, 2, 3, 1)).astype(jnp.bfloat16)
    dn = ('NHWC', 'HWIO', 'NHWC')

    y = lax.conv_general_dilated(x, w1.reshape(1, 1, c1, c_).astype(jnp.bfloat16),
                                 (1, 1), 'SAME', dimension_numbers=dn,
                                 preferred_element_type=jnp.float32)
    y = y * (g1 / jnp.sqrt(v1 + eps)) + (be1 - m1 * g1 / jnp.sqrt(v1 + eps))
    y = y * jax.nn.sigmoid(y)
    y = lax.conv_general_dilated(y.astype(jnp.bfloat16), w2.astype(jnp.bfloat16),
                                 (1, 1), 'SAME', dimension_numbers=dn,
                                 preferred_element_type=jnp.float32)
    y = y * (g2 / jnp.sqrt(v2 + eps)) + (be2 - m2 * g2 / jnp.sqrt(v2 + eps))
    y = y * jax.nn.sigmoid(y)
    if shortcut and c1 == c2:
        y = y + x.astype(jnp.float32)
    return jnp.transpose(y, (0, 3, 1, 2))


def make_params(key, c1, c2, e=0.5):
    """Deterministic synthetic parameters (conv weights + BN stats)."""
    c_ = int(c2 * e)
    ks = jax.random.split(key, 8)
    w1 = jax.random.normal(ks[0], (c1, c_), jnp.float32) * 0.2        # 1x1 (Cin,Cout)
    w2 = jax.random.normal(ks[1], (3, 3, c_, c2), jnp.float32) * 0.1  # HWIO
    g1 = 1.0 + 0.1 * jax.random.normal(ks[2], (c_,), jnp.float32)
    be1 = 0.1 * jax.random.normal(ks[3], (c_,), jnp.float32)
    m1 = 0.1 * jax.random.normal(ks[4], (c_,), jnp.float32)
    v1 = jnp.abs(1.0 + 0.1 * jax.random.normal(ks[5], (c_,), jnp.float32))
    g2 = 1.0 + 0.1 * jax.random.normal(ks[6], (c2,), jnp.float32)
    be2 = 0.1 * jax.random.normal(ks[7], (c2,), jnp.float32)
    m2 = jnp.zeros((c2,), jnp.float32)
    v2 = jnp.ones((c2,), jnp.float32)
    return (w1, g1, be1, m1, v1, w2, g2, be2, m2, v2)


if __name__ == "__main__":
    key = jax.random.PRNGKey(0)
    kx, kp = jax.random.split(key)

    N, C1, H, W = 2, 4, 16, 16
    C2 = 4                       # c1 == c2 -> residual shortcut active
    x = jax.random.normal(kx, (N, C1, H, W), jnp.float32)
    params = make_params(kp, C1, C2, e=0.5)

    fwd = jax.jit(functools.partial(bottleneck_pallas, shortcut=True))
    out = fwd(x, params)
    jax.block_until_ready(out)

    ref = bottleneck_ref(x, params, shortcut=True)
    assert out.shape == (N, C2, H, W)
    err = jnp.max(jnp.abs(out - ref))
    assert jnp.allclose(out, ref, atol=3e-2, rtol=3e-2), f"max abs err {err}"

    print("KERNEL_OK")
</pallas_src>

<mosaic_0001>
module attributes {stable_mosaic.version = 11 : i64} {
  func.func @_bottleneck_kernel(%arg0: i32, %arg1: memref<1x432x128xbf16, #tpu.memory_space<vmem>>, %arg2: memref<128x128xbf16, #tpu.memory_space<vmem>>, %arg3: memref<1x128xf32, #tpu.memory_space<vmem>>, %arg4: memref<1x128xf32, #tpu.memory_space<vmem>>, %arg5: memref<3x384x128xbf16, #tpu.memory_space<vmem>>, %arg6: memref<1x128xf32, #tpu.memory_space<vmem>>, %arg7: memref<1x128xf32, #tpu.memory_space<vmem>>, %arg8: memref<1x16x24x128xbf16, #tpu.memory_space<vmem>>) attributes {dimension_semantics = [#tpu.dimension_semantics<parallel>], iteration_bounds = array<i64: 2>, scalar_prefetch = 0 : i64, scratch_operands = 0 : i64, tpu.core_type = #tpu.core_type<tc>, window_params = [{transform_indices = @transform_0, window_bounds = array<i64: 1, 432, 128>}, {pipeline_mode = #tpu.pipeline_mode<synchronous>, transform_indices = @transform_1, window_bounds = array<i64: 128, 128>}, {pipeline_mode = #tpu.pipeline_mode<synchronous>, transform_indices = @transform_2, window_bounds = array<i64: 1, 128>}, {pipeline_mode = #tpu.pipeline_mode<synchronous>, transform_indices = @transform_3, window_bounds = array<i64: 1, 128>}, {pipeline_mode = #tpu.pipeline_mode<synchronous>, transform_indices = @transform_4, window_bounds = array<i64: 3, 384, 128>}, {pipeline_mode = #tpu.pipeline_mode<synchronous>, transform_indices = @transform_5, window_bounds = array<i64: 1, 128>}, {pipeline_mode = #tpu.pipeline_mode<synchronous>, transform_indices = @transform_6, window_bounds = array<i64: 1, 128>}, {transform_indices = @transform_7, window_bounds = array<i64: 1, 16, 24, 128>}]} {
    %c0 = arith.constant 0 : index
    %c0_0 = arith.constant 0 : index
    %c0_1 = arith.constant 0 : index
    %0 = vector.load %arg1[%c0, %c0_0, %c0_1] : memref<1x432x128xbf16, #tpu.memory_space<vmem>>, vector<1x432x128xbf16>
    %1 = vector.shape_cast %0 : vector<1x432x128xbf16> to vector<432x128xbf16>
    %c0_2 = arith.constant 0 : index
    %c0_3 = arith.constant 0 : index
    %2 = vector.load %arg2[%c0_2, %c0_3] : memref<128x128xbf16, #tpu.memory_space<vmem>>, vector<128x128xbf16>
    %cst = arith.constant dense<0.000000e+00> : vector<432x128xf32>
    %3 = tpu.matmul %1, %2, %cst {dimension_numbers = #tpu.dot_dimension_numbers<[1], [0], [0], [1], [0, 0, 1, 1], [], []>} : vector<432x128xbf16>, vector<128x128xbf16>, vector<432x128xf32> -> vector<432x128xf32>
    %c0_4 = arith.constant 0 : index
    %c0_5 = arith.constant 0 : index
    %4 = vector.load %arg3[%c0_4, %c0_5] : memref<1x128xf32, #tpu.memory_space<vmem>>, vector<1x128xf32>
    %5 = vector.broadcast %4 : vector<1x128xf32> to vector<432x128xf32>
    %6 = arith.mulf %3, %5 : vector<432x128xf32>
    %c0_6 = arith.constant 0 : index
    %c0_7 = arith.constant 0 : index
    %7 = vector.load %arg4[%c0_6, %c0_7] : memref<1x128xf32, #tpu.memory_space<vmem>>, vector<1x128xf32>
    %8 = vector.broadcast %7 : vector<1x128xf32> to vector<432x128xf32>
    %9 = arith.addf %6, %8 : vector<432x128xf32>
    %10 = arith.negf %9 : vector<432x128xf32>
    %11 = math.exp %10 : vector<432x128xf32>
    %cst_8 = arith.constant 1.000000e+00 : f32
    %12 = vector.broadcast %cst_8 : f32 to vector<432x128xf32>
    %13 = arith.addf %12, %11 : vector<432x128xf32>
    %14 = arith.divf %12, %13 : vector<432x128xf32>
    %15 = arith.mulf %9, %14 : vector<432x128xf32>
    %16 = tpu.iota {dimensions = array<i32: 0>} : vector<18x24x1xi32>
    %17 = vector.shape_cast %16 : vector<18x24x1xi32> to vector<432x1xi32>
    %18 = tpu.iota {dimensions = array<i32: 1>} : vector<18x24x1xi32>
    %19 = vector.shape_cast %18 : vector<18x24x1xi32> to vector<432x1xi32>
    %c1_i32 = arith.constant 1 : i32
    %20 = vector.broadcast %c1_i32 : i32 to vector<432x1xi32>
    %21 = arith.cmpi sge, %19, %20 : vector<432x1xi32>
    %c16_i32 = arith.constant 16 : i32
    %22 = vector.broadcast %c16_i32 : i32 to vector<432x1xi32>
    %23 = arith.cmpi sle, %19, %22 : vector<432x1xi32>
    %24 = arith.andi %21, %23 : vector<432x1xi1>
    %c1_i32_9 = arith.constant 1 : i32
    %25 = vector.broadcast %c1_i32_9 : i32 to vector<432x1xi32>
    %26 = arith.cmpi sge, %17, %25 : vector<432x1xi32>
    %27 = arith.andi %24, %26 : vector<432x1xi1>
    %c1_i32_10 = arith.constant 1 : i32
    %28 = vector.broadcast %c1_i32_10 : i32 to vector<432x1xi32>
    %29 = arith.cmpi sge, %17, %28 : vector<432x1xi32>
    %30 = arith.andi %27, %29 : vector<432x1xi1>
    %c16_i32_11 = arith.constant 16 : i32
    %31 = vector.broadcast %c16_i32_11 : i32 to vector<432x1xi32>
    %32 = arith.cmpi sle, %17, %31 : vector<432x1xi32>
    %33 = arith.andi %30, %32 : vector<432x1xi1>
    %cst_12 = arith.constant 0.000000e+00 : f32
    %34 = vector.shape_cast %33 : vector<432x1xi1> to vector<432x1xi1>
    %35 = vector.broadcast %34 : vector<432x1xi1> to vector<432x128xi1>
    %36 = vector.broadcast %cst_12 : f32 to vector<432x128xf32>
    %37 = arith.select %35, %15, %36 : vector<432x128xi1>, vector<432x128xf32>
    %c1_i32_13 = arith.constant 1 : i32
    %38 = tpu.dynamic_rotate %37 by %c1_i32_13 dim 0 : vector<432x128xf32>, i32 -> vector<432x128xf32>
    %c431_i32 = arith.constant 431 : i32
    %39 = tpu.dynamic_rotate %37 by %c431_i32 dim 0 : vector<432x128xf32>, i32 -> vector<432x128xf32>
    %40 = tpu.concatenate %38, %37, %39 in 1 : vector<432x128xf32>, vector<432x128xf32>, vector<432x128xf32> -> vector<432x384xf32>
    %41 = arith.truncf %40 : vector<432x384xf32> to vector<432x384xbf16>
    %42 = vector.extract_strided_slice %41 {offsets = [0, 0], sizes = [384, 384], strides = [1, 1]} : vector<432x384xbf16> to vector<384x384xbf16>
    %c0_14 = arith.constant 0 : index
    %c0_15 = arith.constant 0 : index
    %c0_16 = arith.constant 0 : index
    %43 = vector.load %arg5[%c0_14, %c0_15, %c0_16] : memref<3x384x128xbf16, #tpu.memory_space<vmem>>, vector<1x384x128xbf16>
    %44 = vector.shape_cast %43 : vector<1x384x128xbf16> to vector<384x128xbf16>
    %cst_17 = arith.constant dense<0.000000e+00> : vector<384x128xf32>
    %45 = tpu.matmul %42, %44, %cst_17 {dimension_numbers = #tpu.dot_dimension_numbers<[1], [0], [0], [1], [0, 0, 1, 1], [], []>} : vector<384x384xbf16>, vector<384x128xbf16>, vector<384x128xf32> -> vector<384x128xf32>
    %46 = vector.extract_strided_slice %41 {offsets = [24, 0], sizes = [384, 384], strides = [1, 1]} : vector<432x384xbf16> to vector<384x384xbf16>
    %c1 = arith.constant 1 : index
    %c0_18 = arith.constant 0 : index
    %c0_19 = arith.constant 0 : index
    %47 = vector.load %arg5[%c1, %c0_18, %c0_19] : memref<3x384x128xbf16, #tpu.memory_space<vmem>>, vector<1x384x128xbf16>
    %48 = vector.shape_cast %47 : vector<1x384x128xbf16> to vector<384x128xbf16>
    %cst_20 = arith.constant dense<0.000000e+00> : vector<384x128xf32>
    %49 = tpu.matmul %46, %48, %cst_20 {dimension_numbers = #tpu.dot_dimension_numbers<[1], [0], [0], [1], [0, 0, 1, 1], [], []>} : vector<384x384xbf16>, vector<384x128xbf16>, vector<384x128xf32> -> vector<384x128xf32>
    %50 = arith.addf %45, %49 : vector<384x128xf32>
    %51 = vector.extract_strided_slice %41 {offsets = [48, 0], sizes = [384, 384], strides = [1, 1]} : vector<432x384xbf16> to vector<384x384xbf16>
    %c2 = arith.constant 2 : index
    %c0_21 = arith.constant 0 : index
    %c0_22 = arith.constant 0 : index
    %52 = vector.load %arg5[%c2, %c0_21, %c0_22] : memref<3x384x128xbf16, #tpu.memory_space<vmem>>, vector<1x384x128xbf16>
    %53 = vector.shape_cast %52 : vector<1x384x128xbf16> to vector<384x128xbf16>
    %cst_23 = arith.constant dense<0.000000e+00> : vector<384x128xf32>
    %54 = tpu.matmul %51, %53, %cst_23 {dimension_numbers = #tpu.dot_dimension_numbers<[1], [0], [0], [1], [0, 0, 1, 1], [], []>} : vector<384x384xbf16>, vector<384x128xbf16>, vector<384x128xf32> -> vector<384x128xf32>
    %55 = arith.addf %50, %54 : vector<384x128xf32>
    %c0_24 = arith.constant 0 : index
    %c0_25 = arith.constant 0 : index
    %56 = vector.load %arg6[%c0_24, %c0_25] : memref<1x128xf32, #tpu.memory_space<vmem>>, vector<1x128xf32>
    %57 = vector.broadcast %56 : vector<1x128xf32> to vector<384x128xf32>
    %58 = arith.mulf %55, %57 : vector<384x128xf32>
    %c0_26 = arith.constant 0 : index
    %c0_27 = arith.constant 0 : index
    %59 = vector.load %arg7[%c0_26, %c0_27] : memref<1x128xf32, #tpu.memory_space<vmem>>, vector<1x128xf32>
    %60 = vector.broadcast %59 : vector<1x128xf32> to vector<384x128xf32>
    %61 = arith.addf %58, %60 : vector<384x128xf32>
    %62 = arith.negf %61 : vector<384x128xf32>
    %63 = math.exp %62 : vector<384x128xf32>
    %cst_28 = arith.constant 1.000000e+00 : f32
    %64 = vector.broadcast %cst_28 : f32 to vector<384x128xf32>
    %65 = arith.addf %64, %63 : vector<384x128xf32>
    %66 = arith.divf %64, %65 : vector<384x128xf32>
    %67 = arith.mulf %61, %66 : vector<384x128xf32>
    %68 = vector.extract_strided_slice %1 {offsets = [24, 0], sizes = [384, 128], strides = [1, 1]} : vector<432x128xbf16> to vector<384x128xbf16>
    %69 = arith.extf %68 : vector<384x128xbf16> to vector<384x128xf32>
    %70 = arith.addf %67, %69 : vector<384x128xf32>
    %71 = vector.shape_cast %70 : vector<384x128xf32> to vector<1x16x24x128xf32>
    %72 = arith.truncf %71 : vector<1x16x24x128xf32> to vector<1x16x24x128xbf16>
    %c0_29 = arith.constant 0 : index
    %c0_30 = arith.constant 0 : index
    %c0_31 = arith.constant 0 : index
    %c0_32 = arith.constant 0 : index
    %73 = vector.load %arg8[%c0_29, %c0_30, %c0_31, %c0_32] : memref<1x16x24x128xbf16, #tpu.memory_space<vmem>>, vector<1x16x24x128xbf16>
    tpu.vector_store %arg8[%c0_29, %c0_30, %c0_31, %c0_32], %72 {strides = array<i32>} : memref<1x16x24x128xbf16, #tpu.memory_space<vmem>>, vector<1x16x24x128xbf16>,
    return
  }
  func.func @transform_0(%arg0: i32) -> (i32, i32, i32) {
    %c0_i32 = arith.constant 0 : i32
    %c0_i32_0 = arith.constant 0 : i32
    %c0_i32_1 = arith.constant 0 : i32
    return %arg0, %c0_i32, %c0_i32_0 : i32, i32, i32
  }
  func.func @transform_1(%arg0: i32) -> (i32, i32) {
    %c0_i32 = arith.constant 0 : i32
    %c0_i32_0 = arith.constant 0 : i32
    %c0_i32_1 = arith.constant 0 : i32
    return %c0_i32, %c0_i32_0 : i32, i32
  }
  func.func @transform_2(%arg0: i32) -> (i32, i32) {
    %c0_i32 = arith.constant 0 : i32
    %c0_i32_0 = arith.constant 0 : i32
    %c0_i32_1 = arith.constant 0 : i32
    return %c0_i32, %c0_i32_0 : i32, i32
  }
  func.func @transform_3(%arg0: i32) -> (i32, i32) {
    %c0_i32 = arith.constant 0 : i32
    %c0_i32_0 = arith.constant 0 : i32
    %c0_i32_1 = arith.constant 0 : i32
    return %c0_i32, %c0_i32_0 : i32, i32
  }
  func.func @transform_4(%arg0: i32) -> (i32, i32, i32) {
    %c0_i32 = arith.constant 0 : i32
    %c0_i32_0 = arith.constant 0 : i32
    %c0_i32_1 = arith.constant 0 : i32
    %c0_i32_2 = arith.constant 0 : i32
    return %c0_i32, %c0_i32_0, %c0_i32_1 : i32, i32, i32
  }
  func.func @transform_5(%arg0: i32) -> (i32, i32) {
    %c0_i32 = arith.constant 0 : i32
    %c0_i32_0 = arith.constant 0 : i32
    %c0_i32_1 = arith.constant 0 : i32
    return %c0_i32, %c0_i32_0 : i32, i32
  }
  func.func @transform_6(%arg0: i32) -> (i32, i32) {
    %c0_i32 = arith.constant 0 : i32
    %c0_i32_0 = arith.constant 0 : i32
    %c0_i32_1 = arith.constant 0 : i32
    return %c0_i32, %c0_i32_0 : i32, i32
  }
  func.func @transform_7(%arg0: i32) -> (i32, i32, i32, i32) {
    %c0_i32 = arith.constant 0 : i32
    %c0_i32_0 = arith.constant 0 : i32
    %c0_i32_1 = arith.constant 0 : i32
    %c0_i32_2 = arith.constant 0 : i32
    return %arg0, %c0_i32, %c0_i32_0, %c0_i32_1 : i32, i32, i32, i32
  }
}

</mosaic_0001>

<bundles_post_ra>
// kernel: bottleneck_pallas.1
= control target key start
LH: loop header
LB: loop body
LE: loop exit
PB: predicated region body
PF: predicated region fallthrough
CT: control target
= control target key end

     0   :  { %s7134_s24 = smov 0   ;;  %s11353_s0 = inlined_call_operand.vmem [shape: bf16[2,432,128], index: 0, kind: input, shape index: {}]   ;;  %s11354_s1 = inlined_call_operand.vmem [shape: bf16[128,128], index: 1, kind: input, shape index: {}]   ;;  %s11355_s2 = inlined_call_operand.vmem [shape: f32[1,128], index: 2, kind: input, shape index: {}]   ;;  %s11356_s3 = inlined_call_operand.vmem [shape: f32[1,128], index: 3, kind: input, shape index: {}]   ;;  %s11357_s4 = inlined_call_operand.vmem [shape: bf16[3,384,128], index: 4, kind: input, shape index: {}]   ;;  %s11358_s5 = inlined_call_operand.vmem [shape: f32[1,128], index: 5, kind: input, shape index: {}]   ;;  %s11359_s6 = inlined_call_operand.vmem [shape: f32[1,128], index: 6, kind: input, shape index: {}]   ;;  %s11360_s7 = inlined_call_operand.vmem [shape: bf16[2,16,24,128], index: 7, kind: output, shape index: {}]  }
   0x1 LB: > { %s5772_s25 = sadd.s32 4294967295, %s7091_s24   ;;  %p5776_p0 = scmp.ge.s32.totalorder %s7091_s24, 1  ;;  %s7091_s24 = sphi %s7134_s24, %s17_s24  }
   0x2   : > { %p237_p1 = scmp.lt.s32.totalorder %s7091_s24, 3 }
   0x4   : > { %p238_p2 = pnand %p5776_p0, %p237_p1 }
   0x6   : > { %241 = sbr.rel (%p238_p2) target bundleno = 1593 (0x639), region = 48 }
   0xb   : > { %v6435_v0 = vld [vmem:[%s11354_s1 + $0x38] sm:$0xff]  ;;  %v6434_v1 = vld [vmem:[%s11354_s1 + $0x30] sm:$0xff]  ;;  %v6433_v2 = vld [vmem:[%s11354_s1 + $0x28] sm:$0xff]  ;;  %p269_p3 = scmp.lt.s32.totalorder %s5772_s25, 1  ;;  %v1761_v52 = vlaneseq }
   0xc   : > { %559 = vmatpush.bf16.msra.mxu0 %v6435_v0  ;;  %v6432_v3 = vld [vmem:[%s11354_s1 + $0x20] sm:$0xff]  ;;  %v6431_v4 = vld [vmem:[%s11354_s1 + $0x18] sm:$0xff]  ;;  %v6430_v5 = vld [vmem:[%s11354_s1 + $0x10] sm:$0xff] }
   0xd   : > { %s12134_s25 = smov (!%p269_p3, %s5772_s25), 1  ;;  %v6429_v6 = vld [vmem:[%s11354_s1 + $0x8] sm:$0xff]  ;;  %v6428_v7 = vld [vmem:[%s11354_s1] sm:$0xff]  ;;  %v6467_v19 = vld [vmem:[%s11357_s4 + $0xf8] sm:$0xff]  ;;  %v7239_v59 = vshrl.u32 %v1761_v52, 7 }
   0xe   : > { %s6675_s17 = smul.u32 216, %s12134_s25  ;;  %2749 = vmatpush.bf16.msra.mxu1 %v6467_v19  ;;  %6651 = vmatpush.bf16.msra.mxu3 %v6467_v19  ;;  %v6466_v22 = vld [vmem:[%s11357_s4 + $0xf0] sm:$0xff]  ;;  %v6465_v23 = vld [vmem:[%s11357_s4 + $0xe8] sm:$0xff]  ;;  %v7196_v24 = vld [vmem:[%s11355_s2] ss:$0 sm:$0xff] }
   0xf   : > { %v7201_v25 = vld [vmem:[%s11356_s3] ss:$0 sm:$0xff]  ;;  %v6463_v30 = vld [vmem:[%s11357_s4 + $0xd8] sm:$0xff]  ;;  %v6462_v35 = vld [vmem:[%s11357_s4 + $0xd0] sm:$0xff]  ;;  %vm1765_vm4 = vcmp.ge.s32.totalorder %v7239_v59, 1  ;;  %vm1876_vm6 = vcmp.lt.s32.totalorder %v7239_v59, 1 }
  0x10   : > { %560 = vmatpush.bf16.msra.mxu0 %v6434_v1  ;;  %s7172_s22 = scalar_lea.vmem %s11353_s0, %s6675_s17  ;;  %v6464_v27 = vld [vmem:[%s11357_s4 + $0xe0] sm:$0xff]  ;;  %v6461_v39 = vld [vmem:[%s11357_s4 + $0xc8] sm:$0xff]  ;;  %vm1974_vm7 = vcmp.lt.s32.totalorder %v7239_v59, 7  ;;  %s6676_s29 = smul.u32 192, %s12134_s25 }
  0x11   : > { %v6401_v8 = vld [vmem:[%s7172_s22] sm:$0xff]  ;;  %v6402_v9 = vld [vmem:[%s7172_s22 + $0x8] sm:$0xff]  ;;  %v6403_v10 = vld [vmem:[%s7172_s22 + $0x10] sm:$0xff] }
  0x12   : > { %v6404_v11 = vld [vmem:[%s7172_s22 + $0x18] sm:$0xff]  ;;  %v6405_v12 = vld [vmem:[%s7172_s22 + $0x20] sm:$0xff]  ;;  %v6406_v13 = vld [vmem:[%s7172_s22 + $0x28] sm:$0xff]  ;;  %2750 = vmatpush.bf16.msra.mxu1 %v6466_v22  ;;  %6652 = vmatpush.bf16.msra.mxu3 %v6466_v22  ;;  %s10418_s8 = scalar_lea.vmem %s11360_s7, %s6676_s29 }
  0x13   : > { %v6407_v14 = vld [vmem:[%s7172_s22 + $0x30] sm:$0xff]  ;;  %v6408_v15 = vld [vmem:[%s7172_s22 + $0x38] sm:$0xff]  ;;  %v6409_v16 = vld [vmem:[%s7172_s22 + $0x40] sm:$0xff] }
  0x14   : > { %561 = vmatpush.bf16.msra.mxu0 %v6433_v2  ;;  %v6410_v20 = vld [vmem:[%s7172_s22 + $0x48] sm:$0xff]  ;;  %v6411_v32 = vld [vmem:[%s7172_s22 + $0x50] sm:$0xff]  ;;  %v6460_v43 = vld [vmem:[%s11357_s4 + $0xc0] sm:$0xff] }
  0x15   : > { %v6412_v50 = vld [vmem:[%s7172_s22 + $0x58] sm:$0xff] }
  0x16   : > { %2751 = vmatpush.bf16.msra.mxu1 %v6465_v23  ;;  %6653 = vmatpush.bf16.msra.mxu3 %v6465_v23 }
  0x18   : > { %562 = vmatpush.bf16.msra.mxu0 %v6432_v3 }
  0x1a   : > { %2752 = vmatpush.bf16.msra.mxu1 %v6464_v27  ;;  %6654 = vmatpush.bf16.msra.mxu3 %v6464_v27  ;;  %v6413_v27 = vld [vmem:[%s7172_s22 + $0x60] sm:$0xff] }
  0x1c   : > { %563 = vmatpush.bf16.msra.mxu0 %v6431_v4 }
  0x1e   : > { %2753 = vmatpush.bf16.msra.mxu1 %v6463_v30  ;;  %6655 = vmatpush.bf16.msra.mxu3 %v6463_v30 }
  0x20   : > { %564 = vmatpush.bf16.msra.mxu0 %v6430_v5 }
  0x22   : > { %2754 = vmatpush.bf16.msra.mxu1 %v6462_v35  ;;  %6656 = vmatpush.bf16.msra.mxu3 %v6462_v35 }
  0x24   : > { %565 = vmatpush.bf16.msra.mxu0 %v6429_v6 }
  0x26   : > { %2755 = vmatpush.bf16.msra.mxu1 %v6461_v39  ;;  %6657 = vmatpush.bf16.msra.mxu3 %v6461_v39 }
  0x28   : > { %566 = vmatpush.bf16.msra.mxu0 %v6428_v7 }
  0x2a   : > { %2756 = vmatpush.bf16.msra.mxu1 %v6460_v43  ;;  %6658 = vmatpush.bf16.msra.mxu3 %v6460_v43 }
  0x2b   : > { %567 = vmatmul.bf16.vlgmr.msra.gmra.mxu0 %v6401_v8 }
  0x3b   : > { %570 = vmatmul.bf16.gmra.mxu0 %v6402_v9 }
  0x4b   : > { %574 = vmatmul.bf16.gmra.mxu0 %v6403_v10 }
  0x5b   : > { %579 = vmatmul.bf16.gmra.mxu0 %v6404_v11 }
  0x6b   : > { %584 = vmatmul.bf16.gmra.mxu0 %v6405_v12 }
  0x7b   : > { %589 = vmatmul.bf16.gmra.mxu0 %v6406_v13 }
  0x8b   : > { %594 = vmatmul.bf16.gmra.mxu0 %v6407_v14 }
  0x9b   : > { %599 = vmatmul.bf16.gmra.mxu0 %v6408_v15 }
  0xa8   : > { %v568_v17 = vpop.f32.mrf.mxu0 }
  0xab   : > { %604 = vmatmul.bf16.gmra.mxu0 %v6409_v16 }
  0xb0   : > { %v569_v18 = vpop.f32.mrf.mxu0 }
  0xb8   : > { %v571_v21 = vpop.f32.mrf.mxu0 }
  0xb9   : > { %v7259_v21 = vadd.s32 16, %v7239_v59 }
  0xbb   : > { %609 = vmatmul.bf16.gmra.mxu0 %v6410_v20  ;;  %vm1770_vm12 = vcmp.le.s32.totalorder %v7259_v21, 16  ;;  %v9553_v21 = vld [vmem:[%s11357_s4 + $0x1a0] sm:$0xff] }
  0xbc   : > { %11750 = vst [vmem:[#allocation128_spill] sm:$0xff] %v9553_v21 }
  0xc0   : > { %v572_v26 = vpop.f32.mrf.mxu0 }
  0xc1   : > { %v701_v28 = vmul.f32 %v7196_v24, %v572_v26 }
  0xc3   : > { %v7208_v29 = vadd.f32 %v7201_v25, %v701_v28 }
  0xc5   : > { %v5919_v31 = vmul.f32 -1.442695, %v7208_v29 }
  0xc7   : > { %6690 = vpow2.f32 %v5919_v31 }
  0xc8   : > { %v575_v33 = vpop.f32.mrf.mxu0 }
  0xc9   : > { %v702_v34 = vmul.f32 %v7196_v24, %v575_v33 }
  0xcb   : > { %v7220_v36 = vadd.f32 %v7201_v25, %v702_v34  ;;  %614 = vmatmul.bf16.gmra.mxu0 %v6411_v32 }
  0xcd   : > { %v6691_v37 = vpop.eup %6690  ;;  %v5920_v38 = vmul.f32 -1.442695, %v7220_v36 }
  0xce   : > { %v945_v40 = vadd.f32 1.0, %v6691_v37  ;;  %v11362_v37 = vmov 0.0|0.0  }
  0xcf   : > { %6692 = vpow2.f32 %v5920_v38  ;;  %v7275_v38 = vunpack.c.h.b16 %v11362_v37  ;;  %v7702_v37 = vld [vmem:[%s11355_s2] ss:$0 sm:$0xff] }
  0xd0   : > { %6694 = vrcp.f32 %v945_v40  ;;  %v577_v41 = vpop.f32.mrf.mxu0  ;;  %v1004_v55 = vand.u32 2147483648, %v945_v40  ;;  %v1002_v57 = vand.u32 2147483647, %v945_v40  ;;  %vm998_vm1 = vweird.f32 %v945_v40 }
  0xd1   : > { %v703_v42 = vmul.f32 %v7196_v24, %v577_v41  ;;  %11506 = vst [vmem:[#allocation2_spill] sm:$0xff] %v7275_v38 }
  0xd2   : > { %v1005_v0 = vor.u32 1.1754944e-38, %v1004_v55  ;;  %vm1003_vm3 = vcmp.eq.f32.partialorder %v1002_v57, 8.507059e+37 }
  0xd3   : > { %v7231_v44 = vadd.f32 %v7201_v25, %v703_v42 }
  0xd5   : > { %v6693_v45 = vpop.eup %6692  ;;  %v5921_v46 = vmul.f32 -1.442695, %v7231_v44 }
  0xd6   : > { %v6695_v47 = vpop.eup %6694  ;;  %v946_v48 = vadd.f32 1.0, %v6693_v45 }
  0xd7   : > { %v994_v49 = vmul.f32 %v6695_v47, %v945_v40  ;;  %6696 = vpow2.f32 %v5921_v46  ;;  %vm999_vm0 = vweird.f32 %v6695_v47 }
  0xd8   : > { %6698 = vrcp.f32 %v946_v48  ;;  %v580_v51 = vpop.f32.mrf.mxu0  ;;  %vm1000_vm2 = vmor %vm998_vm1, %vm999_vm0  ;;  %v1017_v9 = vand.u32 2147483647, %v946_v48  ;;  %v1019_v10 = vand.u32 2147483648, %v946_v48  ;;  %vm1013_vm8 = vweird.f32 %v946_v48 }
  0xd9   : > { %v995_v53 = vsub.f32 1.0, %v994_v49  ;;  %v704_v54 = vmul.f32 %v7196_v24, %v580_v51 }
  0xda   : > { %v1020_v19 = vor.u32 1.1754944e-38, %v1019_v10  ;;  %vm1018_vm10 = vcmp.eq.f32.partialorder %v1017_v9, 8.507059e+37 }
  0xdb   : > { %v996_v56 = vmul.f32 %v6695_v47, %v995_v53  ;;  %v7237_v58 = vadd.f32 %v7201_v25, %v704_v54  ;;  %619 = vmatmul.bf16.gmra.mxu0 %v6412_v50 }
  0xdd   : > { %v6697_v60 = vpop.eup %6696  ;;  %v997_v61 = vadd.f32 %v6695_v47, %v996_v56  ;;  %v5922_v62 = vmul.f32 -1.442695, %v7237_v58 }
  0xde   : > { %v6699_v63 = vpop.eup %6698  ;;  %v7242_v1 = vadd.f32 1.0, %v6697_v60 }
  0xdf   : > { %v1001_v2 = vsel %vm1000_vm2, %v6695_v47, %v997_v61  ;;  %v1009_v3 = vmul.f32 %v6699_v63, %v946_v48  ;;  %6700 = vpow2.f32 %v5922_v62  ;;  %vm1014_vm5 = vweird.f32 %v6699_v63 }
  0xe0   : > { %v1006_v4 = vsel %vm1003_vm3, %v1005_v0, %v1001_v2  ;;  %6702 = vrcp.f32 %v7242_v1  ;;  %v582_v5 = vpop.f32.mrf.mxu0  ;;  %vm1015_vm9 = vmor %vm1013_vm8, %vm1014_vm5  ;;  %v1034_v30 = vand.u32 2147483648, %v7242_v1  ;;  %vm1028_vm11 = vweird.f32 %v7242_v1 }
  0xe1   : > { %v1713_v6 = vmul.f32 %v1006_v4, %v7208_v29  ;;  %v1010_v7 = vsub.f32 1.0, %v1009_v3  ;;  %v705_v8 = vmul.f32 %v7196_v24, %v582_v5  ;;  %v1032_v29 = vand.u32 2147483647, %v7242_v1 }
  0xe2   : > { %v1035_v43 = vor.u32 1.1754944e-38, %v1034_v30 }
  0xe3   : > { %v1011_v11 = vmul.f32 %v6699_v63, %v1010_v7  ;;  %v7249_v12 = vadd.f32 %v7201_v25, %v705_v8  ;;  %v1780_v13 = vsel %vm1765_vm4, %v1713_v6, 0.0  ;;  %vm7281_vm14 = vcmp.eq.f32.partialorder %v1032_v29, 8.507059e+37 }
  0xe4   : > { %v1828_v17 = vrot.slane %v1780_v13, 7  ;;  %v1926_v22 = vrot.slane %v1780_v13, 1 }
  0xe5   : > { %v6701_v14 = vpop.eup %6700  ;;  %v1012_v15 = vadd.f32 %v6699_v63, %v1011_v11  ;;  %v5923_v16 = vmul.f32 -1.442695, %v7249_v12 }
  0xe6   : > { %v6703_v18 = vpop.eup %6702  ;;  %v7256_v20 = vadd.f32 1.0, %v6701_v14  ;;  %v1925_v35 = vsel %vm1876_vm6, 0.0, %v1828_v17  ;;  %v2023_v39 = vsel %vm1974_vm7, 0.0, %v1926_v22 }
  0xe7   : > { %v1016_v23 = vsel %vm1015_vm9, %v6699_v63, %v1012_v15  ;;  %v1024_v26 = vmul.f32 %v6703_v18, %v7242_v1  ;;  %6704 = vpow2.f32 %v5923_v16  ;;  %vm1029_vm13 = vweird.f32 %v6703_v18 }
  0xe8   : > { %v1021_v28 = vsel %vm1018_vm10, %v1020_v19, %v1016_v23  ;;  %6706 = vrcp.f32 %v7256_v20  ;;  %v585_v31 = vpop.f32.mrf.mxu0  ;;  %v7288_v46 = vpack.c.bf16 %v1780_v13, %v1925_v35  ;;  %vm1043_vm15 = vweird.f32 %v7256_v20  ;;  %vm1030_vm0 = vmor %vm1028_vm11, %vm1029_vm13 }
  0xe9   : > { %v7267_v32 = vmul.f32 %v1021_v28, %v7220_v36  ;;  %v1025_v33 = vsub.f32 1.0, %v1024_v26  ;;  %v706_v34 = vmul.f32 %v7196_v24, %v585_v31  ;;  %v2026_v55 = vpack.c.bf16 %v2023_v39, %v2023_v39 }
  0xea   : > { %v1047_v60 = vand.u32 2147483647, %v7256_v20  ;;  %v1049_v63 = vand.u32 2147483648, %v7256_v20  ;;  %v11361_v1 = vunpack.c.l.b16 %v7288_v46  ;;  %v2318_v4 = vunpack.c.h.b16 %v7288_v46 }
  0xeb   : > { %v1829_v36 = vrot.slane %v7267_v32, 7  ;;  %v1927_v40 = vrot.slane %v7267_v32, 1  ;;  %v1026_v41 = vmul.f32 %v6703_v18, %v1025_v33  ;;  %624 = vmatmul.bf16.gmra.mxu0 %v6413_v27  ;;  %v7286_v45 = vadd.f32 %v7201_v25, %v706_v34 }
  0xec   : > { %v7315_v8 = vunpack.c.l.b16 %v2026_v55  ;;  %v1050_v23 = vor.u32 1.1754944e-38, %v1049_v63  ;;  %vm1048_vm3 = vcmp.eq.f32.partialorder %v1047_v60, 8.507059e+37 }
  0xed   : > { %v6705_v47 = vpop.eup %6704  ;;  %v1027_v48 = vadd.f32 %v6703_v18, %v1026_v41  ;;  %v1924_v49 = vsel %vm1876_vm6, %v1828_v17, %v1829_v36  ;;  %v2022_v50 = vsel %vm1974_vm7, %v1926_v22, %v1927_v40  ;;  %v5924_v53 = vmul.f32 -1.442695, %v7286_v45 }
  0xee   : > { %v6707_v51 = vpop.eup %6706  ;;  %v7297_v52 = vadd.f32 1.0, %v6705_v47  ;;  %v7301_v54 = vpack.c.bf16 %v7267_v32, %v1924_v49  ;;  %v2028_v61 = vpack.c.bf16 %v2022_v50, %v2022_v50  ;;  %11509 = vst [vmem:[#allocation3_spill] sm:$0xff] %v7315_v8  ;;  %v6414_v32 = vld [vmem:[%s7172_s22 + $0x68] sm:$0xff] }
  0xef   : > { %v1031_v56 = vsel %vm1030_vm0, %v6703_v18, %v1027_v48  ;;  %v1039_v57 = vmul.f32 %v6707_v51, %v7256_v20  ;;  %vm1044_vm1 = vweird.f32 %v6707_v51  ;;  %v7331_v18 = vpack.c.b16 %v2318_v4, %v7275_v38 }
  0xf0   : > { %v1036_v62 = vsel %vm7281_vm14, %v1035_v43, %v1031_v56  ;;  %6708 = vrcp.f32 %v7297_v52  ;;  %v587_v0 = vpop.f32.mrf.mxu0  ;;  %v2320_v6 = vunpack.c.l.b16 %v7301_v54  ;;  %v2321_v7 = vunpack.c.h.b16 %v7301_v54  ;;  %vm1045_vm2 = vmor %vm1043_vm15, %vm1044_vm1 }
  0xf1   : > { %v1715_v2 = vmul.f32 %v1036_v62, %v7231_v44  ;;  %v1040_v3 = vsub.f32 1.0, %v1039_v57  ;;  %6710 = vpow2.f32 %v5924_v53  ;;  %v707_v5 = vmul.f32 %v7196_v24, %v587_v0  ;;  %11511 = vst [vmem:[#allocation5_spill] sm:$0xff] %v7331_v18 }
  0xf2   : > { %v7319_v11 = vunpack.c.l.b16 %v2028_v61  ;;  %v2461_v13 = vpack.c.b16 %v2320_v6, %v11361_v1  ;;  %v7328_v17 = vpack.c.b16 %v2321_v7, %v2318_v4  ;;  %v1062_v43 = vand.u32 2147483647, %v7297_v52 }
  0xf3   : > { %v1041_v9 = vmul.f32 %v6707_v51, %v1040_v3  ;;  %v1782_v10 = vsel %vm1770_vm12, %v1715_v2, 0.0  ;;  %v7322_v44 = vadd.f32 %v7201_v25, %v707_v5  ;;  %v1064_v47 = vand.u32 2147483648, %v7297_v52 }
  0xf4   : > { %11510 = vst [vmem:[#allocation4_spill] sm:$0xff] %v7319_v11  ;;  %v1830_v14 = vrot.slane %v1782_v10, 7  ;;  %v1928_v15 = vrot.slane %v1782_v10, 1  ;;  %2757 = vmatmul.bf16.vlgmr.msra.gmra.mxu1 %v2461_v13  ;;  %vm1058_vm8 = vweird.f32 %v7297_v52  ;;  %vm1063_vm10 = vcmp.eq.f32.partialorder %v1062_v43, 8.507059e+37  ;;  %v6415_v43 = vld [vmem:[%s7172_s22 + $0x70] sm:$0xff] }
  0xf5   : > { %v1042_v16 = vadd.f32 %v6707_v51, %v1041_v9  ;;  %v5925_v26 = vmul.f32 -1.442695, %v7322_v44  ;;  %v1065_v62 = vor.u32 1.1754944e-38, %v1064_v47 }
  0xf6   : > { %v6709_v22 = vpop.eup %6708  ;;  %v1923_v27 = vsel %vm1876_vm6, %v1829_v36, %v1830_v14  ;;  %v2021_v28 = vsel %vm1974_vm7, %v1927_v40, %v1928_v15 }
  0xf7   : > { %v6711_v29 = vpop.eup %6710  ;;  %v1046_v30 = vsel %vm1045_vm2, %v6707_v51, %v1042_v16  ;;  %v1054_v31 = vmul.f32 %v6709_v22, %v7297_v52  ;;  %v7344_v33 = vpack.c.bf16 %v1782_v10, %v1923_v27  ;;  %6712 = vpow2.f32 %v5925_v26 }
  0xf8   : > { %v1051_v20 = vsel %vm1048_vm3, %v1050_v23, %v1046_v30  ;;  %v7346_v34 = vadd.f32 1.0, %v6711_v29  ;;  %v590_v35 = vpop.f32.mrf.mxu0  ;;  %v2030_v39 = vpack.c.bf16 %v2021_v28, %v2021_v28  ;;  %vm1059_vm5 = vweird.f32 %v6709_v22 }
  0xf9   : > { %v1716_v41 = vmul.f32 %v1051_v20, %v7237_v58  ;;  %v1055_v36 = vsub.f32 1.0, %v1054_v31  ;;  %v708_v42 = vmul.f32 %v7196_v24, %v590_v35  ;;  %v2323_v40 = vunpack.c.l.b16 %v7344_v33  ;;  %vm1060_vm9 = vmor %vm1058_vm8, %vm1059_vm5 }
  0xfa   : > { %6714 = vrcp.f32 %v7346_v34  ;;  %v2324_v57 = vunpack.c.h.b16 %v7344_v33  ;;  %v7364_v60 = vunpack.c.l.b16 %v2030_v39  ;;  %v1079_v16 = vand.u32 2147483648, %v7346_v34 }
  0xfb   : > { %v1783_v48 = vsel %vm1765_vm4, %v1716_v41, 0.0  ;;  %v1056_v49 = vmul.f32 %v6709_v22, %v1055_v36  ;;  %v7357_v50 = vadd.f32 %v7201_v25, %v708_v42  ;;  %629 = vmatmul.bf16.gmra.mxu0 %v6414_v32  ;;  %v7359_v58 = vpack.c.b16 %v2323_v40, %v2320_v6 }
  0xfc   : > { %v1831_v51 = vrot.slane %v1783_v48, 7  ;;  %v1929_v53 = vrot.slane %v1783_v48, 1  ;;  %11512 = vst [vmem:[#allocation6_spill] sm:$0xff] %v7364_v60  ;;  %v7377_v10 = vpack.c.b16 %v2324_v57, %v2321_v7  ;;  %vm1073_vm13 = vweird.f32 %v7346_v34 }
  0xfd   : > { %v1057_v55 = vadd.f32 %v6709_v22, %v1056_v49  ;;  %v5926_v56 = vmul.f32 -1.442695, %v7357_v50  ;;  %v6713_v61 = vpop.eup %6712 }
  0xfe   : > { %v1922_v63 = vsel %vm1876_vm6, %v1830_v14, %v1831_v51  ;;  %v2020_v0 = vsel %vm1974_vm7, %v1928_v15, %v1929_v53  ;;  %v7371_v52 = vadd.f32 1.0, %v6713_v61  ;;  %11513 = vst [vmem:[#allocation7_spill] sm:$0xff] %v7377_v10  ;;  %v1077_v15 = vand.u32 2147483647, %v7346_v34 }
  0xff   : > { %v1061_v2 = vsel %vm1060_vm9, %v6709_v22, %v1057_v55  ;;  %6716 = vpow2.f32 %v5926_v56  ;;  %v2033_v3 = vpack.c.bf16 %v1783_v48, %v1922_v63  ;;  %v2032_v28 = vpack.c.bf16 %v2020_v0, %v2020_v0 }
 0x100   : > { %v6715_v4 = vpop.eup %6714  ;;  %v1066_v5 = vsel %vm1063_vm10, %v1065_v62, %v1061_v2  ;;  %v592_v6 = vpop.f32.mrf.mxu0  ;;  %6718 = vrcp.f32 %v7371_v52  ;;  %vm1078_vm14 = vcmp.eq.f32.partialorder %v1077_v15, 8.507059e+37  ;;  %v1092_v48 = vand.u32 2147483647, %v7371_v52 }
 0x101   : > { %v7380_v13 = vmul.f32 %v1066_v5, %v7249_v12  ;;  %v1069_v14 = vmul.f32 %v6715_v4, %v7346_v34  ;;  %v709_v22 = vmul.f32 %v7196_v24, %v592_v6  ;;  %v2326_v7 = vunpack.c.l.b16 %v2033_v3 }
 0x102   : > { %vm1074_vm11 = vweird.f32 %v6715_v4  ;;  %v2327_v27 = vunpack.c.h.b16 %v2033_v3  ;;  %v1094_v55 = vand.u32 2147483648, %v7371_v52  ;;  %v7415_v56 = vunpack.c.l.b16 %v2032_v28 }
 0x103   : > { %v1832_v23 = vrot.slane %v7380_v13, 7  ;;  %v1930_v26 = vrot.slane %v7380_v13, 1  ;;  %v1070_v54 = vsub.f32 1.0, %v1069_v14  ;;  %v7390_v12 = vadd.f32 %v7201_v25, %v709_v22  ;;  %vm1075_vm15 = vmor %vm1073_vm13, %vm1074_vm11 }
 0x104   : > { %v2464_v31 = vpack.c.b16 %v2326_v7, %v2323_v40  ;;  %v7406_v41 = vpack.c.b16 %v2327_v27, %v2324_v57  ;;  %v1080_v40 = vor.u32 1.1754944e-38, %v1079_v16  ;;  %11514 = vst [vmem:[#allocation8_spill] sm:$0xff] %v7415_v56  ;;  %vm1088_vm0 = vweird.f32 %v7371_v52 }
 0x105   : > { %v6717_v29 = vpop.eup %6716  ;;  %v1071_v30 = vmul.f32 %v6715_v4, %v1070_v54  ;;  %v1921_v32 = vsel %vm1876_vm6, %v1831_v51, %v1832_v23  ;;  %v2019_v33 = vsel %vm1974_vm7, %v1929_v53, %v1930_v26  ;;  %v5927_v35 = vmul.f32 -1.442695, %v7390_v12 }
 0x106   : > { %v7400_v20 = vadd.f32 1.0, %v6717_v29  ;;  %v7404_v39 = vpack.c.bf16 %v7380_v13, %v1921_v32  ;;  %v6719_v36 = vpop.eup %6718  ;;  %2762 = vmatmul.bf16.gmra.mxu1 %v2464_v31  ;;  %v2034_v51 = vpack.c.bf16 %v2019_v33, %v2019_v33  ;;  %vm7431_vm2 = vcmp.eq.f32.partialorder %v1092_v48, 8.507059e+37 }
 0x107   : > { %v1072_v42 = vadd.f32 %v6715_v4, %v1071_v30  ;;  %v1084_v47 = vmul.f32 %v6719_v36, %v7371_v52  ;;  %vm1089_vm1 = vweird.f32 %v6719_v36  ;;  %v1095_v28 = vor.u32 1.1754944e-38, %v1094_v55 }
 0x108   : > { %6720 = vrcp.f32 %v7400_v20  ;;  %v595_v49 = vpop.f32.mrf.mxu0  ;;  %v2329_v62 = vunpack.c.l.b16 %v7404_v39  ;;  %v2330_v0 = vunpack.c.h.b16 %v7404_v39  ;;  %v7427_v5 = vunpack.c.l.b16 %v2034_v51  ;;  %vm1090_vm3 = vmor %vm1088_vm0, %vm1089_vm1 }
 0x109   : > { %v1076_v53 = vsel %vm1075_vm15, %v6715_v4, %v1072_v42  ;;  %6722 = vpow2.f32 %v5927_v35  ;;  %v1085_v57 = vsub.f32 1.0, %v1084_v47  ;;  %v710_v61 = vmul.f32 %v7196_v24, %v595_v49 }
 0x10a   : > { %v1081_v34 = vsel %vm1078_vm14, %v1080_v40, %v1076_v53  ;;  %v7425_v4 = vpack.c.b16 %v2329_v62, %v2326_v7  ;;  %11515 = vst [vmem:[#allocation9_spill] sm:$0xff] %v7427_v5  ;;  %vm1103_vm8 = vweird.f32 %v7400_v20 }
 0x10b   : > { %v1718_v63 = vmul.f32 %v1081_v34, %v7286_v45  ;;  %634 = vmatmul.bf16.gmra.mxu0 %v6415_v43  ;;  %v1086_v2 = vmul.f32 %v6719_v36, %v1085_v57  ;;  %v7423_v3 = vadd.f32 %v7201_v25, %v710_v61  ;;  %v7435_v45 = vpack.c.b16 %v2330_v0, %v2327_v27 }
 0x10c   : > { %v1109_v27 = vand.u32 2147483648, %v7400_v20 }
 0x10d   : > { %v1785_v6 = vsel %vm1770_vm12, %v1718_v63, 0.0  ;;  %11518 = vst [vmem:[#allocation10_spill] sm:$0xff] %v7435_v45  ;;  %v1087_v54 = vadd.f32 %v6719_v36, %v1086_v2  ;;  %v5928_v7 = vmul.f32 -1.442695, %v7423_v3 }
 0x10e   : > { %v6721_v16 = vpop.eup %6720  ;;  %v1833_v22 = vrot.slane %v1785_v6, 7  ;;  %v1931_v30 = vrot.slane %v1785_v6, 1  ;;  %v1110_v57 = vor.u32 1.1754944e-38, %v1109_v27 }
 0x10f   : > { %v6723_v29 = vpop.eup %6722  ;;  %v1099_v31 = vmul.f32 %v6721_v16, %v7400_v20  ;;  %v1091_v33 = vsel %vm1090_vm3, %v6719_v36, %v1087_v54  ;;  %6724 = vpow2.f32 %v5928_v7  ;;  %v1107_v36 = vand.u32 2147483647, %v7400_v20 }
 0x110   : > { %v7447_v35 = vadd.f32 1.0, %v6723_v29  ;;  %v597_v39 = vpop.f32.mrf.mxu0  ;;  %v1920_v42 = vsel %vm1876_vm6, %v1832_v23, %v1833_v22  ;;  %v1096_v52 = vsel %vm7431_vm2, %v1095_v28, %v1091_v33  ;;  %vm1104_vm5 = vweird.f32 %v6721_v16 }
 0x111   : > { %v1100_v40 = vsub.f32 1.0, %v1099_v31  ;;  %v711_v43 = vmul.f32 %v7196_v24, %v597_v39  ;;  %v7456_v47 = vpack.c.bf16 %v1785_v6, %v1920_v42  ;;  %v1719_v48 = vmul.f32 %v1096_v52, %v7322_v44  ;;  %vm1105_vm9 = vmor %vm1103_vm8, %vm1104_vm5 }
 0x112   : > { %6726 = vrcp.f32 %v7447_v35  ;;  %v2018_v44 = vsel %vm1974_vm7, %v1930_v26, %v1931_v30  ;;  %vm1108_vm10 = vcmp.eq.f32.partialorder %v1107_v36, 8.507059e+37  ;;  %v6416_v26 = vld [vmem:[%s7172_s22 + $0x78] sm:$0xff]  ;;  %v1124_v39 = vand.u32 2147483648, %v7447_v35 }
 0x113   : > { %v1101_v49 = vmul.f32 %v6721_v16, %v1100_v40  ;;  %v7462_v51 = vadd.f32 %v7201_v25, %v711_v43  ;;  %v2332_v23 = vunpack.c.l.b16 %v7456_v47  ;;  %v1786_v53 = vsel %vm1765_vm4, %v1719_v48, 0.0 }
 0x114   : > { %v2333_v55 = vunpack.c.h.b16 %v7456_v47  ;;  %v1834_v6 = vrot.slane %v1786_v53, 7  ;;  %v1932_v20 = vrot.slane %v1786_v53, 1  ;;  %v2036_v54 = vpack.c.bf16 %v2018_v44, %v2018_v44  ;;  %v6417_v47 = vld [vmem:[%s7172_s22 + $0x80] sm:$0xff] }
 0x115   : > { %v1102_v34 = vadd.f32 %v6721_v16, %v1101_v49  ;;  %v5929_v61 = vmul.f32 -1.442695, %v7462_v51  ;;  %v2467_v63 = vpack.c.b16 %v2332_v23, %v2329_v62  ;;  %v6725_v2 = vpop.eup %6724  ;;  %v1122_v62 = vand.u32 2147483647, %v7447_v35 }
 0x116   : > { %v7476_v14 = vpack.c.b16 %v2333_v55, %v2330_v0  ;;  %v7478_v13 = vadd.f32 1.0, %v6725_v2  ;;  %v1919_v27 = vsel %vm1876_vm6, %v1833_v22, %v1834_v6  ;;  %v2017_v0 = vsel %vm1974_vm7, %v1931_v30, %v1932_v20 }
 0x117   : > { %v1106_v28 = vsel %vm1105_vm9, %v6721_v16, %v1102_v34  ;;  %6728 = vpow2.f32 %v5929_v61  ;;  %2767 = vmatmul.bf16.gmra.mxu1 %v2467_v63  ;;  %v7493_v52 = vunpack.c.l.b16 %v2036_v54  ;;  %v2039_v30 = vpack.c.bf16 %v1786_v53, %v1919_v27 }
 0x118   : > { %v6727_v7 = vpop.eup %6726  ;;  %v1111_v29 = vsel %vm1108_vm10, %v1110_v57, %v1106_v28  ;;  %v600_v31 = vpop.f32.mrf.mxu0  ;;  %6730 = vrcp.f32 %v7478_v13  ;;  %vm1118_vm11 = vweird.f32 %v7447_v35  ;;  %vm7498_vm13 = vcmp.eq.f32.partialorder %v1122_v62, 8.507059e+37 }
 0x119   : > { %v7487_v33 = vmul.f32 %v1111_v29, %v7357_v50  ;;  %v1114_v16 = vmul.f32 %v6727_v7, %v7447_v35  ;;  %v712_v42 = vmul.f32 %v7196_v24, %v600_v31  ;;  %11519 = vst [vmem:[#allocation11_spill] sm:$0xff] %v7493_v52  ;;  %v2038_v36 = vpack.c.bf16 %v2017_v0, %v2017_v0 }
 0x11a   : > { %vm1119_vm14 = vweird.f32 %v6727_v7  ;;  %v2335_v57 = vunpack.c.l.b16 %v2039_v30  ;;  %v1125_v53 = vor.u32 1.1754944e-38, %v1124_v39  ;;  %v7519_v29 = vpack.c.b16 %v7493_v52, %v7427_v5 }
 0x11b   : > { %v1835_v40 = vrot.slane %v7487_v33, 7  ;;  %v1933_v22 = vrot.slane %v7487_v33, 1  ;;  %v1115_v43 = vsub.f32 1.0, %v1114_v16  ;;  %639 = vmatmul.bf16.gmra.mxu0 %v6416_v26  ;;  %v7503_v48 = vadd.f32 %v7201_v25, %v712_v42  ;;  %vm1120_vm15 = vmor %vm1118_vm11, %vm1119_vm14 }
 0x11c   : > { %v7515_v26 = vpack.c.b16 %v2335_v57, %v2332_v23  ;;  %11522 = vst [vmem:[#allocation12_spill] sm:$0xff] %v7519_v29  ;;  %vm1133_vm0 = vweird.f32 %v7478_v13  ;;  %v7532_v31 = vunpack.c.l.b16 %v2038_v36  ;;  %v1137_v0 = vand.u32 2147483647, %v7478_v13 }
 0x11d   : > { %v6729_v49 = vpop.eup %6728  ;;  %v1116_v44 = vmul.f32 %v6727_v7, %v1115_v43  ;;  %v1918_v34 = vsel %vm1876_vm6, %v1834_v6, %v1835_v40  ;;  %v5930_v63 = vmul.f32 -1.442695, %v7503_v48  ;;  %v7525_v6 = vsel %vm1974_vm7, %v1932_v20, %v1933_v22 }
 0x11e   : > { %v7509_v61 = vadd.f32 1.0, %v6729_v49  ;;  %v7513_v2 = vpack.c.bf16 %v7487_v33, %v1918_v34  ;;  %v6731_v54 = vpop.eup %6730  ;;  %11523 = vst [vmem:[#allocation13_spill] sm:$0xff] %v7532_v31  ;;  %v2336_v16 = vunpack.c.h.b16 %v2039_v30  ;;  %v1139_v49 = vand.u32 2147483648, %v7478_v13 }
 0x11f   : > { %v1117_v28 = vadd.f32 %v6727_v7, %v1116_v44  ;;  %v1129_v62 = vmul.f32 %v6731_v54, %v7478_v13  ;;  %vm1134_vm1 = vweird.f32 %v6731_v54  ;;  %vm7547_vm2 = vcmp.eq.f32.partialorder %v1137_v0, 8.507059e+37 }
 0x120   : > { %6732 = vrcp.f32 %v7509_v61  ;;  %v602_v23 = vpop.f32.mrf.mxu0  ;;  %v2338_v42 = vunpack.c.l.b16 %v7513_v2  ;;  %v2339_v36 = vunpack.c.h.b16 %v7513_v2  ;;  %vm1135_vm3 = vmor %vm1133_vm0, %vm1134_vm1  ;;  %v1140_v0 = vor.u32 1.1754944e-38, %v1139_v49 }
 0x121   : > { %v1121_v27 = vsel %vm1120_vm15, %v6727_v7, %v1117_v28  ;;  %6734 = vpow2.f32 %v5930_v63  ;;  %v1130_v39 = vsub.f32 1.0, %v1129_v62  ;;  %v713_v35 = vmul.f32 %v7196_v24, %v602_v23 }
 0x122   : > { %v1126_v20 = vsel %vm7498_vm13, %v1125_v53, %v1121_v27  ;;  %v2470_v30 = vpack.c.b16 %v2338_v42, %v2335_v57  ;;  %v7553_v53 = vpack.c.b16 %v2339_v36, %v2336_v16  ;;  %v7557_v63 = vpack.c.b16 %v2336_v16, %v2333_v55 }
 0x123   : > { %v1721_v43 = vmul.f32 %v1126_v20, %v7390_v12  ;;  %v1131_v7 = vmul.f32 %v6731_v54, %v1130_v39  ;;  %v7543_v44 = vadd.f32 %v7201_v25, %v713_v35  ;;  %v1152_v57 = vand.u32 2147483647, %v7509_v61 }
 0x124   : > { %11526 = vst [vmem:[#allocation14_spill] sm:$0xff] %v7557_v63  ;;  %v1154_v39 = vand.u32 2147483648, %v7509_v61  ;;  %vm1148_vm5 = vweird.f32 %v7509_v61 }
 0x125   : > { %v1788_v12 = vsel %vm1770_vm12, %v1721_v43, 0.0  ;;  %v1132_v28 = vadd.f32 %v6731_v54, %v1131_v7  ;;  %v5931_v62 = vmul.f32 -1.442695, %v7543_v44  ;;  %vm7578_vm8 = vcmp.eq.f32.partialorder %v1152_v57, 8.507059e+37 }
 0x126   : > { %v6733_v2 = vpop.eup %6732  ;;  %v1836_v23 = vrot.slane %v1788_v12, 7  ;;  %v1934_v55 = vrot.slane %v1788_v12, 1 }
 0x127   : > { %v6735_v27 = vpop.eup %6734  ;;  %v1144_v20 = vmul.f32 %v6733_v2, %v7509_v61  ;;  %2772 = vmatmul.bf16.gmra.mxu1 %v2470_v30  ;;  %v1136_v16 = vsel %vm1135_vm3, %v6731_v54, %v1132_v28  ;;  %6736 = vpow2.f32 %v5931_v62  ;;  %vm1149_vm9 = vweird.f32 %v6733_v2 }
 0x128   : > { %v7567_v35 = vadd.f32 1.0, %v6735_v27  ;;  %v605_v43 = vpop.f32.mrf.mxu0  ;;  %v1917_v7 = vsel %vm1876_vm6, %v1835_v40, %v1836_v23  ;;  %v1141_v13 = vsel %vm7547_vm2, %v1140_v0, %v1136_v16  ;;  %v1155_v62 = vor.u32 1.1754944e-38, %v1154_v39  ;;  %vm1150_vm10 = vmor %vm1148_vm5, %vm1149_vm9 }
 0x129   : > { %v1145_v49 = vsub.f32 1.0, %v1144_v20  ;;  %v714_v15 = vmul.f32 %v7196_v24, %v605_v43  ;;  %v2043_v19 = vpack.c.bf16 %v1788_v12, %v1917_v7  ;;  %v1722_v30 = vmul.f32 %v1141_v13, %v7423_v3 }
 0x12a   : > { %6738 = vrcp.f32 %v7567_v35  ;;  %v2015_v57 = vsel %vm1974_vm7, %v1933_v22, %v1934_v55  ;;  %v2040_v16 = vpack.c.bf16 %v7525_v6, %v7525_v6  ;;  %vm1163_vm11 = vweird.f32 %v7567_v35 }
 0x12b   : > { %v1146_v28 = vmul.f32 %v6733_v2, %v1145_v49  ;;  %v7584_v40 = vadd.f32 %v7201_v25, %v714_v15  ;;  %644 = vmatmul.bf16.gmra.mxu0 %v6417_v47  ;;  %v2341_v34 = vunpack.c.l.b16 %v2043_v19  ;;  %v1789_v12 = vsel %vm1765_vm4, %v1722_v30, 0.0 }
 0x12c   : > { %v2342_v3 = vunpack.c.h.b16 %v2043_v19  ;;  %v1837_v27 = vrot.slane %v1789_v12, 7  ;;  %v1935_v0 = vrot.slane %v1789_v12, 1  ;;  %v2042_v19 = vpack.c.bf16 %v2015_v57, %v2015_v57 }
 0x12d   : > { %v1147_v20 = vadd.f32 %v6733_v2, %v1146_v28  ;;  %v6737_v15 = vpop.eup %6736  ;;  %v5932_v47 = vmul.f32 -1.442695, %v7584_v40  ;;  %v7597_v43 = vpack.c.b16 %v2341_v34, %v2338_v42  ;;  %v7619_v54 = vunpack.c.l.b16 %v2040_v16 }
 0x12e   : > { %v7599_v39 = vpack.c.b16 %v2342_v3, %v2339_v36  ;;  %v7601_v7 = vadd.f32 1.0, %v6737_v15  ;;  %v1916_v22 = vsel %vm1876_vm6, %v1836_v23, %v1837_v27  ;;  %v2014_v6 = vsel %vm1974_vm7, %v1934_v55, %v1935_v0 }
 0x12f   : > { %v1151_v33 = vsel %vm1150_vm10, %v6733_v2, %v1147_v20  ;;  %6740 = vpow2.f32 %v5932_v47  ;;  %v2045_v42 = vpack.c.bf16 %v1789_v12, %v1916_v22  ;;  %v7614_v2 = vunpack.c.l.b16 %v2042_v19  ;;  %11531 = vst [vmem:[#allocation17_spill] sm:$0xff] %v7619_v54 }
 0x130   : > { %11529 = vst [vmem:[#allocation15_spill] sm:$0xff] %v7599_v39  ;;  %v6739_v13 = vpop.eup %6738  ;;  %v1156_v61 = vsel %vm7578_vm8, %v1155_v62, %v1151_v33  ;;  %v607_v49 = vpop.f32.mrf.mxu0  ;;  %6742 = vrcp.f32 %v7601_v7  ;;  %v1167_v23 = vand.u32 2147483647, %v7567_v35  ;;  %v1169_v55 = vand.u32 2147483648, %v7567_v35  ;;  %v6418_v33 = vld [vmem:[%s7172_s22 + $0x88] sm:$0xff] }
 0x131   : > { %v7610_v30 = vmul.f32 %v1156_v61, %v7462_v51  ;;  %v1159_v36 = vmul.f32 %v6739_v13, %v7567_v35  ;;  %11530 = vst [vmem:[#allocation16_spill] sm:$0xff] %v7614_v2  ;;  %v715_v28 = vmul.f32 %v7196_v24, %v607_v49  ;;  %v2344_v57 = vunpack.c.l.b16 %v2045_v42 }
 0x132   : > { %vm1164_vm13 = vweird.f32 %v6739_v13  ;;  %v2345_v15 = vunpack.c.h.b16 %v2045_v42  ;;  %vm1168_vm14 = vcmp.eq.f32.partialorder %v1167_v23, 8.507059e+37  ;;  %v2044_v32 = vpack.c.bf16 %v2014_v6, %v2014_v6 }
 0x133   : > { %v1838_v62 = vrot.slane %v7610_v30, 7  ;;  %v1936_v12 = vrot.slane %v7610_v30, 1  ;;  %v1160_v51 = vsub.f32 1.0, %v1159_v36  ;;  %v7625_v20 = vadd.f32 %v7201_v25, %v715_v28  ;;  %vm1165_vm15 = vmor %vm1163_vm11, %vm1164_vm13 }
 0x134   : > { %v2473_v19 = vpack.c.b16 %v2344_v57, %v2341_v34  ;;  %v7637_v36 = vpack.c.b16 %v2345_v15, %v2342_v3  ;;  %vm1178_vm0 = vweird.f32 %v7601_v7 }
 0x135   : > { %v1161_v47 = vmul.f32 %v6739_v13, %v1160_v51  ;;  %v1915_v16 = vsel %vm1876_vm6, %v1837_v27, %v1838_v62  ;;  %v6741_v22 = vpop.eup %6740  ;;  %v5933_v61 = vmul.f32 -1.442695, %v7625_v20  ;;  %v2013_v34 = vsel %vm1974_vm7, %v1935_v0, %v1936_v12 }
 0x136   : > { %v7635_v49 = vpack.c.bf16 %v7610_v30, %v1915_v16  ;;  %v6743_v42 = vpop.eup %6742  ;;  %v1170_v27 = vor.u32 1.1754944e-38, %v1169_v55  ;;  %v7643_v51 = vadd.f32 1.0, %v6741_v22  ;;  %v2046_v23 = vpack.c.bf16 %v2013_v34, %v2013_v34 }
 0x137   : > { %v1162_v28 = vadd.f32 %v6739_v13, %v1161_v47  ;;  %2777 = vmatmul.bf16.gmra.mxu1 %v2473_v19  ;;  %v1174_v3 = vmul.f32 %v6743_v42, %v7601_v7  ;;  %6744 = vpow2.f32 %v5933_v61  ;;  %v1184_v19 = vand.u32 2147483648, %v7601_v7 }
 0x138   : > { %v610_v16 = vpop.f32.mrf.mxu0  ;;  %v11366_v50 = vunpack.c.l.b16 %v7635_v49  ;;  %6746 = vrcp.f32 %v7643_v51  ;;  %v1182_v61 = vand.u32 2147483647, %v7601_v7  ;;  %vm1179_vm1 = vweird.f32 %v6743_v42 }
 0x139   : > { %v1166_v0 = vsel %vm1165_vm15, %v6739_v13, %v1162_v28  ;;  %v1175_v47 = vsub.f32 1.0, %v1174_v3  ;;  %v716_v35 = vmul.f32 %v7196_v24, %v610_v16  ;;  %v11364_v13 = vunpack.c.h.b16 %v7635_v49  ;;  %vm1180_vm2 = vmor %vm1178_vm0, %vm1179_vm1 }
 0x13a   : > { %v1171_v55 = vsel %vm1168_vm14, %v1170_v27, %v1166_v0  ;;  %v7659_v6 = vpack.c.b16 %v11366_v50, %v2344_v57  ;;  %v7665_v27 = vunpack.c.l.b16 %v2044_v32  ;;  %v7679_v57 = vpack.c.b16 %v7619_v54, %v7532_v31 }
 0x13b   : > { %v1724_v22 = vmul.f32 %v1171_v55, %v7503_v48  ;;  %649 = vmatmul.bf16.gmra.mxu0 %v6418_v33  ;;  %v1176_v28 = vmul.f32 %v6743_v42, %v1175_v47  ;;  %v7663_v34 = vadd.f32 %v7201_v25, %v716_v35  ;;  %v7671_v48 = vunpack.c.l.b16 %v2046_v23 }
 0x13c   : > { %11532 = vst [vmem:[#allocation18_spill] sm:$0xff] %v7665_v27  ;;  %v7675_v33 = vpack.c.b16 %v11364_v13, %v2345_v15  ;;  %v1185_v32 = vor.u32 1.1754944e-38, %v1184_v19  ;;  %v7692_v35 = vpack.c.b16 %v7665_v27, %v7614_v2  ;;  %vm1183_vm3 = vcmp.eq.f32.partialorder %v1182_v61, 8.507059e+37 }
 0x13d   : > { %v7669_v24 = vsel %vm1770_vm12, %v1724_v22, 0.0  ;;  %11533 = vst [vmem:[#allocation19_spill] sm:$0xff] %v7671_v48  ;;  %v6745_v3 = vpop.eup %6744  ;;  %v1177_v16 = vadd.f32 %v6743_v42, %v1176_v28  ;;  %v5934_v0 = vmul.f32 -1.442695, %v7663_v34  ;;  %v1197_v1 = vand.u32 2147483647, %v7643_v51 }
 0x13e   : > { %11534 = vst [vmem:[#allocation20_spill] sm:$0xff] %v7675_v33  ;;  %v11365_v25 = vrot.slane %v7669_v24, 7  ;;  %v6747_v55 = vpop.eup %6746  ;;  %v11363_v47 = vrot.slane %v7669_v24, 1  ;;  %v7686_v23 = vadd.f32 1.0, %v6745_v3  ;;  %v1199_v15 = vand.u32 2147483648, %v7643_v51 }
 0x13f   : > { %11535 = vst [vmem:[#allocation21_spill] sm:$0xff] %v7679_v57  ;;  %v1181_v22 = vsel %vm1180_vm2, %v6743_v42, %v1177_v16  ;;  %v1189_v19 = vmul.f32 %v6747_v55, %v7643_v51  ;;  %6748 = vpow2.f32 %v5934_v0  ;;  %vm1194_vm5 = vweird.f32 %v6747_v55  ;;  %v7720_v16 = vld [vmem:[%s11356_s3] ss:$0 sm:$0xff] }
 0x140   : > { %11536 = vst [vmem:[#allocation22_spill] sm:$0xff] %v7692_v35  ;;  %v612_v28 = vpop.f32.mrf.mxu0  ;;  %v1186_v9 = vsel %vm1183_vm3, %v1185_v32, %v1181_v22  ;;  %6750 = vrcp.f32 %v7686_v23  ;;  %v1914_v61 = vsel %vm1876_vm6, %v1838_v62, %v11365_v25  ;;  %vm1193_vm8 = vweird.f32 %v7643_v51 }
 0x141   : > { %v1725_v7 = vmul.f32 %v1186_v9, %v7543_v44  ;;  %v1190_v3 = vsub.f32 1.0, %v1189_v19  ;;  %v717_v42 = vmul.f32 %v7702_v37, %v612_v28  ;;  %v2012_v9 = vsel %vm1974_vm7, %v1936_v12, %v11363_v47  ;;  %vm1195_vm10 = vmor %vm1193_vm8, %vm1194_vm5 }
 0x142   : > { %v7726_v62 = vpack.c.bf16 %v7669_v24, %v1914_v61  ;;  %vm7729_vm9 = vcmp.eq.f32.partialorder %v1197_v1, 8.507059e+37  ;;  %v2048_v0 = vpack.c.bf16 %v2012_v9, %v2012_v9  ;;  %v1200_v28 = vor.u32 1.1754944e-38, %v1199_v15  ;;  %v6419_v1 = vld [vmem:[%s7172_s22 + $0x90] sm:$0xff] }
 0x143   : > { %v1191_v44 = vmul.f32 %v6747_v55, %v1190_v3  ;;  %v7723_v32 = vadd.f32 %v7720_v16, %v717_v42  ;;  %v1792_v12 = vsel %vm1765_vm4, %v1725_v7, 0.0  ;;  %vm1208_vm11 = vweird.f32 %v7686_v23 }
 0x144   : > { %v2350_v42 = vunpack.c.l.b16 %v7726_v62  ;;  %v1840_v61 = vrot.slane %v1792_v12, 7  ;;  %v1212_v9 = vand.u32 2147483647, %v7686_v23  ;;  %v1938_v50 = vrot.slane %v1792_v12, 1 }
 0x145   : > { %v6749_v22 = vpop.eup %6748  ;;  %v1192_v19 = vadd.f32 %v6747_v55, %v1191_v44  ;;  %v5935_v3 = vmul.f32 -1.442695, %v7723_v32  ;;  %v7747_v35 = vunpack.c.l.b16 %v2048_v0  ;;  %v11542_v0 = vunpack.c.h.b16 %v7635_v49 }
 0x146   : > { %v6751_v47 = vpop.eup %6750  ;;  %v7738_v51 = vadd.f32 1.0, %v6749_v22  ;;  %vm1213_vm15 = vcmp.eq.f32.partialorder %v1212_v9, 8.507059e+37 }
 0x147   : > { %v1196_v25 = vsel %vm1195_vm10, %v6747_v55, %v1192_v19  ;;  %v1204_v7 = vmul.f32 %v6751_v47, %v7686_v23  ;;  %6752 = vpow2.f32 %v5935_v3  ;;  %11539 = vst [vmem:[#allocation23_spill] sm:$0xff] %v7747_v35  ;;  %v1214_v55 = vand.u32 2147483648, %v7686_v23 }
 0x148   : > { %v615_v15 = vpop.f32.mrf.mxu0  ;;  %v1201_v44 = vsel %vm7729_vm9, %v1200_v28, %v1196_v25  ;;  %6754 = vrcp.f32 %v7738_v51  ;;  %v11540_v19 = vunpack.c.l.b16 %v7635_v49  ;;  %vm1209_vm13 = vweird.f32 %v6751_v47 }
 0x149   : > { %v7750_v22 = vmul.f32 %v1201_v44, %v7584_v40  ;;  %v1205_v57 = vsub.f32 1.0, %v1204_v7  ;;  %v718_v3 = vmul.f32 %v7702_v37, %v615_v15  ;;  %v11541_v25 = vrot.slane %v7669_v24, 7  ;;  %vm1210_vm14 = vmor %vm1208_vm11, %vm1209_vm13 }
 0x14a   : > { %v2476_v13 = vpack.c.b16 %v2350_v42, %v11540_v19  ;;  %v11543_v40 = vunpack.c.h.b16 %v7726_v62  ;;  %v1227_v8 = vand.u32 2147483647, %v7738_v51  ;;  %vm1223_vm0 = vweird.f32 %v7738_v51 }
 0x14b   : > { %654 = vmatmul.bf16.gmra.mxu0 %v6419_v1  ;;  %v1913_v30 = vsel %vm1876_vm6, %v11541_v25, %v1840_v61  ;;  %v1841_v7 = vrot.slane %v7750_v22, 7  ;;  %v1939_v44 = vrot.slane %v7750_v22, 1  ;;  %v1206_v19 = vmul.f32 %v6751_v47, %v1205_v57 }
 0x14c   : > { %v7764_v28 = vpack.c.b16 %v11543_v40, %v11542_v0  ;;  %2782 = vmatmul.bf16.gmra.mxu1 %v2476_v13  ;;  %v7770_v1 = vadd.f32 %v7720_v16, %v718_v3  ;;  %v2051_v15 = vpack.c.bf16 %v1792_v12, %v1913_v30  ;;  %v11544_v25 = vrot.slane %v7669_v24, 1 }
 0x14d   : > { %v7780_v0 = vpack.c.b16 %v7747_v35, %v7671_v48  ;;  %v6753_v40 = vpop.eup %6752  ;;  %v1207_v29 = vadd.f32 %v6751_v47, %v1206_v19  ;;  %v1229_v57 = vand.u32 2147483648, %v7738_v51  ;;  %v1912_v13 = vsel %vm1876_vm6, %v1840_v61, %v1841_v7 }
 0x14e   : > { %v7776_v49 = vsel %vm1974_vm7, %v11544_v25, %v1938_v50  ;;  %v7787_v12 = vsel %vm1974_vm7, %v1938_v50, %v1939_v44  ;;  %v6755_v24 = vpop.eup %6754  ;;  %v1215_v3 = vor.u32 1.1754944e-38, %v1214_v55  ;;  %v7792_v30 = vadd.f32 1.0, %v6753_v40 }
 0x14f   : > { %11545 = vst [vmem:[#allocation24_spill] sm:$0xff] %v7780_v0  ;;  %v5936_v25 = vmul.f32 -1.442695, %v7770_v1  ;;  %v2353_v19 = vunpack.c.l.b16 %v2051_v15  ;;  %v1211_v0 = vsel %vm1210_vm14, %v6751_v47, %v1207_v29  ;;  %v1219_v33 = vmul.f32 %v6755_v24, %v7738_v51 }
 0x150   : > { %v617_v61 = vpop.f32.mrf.mxu0  ;;  %v7797_v39 = vpack.c.bf16 %v7750_v22, %v1912_v13  ;;  %v1216_v50 = vsel %vm1213_vm15, %v1215_v3, %v1211_v0  ;;  %vm7800_vm1 = vcmp.eq.f32.partialorder %v1227_v8, 8.507059e+37  ;;  %6756 = vrcp.f32 %v7792_v30 }
 0x151   : > { %v1727_v55 = vmul.f32 %v1216_v50, %v7625_v20  ;;  %v1220_v40 = vsub.f32 1.0, %v1219_v33  ;;  %v1230_v29 = vor.u32 1.1754944e-38, %v1229_v57  ;;  %6758 = vpow2.f32 %v5936_v25 }
 0x152   : > { %vm1224_vm2 = vweird.f32 %v6755_v24  ;;  %v719_v47 = vmul.f32 %v7702_v37, %v617_v61  ;;  %v7807_v9 = vpack.c.b16 %v2353_v19, %v2350_v42  ;;  %v2354_v22 = vunpack.c.h.b16 %v2051_v15 }
 0x153   : > { %v1221_v0 = vmul.f32 %v6755_v24, %v1220_v40  ;;  %v2356_v8 = vunpack.c.l.b16 %v7797_v39  ;;  %v1794_v13 = vsel %vm1770_vm12, %v1727_v55, 0.0  ;;  %v2357_v3 = vunpack.c.h.b16 %v7797_v39  ;;  %vm1225_vm5 = vmor %vm1223_vm0, %vm1224_vm2  ;;  %v6420_v40 = vld [vmem:[%s7172_s22 + $0x98] sm:$0xff] }
 0x154   : > { %v7814_v20 = vadd.f32 %v7720_v16, %v719_v47  ;;  %v1842_v33 = vrot.slane %v1794_v13, 7  ;;  %v1940_v57 = vrot.slane %v1794_v13, 1  ;;  %v2050_v25 = vpack.c.bf16 %v7776_v49, %v7776_v49 }
 0x155   : > { %v1222_v42 = vadd.f32 %v6755_v24, %v1221_v0  ;;  %vm1238_vm3 = vweird.f32 %v7792_v30  ;;  %v1242_v15 = vand.u32 2147483647, %v7792_v30  ;;  %v1244_v61 = vand.u32 2147483648, %v7792_v30 }
 0x156   : > { %v7821_v50 = vpack.c.b16 %v2357_v3, %v2354_v22  ;;  %v6757_v55 = vpop.eup %6756  ;;  %v5937_v39 = vmul.f32 -1.442695, %v7814_v20  ;;  %v1911_v49 = vsel %vm1876_vm6, %v1841_v7, %v1842_v33  ;;  %v2009_v47 = vsel %vm1974_vm7, %v1939_v44, %v1940_v57 }
 0x157   : > { %v11548_v0 = vunpack.c.h.b16 %v7726_v62  ;;  %v6759_v27 = vpop.eup %6758  ;;  %v1226_v48 = vsel %vm1225_vm5, %v6755_v24, %v1222_v42  ;;  %v1234_v45 = vmul.f32 %v6757_v55, %v7792_v30  ;;  %v2479_v54 = vpack.c.b16 %v2356_v8, %v2353_v19 }
 0x158   : > { %v620_v51 = vpop.f32.mrf.mxu0  ;;  %v7837_v2 = vpack.c.bf16 %v1794_v13, %v1911_v49  ;;  %v1231_v10 = vsel %vm7800_vm1, %v1230_v29, %v1226_v48  ;;  %v7841_v52 = vadd.f32 1.0, %v6759_v27  ;;  %6760 = vpow2.f32 %v5937_v39 }
 0x159   : > { %v7834_v63 = vpack.c.b16 %v2354_v22, %v11548_v0  ;;  %v720_v7 = vmul.f32 %v7702_v37, %v620_v51  ;;  %v1728_v62 = vmul.f32 %v1231_v10, %v7663_v34  ;;  %v1235_v44 = vsub.f32 1.0, %v1234_v45 }
 0x15a   : > { %v2359_v22 = vunpack.c.l.b16 %v7837_v2  ;;  %v7846_v24 = vunpack.c.l.b16 %v2050_v25  ;;  %vm1239_vm8 = vweird.f32 %v6757_v55  ;;  %vm7848_vm9 = vcmp.eq.f32.partialorder %v1242_v15, 8.507059e+37 }
 0x15b   : > { %11549 = vst [vmem:[#allocation25_spill] sm:$0xff] %v7834_v63  ;;  %6762 = vrcp.f32 %v7841_v52  ;;  %659 = vmatmul.bf16.gmra.mxu0 %v6420_v40  ;;  %v2360_v27 = vunpack.c.h.b16 %v7837_v2  ;;  %v1795_v48 = vsel %vm1765_vm4, %v1728_v62, 0.0  ;;  %v1236_v23 = vmul.f32 %v6757_v55, %v1235_v44  ;;  %vm1240_vm10 = vmor %vm1238_vm3, %vm1239_vm8 }
 0x15c   : > { %11550 = vst [vmem:[#allocation26_spill] sm:$0xff] %v7846_v24  ;;  %2787 = vmatmul.bf16.gmra.mxu1 %v2479_v54  ;;  %v7857_v10 = vadd.f32 %v7720_v16, %v720_v7  ;;  %v7861_v45 = vpack.c.b16 %v2359_v22, %v2356_v8  ;;  %v1843_v34 = vrot.slane %v1795_v48, 7  ;;  %v1941_v29 = vrot.slane %v1795_v48, 1 }
 0x15d   : > { %v1245_v13 = vor.u32 1.1754944e-38, %v1244_v61  ;;  %v2052_v25 = vpack.c.bf16 %v7787_v12, %v7787_v12  ;;  %v1237_v42 = vadd.f32 %v6757_v55, %v1236_v23  ;;  %v2054_v54 = vpack.c.bf16 %v2009_v47, %v2009_v47 }
 0x15e   : > { %v5938_v15 = vmul.f32 -1.442695, %v7857_v10  ;;  %v6761_v40 = vpop.eup %6760  ;;  %v1257_v8 = vand.u32 2147483647, %v7841_v52  ;;  %v1910_v61 = vsel %vm1876_vm6, %v1842_v33, %v1843_v34  ;;  %v7876_v12 = vsel %vm1974_vm7, %v1940_v57, %v1941_v29 }
 0x15f   : > { %v7878_v49 = vpack.c.b16 %v2360_v27, %v2357_v3  ;;  %v1241_v0 = vsel %vm1240_vm10, %v6757_v55, %v1237_v42  ;;  %v7880_v51 = vadd.f32 1.0, %v6761_v40  ;;  %v7882_v7 = vpack.c.bf16 %v1795_v48, %v1910_v61 }
 0x160   : > { %6764 = vpow2.f32 %v5938_v15  ;;  %v622_v47 = vpop.f32.mrf.mxu0  ;;  %v1246_v62 = vsel %vm7848_vm9, %v1245_v13, %v1241_v0  ;;  %vm1253_vm11 = vweird.f32 %v7841_v52  ;;  %v7893_v55 = vunpack.c.l.b16 %v2054_v54 }
 0x161   : > { %11553 = vst [vmem:[#allocation27_spill] sm:$0xff] %v7878_v49  ;;  %v6763_v30 = vpop.eup %6762  ;;  %v721_v33 = vmul.f32 %v7702_v37, %v622_v47  ;;  %v7889_v57 = vmul.f32 %v1246_v62, %v7723_v32  ;;  %6766 = vrcp.f32 %v7880_v51  ;;  %vm7895_vm13 = vcmp.eq.f32.partialorder %v1257_v8, 8.507059e+37 }
 0x162   : > { %v1249_v3 = vmul.f32 %v6763_v30, %v7841_v52  ;;  %11554 = vst [vmem:[#allocation28_spill] sm:$0xff] %v7893_v55  ;;  %v1259_v19 = vand.u32 2147483648, %v7841_v52  ;;  %v7903_v23 = vunpack.c.l.b16 %v2052_v25  ;;  %v2362_v15 = vunpack.c.l.b16 %v7882_v7 }
 0x163   : > { %v7901_v48 = vadd.f32 %v7720_v16, %v721_v33  ;;  %v1844_v32 = vrot.slane %v7889_v57, 7  ;;  %vm1254_vm14 = vweird.f32 %v6763_v30  ;;  %v1272_v54 = vand.u32 2147483647, %v7880_v51 }
 0x164   : > { %11557 = vst [vmem:[#allocation29_spill] sm:$0xff] %v7903_v23  ;;  %v1250_v42 = vsub.f32 1.0, %v1249_v3  ;;  %v2363_v8 = vunpack.c.h.b16 %v7882_v7  ;;  %v1274_v25 = vand.u32 2147483648, %v7880_v51  ;;  %v6421_v3 = vld [vmem:[%s7172_s22 + $0xa0] sm:$0xff]  ;;  %v2482_v49 = vpack.c.b16 %v2362_v15, %v2359_v22  ;;  %vm1255_vm15 = vmor %vm1253_vm11, %vm1254_vm14 }
 0x165   : > { %v5939_v40 = vmul.f32 -1.442695, %v7901_v48  ;;  %v1909_v47 = vsel %vm1876_vm6, %v1843_v34, %v1844_v32  ;;  %v11558_v34 = vrot.slane %v7889_v57, 1  ;;  %v2056_v2 = vpack.c.bf16 %v7876_v12, %v7876_v12  ;;  %v6475_v12 = vld [vmem:[%s11357_s4 + $0x138] sm:$0xff] }
 0x166   : > { %v6765_v61 = vpop.eup %6764  ;;  %v1251_v0 = vmul.f32 %v6763_v30, %v1250_v42  ;;  %v7922_v39 = vpack.c.bf16 %v7889_v57, %v1909_v47  ;;  %v7924_v7 = vpack.c.b16 %v2363_v8, %v2360_v27  ;;  %v1260_v27 = vor.u32 1.1754944e-38, %v1259_v19  ;;  %6659 = vmatpush.bf16.msra.mxu2 %v6475_v12  ;;  %2878 = vmatpush.bf16.msrb.mxu0 %v6475_v12 }
 0x167   : > { %v7918_v33 = vadd.f32 1.0, %v6765_v61  ;;  %6768 = vpow2.f32 %v5939_v40  ;;  %v6767_v42 = vpop.eup %6766  ;;  %v2007_v62 = vsel %vm1974_vm7, %v1941_v29, %v11558_v34  ;;  %v7934_v40 = vpack.c.b16 %v7903_v23, %v7846_v24  ;;  %v6473_v29 = vld [vmem:[%s11357_s4 + $0x128] sm:$0xff] }
 0x168   : > { %v1252_v13 = vadd.f32 %v6763_v30, %v1251_v0  ;;  %v625_v63 = vpop.f32.mrf.mxu0  ;;  %v1264_v61 = vmul.f32 %v6767_v42, %v7880_v51  ;;  %vm1268_vm0 = vweird.f32 %v7880_v51  ;;  %vm7944_vm1 = vcmp.eq.f32.partialorder %v1272_v54, 8.507059e+37 }
 0x169   : > { %11559 = vst [vmem:[#allocation30_spill] sm:$0xff] %v7934_v40  ;;  %6770 = vrcp.f32 %v7918_v33  ;;  %v722_v0 = vmul.f32 %v7702_v37, %v625_v63  ;;  %v11384_v47 = vunpack.c.l.b16 %v7922_v39  ;;  %vm1269_vm2 = vweird.f32 %v6767_v42 }
 0x16a   : > { %v1256_v22 = vsel %vm1255_vm15, %v6763_v30, %v1252_v13  ;;  %v1265_v19 = vsub.f32 1.0, %v1264_v61  ;;  %v11383_v30 = vunpack.c.h.b16 %v7922_v39  ;;  %v1275_v54 = vor.u32 1.1754944e-38, %v1274_v25  ;;  %vm1270_vm3 = vmor %vm1268_vm0, %vm1269_vm2 }
 0x16b   : > { %v1261_v52 = vsel %vm7895_vm13, %v1260_v27, %v1256_v22  ;;  %664 = vmatmul.bf16.gmra.mxu0 %v6421_v3  ;;  %v7958_v63 = vadd.f32 %v7720_v16, %v722_v0  ;;  %v1287_v3 = vand.u32 2147483647, %v7918_v33  ;;  %v7963_v27 = vpack.c.b16 %v11384_v47, %v2362_v15 }
 0x16c   : > { %v1730_v13 = vmul.f32 %v1261_v52, %v7770_v1  ;;  %2792 = vmatmul.bf16.gmra.mxu1 %v2482_v49  ;;  %v1266_v34 = vmul.f32 %v6767_v42, %v1265_v19  ;;  %v2058_v61 = vpack.c.bf16 %v2007_v62, %v2007_v62  ;;  %v7974_v22 = vpack.c.b16 %v11383_v30, %v2363_v8  ;;  %v6474_v62 = vld [vmem:[%s11357_s4 + $0x130] sm:$0xff] }
 0x16d   : > { %v6769_v44 = vpop.eup %6768  ;;  %v5940_v49 = vmul.f32 -1.442695, %v7958_v63  ;;  %v1289_v15 = vand.u32 2147483648, %v7918_v33  ;;  %v7981_v12 = vunpack.c.l.b16 %v2056_v2  ;;  %vm1283_vm5 = vweird.f32 %v7918_v33  ;;  %6660 = vmatpush.bf16.msra.mxu2 %v6474_v62  ;;  %2879 = vmatpush.bf16.msrb.mxu0 %v6474_v62 }
 0x16e   : > { %v7967_v1 = vsel %vm1770_vm12, %v1730_v13, 0.0  ;;  %v7969_v25 = vadd.f32 1.0, %v6769_v44  ;;  %11562 = vst [vmem:[#allocation31_spill] sm:$0xff] %v7974_v22  ;;  %v1267_v19 = vadd.f32 %v6767_v42, %v1266_v34  ;;  %v7989_v34 = vunpack.c.l.b16 %v2058_v61 }
 0x16f   : > { %v6771_v0 = vpop.eup %6770  ;;  %v1845_v52 = vrot.slane %v7967_v1, 7  ;;  %11563 = vst [vmem:[#allocation32_spill] sm:$0xff] %v7981_v12  ;;  %vm7992_vm8 = vcmp.eq.f32.partialorder %v1287_v3, 8.507059e+37  ;;  %v1290_v3 = vor.u32 1.1754944e-38, %v1289_v15  ;;  %v11569_v15 = vrot.slane %v7889_v57, 1 }
 0x170   : > { %v1279_v8 = vmul.f32 %v6771_v0, %v7918_v33  ;;  %6772 = vrcp.f32 %v7969_v25  ;;  %v627_v44 = vpop.f32.mrf.mxu0  ;;  %11564 = vst [vmem:[#allocation33_spill] sm:$0xff] %v7989_v34  ;;  %v1271_v30 = vsel %vm1270_vm3, %v6767_v42, %v1267_v19  ;;  %vm1284_vm9 = vweird.f32 %v6771_v0 }
 0x171   : > { %6774 = vpow2.f32 %v5940_v49  ;;  %v1276_v51 = vsel %vm7944_vm1, %v1275_v54, %v1271_v30  ;;  %v723_v13 = vmul.f32 %v7702_v37, %v627_v44  ;;  %v1908_v42 = vsel %vm1876_vm6, %v1844_v32, %v1845_v52  ;;  %v8004_v19 = vpop.f32.mrf.mxu1  ;;  %6661 = vmatpush.bf16.msra.mxu2 %v6473_v29  ;;  %2880 = vmatpush.bf16.msrb.mxu0 %v6473_v29  ;;  %vm1285_vm11 = vmor %vm1283_vm5, %vm1284_vm9  ;;  %v6422_v44 = vld [vmem:[%s7172_s22 + $0xa8] sm:$0xff] }
 0x172   : > { %v1280_v2 = vsub.f32 1.0, %v1279_v8  ;;  %v1731_v61 = vmul.f32 %v1276_v51, %v7814_v20  ;;  %11567 = vst [vmem:[#allocation34_spill] sm:$0xff] %v8004_v19  ;;  %v8007_v49 = vpack.c.bf16 %v7967_v1, %v1908_v42  ;;  %v11568_v20 = vrot.slane %v7967_v1, 1 }
 0x173   : > { %v8013_v54 = vadd.f32 %v7720_v16, %v723_v13  ;;  %vm1298_vm10 = vweird.f32 %v7969_v25  ;;  %v1302_v57 = vand.u32 2147483647, %v7969_v25  ;;  %v11570_v29 = vunpack.c.l.b16 %v7922_v39 }
 0x174   : > { %v1281_v30 = vmul.f32 %v6771_v0, %v1280_v2  ;;  %v8023_v62 = vsel %vm1974_vm7, %v11569_v15, %v11568_v20  ;;  %v2368_v8 = vunpack.c.l.b16 %v8007_v49  ;;  %v1798_v13 = vsel %vm1765_vm4, %v1731_v61, 0.0 }
 0x175   : > { %v5941_v42 = vmul.f32 -1.442695, %v8013_v54  ;;  %v1846_v20 = vrot.slane %v1798_v13, 7  ;;  %v1304_v61 = vand.u32 2147483648, %v7969_v25  ;;  %v11571_v22 = vunpack.c.h.b16 %v7922_v39 }
 0x176   : > { %v6773_v51 = vpop.eup %6772  ;;  %v1282_v2 = vadd.f32 %v6771_v0, %v1281_v30  ;;  %v2485_v40 = vpack.c.b16 %v2368_v8, %v11570_v29  ;;  %v6472_v30 = vld [vmem:[%s11357_s4 + $0x120] sm:$0xff]  ;;  %v11572_v19 = vunpack.c.h.b16 %v8007_v49  ;;  %vm8061_vm13 = vcmp.eq.f32.partialorder %v1302_v57, 8.507059e+37 }
 0x177   : > { %v6775_v15 = vpop.eup %6774  ;;  %v1294_v32 = vmul.f32 %v6773_v51, %v7969_v25  ;;  %6776 = vpow2.f32 %v5941_v42  ;;  %v1907_v31 = vsel %vm1876_vm6, %v1845_v52, %v1846_v20  ;;  %6662 = vmatpush.bf16.msra.mxu2 %v6472_v30  ;;  %2881 = vmatpush.bf16.msrb.mxu0 %v6472_v30  ;;  %vm1299_vm14 = vweird.f32 %v6773_v51 }
 0x178   : > { %v8047_v23 = vpack.c.b16 %v11572_v19, %v11571_v22  ;;  %v1286_v33 = vsel %vm1285_vm11, %v6771_v0, %v1282_v2  ;;  %v8049_v35 = vadd.f32 1.0, %v6775_v15  ;;  %v630_v24 = vpop.f32.mrf.mxu0  ;;  %v8056_v5 = vpack.c.bf16 %v1798_v13, %v1907_v31  ;;  %vm1300_vm15 = vmor %vm1298_vm10, %vm1299_vm14 }
 0x179   : > { %v1291_v29 = vsel %vm7992_vm8, %v1290_v3, %v1286_v33  ;;  %v1295_v18 = vsub.f32 1.0, %v1294_v32  ;;  %v724_v56 = vmul.f32 %v7702_v37, %v630_v24  ;;  %v1944_v0 = vrot.slane %v1798_v13, 1  ;;  %v8069_v24 = vpop.f32.mrf.mxu1 }
 0x17a   : > { %v8059_v39 = vmul.f32 %v1291_v29, %v7857_v10  ;;  %6778 = vrcp.f32 %v8049_v35  ;;  %11575 = vst [vmem:[#allocation35_spill] sm:$0xff] %v8069_v24  ;;  %v11394_v31 = vunpack.c.l.b16 %v8056_v5  ;;  %v6471_v10 = vld [vmem:[%s11357_s4 + $0x118] sm:$0xff]  ;;  %v1305_v32 = vor.u32 1.1754944e-38, %v1304_v61 }
 0x17b   : > { %v1296_v52 = vmul.f32 %v6773_v51, %v1295_v18  ;;  %v8067_v47 = vadd.f32 %v7720_v16, %v724_v56  ;;  %669 = vmatmul.bf16.gmra.mxu0 %v6422_v44  ;;  %v2372_v18 = vunpack.c.h.b16 %v8056_v5  ;;  %v1317_v56 = vand.u32 2147483647, %v8049_v35  ;;  %6663 = vmatpush.bf16.msra.mxu2 %v6471_v10 }
 0x17c   : > { %v1847_v3 = vrot.slane %v8059_v39, 7  ;;  %v11395_v19 = vrot.slane %v8059_v39, 1  ;;  %2797 = vmatmul.bf16.gmra.mxu1 %v2485_v40  ;;  %2882 = vmatpush.bf16.msrb.mxu0 %v6471_v10  ;;  %v8082_v44 = vpack.c.b16 %v11394_v31, %v2368_v8  ;;  %v1319_v40 = vand.u32 2147483648, %v8049_v35 }
 0x17d   : > { %v1297_v13 = vadd.f32 %v6773_v51, %v1296_v52  ;;  %v5942_v2 = vmul.f32 -1.442695, %v8067_v47  ;;  %v6777_v57 = vpop.eup %6776  ;;  %v11576_v15 = vrot.slane %v7967_v1, 1  ;;  %vm1313_vm0 = vweird.f32 %v8049_v35 }
 0x17e   : > { %v1906_v42 = vsel %vm1876_vm6, %v1846_v20, %v1847_v3  ;;  %v2004_v8 = vsel %vm1974_vm7, %v1944_v0, %v11395_v19  ;;  %v8098_v33 = vadd.f32 1.0, %v6777_v57  ;;  %v6470_v20 = vld [vmem:[%s11357_s4 + $0x110] sm:$0xff]  ;;  %vm8117_vm1 = vcmp.eq.f32.partialorder %v1317_v56, 8.507059e+37  ;;  %v6469_v56 = vld [vmem:[%s11357_s4 + $0x108] sm:$0xff] }
 0x17f   : > { %v2005_v61 = vsel %vm1974_vm7, %v11576_v15, %v1944_v0  ;;  %v1301_v30 = vsel %vm1300_vm15, %v6773_v51, %v1297_v13  ;;  %6780 = vpow2.f32 %v5942_v2  ;;  %v8101_v25 = vpack.c.bf16 %v8059_v39, %v1906_v42  ;;  %6664 = vmatpush.bf16.msra.mxu2 %v6470_v20 }
 0x180   : > { %v6779_v1 = vpop.eup %6778  ;;  %v1306_v29 = vsel %vm8061_vm13, %v1305_v32, %v1301_v30  ;;  %v632_v52 = vpop.f32.mrf.mxu0  ;;  %v2060_v51 = vpack.c.bf16 %v8023_v62, %v8023_v62  ;;  %v11577_v0 = vunpack.c.h.b16 %v8007_v49  ;;  %6782 = vrcp.f32 %v8098_v33  ;;  %2883 = vmatpush.bf16.msrb.mxu0 %v6470_v20 }
 0x181   : > { %v1733_v13 = vmul.f32 %v1306_v29, %v7901_v48  ;;  %v1309_v2 = vmul.f32 %v6779_v1, %v8049_v35  ;;  %v1320_v22 = vor.u32 1.1754944e-38, %v1319_v40  ;;  %v725_v32 = vmul.f32 %v7702_v37, %v632_v52 }
 0x182   : > { %v8113_v10 = vpack.c.b16 %v2372_v18, %v11577_v0  ;;  %v2062_v62 = vpack.c.bf16 %v2005_v61, %v2005_v61  ;;  %v2064_v42 = vpack.c.bf16 %v2004_v8, %v2004_v8  ;;  %vm1314_vm2 = vweird.f32 %v6779_v1 }
 0x183   : > { %v1310_v49 = vsub.f32 1.0, %v1309_v2  ;;  %v8125_v48 = vsel %vm1770_vm12, %v1733_v13, 0.0  ;;  %v2375_v15 = vunpack.c.h.b16 %v8101_v25  ;;  %v1332_v30 = vand.u32 2147483647, %v8098_v33  ;;  %v8135_v20 = vpop.f32.mrf.mxu1  ;;  %6665 = vmatpush.bf16.msra.mxu2 %v6469_v56  ;;  %v6423_v13 = vld [vmem:[%s7172_s22 + $0xb0] sm:$0xff]  ;;  %vm1315_vm5 = vmor %vm1313_vm0, %vm1314_vm2 }
 0x184   : > { %11578 = vst [vmem:[#allocation36_spill] sm:$0xff] %v8113_v10  ;;  %v8133_v40 = vadd.f32 %v7720_v16, %v725_v32  ;;  %v2374_v61 = vunpack.c.l.b16 %v8101_v25  ;;  %v11397_v8 = vrot.slane %v8125_v48, 7  ;;  %v1334_v0 = vand.u32 2147483648, %v8098_v33  ;;  %2884 = vmatpush.bf16.msrb.mxu0 %v6469_v56 }
 0x185   : > { %11581 = vst [vmem:[#allocation37_spill] sm:$0xff] %v8135_v20  ;;  %v6781_v29 = vpop.eup %6780  ;;  %v1311_v52 = vmul.f32 %v6779_v1, %v1310_v49  ;;  %v8141_v2 = vpack.c.b16 %v2375_v15, %v2372_v18  ;;  %v8150_v19 = vunpack.c.l.b16 %v2060_v51  ;;  %vm1328_vm3 = vweird.f32 %v8098_v33  ;;  %v6468_v18 = vld [vmem:[%s11357_s4 + $0x100] sm:$0xff] }
 0x186   : > { %v8143_v31 = vadd.f32 1.0, %v6781_v29  ;;  %v5943_v32 = vmul.f32 -1.442695, %v8133_v40  ;;  %v1905_v25 = vsel %vm1876_vm6, %v1847_v3, %v11397_v8  ;;  %v6783_v49 = vpop.eup %6782  ;;  %v11583_v29 = vrot.slane %v8125_v48, 1 }
 0x187   : > { %11582 = vst [vmem:[#allocation38_spill] sm:$0xff] %v8150_v19  ;;  %v1312_v10 = vadd.f32 %v6779_v1, %v1311_v52  ;;  %v8155_v56 = vpack.c.bf16 %v8125_v48, %v1905_v25  ;;  %v11584_v20 = vrot.slane %v8059_v39, 1  ;;  %v1324_v51 = vmul.f32 %v6783_v49, %v8098_v33  ;;  %6666 = vmatpush.bf16.msra.mxu2 %v6468_v18 }
 0x188   : > { %vm8170_vm8 = vcmp.eq.f32.partialorder %v1332_v30, 8.507059e+37  ;;  %6784 = vrcp.f32 %v8143_v31  ;;  %v11587_v25 = vunpack.c.l.b16 %v8056_v5  ;;  %v635_v24 = vpop.f32.mrf.mxu0  ;;  %v8177_v39 = vunpack.c.l.b16 %v2062_v62  ;;  %2885 = vmatpush.bf16.msrb.mxu0 %v6468_v18 }
 0x189   : > { %v2003_v3 = vsel %vm1974_vm7, %v11584_v20, %v11583_v29  ;;  %v1316_v11 = vsel %vm1315_vm5, %v6779_v1, %v1312_v10  ;;  %v1335_v20 = vor.u32 1.1754944e-38, %v1334_v0  ;;  %6786 = vpow2.f32 %v5943_v32  ;;  %v6443_v1 = vld [vmem:[%s11357_s4 + $0x38] sm:$0xff] }
 0x18a   : > { %v2488_v8 = vpack.c.b16 %v2374_v61, %v11587_v25  ;;  %11588 = vst [vmem:[#allocation39_spill] sm:$0xff] %v8177_v39  ;;  %v8179_v35 = vunpack.c.l.b16 %v2064_v42  ;;  %v1321_v30 = vsel %vm8117_vm1, %v1320_v22, %v1316_v11  ;;  %v1325_v29 = vsub.f32 1.0, %v1324_v51  ;;  %3431 = vmatpush.bf16.msrb.mxu1 %v6443_v1 }
 0x18b   : > { %v726_v60 = vmul.f32 %v7702_v37, %v635_v24  ;;  %v11403_v38 = vunpack.c.l.b16 %v8155_v56  ;;  %v1734_v5 = vmul.f32 %v1321_v30, %v7958_v63  ;;  %vm1329_vm9 = vweird.f32 %v6783_v49  ;;  %674 = vmatmul.bf16.gmra.mxu0 %v6423_v13  ;;  %v8194_v24 = vpop.f32.mrf.mxu1 }
 0x18c   : > { %11589 = vst [vmem:[#allocation40_spill] sm:$0xff] %v8179_v35  ;;  %v1347_v62 = vand.u32 2147483647, %v8143_v31  ;;  %v2378_v10 = vunpack.c.h.b16 %v8155_v56  ;;  %v1326_v42 = vmul.f32 %v6783_v49, %v1325_v29  ;;  %2802 = vmatmul.bf16.gmra.mxu1 %v2488_v8  ;;  %v1349_v0 = vand.u32 2147483648, %v8143_v31  ;;  %vm1330_vm10 = vmor %vm1328_vm3, %vm1329_vm9  ;;  %v6442_v29 = vld [vmem:[%s11357_s4 + $0x30] sm:$0xff] }
 0x18d   : > { %v8192_v11 = vadd.f32 %v7720_v16, %v726_v60  ;;  %11590 = vst [vmem:[#allocation41_spill] sm:$0xff] %v8194_v24  ;;  %v8198_v63 = vpack.c.b16 %v11403_v38, %v2374_v61  ;;  %v8204_v22 = vsel %vm1765_vm4, %v1734_v5, 0.0  ;;  %v8211_v60 = vpack.c.b16 %v7981_v12, %v7893_v55 }
 0x18e   : > { %v8207_v8 = vpack.c.b16 %v2378_v10, %v2375_v15  ;;  %v6785_v13 = vpop.eup %6784  ;;  %v1849_v61 = vrot.slane %v8204_v22, 7  ;;  %v1327_v32 = vadd.f32 %v6783_v49, %v1326_v42  ;;  %v2066_v51 = vpack.c.bf16 %v2003_v3, %v2003_v3  ;;  %3432 = vmatpush.bf16.msrb.mxu1 %v6442_v29 }
 0x18f   : > { %11592 = vst [vmem:[#allocation43_spill] sm:$0xff] %v8211_v60  ;;  %v5944_v18 = vmul.f32 -1.442695, %v8192_v11  ;;  %v6787_v25 = vpop.eup %6786  ;;  %v1339_v30 = vmul.f32 %v6785_v13, %v8143_v31  ;;  %vm1343_vm11 = vweird.f32 %v8143_v31  ;;  %vm8220_vm13 = vcmp.eq.f32.partialorder %v1347_v62, 8.507059e+37 }
 0x190   : > { %11591 = vst [vmem:[#allocation42_spill] sm:$0xff] %v8207_v8  ;;  %v8229_v3 = vpack.c.b16 %v8150_v19, %v7989_v34  ;;  %v1331_v5 = vsel %vm1330_vm10, %v6783_v49, %v1327_v32  ;;  %v8231_v1 = vadd.f32 1.0, %v6787_v25  ;;  %v637_v33 = vpop.f32.mrf.mxu0  ;;  %v11596_v42 = vrot.slane %v8125_v48, 7 }
 0x191   : > { %6788 = vpow2.f32 %v5944_v18  ;;  %v1336_v57 = vsel %vm8170_vm8, %v1335_v20, %v1331_v5  ;;  %v1340_v38 = vsub.f32 1.0, %v1339_v30  ;;  %v727_v60 = vmul.f32 %v7702_v37, %v637_v33  ;;  %v6441_v20 = vld [vmem:[%s11357_s4 + $0x28] sm:$0xff] }
 0x192   : > { %11595 = vst [vmem:[#allocation44_spill] sm:$0xff] %v8229_v3  ;;  %v1904_v62 = vsel %vm1876_vm6, %v11596_v42, %v1849_v61  ;;  %v8244_v49 = vmul.f32 %v1336_v57, %v8013_v54  ;;  %v1350_v32 = vor.u32 1.1754944e-38, %v1349_v0  ;;  %6790 = vrcp.f32 %v8231_v1  ;;  %3433 = vmatpush.bf16.msrb.mxu1 %v6441_v20  ;;  %v6424_v20 = vld [vmem:[%s7172_s22 + $0xb8] sm:$0xff] }
 0x193   : > { %v8241_v8 = vpack.c.bf16 %v8204_v22, %v1904_v62  ;;  %v8247_v18 = vunpack.c.l.b16 %v2066_v51  ;;  %v1947_v25 = vrot.slane %v8204_v22, 1  ;;  %v1341_v42 = vmul.f32 %v6785_v13, %v1340_v38 }
 0x194   : > { %vm1344_vm14 = vweird.f32 %v6785_v13  ;;  %v8251_v52 = vadd.f32 %v7720_v16, %v727_v60  ;;  %v1850_v30 = vrot.slane %v8244_v49, 7  ;;  %v1948_v54 = vrot.slane %v8244_v49, 1  ;;  %v8258_v57 = vpop.f32.mrf.mxu1 }
 0x195   : > { %11597 = vst [vmem:[#allocation45_spill] sm:$0xff] %v8247_v18  ;;  %v2380_v0 = vunpack.c.l.b16 %v8241_v8  ;;  %v11407_v22 = vunpack.c.h.b16 %v8241_v8  ;;  %v1342_v38 = vadd.f32 %v6785_v13, %v1341_v42  ;;  %v1362_v51 = vand.u32 2147483647, %v8231_v1  ;;  %vm1345_vm15 = vmor %vm1343_vm11, %vm1344_vm14 }
 0x196   : > { %11598 = vst [vmem:[#allocation46_spill] sm:$0xff] %v8258_v57  ;;  %v1364_v60 = vand.u32 2147483648, %v8231_v1  ;;  %v5945_v29 = vmul.f32 -1.442695, %v8251_v52  ;;  %v1903_v33 = vsel %vm1876_vm6, %v1849_v61, %v1850_v30  ;;  %v2001_v3 = vsel %vm1974_vm7, %v1947_v25, %v1948_v54  ;;  %v6440_v61 = vld [vmem:[%s11357_s4 + $0x20] sm:$0xff] }
 0x197   : > { %v6789_v5 = vpop.eup %6788  ;;  %v8271_v62 = vpack.c.b16 %v11407_v22, %v2378_v10  ;;  %v1346_v57 = vsel %vm1345_vm15, %v6785_v13, %v1342_v38  ;;  %v8281_v31 = vpack.c.bf16 %v8244_v49, %v1903_v33  ;;  %v11599_v42 = vunpack.c.l.b16 %v8155_v56  ;;  %3434 = vmatpush.bf16.msrb.mxu1 %v6440_v61  ;;  %v6439_v33 = vld [vmem:[%s11357_s4 + $0x18] sm:$0xff] }
 0x198   : > { %v8277_v24 = vadd.f32 1.0, %v6789_v5  ;;  %6792 = vpow2.f32 %v5945_v29  ;;  %v6791_v10 = vpop.eup %6790  ;;  %v1351_v22 = vsel %vm8220_vm13, %v1350_v32, %v1346_v57  ;;  %v640_v12 = vpop.f32.mrf.mxu0  ;;  %v11600_v13 = vrot.slane %v8125_v48, 1 }
 0x199   : > { %v2491_v19 = vpack.c.b16 %v2380_v0, %v11599_v42  ;;  %v8296_v49 = vpack.c.b16 %v8179_v35, %v8177_v39  ;;  %v1736_v29 = vmul.f32 %v1351_v22, %v8067_v47  ;;  %v1354_v5 = vmul.f32 %v6791_v10, %v8231_v1 }
 0x19a   : > { %v2002_v38 = vsel %vm1974_vm7, %v11600_v13, %v1947_v25  ;;  %6794 = vrcp.f32 %v8277_v24  ;;  %v11602_v15 = vmov 0.0|0.0   ;;  %vm1358_vm0 = vweird.f32 %v8231_v1 }
 0x19b   : > { %11601 = vst [vmem:[#allocation47_spill] sm:$0xff] %v8296_v49  ;;  %v8302_v56 = vunpack.c.l.b16 %v11602_v15  ;;  %vm8305_vm1 = vcmp.eq.f32.partialorder %v1362_v51, 8.507059e+37  ;;  %v1365_v32 = vor.u32 1.1754944e-38, %v1364_v60  ;;  %v728_v25 = vmul.f32 %v7702_v37, %v640_v12  ;;  %679 = vmatmul.bf16.gmra.mxu0 %v6424_v20  ;;  %3435 = vmatpush.bf16.msrb.mxu1 %v6439_v33 }
 0x19c   : > { %v8312_v47 = vsel %vm1770_vm12, %v1736_v29, 0.0  ;;  %v1355_v57 = vsub.f32 1.0, %v1354_v5  ;;  %v11412_v22 = vunpack.c.l.b16 %v8281_v31  ;;  %v2070_v42 = vpack.c.bf16 %v2001_v3, %v2001_v3  ;;  %2807 = vmatmul.bf16.gmra.mxu1 %v2491_v19  ;;  %v8321_v60 = vpop.f32.mrf.mxu1 }
 0x19d   : > { %11603 = vst [vmem:[#allocation48_spill] sm:$0xff] %v8302_v56  ;;  %v11411_v51 = vrot.slane %v8312_v47, 7  ;;  %vm1359_vm2 = vweird.f32 %v6791_v10  ;;  %v1377_v12 = vand.u32 2147483647, %v8277_v24  ;;  %v1379_v20 = vand.u32 2147483648, %v8277_v24 }
 0x19e   : > { %11606 = vst [vmem:[#allocation49_spill] sm:$0xff] %v8321_v60  ;;  %v6793_v13 = vpop.eup %6792  ;;  %v1356_v29 = vmul.f32 %v6791_v10, %v1355_v57  ;;  %v8325_v5 = vadd.f32 %v7720_v16, %v728_v25  ;;  %v8329_v3 = vpack.c.b16 %v11412_v22, %v2380_v0  ;;  %v2068_v61 = vpack.c.bf16 %v2002_v38, %v2002_v38  ;;  %vm1360_vm5 = vmor %vm1358_vm0, %vm1359_vm2 }
 0x19f   : > { %v8331_v15 = vadd.f32 1.0, %v6793_v13  ;;  %v1902_v19 = vsel %vm1876_vm6, %v1850_v30, %v11411_v51  ;;  %v11608_v57 = vrot.slane %v8312_v47, 1  ;;  %vm1373_vm3 = vweird.f32 %v8277_v24  ;;  %v6438_v30 = vld [vmem:[%s11357_s4 + $0x10] sm:$0xff] }
 0x1a0   : > { %11607 = vst [vmem:[#allocation50_spill] sm:$0xff] %v8329_v3  ;;  %v6795_v25 = vpop.eup %6794  ;;  %v1357_v33 = vadd.f32 %v6791_v10, %v1356_v29  ;;  %v5946_v0 = vmul.f32 -1.442695, %v8325_v5  ;;  %v8346_v13 = vpack.c.bf16 %v8312_v47, %v1902_v19  ;;  %v642_v38 = vpop.f32.mrf.mxu0  ;;  %v2384_v29 = vunpack.c.h.b16 %v8281_v31  ;;  %3436 = vmatpush.bf16.msrb.mxu1 %v6438_v30 }
 0x1a1   : > { %v8341_v49 = vsel %vm1974_vm7, %v1948_v54, %v11608_v57  ;;  %v1369_v54 = vmul.f32 %v6795_v25, %v8277_v24  ;;  %6796 = vrcp.f32 %v8331_v15  ;;  %v8357_v57 = vunpack.c.l.b16 %v2070_v42 }
 0x1a2   : > { %v1361_v51 = vsel %vm1360_vm5, %v6791_v10, %v1357_v33  ;;  %vm8359_vm8 = vcmp.eq.f32.partialorder %v1377_v12, 8.507059e+37  ;;  %v1380_v22 = vor.u32 1.1754944e-38, %v1379_v20  ;;  %6798 = vpow2.f32 %v5946_v0  ;;  %v6437_v20 = vld [vmem:[%s11357_s4 + $0x8] sm:$0xff] }
 0x1a3   : > { %v1366_v1 = vsel %vm8305_vm1, %v1365_v32, %v1361_v51  ;;  %v1370_v60 = vsub.f32 1.0, %v1369_v54  ;;  %v729_v35 = vmul.f32 %v7702_v37, %v642_v38  ;;  %v8366_v39 = vunpack.c.l.b16 %v2068_v61 }
 0x1a4   : > { %v1737_v34 = vmul.f32 %v1366_v1, %v8133_v40  ;;  %v1392_v42 = vand.u32 2147483647, %v8331_v15  ;;  %v2386_v10 = vunpack.c.l.b16 %v8346_v13  ;;  %v11416_v12 = vunpack.c.h.b16 %v8346_v13  ;;  %v8378_v37 = vpop.f32.mrf.mxu1  ;;  %3437 = vmatpush.bf16.msrb.mxu1 %v6437_v20  ;;  %v6425_v20 = vld [vmem:[%s7172_s22 + $0xc0] sm:$0xff] }
 0x1a5   : > { %11611 = vst [vmem:[#allocation51_spill] sm:$0xff] %v8366_v39  ;;  %v1371_v33 = vmul.f32 %v6795_v25, %v1370_v60  ;;  %vm1374_vm9 = vweird.f32 %v6795_v25  ;;  %v8376_v48 = vadd.f32 %v7720_v16, %v729_v35  ;;  %vm1388_vm10 = vweird.f32 %v8331_v15 }
 0x1a6   : > { %11612 = vst [vmem:[#allocation52_spill] sm:$0xff] %v8378_v37  ;;  %v1804_v32 = vsel %vm1765_vm4, %v1737_v34, 0.0  ;;  %v2495_v51 = vpack.c.b16 %v11416_v12, %v2384_v29  ;;  %v11613_v61 = vunpack.c.h.b16 %v8241_v8  ;;  %v1394_v30 = vand.u32 2147483648, %v8331_v15  ;;  %vm1375_vm11 = vmor %vm1373_vm3, %vm1374_vm9 }
 0x1a7   : > { %v6797_v16 = vpop.eup %6796  ;;  %v1852_v35 = vrot.slane %v1804_v32, 7  ;;  %v1372_v0 = vadd.f32 %v6795_v25, %v1371_v33  ;;  %v5947_v54 = vmul.f32 -1.442695, %v8376_v48  ;;  %vm8397_vm13 = vcmp.eq.f32.partialorder %v1392_v42, 8.507059e+37  ;;  %v6436_v33 = vld [vmem:[%s11357_s4] sm:$0xff] }
 0x1a8   : > { %v8389_v60 = vpack.c.b16 %v2384_v29, %v11613_v61  ;;  %v6799_v38 = vpop.eup %6798  ;;  %v1384_v34 = vmul.f32 %v6797_v16, %v8331_v15  ;;  %v11617_v8 = vunpack.c.l.b16 %v8281_v31  ;;  %2941 = vmatmul.bf16.vlgmr.msra.gmra.mxu2 %v2495_v51  ;;  %v8409_v61 = vpack.c.b16 %v8366_v39, %v8247_v18  ;;  %v645_v42 = vpop.f32.mrf.mxu0  ;;  %3438 = vmatpush.bf16.msrb.mxu1 %v6436_v33 }
 0x1a9   : > { %v1376_v24 = vsel %vm1375_vm11, %v6795_v25, %v1372_v0  ;;  %v8411_v40 = vadd.f32 1.0, %v6799_v38  ;;  %6800 = vpow2.f32 %v5947_v54  ;;  %v11619_v12 = vrot.slane %v8312_v47, 7 }
 0x1aa   : > { %11614 = vst [vmem:[#allocation53_spill] sm:$0xff] %v8389_v60  ;;  %v2494_v29 = vpack.c.b16 %v2386_v10, %v11617_v8  ;;  %v1381_v51 = vsel %vm8359_vm8, %v1380_v22, %v1376_v24  ;;  %v1385_v8 = vsub.f32 1.0, %v1384_v34  ;;  %v8422_v60 = vld [vmem:[%s11355_s2] ss:$0 sm:$0xff]  ;;  %v1950_v54 = vrot.slane %v1804_v32, 1 }
 0x1ab   : > { %11618 = vst [vmem:[#allocation54_spill] sm:$0xff] %v8409_v61  ;;  %v1901_v31 = vsel %vm1876_vm6, %v11619_v12, %v1852_v35  ;;  %v730_v25 = vmul.f32 %v8422_v60, %v645_v42  ;;  %v8428_v38 = vmul.f32 %v1381_v51, %v8192_v11  ;;  %v1395_v61 = vor.u32 1.1754944e-38, %v1394_v30  ;;  %v8434_v22 = vld [vmem:[%s11356_s3] ss:$0 sm:$0xff]  ;;  %684 = vmatmul.bf16.gmra.mxu0 %v6425_v20 }
 0x1ac   : > { %v8425_v0 = vpack.c.bf16 %v1804_v32, %v1901_v31  ;;  %6802 = vrcp.f32 %v8411_v40  ;;  %v1386_v19 = vmul.f32 %v6797_v16, %v1385_v8  ;;  %vm1389_vm14 = vweird.f32 %v6797_v16  ;;  %2812 = vmatmul.bf16.gmra.mxu1 %v2494_v29  ;;  %v8442_v30 = vpop.f32.mrf.mxu1 }
 0x1ad   : > { %v8437_v12 = vadd.f32 %v8434_v22, %v730_v25  ;;  %v1853_v32 = vrot.slane %v8428_v38, 7  ;;  %v1951_v11 = vrot.slane %v8428_v38, 1  ;;  %11620 = vst [vmem:[#allocation55_spill] sm:$0xff] %v8442_v30  ;;  %v2072_v24 = vpack.c.bf16 %v8341_v49, %v8341_v49  ;;  %vm1390_vm15 = vmor %vm1388_vm10, %vm1389_vm14 }
 0x1ae   : > { %v11420_v34 = vunpack.c.l.b16 %v8425_v0  ;;  %v2390_v33 = vunpack.c.h.b16 %v8425_v0  ;;  %v1387_v42 = vadd.f32 %v6797_v16, %v1386_v19  ;;  %v1407_v31 = vand.u32 2147483647, %v8411_v40 }
 0x1af   : > { %v1409_v51 = vand.u32 2147483648, %v8411_v40  ;;  %v5948_v20 = vmul.f32 -1.442695, %v8437_v12  ;;  %v6801_v8 = vpop.eup %6800  ;;  %v1900_v29 = vsel %vm1876_vm6, %v1852_v35, %v1853_v32  ;;  %v11622_v49 = vrot.slane %v8312_v47, 1 }
 0x1b0   : > { %v8457_v25 = vpack.c.b16 %v11420_v34, %v2386_v10  ;;  %v1998_v30 = vsel %vm1974_vm7, %v1950_v54, %v1951_v11  ;;  %v1391_v37 = vsel %vm1390_vm15, %v6797_v16, %v1387_v42  ;;  %v8465_v39 = vadd.f32 1.0, %v6801_v8  ;;  %v647_v47 = vpop.f32.mrf.mxu0 }
 0x1b1   : > { %v1999_v19 = vsel %vm1974_vm7, %v11622_v49, %v1950_v54  ;;  %6804 = vpow2.f32 %v5948_v20  ;;  %v8468_v15 = vpack.c.bf16 %v8428_v38, %v1900_v29  ;;  %v1396_v10 = vsel %vm8397_vm13, %v1395_v61, %v1391_v37 }
 0x1b2   : > { %11621 = vst [vmem:[#allocation56_spill] sm:$0xff] %v8457_v25  ;;  %v6803_v35 = vpop.eup %6802  ;;  %vm1403_vm0 = vweird.f32 %v8411_v40  ;;  %v8473_v34 = vunpack.c.l.b16 %v2072_v24  ;;  %v11624_v49 = vunpack.c.h.b16 %v8346_v13  ;;  %v1739_v16 = vmul.f32 %v1396_v10, %v8251_v52  ;;  %v6451_v52 = vld [vmem:[%s11357_s4 + $0x78] sm:$0xff] }
 0x1b3   : > { %v1399_v54 = vmul.f32 %v6803_v35, %v8411_v40  ;;  %vm8481_vm1 = vcmp.eq.f32.partialorder %v1407_v31, 8.507059e+37  ;;  %6806 = vrcp.f32 %v8465_v39  ;;  %v1410_v37 = vor.u32 1.1754944e-38, %v1409_v51  ;;  %3560 = vmatpush.bf16.msrb.mxu2 %v6451_v52 }
 0x1b4   : > { %11623 = vst [vmem:[#allocation57_spill] sm:$0xff] %v8473_v34  ;;  %v8477_v18 = vpack.c.b16 %v2390_v33, %v11624_v49  ;;  %v731_v1 = vmul.f32 %v8422_v60, %v647_v47  ;;  %v2074_v61 = vpack.c.bf16 %v1999_v19, %v1999_v19  ;;  %v2076_v24 = vpack.c.bf16 %v1998_v30, %v1998_v30  ;;  %v8502_v47 = vpop.f32.mrf.mxu1 }
 0x1b5   : > { %v1400_v42 = vsub.f32 1.0, %v1399_v54  ;;  %v1424_v13 = vand.u32 2147483648, %v8465_v39  ;;  %v2393_v20 = vunpack.c.h.b16 %v8468_v15  ;;  %v8494_v31 = vsel %vm1770_vm12, %v1739_v16, 0.0  ;;  %11628 = vst [vmem:[#allocation59_spill] sm:$0xff] %v8502_v47  ;;  %v6426_v47 = vld [vmem:[%s7172_s22 + $0xc8] sm:$0xff] }
 0x1b6   : > { %11625 = vst [vmem:[#allocation58_spill] sm:$0xff] %v8477_v18  ;;  %v1422_v8 = vand.u32 2147483647, %v8465_v39  ;;  %v8498_v51 = vadd.f32 %v8434_v22, %v731_v1  ;;  %v2392_v30 = vunpack.c.l.b16 %v8468_v15  ;;  %v11424_v29 = vrot.slane %v8494_v31, 7 }
 0x1b7   : > { %v6805_v19 = vpop.eup %6804  ;;  %v1401_v10 = vmul.f32 %v6803_v35, %v1400_v42  ;;  %vm1404_vm2 = vweird.f32 %v6803_v35  ;;  %v2498_v49 = vpack.c.b16 %v2393_v20, %v2390_v33  ;;  %v11425_v16 = vrot.slane %v8494_v31, 1 }
 0x1b8   : > { %vm1418_vm3 = vweird.f32 %v8465_v39  ;;  %v8506_v54 = vadd.f32 1.0, %v6805_v19  ;;  %v5949_v1 = vmul.f32 -1.442695, %v8498_v51  ;;  %v1899_v15 = vsel %vm1876_vm6, %v1853_v32, %v11424_v29  ;;  %vm1405_vm5 = vmor %vm1403_vm0, %vm1404_vm2 }
 0x1b9   : > { %v6807_v18 = vpop.eup %6806  ;;  %v1402_v42 = vadd.f32 %v6803_v35, %v1401_v10  ;;  %v1425_v55 = vor.u32 1.1754944e-38, %v1424_v13  ;;  %2946 = vmatmul.bf16.gmra.mxu2 %v2498_v49  ;;  %v8515_v33 = vpack.c.bf16 %v8494_v31, %v1899_v15  ;;  %v1997_v52 = vsel %vm1974_vm7, %v1951_v11, %v11425_v16  ;;  %v650_v49 = vpop.f32.mrf.mxu0 }
 0x1ba   : > { %v1414_v19 = vmul.f32 %v6807_v18, %v8465_v39  ;;  %vm8525_vm8 = vcmp.eq.f32.partialorder %v1422_v8, 8.507059e+37  ;;  %6808 = vrcp.f32 %v8506_v54  ;;  %v11631_v13 = vunpack.c.l.b16 %v8425_v0 }
 0x1bb   : > { %v8532_v15 = vunpack.c.l.b16 %v2074_v61  ;;  %v1406_v29 = vsel %vm1405_vm5, %v6803_v35, %v1402_v42  ;;  %vm1419_vm9 = vweird.f32 %v6807_v18  ;;  %6810 = vpow2.f32 %v5949_v1  ;;  %689 = vmatmul.bf16.gmra.mxu0 %v6426_v47 }
 0x1bc   : > { %v2497_v10 = vpack.c.b16 %v2392_v30, %v11631_v13  ;;  %v8534_v11 = vunpack.c.l.b16 %v2076_v24  ;;  %v1411_v40 = vsel %vm8481_vm1, %v1410_v37, %v1406_v29  ;;  %v1415_v8 = vsub.f32 1.0, %v1414_v19  ;;  %vm1420_vm11 = vmor %vm1418_vm3, %vm1419_vm9 }
 0x1bd   : > { %11632 = vst [vmem:[#allocation60_spill] sm:$0xff] %v8532_v15  ;;  %v732_v16 = vmul.f32 %v8422_v60, %v650_v49  ;;  %v2395_v25 = vunpack.c.l.b16 %v8515_v33  ;;  %v1740_v3 = vmul.f32 %v1411_v40, %v8325_v5  ;;  %v1437_v0 = vand.u32 2147483647, %v8506_v54  ;;  %v8569_v49 = vpop.f32.mrf.mxu1 }
 0x1be   : > { %11633 = vst [vmem:[#allocation61_spill] sm:$0xff] %v8534_v11  ;;  %v1439_v61 = vand.u32 2147483648, %v8506_v54  ;;  %v2396_v35 = vunpack.c.h.b16 %v8515_v33  ;;  %v1416_v1 = vmul.f32 %v6807_v18, %v1415_v8  ;;  %2817 = vmatmul.bf16.gmra.mxu1 %v2497_v10  ;;  %vm1433_vm10 = vweird.f32 %v8506_v54 }
 0x1bf   : > { %v8545_v24 = vadd.f32 %v8434_v22, %v732_v16  ;;  %v8547_v38 = vpack.c.b16 %v2395_v25, %v2392_v30  ;;  %v1807_v5 = vsel %vm1765_vm4, %v1740_v3, 0.0  ;;  %v8558_v47 = vpack.c.b16 %v8473_v34, %v8357_v57  ;;  %11638 = vst [vmem:[#allocation64_spill] sm:$0xff] %v8569_v49 }
 0x1c0   : > { %v8554_v29 = vpack.c.b16 %v2396_v35, %v2393_v20  ;;  %v6809_v42 = vpop.eup %6808  ;;  %v1855_v33 = vrot.slane %v1807_v5, 7  ;;  %v1417_v16 = vadd.f32 %v6807_v18, %v1416_v1  ;;  %v2078_v19 = vpack.c.bf16 %v1997_v52, %v1997_v52 }
 0x1c1   : > { %11635 = vst [vmem:[#allocation63_spill] sm:$0xff] %v8558_v47  ;;  %v5950_v30 = vmul.f32 -1.442695, %v8545_v24  ;;  %v6811_v13 = vpop.eup %6810  ;;  %v1429_v3 = vmul.f32 %v6809_v42, %v8506_v54  ;;  %vm8565_vm13 = vcmp.eq.f32.partialorder %v1437_v0, 8.507059e+37  ;;  %v1440_v10 = vor.u32 1.1754944e-38, %v1439_v61  ;;  %v652_v1 = vpop.f32.mrf.mxu0 }
 0x1c2   : > { %11634 = vst [vmem:[#allocation62_spill] sm:$0xff] %v8554_v29  ;;  %v8573_v40 = vpack.c.b16 %v8534_v11, %v8532_v15  ;;  %v1421_v8 = vsel %vm1420_vm11, %v6807_v18, %v1417_v16  ;;  %v8575_v52 = vadd.f32 1.0, %v6811_v13  ;;  %v11640_v39 = vrot.slane %v8494_v31, 7  ;;  %v6483_v18 = vld [vmem:[%s11357_s4 + $0x178] sm:$0xff] }
 0x1c3   : > { %6812 = vpow2.f32 %v5950_v30  ;;  %v1426_v37 = vsel %vm8525_vm8, %v1425_v55, %v1421_v8  ;;  %v1430_v61 = vsub.f32 1.0, %v1429_v3  ;;  %v733_v47 = vmul.f32 %v8422_v60, %v652_v1  ;;  %3007 = vmatpush.bf16.msrb.mxu3 %v6483_v18 }
 0x1c4   : > { %11639 = vst [vmem:[#allocation65_spill] sm:$0xff] %v8573_v40  ;;  %v1898_v0 = vsel %vm1876_vm6, %v11640_v39, %v1855_v33  ;;  %v1953_v16 = vrot.slane %v1807_v5, 1  ;;  %v8590_v30 = vmul.f32 %v1426_v37, %v8376_v48  ;;  %6814 = vrcp.f32 %v8575_v52 }
 0x1c5   : > { %v8584_v29 = vpack.c.bf16 %v1807_v5, %v1898_v0  ;;  %v8593_v13 = vunpack.c.l.b16 %v2078_v19  ;;  %v1431_v39 = vmul.f32 %v6809_v42, %v1430_v61  ;;  %vm1434_vm14 = vweird.f32 %v6809_v42 }
 0x1c6   : > { %v8596_v55 = vadd.f32 %v8434_v22, %v733_v47  ;;  %v1856_v3 = vrot.slane %v8590_v30, 7  ;;  %v1954_v8 = vrot.slane %v8590_v30, 1  ;;  %v1452_v5 = vand.u32 2147483647, %v8575_v52  ;;  %vm1435_vm15 = vmor %vm1433_vm10, %vm1434_vm14 }
 0x1c7   : > { %v2398_v32 = vunpack.c.l.b16 %v8584_v29  ;;  %v11433_v48 = vunpack.c.h.b16 %v8584_v29  ;;  %v1432_v37 = vadd.f32 %v6809_v42, %v1431_v39  ;;  %v1454_v19 = vand.u32 2147483648, %v8575_v52 }
 0x1c8   : > { %v5951_v1 = vmul.f32 -1.442695, %v8596_v55  ;;  %v1897_v18 = vsel %vm1876_vm6, %v1855_v33, %v1856_v3  ;;  %v1995_v39 = vsel %vm1974_vm7, %v1953_v16, %v1954_v8  ;;  %v8625_v33 = vpack.c.b16 %v8302_v56, %v8302_v56 }
 0x1c9   : > { %v2500_v0 = vpack.c.b16 %v2398_v32, %v2395_v25  ;;  %v6813_v47 = vpop.eup %6812  ;;  %v2501_v61 = vpack.c.b16 %v11433_v48, %v2396_v35  ;;  %v1436_v49 = vsel %vm1435_vm15, %v6809_v42, %v1432_v37  ;;  %v6427_v25 = vld [vmem:[%s7172_s22 + $0xd0] sm:$0xff]  ;;  %v8619_v54 = vpack.c.bf16 %v8590_v30, %v1897_v18  ;;  %v655_v40 = vpop.f32.mrf.mxu0 }
 0x1ca   : > { %v8615_v34 = vadd.f32 1.0, %v6813_v47  ;;  %6816 = vpow2.f32 %v5951_v1  ;;  %v6815_v15 = vpop.eup %6814  ;;  %v1441_v35 = vsel %vm8565_vm13, %v1440_v10, %v1436_v49  ;;  %11641 = vst [vmem:[#allocation66_spill] sm:$0xff] %v8625_v33  ;;  %v11642_v42 = vrot.slane %v8494_v31, 1  ;;  %v6450_v31 = vld [vmem:[%s11357_s4 + $0x70] sm:$0xff] }
 0x1cb   : > { %2822 = vmatmul.bf16.vlgmr.msra.gmra.mxu3 %v2500_v0  ;;  %2951 = vmatmul.bf16.gmra.mxu2 %v2501_v61  ;;  %v1742_v1 = vmul.f32 %v1441_v35, %v8437_v12  ;;  %v1444_v30 = vmul.f32 %v6815_v15, %v8575_v52  ;;  %v8634_v0 = vpop.f32.mrf.mxu1  ;;  %v11644_v20 = vunpack.c.l.b16 %v7288_v46  ;;  %vm1448_vm0 = vweird.f32 %v8575_v52 }
 0x1cc   : > { %v1996_v37 = vsel %vm1974_vm7, %v11642_v42, %v1953_v16  ;;  %6818 = vrcp.f32 %v8615_v34  ;;  %11643 = vst [vmem:[#allocation67_spill] sm:$0xff] %v8634_v0  ;;  %vm8642_vm1 = vcmp.eq.f32.partialorder %v1452_v5, 8.507059e+37  ;;  %v1455_v49 = vor.u32 1.1754944e-38, %v1454_v19  ;;  %693 = vmatmul.bf16.gmra.mxu0 %v6427_v25  ;;  %3561 = vmatpush.bf16.msrb.mxu2 %v6450_v31 }
 0x1cd   : > { %v8639_v10 = vpack.c.b16 %v11644_v20, %v8302_v56  ;;  %v734_v12 = vmul.f32 %v8422_v60, %v655_v40  ;;  %v8649_v16 = vsel %vm1770_vm12, %v1742_v1, 0.0  ;;  %v1445_v47 = vsub.f32 1.0, %v1444_v30 }
 0x1ce   : > { %v2401_v61 = vunpack.c.l.b16 %v8619_v54  ;;  %v2082_v46 = vpack.c.bf16 %v1995_v39, %v1995_v39  ;;  %v11434_v18 = vrot.slane %v8649_v16, 7  ;;  %v11435_v35 = vrot.slane %v8649_v16, 1  ;;  %3439 = vmatmul.bf16.vlgmr.msrb.gmra.mxu1 %v8625_v33 }
 0x1cf   : > { %vm1449_vm2 = vweird.f32 %v6815_v15  ;;  %v1467_v5 = vand.u32 2147483647, %v8615_v34  ;;  %v1446_v40 = vmul.f32 %v6815_v15, %v1445_v47  ;;  %v8657_v42 = vadd.f32 %v8434_v22, %v734_v12 }
 0x1d0   : > { %v6817_v19 = vpop.eup %6816  ;;  %v8659_v1 = vpack.c.b16 %v2401_v61, %v2398_v32  ;;  %v2080_v25 = vpack.c.bf16 %v1996_v37, %v1996_v37  ;;  %vm1463_vm3 = vweird.f32 %v8615_v34  ;;  %v1469_v39 = vand.u32 2147483648, %v8615_v34  ;;  %vm1450_vm5 = vmor %vm1448_vm0, %vm1449_vm2 }
 0x1d1   : > { %v8663_v30 = vadd.f32 1.0, %v6817_v19  ;;  %v1896_v20 = vsel %vm1876_vm6, %v1856_v3, %v11434_v18  ;;  %v8673_v12 = vsel %vm1974_vm7, %v1954_v8, %v11435_v35  ;;  %v1447_v47 = vadd.f32 %v6815_v15, %v1446_v40  ;;  %v657_v8 = vpop.f32.mrf.mxu0 }
 0x1d2   : > { %v6819_v32 = vpop.eup %6818  ;;  %v5952_v37 = vmul.f32 -1.442695, %v8657_v42  ;;  %v8677_v48 = vpack.c.bf16 %v8649_v16, %v1896_v20  ;;  %v2402_v19 = vunpack.c.h.b16 %v8619_v54  ;;  %vm8684_vm8 = vcmp.eq.f32.partialorder %v1467_v5, 8.507059e+37 }
 0x1d3   : > { %v1459_v3 = vmul.f32 %v6819_v32, %v8615_v34  ;;  %6820 = vrcp.f32 %v8663_v30  ;;  %v8689_v40 = vunpack.c.l.b16 %v2082_v46  ;;  %v1451_v35 = vsel %vm1450_vm5, %v6815_v15, %v1447_v47  ;;  %v8691_v20 = vpop.f32.mrf.mxu1 }
 0x1d4   : > { %vm1464_vm9 = vweird.f32 %v6819_v32  ;;  %6822 = vpow2.f32 %v5952_v37  ;;  %11650 = vst [vmem:[#allocation69_spill] sm:$0xff] %v8691_v20  ;;  %v8693_v54 = vunpack.c.l.b16 %v2080_v25  ;;  %v1456_v52 = vsel %vm8642_vm1, %v1455_v49, %v1451_v35 }
 0x1d5   : > { %11649 = vst [vmem:[#allocation68_spill] sm:$0xff] %v8689_v40  ;;  %v1460_v56 = vsub.f32 1.0, %v1459_v3  ;;  %v735_v5 = vmul.f32 %v8422_v60, %v657_v8  ;;  %v2404_v33 = vunpack.c.l.b16 %v8677_v48  ;;  %v1743_v0 = vmul.f32 %v1456_v52, %v8498_v51  ;;  %vm1465_vm11 = vmor %vm1463_vm3, %vm1464_vm9 }
 0x1d6   : > { %11651 = vst [vmem:[#allocation70_spill] sm:$0xff] %v8693_v54  ;;  %v1482_v46 = vand.u32 2147483647, %v8663_v30  ;;  %v1484_v15 = vand.u32 2147483648, %v8663_v30  ;;  %v2405_v47 = vunpack.c.h.b16 %v8677_v48  ;;  %v1470_v3 = vor.u32 1.1754944e-38, %v1469_v39 }
 0x1d7   : > { %v1461_v37 = vmul.f32 %v6819_v32, %v1460_v56  ;;  %v8704_v25 = vadd.f32 %v8434_v22, %v735_v5  ;;  %v2503_v49 = vpack.c.b16 %v2404_v33, %v2401_v61  ;;  %v1810_v8 = vsel %vm1765_vm4, %v1743_v0, 0.0 }
 0x1d8   : > { %v2504_v51 = vpack.c.b16 %v2405_v47, %v2402_v19  ;;  %v11652_v52 = vunpack.c.h.b16 %v8584_v29  ;;  %vm1478_vm10 = vweird.f32 %v8663_v30  ;;  %v1858_v61 = vrot.slane %v1810_v8, 7 }
 0x1d9   : > { %v6821_v56 = vpop.eup %6820  ;;  %v1462_v5 = vadd.f32 %v6819_v32, %v1461_v37  ;;  %v5953_v20 = vmul.f32 -1.442695, %v8704_v25  ;;  %vm8723_vm13 = vcmp.eq.f32.partialorder %v1482_v46, 8.507059e+37  ;;  %v1485_v29 = vor.u32 1.1754944e-38, %v1484_v15  ;;  %v660_v34 = vpop.f32.mrf.mxu0 }
 0x1da   : > { %v8715_v48 = vpack.c.b16 %v2402_v19, %v11652_v52  ;;  %v6823_v11 = vpop.eup %6822  ;;  %v1474_v39 = vmul.f32 %v6821_v56, %v8663_v30  ;;  %v2084_v19 = vpack.c.bf16 %v8673_v12, %v8673_v12  ;;  %v8731_v37 = vpack.c.b16 %v8693_v54, %v8593_v13 }
 0x1db   : > { %2827 = vmatmul.bf16.gmra.mxu3 %v2503_v49  ;;  %v1466_v31 = vsel %vm1465_vm11, %v6819_v32, %v1462_v5  ;;  %v8733_v52 = vadd.f32 1.0, %v6823_v11  ;;  %6824 = vpow2.f32 %v5953_v20  ;;  %2956 = vmatmul.bf16.gmra.mxu2 %v2504_v51  ;;  %v11657_v46 = vrot.slane %v8649_v16, 7  ;;  %v8741_v12 = vpop.f32.mrf.mxu1 }
 0x1dc   : > { %11653 = vst [vmem:[#allocation71_spill] sm:$0xff] %v8715_v48  ;;  %v1471_v15 = vsel %vm8684_vm8, %v1470_v3, %v1466_v31  ;;  %v1475_v49 = vsub.f32 1.0, %v1474_v39  ;;  %v736_v48 = vmul.f32 %v8422_v60, %v660_v34  ;;  %vm1479_vm14 = vweird.f32 %v6821_v56  ;;  %2886 = vmatmul.bf16.vlgmr.msrb.gmra.mxu0 %v7328_v17 }
 0x1dd   : > { %11656 = vst [vmem:[#allocation72_spill] sm:$0xff] %v8731_v37  ;;  %v1895_v35 = vsel %vm1876_vm6, %v11657_v46, %v1858_v61  ;;  %v8745_v11 = vmul.f32 %v1471_v15, %v8545_v24  ;;  %6826 = vrcp.f32 %v8733_v52  ;;  %v1956_v32 = vrot.slane %v1810_v8, 1  ;;  %vm1480_vm15 = vmor %vm1478_vm10, %vm1479_vm14 }
 0x1de   : > { %11658 = vst [vmem:[#allocation73_spill] sm:$0xff] %v8741_v12  ;;  %v2087_v37 = vpack.c.bf16 %v1810_v8, %v1895_v35  ;;  %v1476_v20 = vmul.f32 %v6821_v56, %v1475_v49  ;;  %v8749_v51 = vadd.f32 %v8434_v22, %v736_v48  ;;  %v8752_v3 = vunpack.c.l.b16 %v2084_v19  ;;  %3444 = vmatmul.bf16.gmra.mxu1 %v8639_v10  ;;  %v6482_v8 = vld [vmem:[%s11357_s4 + $0x170] sm:$0xff] }
 0x1df   : > { %v1859_v5 = vrot.slane %v8745_v11, 7  ;;  %v1957_v35 = vrot.slane %v8745_v11, 1  ;;  %v1497_v24 = vand.u32 2147483647, %v8733_v52  ;;  %v1499_v31 = vand.u32 2147483648, %v8733_v52  ;;  %3008 = vmatpush.bf16.msrb.mxu3 %v6482_v8 }
 0x1e0   : > { %v2407_v18 = vunpack.c.l.b16 %v2087_v37  ;;  %11659 = vst [vmem:[#allocation74_spill] sm:$0xff] %v8752_v3  ;;  %v2408_v39 = vunpack.c.h.b16 %v2087_v37  ;;  %v1477_v48 = vadd.f32 %v6821_v56, %v1476_v20  ;;  %v5954_v17 = vmul.f32 -1.442695, %v8749_v51 }
 0x1e1   : > { %v6825_v34 = vpop.eup %6824  ;;  %v1894_v10 = vsel %vm1876_vm6, %v1858_v61, %v1859_v5  ;;  %v11660_v46 = vrot.slane %v8649_v16, 1  ;;  %v1992_v15 = vsel %vm1974_vm7, %v1956_v32, %v1957_v35  ;;  %vm1493_vm0 = vweird.f32 %v8733_v52  ;;  %v662_v16 = vpop.f32.mrf.mxu0 }
 0x1e2   : > { %v8763_v19 = vpack.c.b16 %v2407_v18, %v2404_v33  ;;  %v8776_v49 = vpack.c.b16 %v2408_v39, %v2405_v47  ;;  %v1481_v33 = vsel %vm1480_vm15, %v6821_v56, %v1477_v48  ;;  %v8778_v20 = vadd.f32 1.0, %v6825_v34 }
 0x1e3   : > { %v1993_v37 = vsel %vm1974_vm7, %v11660_v46, %v1956_v32  ;;  %6828 = vpow2.f32 %v5954_v17  ;;  %v8781_v30 = vpack.c.bf16 %v8745_v11, %v1894_v10  ;;  %v6827_v8 = vpop.eup %6826  ;;  %v1486_v61 = vsel %vm8723_vm13, %v1485_v29, %v1481_v33  ;;  %v8797_v11 = vpop.f32.mrf.mxu1 }
 0x1e4   : > { %11661 = vst [vmem:[#allocation75_spill] sm:$0xff] %v8776_v49  ;;  %v8788_v46 = vpack.c.b16 %v8752_v3, %v8689_v40  ;;  %v1745_v47 = vmul.f32 %v1486_v61, %v8596_v55  ;;  %v1489_v56 = vmul.f32 %v6827_v8, %v8733_v52  ;;  %vm8792_vm1 = vcmp.eq.f32.partialorder %v1497_v24, 8.507059e+37 }
 0x1e5   : > { %6830 = vrcp.f32 %v8778_v20  ;;  %11665 = vst [vmem:[#allocation77_spill] sm:$0xff] %v8797_v11  ;;  %v1500_v0 = vor.u32 1.1754944e-38, %v1499_v31  ;;  %v737_v29 = vmul.f32 %v8422_v60, %v662_v16  ;;  %v2086_v48 = vpack.c.bf16 %v1993_v37, %v1993_v37 }
 0x1e6   : > { %11662 = vst [vmem:[#allocation76_spill] sm:$0xff] %v8788_v46  ;;  %v2088_v17 = vpack.c.bf16 %v1992_v15, %v1992_v15  ;;  %v1490_v34 = vsub.f32 1.0, %v1489_v56  ;;  %v2410_v10 = vunpack.c.l.b16 %v8781_v30  ;;  %v2411_v55 = vunpack.c.h.b16 %v8781_v30 }
 0x1e7   : > { %v8804_v24 = vsel %vm1770_vm12, %v1745_v47, 0.0  ;;  %vm1494_vm2 = vweird.f32 %v6827_v8  ;;  %v1512_v33 = vand.u32 2147483647, %v8778_v20  ;;  %v8808_v61 = vadd.f32 %v8434_v22, %v737_v29 }
 0x1e8   : > { %v11445_v31 = vrot.slane %v8804_v24, 7  ;;  %v1491_v37 = vmul.f32 %v6827_v8, %v1490_v34  ;;  %v2506_v15 = vpack.c.b16 %v2410_v10, %v2407_v18  ;;  %v2507_v56 = vpack.c.b16 %v2411_v55, %v2408_v39  ;;  %vm1495_vm5 = vmor %vm1493_vm0, %vm1494_vm2 }
 0x1e9   : > { %v6829_v16 = vpop.eup %6828  ;;  %v11444_v46 = vrot.slane %v8804_v24, 1  ;;  %vm1508_vm3 = vweird.f32 %v8778_v20  ;;  %v5955_v47 = vmul.f32 -1.442695, %v8808_v61  ;;  %v1514_v12 = vand.u32 2147483648, %v8778_v20 }
 0x1ea   : > { %v8813_v30 = vadd.f32 1.0, %v6829_v16  ;;  %v1893_v29 = vsel %vm1876_vm6, %v1859_v5, %v11445_v31  ;;  %v1492_v11 = vadd.f32 %v6827_v8, %v1491_v37  ;;  %vm8832_vm8 = vcmp.eq.f32.partialorder %v1512_v33, 8.507059e+37  ;;  %v665_v16 = vpop.f32.mrf.mxu0 }
 0x1eb   : > { %v6831_v49 = vpop.eup %6830  ;;  %2832 = vmatmul.bf16.gmra.mxu3 %v2506_v15  ;;  %v8822_v18 = vpack.c.bf16 %v8804_v24, %v1893_v29  ;;  %v1991_v39 = vsel %vm1974_vm7, %v1957_v35, %v11444_v46  ;;  %2961 = vmatmul.bf16.gmra.mxu2 %v2507_v56  ;;  %v8837_v37 = vunpack.c.l.b16 %v2086_v48  ;;  %v8839_v35 = vpop.f32.mrf.mxu1  ;;  %v8841_v29 = vunpack.c.l.b16 %v2088_v17 }
 0x1ec   : > { %v1504_v34 = vmul.f32 %v6831_v49, %v8778_v20  ;;  %6832 = vrcp.f32 %v8813_v30  ;;  %v1496_v15 = vsel %vm1495_vm5, %v6827_v8, %v1492_v11  ;;  %vm1509_vm9 = vweird.f32 %v6831_v49  ;;  %11669 = vst [vmem:[#allocation79_spill] sm:$0xff] %v8839_v35  ;;  %2891 = vmatmul.bf16.gmra.mxu0 %v7406_v41 }
 0x1ed   : > { %11668 = vst [vmem:[#allocation78_spill] sm:$0xff] %v8837_v37  ;;  %6834 = vpow2.f32 %v5955_v47  ;;  %v1501_v52 = vsel %vm8792_vm1, %v1500_v0, %v1496_v15  ;;  %v738_v46 = vmul.f32 %v8422_v60, %v665_v16  ;;  %v2413_v31 = vunpack.c.l.b16 %v8822_v18  ;;  %v6449_v0 = vld [vmem:[%s11357_s4 + $0x68] sm:$0xff]  ;;  %vm1510_vm10 = vmor %vm1508_vm3, %vm1509_vm9 }
 0x1ee   : > { %11670 = vst [vmem:[#allocation80_spill] sm:$0xff] %v8841_v29  ;;  %v1505_v33 = vsub.f32 1.0, %v1504_v34  ;;  %v1746_v56 = vmul.f32 %v1501_v52, %v8657_v42  ;;  %v1527_v48 = vand.u32 2147483647, %v8813_v30  ;;  %v1529_v8 = vand.u32 2147483648, %v8813_v30  ;;  %3449 = vmatmul.bf16.gmra.mxu1 %v7359_v58  ;;  %3562 = vmatpush.bf16.msrb.mxu2 %v6449_v0 }
 0x1ef   : > { %v2414_v11 = vunpack.c.h.b16 %v8822_v18  ;;  %v8854_v32 = vadd.f32 %v8434_v22, %v738_v46  ;;  %v8859_v47 = vpack.c.b16 %v2413_v31, %v2410_v10  ;;  %v1515_v34 = vor.u32 1.1754944e-38, %v1514_v12 }
 0x1f0   : > { %v1506_v17 = vmul.f32 %v6831_v49, %v1505_v33  ;;  %v1813_v41 = vsel %vm1765_vm4, %v1746_v56, 0.0  ;;  %v8869_v58 = vpack.c.b16 %v8841_v29, %v8837_v37  ;;  %v2090_v10 = vpack.c.bf16 %v1991_v39, %v1991_v39 }
 0x1f1   : > { %v8865_v18 = vpack.c.b16 %v2414_v11, %v2411_v55  ;;  %v1861_v16 = vrot.slane %v1813_v41, 7  ;;  %v5956_v52 = vmul.f32 -1.442695, %v8854_v32  ;;  %vm1523_vm11 = vweird.f32 %v8813_v30  ;;  %v6448_v55 = vld [vmem:[%s11357_s4 + $0x60] sm:$0xff] }
 0x1f2   : > { %11672 = vst [vmem:[#allocation82_spill] sm:$0xff] %v8869_v58  ;;  %v6833_v46 = vpop.eup %6832  ;;  %v1507_v15 = vadd.f32 %v6831_v49, %v1506_v17  ;;  %vm8877_vm13 = vcmp.eq.f32.partialorder %v1527_v48, 8.507059e+37  ;;  %v1530_v56 = vor.u32 1.1754944e-38, %v1529_v8  ;;  %v667_v0 = vpop.f32.mrf.mxu0  ;;  %v11675_v39 = vrot.slane %v8804_v24, 7  ;;  %3563 = vmatpush.bf16.msrb.mxu2 %v6448_v55 }
 0x1f3   : > { %11671 = vst [vmem:[#allocation81_spill] sm:$0xff] %v8865_v18  ;;  %v6835_v33 = vpop.eup %6834  ;;  %v1519_v12 = vmul.f32 %v6833_v46, %v8813_v30  ;;  %6836 = vpow2.f32 %v5956_v52  ;;  %v8889_v35 = vpop.f32.mrf.mxu1  ;;  %v739_v48 = vmul.f32 %v8422_v60, %v667_v0  ;;  %vm1524_vm14 = vweird.f32 %v6833_v46 }
 0x1f4   : > { %v1511_v42 = vsel %vm1510_vm10, %v6831_v49, %v1507_v15  ;;  %v8881_v17 = vadd.f32 1.0, %v6835_v33  ;;  %v1892_v20 = vsel %vm1876_vm6, %v11675_v39, %v1861_v16  ;;  %11676 = vst [vmem:[#allocation83_spill] sm:$0xff] %v8889_v35  ;;  %v6481_v49 = vld [vmem:[%s11357_s4 + $0x168] sm:$0xff]  ;;  %v1959_v15 = vrot.slane %v1813_v41, 1  ;;  %vm1525_vm15 = vmor %vm1523_vm11, %vm1524_vm14 }
 0x1f5   : > { %v1516_v58 = vsel %vm8832_vm8, %v1515_v34, %v1511_v42  ;;  %v1520_v18 = vsub.f32 1.0, %v1519_v12  ;;  %v8895_v8 = vpack.c.bf16 %v1813_v41, %v1892_v20  ;;  %v8899_v33 = vunpack.c.l.b16 %v2090_v10  ;;  %3009 = vmatpush.bf16.msrb.mxu3 %v6481_v49 }
 0x1f6   : > { %v1747_v52 = vmul.f32 %v1516_v58, %v8704_v25  ;;  %6838 = vrcp.f32 %v8881_v17  ;;  %v8902_v42 = vadd.f32 %v8434_v22, %v739_v48  ;;  %v1542_v39 = vand.u32 2147483647, %v8881_v17 }
 0x1f7   : > { %11677 = vst [vmem:[#allocation84_spill] sm:$0xff] %v8899_v33  ;;  %v1521_v5 = vmul.f32 %v6833_v46, %v1520_v18  ;;  %v2416_v34 = vunpack.c.l.b16 %v8895_v8  ;;  %v11450_v41 = vunpack.c.h.b16 %v8895_v8  ;;  %v1544_v25 = vand.u32 2147483648, %v8881_v17 }
 0x1f8   : > { %v1862_v12 = vrot.slane %v1747_v52, 7  ;;  %v1960_v0 = vrot.slane %v1747_v52, 1  ;;  %v5957_v58 = vmul.f32 -1.442695, %v8902_v42  ;;  %vm1538_vm0 = vweird.f32 %v8881_v17 }
 0x1f9   : > { %v1522_v20 = vadd.f32 %v6833_v46, %v1521_v5  ;;  %v2509_v10 = vpack.c.b16 %v2416_v34, %v2413_v31  ;;  %v6837_v18 = vpop.eup %6836  ;;  %v2510_v48 = vpack.c.b16 %v11450_v41, %v2414_v11  ;;  %vm8935_vm1 = vcmp.eq.f32.partialorder %v1542_v39, 8.507059e+37 }
 0x1fa   : > { %v1891_v49 = vsel %vm1876_vm6, %v1861_v16, %v1862_v12  ;;  %v1989_v5 = vsel %vm1974_vm7, %v1959_v15, %v1960_v0  ;;  %v8919_v37 = vadd.f32 1.0, %v6837_v18  ;;  %6840 = vpow2.f32 %v5957_v58  ;;  %v670_v41 = vpop.f32.mrf.mxu0 }
 0x1fb   : > { %v1526_v3 = vsel %vm1525_vm15, %v6833_v46, %v1522_v20  ;;  %2837 = vmatmul.bf16.gmra.mxu3 %v2509_v10  ;;  %v8921_v31 = vpack.c.bf16 %v1747_v52, %v1891_v49  ;;  %2966 = vmatmul.bf16.gmra.mxu2 %v2510_v48  ;;  %v11678_v16 = vrot.slane %v8804_v24, 1  ;;  %v8933_v52 = vpop.f32.mrf.mxu1  ;;  %v740_v24 = vmul.f32 %v8422_v60, %v670_v41 }
 0x1fc   : > { %v6839_v30 = vpop.eup %6838  ;;  %v1531_v11 = vsel %vm8877_vm13, %v1530_v56, %v1526_v3  ;;  %6842 = vrcp.f32 %v8919_v37  ;;  %11679 = vst [vmem:[#allocation85_spill] sm:$0xff] %v8933_v52  ;;  %v1545_v3 = vor.u32 1.1754944e-38, %v1544_v25  ;;  %v2094_v56 = vpack.c.bf16 %v1989_v5, %v1989_v5  ;;  %2896 = vmatmul.bf16.gmra.mxu0 %v7476_v14 }
 0x1fd   : > { %v1990_v35 = vsel %vm1974_vm7, %v11678_v16, %v1959_v15  ;;  %v1748_v29 = vmul.f32 %v1531_v11, %v8749_v51  ;;  %v1534_v46 = vmul.f32 %v6839_v30, %v8881_v17  ;;  %vm1539_vm2 = vweird.f32 %v6839_v30 }
 0x1fe   : > { %v2419_v20 = vunpack.c.l.b16 %v8921_v31  ;;  %v1557_v10 = vand.u32 2147483647, %v8919_v37  ;;  %v1559_v25 = vand.u32 2147483648, %v8919_v37  ;;  %3454 = vmatmul.bf16.gmra.mxu1 %v7425_v4  ;;  %v2092_v14 = vpack.c.bf16 %v1990_v35, %v1990_v35  ;;  %vm1540_vm5 = vmor %vm1538_vm0, %vm1539_vm2 }
 0x1ff   : > { %v8942_v15 = vsel %vm1770_vm12, %v1748_v29, 0.0  ;;  %v1535_v51 = vsub.f32 1.0, %v1534_v46  ;;  %v8952_v29 = vadd.f32 %v8434_v22, %v740_v24  ;;  %vm1553_vm3 = vweird.f32 %v8919_v37 }
 0x200   : > { %v11453_v58 = vrot.slane %v8942_v15, 7  ;;  %v11452_v39 = vrot.slane %v8942_v15, 1  ;;  %v6841_v41 = vpop.eup %6840  ;;  %v8954_v48 = vpack.c.b16 %v2419_v20, %v2416_v34  ;;  %v2420_v24 = vunpack.c.h.b16 %v8921_v31 }
 0x201   : > { %v1536_v18 = vmul.f32 %v6839_v30, %v1535_v51  ;;  %v8957_v49 = vadd.f32 1.0, %v6841_v41  ;;  %v5958_v34 = vmul.f32 -1.442695, %v8952_v29  ;;  %vm8978_vm8 = vcmp.eq.f32.partialorder %v1557_v10, 8.507059e+37 }
 0x202   : > { %v1890_v5 = vsel %vm1876_vm6, %v1862_v12, %v11453_v58  ;;  %v8967_v11 = vsel %vm1974_vm7, %v1960_v0, %v11452_v39  ;;  %v6843_v16 = vpop.eup %6842  ;;  %v672_v0 = vpop.f32.mrf.mxu0  ;;  %v8983_v41 = vunpack.c.l.b16 %v2094_v56  ;;  %v8987_v31 = vunpack.c.l.b16 %v2092_v14 }
 0x203   : > { %v1537_v46 = vadd.f32 %v6839_v30, %v1536_v18  ;;  %v8971_v35 = vpack.c.bf16 %v8942_v15, %v1890_v5  ;;  %v1549_v12 = vmul.f32 %v6843_v16, %v8919_v37  ;;  %6844 = vrcp.f32 %v8957_v49  ;;  %v8985_v39 = vpop.f32.mrf.mxu1 }
 0x204   : > { %11684 = vst [vmem:[#allocation86_spill] sm:$0xff] %v8983_v41  ;;  %v1560_v5 = vor.u32 1.1754944e-38, %v1559_v25  ;;  %6846 = vpow2.f32 %v5958_v34  ;;  %v741_v10 = vmul.f32 %v8422_v60, %v672_v0  ;;  %vm1554_vm9 = vweird.f32 %v6843_v16 }
 0x205   : > { %v1541_v18 = vsel %vm1540_vm5, %v6839_v30, %v1537_v46  ;;  %11685 = vst [vmem:[#allocation87_spill] sm:$0xff] %v8985_v39  ;;  %v1550_v58 = vsub.f32 1.0, %v1549_v12  ;;  %v2422_v52 = vunpack.c.l.b16 %v8971_v35  ;;  %v1572_v56 = vand.u32 2147483647, %v8957_v49  ;;  %vm1555_vm11 = vmor %vm1553_vm3, %vm1554_vm9 }
 0x206   : > { %11686 = vst [vmem:[#allocation88_spill] sm:$0xff] %v8987_v31  ;;  %v1546_v17 = vsel %vm8935_vm1, %v1545_v3, %v1541_v18  ;;  %v2423_v30 = vunpack.c.h.b16 %v8971_v35  ;;  %v8997_v46 = vadd.f32 %v8434_v22, %v741_v10  ;;  %v6480_v3 = vld [vmem:[%s11357_s4 + $0x160] sm:$0xff]  ;;  %vm1568_vm10 = vweird.f32 %v8957_v49 }
 0x207   : > { %v1749_v54 = vmul.f32 %v1546_v17, %v8808_v61  ;;  %v1551_v25 = vmul.f32 %v6843_v16, %v1550_v58  ;;  %v2512_v14 = vpack.c.b16 %v2422_v52, %v2419_v20  ;;  %v11687_v35 = vunpack.c.h.b16 %v8895_v8  ;;  %3010 = vmatpush.bf16.msrb.mxu3 %v6480_v3 }
 0x208   : > { %v2513_v34 = vpack.c.b16 %v2423_v30, %v2420_v24  ;;  %v1574_v18 = vand.u32 2147483648, %v8957_v49  ;;  %v5959_v17 = vmul.f32 -1.442695, %v8997_v46  ;;  %vm9020_vm13 = vcmp.eq.f32.partialorder %v1572_v56, 8.507059e+37 }
 0x209   : > { %v1816_v58 = vsel %vm1765_vm4, %v1749_v54, 0.0  ;;  %v9012_v20 = vpack.c.b16 %v2420_v24, %v11687_v35  ;;  %v6845_v12 = vpop.eup %6844  ;;  %v1552_v0 = vadd.f32 %v6843_v16, %v1551_v25  ;;  %v2096_v24 = vpack.c.bf16 %v8967_v11, %v8967_v11 }
 0x20a   : > { %v1864_v10 = vrot.slane %v1816_v58, 7  ;;  %v6847_v61 = vpop.eup %6846  ;;  %v1564_v54 = vmul.f32 %v6845_v12, %v8957_v49  ;;  %v9028_v25 = vpack.c.b16 %v8987_v31, %v8899_v33  ;;  %6848 = vpow2.f32 %v5959_v17  ;;  %v675_v37 = vpop.f32.mrf.mxu0 }
 0x20b   : > { %11688 = vst [vmem:[#allocation89_spill] sm:$0xff] %v9012_v20  ;;  %2842 = vmatmul.bf16.gmra.mxu3 %v2512_v14  ;;  %v1556_v55 = vsel %vm1555_vm11, %v6843_v16, %v1552_v0  ;;  %v9030_v3 = vadd.f32 1.0, %v6847_v61  ;;  %2971 = vmatmul.bf16.gmra.mxu2 %v2513_v34  ;;  %v11692_v35 = vrot.slane %v8942_v15, 7  ;;  %v9038_v11 = vpop.f32.mrf.mxu1  ;;  %v742_v39 = vmul.f32 %v8422_v60, %v675_v37 }
 0x20c   : > { %11691 = vst [vmem:[#allocation90_spill] sm:$0xff] %v9028_v25  ;;  %v1561_v14 = vsel %vm8978_vm8, %v1560_v5, %v1556_v55  ;;  %v1565_v20 = vsub.f32 1.0, %v1564_v54  ;;  %v1575_v61 = vor.u32 1.1754944e-38, %v1574_v18  ;;  %v1962_v34 = vrot.slane %v1816_v58, 1  ;;  %2901 = vmatmul.bf16.gmra.mxu0 %v7553_v53 }
 0x20d   : > { %v1889_v56 = vsel %vm1876_vm6, %v11692_v35, %v1864_v10  ;;  %11693 = vst [vmem:[#allocation91_spill] sm:$0xff] %v9038_v11  ;;  %v9042_v16 = vmul.f32 %v1561_v14, %v8854_v32  ;;  %6850 = vrcp.f32 %v9030_v3  ;;  %vm1569_vm14 = vweird.f32 %v6845_v12 }
 0x20e   : > { %v2099_v25 = vpack.c.bf16 %v1816_v58, %v1889_v56  ;;  %v1566_v0 = vmul.f32 %v6845_v12, %v1565_v20  ;;  %v9046_v17 = vadd.f32 %v8434_v22, %v742_v39  ;;  %3459 = vmatmul.bf16.gmra.mxu1 %v7515_v26  ;;  %v9052_v54 = vunpack.c.l.b16 %v2096_v24  ;;  %vm1570_vm15 = vmor %vm1568_vm10, %vm1569_vm14 }
 0x20f   : > { %v1865_v5 = vrot.slane %v9042_v16, 7  ;;  %v1963_v60 = vrot.slane %v9042_v16, 1  ;;  %v1587_v58 = vand.u32 2147483647, %v9030_v3  ;;  %v11695_v39 = vrot.slane %v8942_v15, 1 }
 0x210   : > { %v2425_v51 = vunpack.c.l.b16 %v2099_v25  ;;  %v2426_v32 = vunpack.c.h.b16 %v2099_v25  ;;  %11694 = vst [vmem:[#allocation92_spill] sm:$0xff] %v9052_v54  ;;  %v1567_v18 = vadd.f32 %v6845_v12, %v1566_v0  ;;  %v5960_v20 = vmul.f32 -1.442695, %v9046_v17  ;;  %v6849_v22 = vpop.eup %6848 }
 0x211   : > { %v1888_v53 = vsel %vm1876_vm6, %v1864_v10, %v1865_v5  ;;  %v1987_v24 = vsel %vm1974_vm7, %v11695_v39, %v1962_v34  ;;  %v1986_v25 = vsel %vm1974_vm7, %v1962_v34, %v1963_v60  ;;  %v9079_v14 = vpack.c.b16 %v9052_v54, %v8983_v41 }
 0x212   : > { %v9056_v55 = vpack.c.b16 %v2425_v51, %v2422_v52  ;;  %v9068_v37 = vpack.c.b16 %v2426_v32, %v2423_v30  ;;  %v1571_v35 = vsel %vm1570_vm15, %v6845_v12, %v1567_v18  ;;  %v9070_v52 = vadd.f32 1.0, %v6849_v22  ;;  %v677_v15 = vpop.f32.mrf.mxu0 }
 0x213   : > { %6852 = vpow2.f32 %v5960_v20  ;;  %v9073_v49 = vpack.c.bf16 %v9042_v16, %v1888_v53  ;;  %v6851_v56 = vpop.eup %6850  ;;  %v1576_v10 = vsel %vm9020_vm13, %v1575_v61, %v1571_v35  ;;  %11697 = vst [vmem:[#allocation94_spill] sm:$0xff] %v9079_v14  ;;  %vm1583_vm0 = vweird.f32 %v9030_v3  ;;  %v9085_v12 = vpop.f32.mrf.mxu1  ;;  %v9095_v61 = vld [vmem:[%s11355_s2] ss:$0 sm:$0xff] }
 0x214   : > { %11696 = vst [vmem:[#allocation93_spill] sm:$0xff] %v9068_v37  ;;  %v1751_v34 = vmul.f32 %v1576_v10, %v8902_v42  ;;  %v1579_v30 = vmul.f32 %v6851_v56, %v9030_v3  ;;  %6854 = vrcp.f32 %v9070_v52  ;;  %vm9087_vm1 = vcmp.eq.f32.partialorder %v1587_v58, 8.507059e+37  ;;  %v9107_v53 = vld [vmem:[%s11356_s3] ss:$0 sm:$0xff] }
 0x215   : > { %11698 = vst [vmem:[#allocation95_spill] sm:$0xff] %v9085_v12  ;;  %v1589_v8 = vand.u32 2147483648, %v9030_v3  ;;  %v743_v42 = vmul.f32 %v9095_v61, %v677_v15  ;;  %v2098_v0 = vpack.c.bf16 %v1987_v24, %v1987_v24  ;;  %v2428_v20 = vunpack.c.l.b16 %v9073_v49 }
 0x216   : > { %v1580_v18 = vsub.f32 1.0, %v1579_v30  ;;  %v2429_v22 = vunpack.c.h.b16 %v9073_v49  ;;  %v9102_v58 = vsel %vm1770_vm12, %v1751_v34, 0.0  ;;  %vm1584_vm2 = vweird.f32 %v6851_v56 }
 0x217   : > { %v9110_v39 = vadd.f32 %v9107_v53, %v743_v42  ;;  %v11461_v24 = vrot.slane %v9102_v58, 7  ;;  %v2100_v35 = vpack.c.bf16 %v1986_v25, %v1986_v25  ;;  %v2515_v30 = vpack.c.b16 %v2428_v20, %v2425_v51  ;;  %vm1585_vm3 = vmor %vm1583_vm0, %vm1584_vm2 }
 0x218   : > { %v1581_v15 = vmul.f32 %v6851_v56, %v1580_v18  ;;  %v2516_v49 = vpack.c.b16 %v2429_v22, %v2426_v32  ;;  %v11460_v14 = vrot.slane %v9102_v58, 1  ;;  %v1590_v34 = vor.u32 1.1754944e-38, %v1589_v8 }
 0x219   : > { %v6853_v10 = vpop.eup %6852  ;;  %v5961_v12 = vmul.f32 -1.442695, %v9110_v39  ;;  %v1887_v42 = vsel %vm1876_vm6, %v1865_v5, %v11461_v24  ;;  %v1602_v25 = vand.u32 2147483647, %v9070_v52  ;;  %vm1598_vm5 = vweird.f32 %v9070_v52 }
 0x21a   : > { %v9114_v37 = vadd.f32 1.0, %v6853_v10  ;;  %v6855_v11 = vpop.eup %6854  ;;  %v1582_v31 = vadd.f32 %v6851_v56, %v1581_v15  ;;  %v9123_v51 = vpack.c.bf16 %v9102_v58, %v1887_v42  ;;  %v1985_v32 = vsel %vm1974_vm7, %v1963_v60, %v11460_v14  ;;  %v680_v5 = vpop.f32.mrf.mxu0 }
 0x21b   : > { %2847 = vmatmul.bf16.gmra.mxu3 %v2515_v30  ;;  %v1594_v8 = vmul.f32 %v6855_v11, %v9070_v52  ;;  %2976 = vmatmul.bf16.gmra.mxu2 %v2516_v49  ;;  %v9135_v18 = vunpack.c.l.b16 %v2098_v0  ;;  %v1604_v15 = vand.u32 2147483648, %v9070_v52  ;;  %v9138_v30 = vpop.f32.mrf.mxu1  ;;  %v9140_v60 = vunpack.c.l.b16 %v2100_v35  ;;  %v6479_v0 = vld [vmem:[%s11357_s4 + $0x158] sm:$0xff] }
 0x21c   : > { %6856 = vrcp.f32 %v9114_v37  ;;  %v1586_v10 = vsel %vm1585_vm3, %v6851_v56, %v1582_v31  ;;  %11702 = vst [vmem:[#allocation97_spill] sm:$0xff] %v9138_v30  ;;  %v744_v14 = vmul.f32 %v9095_v61, %v680_v5  ;;  %v2431_v24 = vunpack.c.l.b16 %v9123_v51  ;;  %2906 = vmatmul.bf16.gmra.mxu0 %v7637_v36  ;;  %3011 = vmatpush.bf16.msrb.mxu3 %v6479_v0 }
 0x21d   : > { %11701 = vst [vmem:[#allocation96_spill] sm:$0xff] %v9135_v18  ;;  %6858 = vpow2.f32 %v5961_v12  ;;  %v1591_v3 = vsel %vm9087_vm1, %v1590_v34, %v1586_v10  ;;  %v1595_v42 = vsub.f32 1.0, %v1594_v8  ;;  %vm1599_vm8 = vweird.f32 %v6855_v11 }
 0x21e   : > { %11703 = vst [vmem:[#allocation98_spill] sm:$0xff] %v9140_v60  ;;  %v1752_v49 = vmul.f32 %v1591_v3, %v8952_v29  ;;  %vm9147_vm9 = vcmp.eq.f32.partialorder %v1602_v25, 8.507059e+37  ;;  %v2432_v56 = vunpack.c.h.b16 %v9123_v51  ;;  %3464 = vmatmul.bf16.gmra.mxu1 %v7597_v43  ;;  %v9155_v16 = vadd.f32 %v9107_v53, %v744_v14  ;;  %v6447_v29 = vld [vmem:[%s11357_s4 + $0x58] sm:$0xff]  ;;  %vm1600_vm10 = vmor %vm1598_vm5, %vm1599_vm8 }
 0x21f   : > { %v1596_v12 = vmul.f32 %v6855_v11, %v1595_v42  ;;  %v9163_v35 = vpack.c.b16 %v2431_v24, %v2428_v20  ;;  %v1617_v25 = vand.u32 2147483647, %v9114_v37  ;;  %v9174_v51 = vpack.c.b16 %v9140_v60, %v9135_v18  ;;  %3564 = vmatpush.bf16.msrb.mxu2 %v6447_v29 }
 0x220   : > { %v1819_v34 = vsel %vm1765_vm4, %v1752_v49, 0.0  ;;  %v9170_v14 = vpack.c.b16 %v2432_v56, %v2429_v22  ;;  %v5962_v20 = vmul.f32 -1.442695, %v9155_v16  ;;  %v2102_v3 = vpack.c.bf16 %v1985_v32, %v1985_v32 }
 0x221   : > { %11707 = vst [vmem:[#allocation100_spill] sm:$0xff] %v9174_v51  ;;  %v1867_v5 = vrot.slane %v1819_v34, 7  ;;  %v1597_v10 = vadd.f32 %v6855_v11, %v1596_v12  ;;  %v1605_v49 = vor.u32 1.1754944e-38, %v1604_v15  ;;  %vm1613_vm11 = vweird.f32 %v9114_v37 }
 0x222   : > { %11706 = vst [vmem:[#allocation99_spill] sm:$0xff] %v9170_v14  ;;  %v6857_v8 = vpop.eup %6856  ;;  %v1619_v36 = vand.u32 2147483648, %v9114_v37  ;;  %6860 = vpow2.f32 %v5962_v20  ;;  %v682_v12 = vpop.f32.mrf.mxu0  ;;  %v11708_v0 = vrot.slane %v9102_v58, 7  ;;  %vm9199_vm13 = vcmp.eq.f32.partialorder %v1617_v25, 8.507059e+37 }
 0x223   : > { %v6859_v42 = vpop.eup %6858  ;;  %v1609_v22 = vmul.f32 %v6857_v8, %v9114_v37  ;;  %v1601_v51 = vsel %vm1600_vm10, %v6855_v11, %v1597_v10  ;;  %v9191_v29 = vpop.f32.mrf.mxu1  ;;  %v745_v30 = vmul.f32 %v9095_v61, %v682_v12  ;;  %v9204_v20 = vunpack.c.l.b16 %v2102_v3 }
 0x224   : > { %v9183_v14 = vadd.f32 1.0, %v6859_v42  ;;  %v1886_v32 = vsel %vm1876_vm6, %v11708_v0, %v1867_v5  ;;  %v1606_v52 = vsel %vm9147_vm9, %v1605_v49, %v1601_v51  ;;  %11709 = vst [vmem:[#allocation101_spill] sm:$0xff] %v9191_v29  ;;  %vm1614_vm14 = vweird.f32 %v6857_v8 }
 0x225   : > { %v1610_v15 = vsub.f32 1.0, %v1609_v22  ;;  %v9194_v54 = vpack.c.bf16 %v1819_v34, %v1886_v32  ;;  %v9197_v11 = vmul.f32 %v1606_v52, %v8997_v46  ;;  %11712 = vst [vmem:[#allocation102_spill] sm:$0xff] %v9204_v20  ;;  %v9207_v51 = vadd.f32 %v9107_v53, %v745_v30  ;;  %vm1615_vm15 = vmor %vm1613_vm11, %vm1614_vm14 }
 0x226   : > { %6862 = vrcp.f32 %v9183_v14  ;;  %v1965_v49 = vrot.slane %v1819_v34, 1  ;;  %v1620_v0 = vor.u32 1.1754944e-38, %v1619_v36  ;;  %v11713_v60 = vrot.slane %v9102_v58, 1 }
 0x227   : > { %v1611_v31 = vmul.f32 %v6857_v8, %v1610_v15  ;;  %v2434_v42 = vunpack.c.l.b16 %v9194_v54  ;;  %v1868_v22 = vrot.slane %v9197_v11, 7  ;;  %v1966_v46 = vrot.slane %v9197_v11, 1 }
 0x228   : > { %v11465_v25 = vunpack.c.h.b16 %v9194_v54  ;;  %v5963_v32 = vmul.f32 -1.442695, %v9207_v51  ;;  %v6861_v52 = vpop.eup %6860  ;;  %v1634_v15 = vand.u32 2147483648, %v9183_v14  ;;  %vm1628_vm0 = vweird.f32 %v9183_v14 }
 0x229   : > { %v1612_v12 = vadd.f32 %v6857_v8, %v1611_v31  ;;  %v2518_v3 = vpack.c.b16 %v2434_v42, %v2431_v24  ;;  %v1885_v34 = vsel %vm1876_vm6, %v1867_v5, %v1868_v22  ;;  %v9224_v31 = vsel %vm1974_vm7, %v1965_v49, %v1966_v46 }
 0x22a   : > { %v2519_v30 = vpack.c.b16 %v11465_v25, %v2432_v56  ;;  %v9226_v29 = vadd.f32 1.0, %v6861_v52  ;;  %6864 = vpow2.f32 %v5963_v32  ;;  %v9229_v37 = vpack.c.bf16 %v9197_v11, %v1885_v34  ;;  %v685_v25 = vpop.f32.mrf.mxu0 }
 0x22b   : > { %v1616_v36 = vsel %vm1615_vm15, %v6857_v8, %v1612_v12  ;;  %2852 = vmatmul.bf16.gmra.mxu3 %v2518_v3  ;;  %v1632_v5 = vand.u32 2147483647, %v9183_v14  ;;  %v1984_v8 = vsel %vm1974_vm7, %v11713_v60, %v1965_v49  ;;  %v2813_v32 = vpop.f32.mrf.mxu1  ;;  %v746_v10 = vmul.f32 %v9095_v61, %v685_v25 }
 0x22c   : > { %v6863_v24 = vpop.eup %6862  ;;  %v1621_v56 = vsel %vm9199_vm13, %v1620_v0, %v1616_v36  ;;  %2981 = vmatmul.bf16.gmra.mxu2 %v2519_v30  ;;  %6866 = vrcp.f32 %v9226_v29  ;;  %v2942_v0 = vpop.f32.mrf.mxu2  ;;  %2911 = vmatmul.bf16.gmra.mxu0 %v7764_v28  ;;  %v1635_v25 = vor.u32 1.1754944e-38, %v1634_v15  ;;  %vm1643_vm3 = vweird.f32 %v9226_v29 }
 0x22d   : > { %v1754_v12 = vmul.f32 %v1621_v56, %v9046_v17  ;;  %v1624_v11 = vmul.f32 %v6863_v24, %v9183_v14  ;;  %v9248_v52 = vadd.f32 %v2942_v0, %v2813_v32  ;;  %v2437_v17 = vunpack.c.l.b16 %v9229_v37 }
 0x22e   : > { %vm9254_vm1 = vcmp.eq.f32.partialorder %v1632_v5, 8.507059e+37  ;;  %3469 = vmatmul.bf16.gmra.mxu1 %v7659_v6  ;;  %vm1629_vm2 = vweird.f32 %v6863_v24  ;;  %v9260_v56 = vadd.f32 %v9107_v53, %v746_v10  ;;  %v2106_v15 = vpack.c.bf16 %v9224_v31, %v9224_v31 }
 0x22f   : > { %v9246_v3 = vsel %vm1770_vm12, %v1754_v12, 0.0  ;;  %v1625_v58 = vsub.f32 1.0, %v1624_v11  ;;  %11714 = vst [vmem:[#allocation103_spill] sm:$0xff] %v9248_v52  ;;  %v9262_v28 = vpack.c.b16 %v2437_v17, %v2434_v42  ;;  %vm1630_vm5 = vmor %vm1628_vm0, %vm1629_vm2  ;;  %v1647_v31 = vand.u32 2147483647, %v9226_v29 }
 0x230   : > { %v11467_v60 = vrot.slane %v9246_v3, 7  ;;  %v11468_v49 = vrot.slane %v9246_v3, 1  ;;  %v6865_v34 = vpop.eup %6864  ;;  %v5964_v0 = vmul.f32 -1.442695, %v9260_v56  ;;  %v2104_v52 = vpack.c.bf16 %v1984_v8, %v1984_v8  ;;  %v6478_v8 = vld [vmem:[%s11357_s4 + $0x150] sm:$0xff] }
 0x231   : > { %v1626_v36 = vmul.f32 %v6863_v24, %v1625_v58  ;;  %v9265_v12 = vadd.f32 1.0, %v6865_v34  ;;  %v1649_v58 = vand.u32 2147483648, %v9226_v29  ;;  %vm9308_vm9 = vcmp.eq.f32.partialorder %v1647_v31, 8.507059e+37  ;;  %3012 = vmatpush.bf16.msrb.mxu3 %v6478_v8 }
 0x232   : > { %v1884_v5 = vsel %vm1876_vm6, %v1868_v22, %v11467_v60  ;;  %v6867_v11 = vpop.eup %6866  ;;  %v9281_v42 = vsel %vm1974_vm7, %v1966_v46, %v11468_v49  ;;  %v687_v34 = vpop.f32.mrf.mxu0  ;;  %v2438_v60 = vunpack.c.h.b16 %v9229_v37  ;;  %v11724_v8 = vrot.slane %v9246_v3, 7 }
 0x233   : > { %v1627_v32 = vadd.f32 %v6863_v24, %v1626_v36  ;;  %v9275_v10 = vpack.c.bf16 %v9246_v3, %v1884_v5  ;;  %v1639_v22 = vmul.f32 %v6867_v11, %v9226_v29  ;;  %6868 = vrcp.f32 %v9265_v12  ;;  %v2815_v5 = vpop.f32.mrf.mxu1 }
 0x234   : > { %6870 = vpow2.f32 %v5964_v0  ;;  %v747_v49 = vmul.f32 %v9095_v61, %v687_v34  ;;  %v2944_v18 = vpop.f32.mrf.mxu2  ;;  %vm1644_vm8 = vweird.f32 %v6867_v11  ;;  %vm1658_vm13 = vweird.f32 %v9265_v12 }
 0x235   : > { %v1631_v36 = vsel %vm1630_vm5, %v6863_v24, %v1627_v32  ;;  %v1640_v14 = vsub.f32 1.0, %v1639_v22  ;;  %v2440_v41 = vunpack.c.l.b16 %v9275_v10  ;;  %v9295_v40 = vadd.f32 %v2944_v18, %v2815_v5  ;;  %vm1645_vm10 = vmor %vm1643_vm3, %vm1644_vm8 }
 0x236   : > { %v1636_v46 = vsel %vm9254_vm1, %v1635_v25, %v1631_v36  ;;  %v9297_v24 = vunpack.c.l.b16 %v2106_v15  ;;  %v9300_v37 = vadd.f32 %v9107_v53, %v747_v49  ;;  %v11473_v25 = vunpack.c.h.b16 %v9275_v10 }
 0x237   : > { %v1755_v33 = vmul.f32 %v1636_v46, %v9110_v39  ;;  %11717 = vst [vmem:[#allocation104_spill] sm:$0xff] %v9295_v40  ;;  %v1641_v32 = vmul.f32 %v6867_v11, %v1640_v14  ;;  %v2521_v30 = vpack.c.b16 %v2440_v41, %v2437_v17  ;;  %v9316_v15 = vunpack.c.l.b16 %v2104_v52 }
 0x238   : > { %11718 = vst [vmem:[#allocation105_spill] sm:$0xff] %v9297_v24  ;;  %v11722_v49 = vunpack.c.h.b16 %v9194_v54  ;;  %v5965_v17 = vmul.f32 -1.442695, %v9300_v37  ;;  %v2522_v31 = vpack.c.b16 %v11473_v25, %v2438_v60  ;;  %v1662_v52 = vand.u32 2147483647, %v9265_v12 }
 0x239   : > { %v9314_v18 = vsel %vm1765_vm4, %v1755_v33, 0.0  ;;  %11721 = vst [vmem:[#allocation106_spill] sm:$0xff] %v9316_v15  ;;  %v6869_v22 = vpop.eup %6868  ;;  %v1642_v34 = vadd.f32 %v6867_v11, %v1641_v32  ;;  %v1650_v33 = vor.u32 1.1754944e-38, %v1649_v58 }
 0x23a   : > { %v9320_v0 = vpack.c.b16 %v2438_v60, %v11722_v49  ;;  %v1870_v36 = vrot.slane %v9314_v18, 7  ;;  %v6871_v5 = vpop.eup %6870  ;;  %v1654_v54 = vmul.f32 %v6869_v22, %v9265_v12  ;;  %6872 = vpow2.f32 %v5965_v17  ;;  %v690_v60 = vpop.f32.mrf.mxu0 }
 0x23b   : > { %2857 = vmatmul.bf16.gmra.mxu3 %v2521_v30  ;;  %v1646_v14 = vsel %vm1645_vm10, %v6867_v11, %v1642_v34  ;;  %v9333_v32 = vadd.f32 1.0, %v6871_v5  ;;  %v2818_v25 = vpop.f32.mrf.mxu1  ;;  %v748_v30 = vmul.f32 %v9095_v61, %v690_v60  ;;  %v1664_v34 = vand.u32 2147483648, %v9265_v12 }
 0x23c   : > { %11723 = vst [vmem:[#allocation107_spill] sm:$0xff] %v9320_v0  ;;  %2986 = vmatmul.bf16.gmra.mxu2 %v2522_v31  ;;  %v1883_v29 = vsel %vm1876_vm6, %v11724_v8, %v1870_v36  ;;  %v1651_v58 = vsel %vm9308_vm9, %v1650_v33, %v1646_v14  ;;  %v1655_v49 = vsub.f32 1.0, %v1654_v54  ;;  %v2947_v17 = vpop.f32.mrf.mxu2  ;;  %v1968_v31 = vrot.slane %v9314_v18, 1  ;;  %2916 = vmatmul.bf16.gmra.mxu0 %v7821_v50 }
 0x23d   : > { %v9343_v46 = vpack.c.bf16 %v9314_v18, %v1883_v29  ;;  %v9346_v11 = vmul.f32 %v1651_v58, %v9155_v16  ;;  %6874 = vrcp.f32 %v9333_v32  ;;  %vm1659_vm11 = vweird.f32 %v6869_v22  ;;  %v6446_v18 = vld [vmem:[%s11357_s4 + $0x50] sm:$0xff] }
 0x23e   : > { %v1656_v5 = vmul.f32 %v6869_v22, %v1655_v49  ;;  %v9352_v39 = vadd.f32 %v9107_v53, %v748_v30  ;;  %v9354_v33 = vadd.f32 %v2947_v17, %v2818_v25  ;;  %3474 = vmatmul.bf16.gmra.mxu1 %v7807_v9  ;;  %v6477_v53 = vld [vmem:[%s11357_s4 + $0x148] sm:$0xff]  ;;  %vm9368_vm14 = vcmp.eq.f32.partialorder %v1662_v52, 8.507059e+37  ;;  %vm1660_vm15 = vmor %vm1658_vm13, %vm1659_vm11  ;;  %3565 = vmatpush.bf16.msrb.mxu2 %v6446_v18 }
 0x23f   : > { %v1871_v61 = vrot.slane %v9346_v11, 7  ;;  %v11474_v16 = vrot.slane %v9346_v11, 1  ;;  %v2443_v54 = vunpack.c.l.b16 %v9343_v46  ;;  %v2444_v12 = vunpack.c.h.b16 %v9343_v46  ;;  %3013 = vmatpush.bf16.msrb.mxu3 %v6477_v53  ;;  %v6445_v52 = vld [vmem:[%s11357_s4 + $0x48] sm:$0xff] }
 0x240   : > { %11725 = vst [vmem:[#allocation108_spill] sm:$0xff] %v9354_v33  ;;  %v1657_v25 = vadd.f32 %v6869_v22, %v1656_v5  ;;  %v5966_v14 = vmul.f32 -1.442695, %v9352_v39  ;;  %v6873_v60 = vpop.eup %6872  ;;  %v1665_v8 = vor.u32 1.1754944e-38, %v1664_v34  ;;  %v11728_v49 = vrot.slane %v9246_v3, 1 }
 0x241   : > { %v1882_v29 = vsel %vm1876_vm6, %v1870_v36, %v1871_v61  ;;  %v9382_v58 = vpack.c.b16 %v2443_v54, %v2440_v41  ;;  %v9388_v34 = vadd.f32 1.0, %v6873_v60  ;;  %v2108_v41 = vpack.c.bf16 %v9281_v42, %v9281_v42  ;;  %v6476_v42 = vld [vmem:[%s11357_s4 + $0x140] sm:$0xff] }
 0x242   : > { %v1981_v46 = vsel %vm1974_vm7, %v11728_v49, %v1968_v31  ;;  %v1661_v30 = vsel %vm1660_vm15, %v6869_v22, %v1657_v25  ;;  %6876 = vpow2.f32 %v5966_v14  ;;  %v9391_v36 = vpack.c.bf16 %v9346_v11, %v1882_v29  ;;  %v692_v18 = vpop.f32.mrf.mxu0  ;;  %3566 = vmatpush.bf16.msrb.mxu2 %v6445_v52 }
 0x243   : > { %v6875_v17 = vpop.eup %6874  ;;  %v1666_v5 = vsel %vm9368_vm14, %v1665_v8, %v1661_v30  ;;  %v9401_v3 = vsel %vm1974_vm7, %v1968_v31, %v11474_v16  ;;  %v11729_v22 = vunpack.c.h.b16 %v9275_v10  ;;  %6878 = vrcp.f32 %v9388_v34  ;;  %v2820_v50 = vpop.f32.mrf.mxu1  ;;  %3014 = vmatpush.bf16.msrb.mxu3 %v6476_v42 }
 0x244   : > { %v1757_v25 = vmul.f32 %v1666_v5, %v9207_v51  ;;  %v1669_v14 = vmul.f32 %v6875_v17, %v9333_v32  ;;  %v2110_v60 = vpack.c.bf16 %v1981_v46, %v1981_v46  ;;  %v1677_v8 = vand.u32 2147483647, %v9333_v32  ;;  %v2949_v29 = vpop.f32.mrf.mxu2 }
 0x245   : > { %v9405_v53 = vpack.c.b16 %v2444_v12, %v11729_v22  ;;  %v1679_v31 = vand.u32 2147483648, %v9333_v32  ;;  %v2446_v10 = vunpack.c.l.b16 %v9391_v36  ;;  %v9416_v51 = vadd.f32 %v2949_v29, %v2820_v50 }
 0x246   : > { %v1670_v49 = vsub.f32 1.0, %v1669_v14  ;;  %v2447_v30 = vunpack.c.h.b16 %v9391_v36  ;;  %v9421_v5 = vsel %vm1770_vm12, %v1757_v25, 0.0  ;;  %vm1674_vm0 = vweird.f32 %v6875_v17 }
 0x247   : > { %11730 = vst [vmem:[#allocation109_spill] sm:$0xff] %v9405_v53  ;;  %v2524_v46 = vpack.c.b16 %v2446_v10, %v2443_v54  ;;  %v1872_v18 = vrot.slane %v9421_v5, 7  ;;  %v9424_v22 = vunpack.c.l.b16 %v2108_v41  ;;  %v1970_v52 = vrot.slane %v9421_v5, 1 }
 0x248   : > { %11731 = vst [vmem:[#allocation110_spill] sm:$0xff] %v9416_v51  ;;  %v6877_v16 = vpop.eup %6876  ;;  %v1671_v53 = vmul.f32 %v6875_v17, %v1670_v49  ;;  %v2525_v0 = vpack.c.b16 %v2447_v30, %v2444_v12  ;;  %v9427_v14 = vunpack.c.l.b16 %v2110_v60  ;;  %vm1673_vm1 = vweird.f32 %v9333_v32 }
 0x249   : > { %11732 = vst [vmem:[#allocation111_spill] sm:$0xff] %v9424_v22  ;;  %v9430_v36 = vadd.f32 1.0, %v6877_v16  ;;  %v1881_v25 = vsel %vm1876_vm6, %v1871_v61, %v1872_v18  ;;  %v9436_v54 = vpack.c.b16 %v9316_v15, %v9204_v20  ;;  %v6879_v41 = vpop.eup %6878  ;;  %v11735_v32 = vrot.slane %v9346_v11, 1  ;;  %vm1675_vm2 = vmor %vm1673_vm1, %vm1674_vm0  ;;  %v11802_v15 = vld [vmem:[#allocation15_spill] sm:$0xff]  ;;  %v11811_v20 = vld [vmem:[#allocation20_spill] sm:$0xff] }
 0x24a   : > { %11733 = vst [vmem:[#allocation112_spill] sm:$0xff] %v9427_v14  ;;  %v1672_v50 = vadd.f32 %v6875_v17, %v1671_v53  ;;  %v9439_v12 = vpack.c.bf16 %v9421_v5, %v1881_v25  ;;  %v1680_v61 = vor.u32 1.1754944e-38, %v1679_v31  ;;  %v1684_v60 = vmul.f32 %v6879_v41, %v9388_v34  ;;  %v694_v53 = vpop.f32.mrf.mxu0 }
 0x24b   : > { %11734 = vst [vmem:[#allocation113_spill] sm:$0xff] %v9436_v54  ;;  %2862 = vmatmul.bf16.gmra.mxu3 %v2524_v46  ;;  %v1979_v16 = vsel %vm1974_vm7, %v11735_v32, %v1970_v52  ;;  %6880 = vrcp.f32 %v9430_v36  ;;  %v2112_v29 = vpack.c.bf16 %v9401_v3, %v9401_v3  ;;  %vm1678_vm3 = vcmp.eq.f32.partialorder %v1677_v8, 8.507059e+37  ;;  %v9453_v11 = vpop.f32.mrf.mxu1 }
 0x24c   : > { %2991 = vmatmul.bf16.gmra.mxu2 %v2525_v0  ;;  %v1676_v49 = vsel %vm1675_vm2, %v6875_v17, %v1672_v50  ;;  %v1692_v5 = vand.u32 2147483647, %v9388_v34  ;;  %v2449_v46 = vunpack.c.l.b16 %v9439_v12  ;;  %v1685_v32 = vsub.f32 1.0, %v1684_v60  ;;  %2921 = vmatmul.bf16.gmra.mxu0 %v7924_v7 }
 0x24d   : > { %v1681_v25 = vsel %vm1678_vm3, %v1680_v61, %v1676_v49  ;;  %v2450_v42 = vunpack.c.h.b16 %v9439_v12  ;;  %v2114_v54 = vpack.c.bf16 %v1979_v16, %v1979_v16  ;;  %vm1689_vm5 = vweird.f32 %v6879_v41 }
 0x24e   : > { %v2823_v31 = vpop.f32.mrf.mxu3  ;;  %v1758_v0 = vmul.f32 %v1681_v25, %v9260_v56  ;;  %v1694_v53 = vand.u32 2147483648, %v9388_v34  ;;  %v2952_v3 = vpop.f32.mrf.mxu2  ;;  %v9460_v17 = vpack.c.b16 %v2449_v46, %v2446_v10  ;;  %v1686_v8 = vmul.f32 %v6879_v41, %v1685_v32  ;;  %3479 = vmatmul.bf16.gmra.mxu1 %v7861_v45 }
 0x24f   : > { %v9463_v50 = vadd.f32 %v2952_v3, %v2823_v31  ;;  %v9465_v61 = vunpack.c.l.b16 %v2112_v29  ;;  %v9467_v60 = vunpack.c.l.b16 %v2114_v54  ;;  %vm1688_vm8 = vweird.f32 %v9388_v34 }
 0x250   : > { %v1825_v56 = vsel %vm1765_vm4, %v1758_v0, 0.0  ;;  %v9472_v12 = vpack.c.b16 %v2450_v42, %v2447_v30  ;;  %v9476_v7 = vpack.c.b16 %v9424_v22, %v9297_v24  ;;  %v1687_v25 = vadd.f32 %v6879_v41, %v1686_v8  ;;  %vm1690_vm9 = vmor %vm1688_vm8, %vm1689_vm5 }
 0x251   : > { %11736 = vst [vmem:[#allocation114_spill] sm:$0xff] %v9463_v50  ;;  %v6881_v10 = vpop.eup %6880  ;;  %v1873_v16 = vrot.slane %v1825_v56, 7  ;;  %v1971_v49 = vrot.slane %v1825_v56, 1  ;;  %v1695_v54 = vor.u32 1.1754944e-38, %v1694_v53  ;;  %v9484_v34 = vpack.c.b16 %v9465_v61, %v9427_v14 }
 0x252   : > { %11737 = vst [vmem:[#allocation115_spill] sm:$0xff] %v9465_v61  ;;  %v1699_v32 = vmul.f32 %v6881_v10, %v9430_v36  ;;  %v1691_v30 = vsel %vm1690_vm9, %v6879_v41, %v1687_v25  ;;  %vm1693_vm4 = vcmp.eq.f32.partialorder %v1692_v5, 8.507059e+37  ;;  %v695_v31 = vpop.f32.mrf.mxu0  ;;  %v6444_v41 = vld [vmem:[%s11357_s4 + $0x40] sm:$0xff]  ;;  %v1707_v5 = vand.u32 2147483647, %v9430_v36 }
 0x253   : > { %11738 = vst [vmem:[#allocation116_spill] sm:$0xff] %v9467_v60  ;;  %v1880_v0 = vsel %vm1876_vm6, %v1872_v18, %v1873_v16  ;;  %v1978_v3 = vsel %vm1974_vm7, %v1970_v52, %v1971_v49  ;;  %v1696_v8 = vsel %vm1693_vm4, %v1695_v54, %v1691_v30  ;;  %v1709_v52 = vand.u32 2147483648, %v9430_v36  ;;  %3567 = vmatpush.bf16.msrb.mxu2 %v6444_v41 }
 0x254   : > { %11739 = vst [vmem:[#allocation117_spill] sm:$0xff] %v9472_v12  ;;  %v1700_v29 = vsub.f32 1.0, %v1699_v32  ;;  %v9492_v53 = vpack.c.bf16 %v1825_v56, %v1880_v0  ;;  %v9497_v12 = vld [vmem:[%s11357_s4 + $0x1b8] sm:$0xff]  ;;  %v1759_v18 = vmul.f32 %v1696_v8, %v9300_v37  ;;  %vm1704_vm10 = vweird.f32 %v6881_v10  ;;  %v9514_v8 = vld [vmem:[%s11357_s4 + $0x1b0] sm:$0xff] }
 0x255   : > { %11740 = vst [vmem:[#allocation118_spill] sm:$0xff] %v9476_v7  ;;  %v9490_v7 = vpop.f32.mrf.mxu1  ;;  %4026 = vmatpush.bf16.msra.mxu0 %v9497_v12  ;;  %vm1703_vm11 = vweird.f32 %v9430_v36  ;;  %v2116_v61 = vpack.c.bf16 %v1978_v3, %v1978_v3  ;;  %v1710_v41 = vor.u32 1.1754944e-38, %v1709_v52  ;;  %vm1708_vm14 = vcmp.eq.f32.partialorder %v1707_v5, 8.507059e+37 }
 0x256   : > { %11741 = vst [vmem:[#allocation119_spill] sm:$0xff] %v9484_v34  ;;  %v2825_v25 = vpop.f32.mrf.mxu3  ;;  %v1701_v54 = vmul.f32 %v6881_v10, %v1700_v29  ;;  %v2954_v56 = vpop.f32.mrf.mxu2  ;;  %v2452_v32 = vunpack.c.l.b16 %v9492_v53  ;;  %v11482_v30 = vunpack.c.h.b16 %v9492_v53  ;;  %v1874_v31 = vrot.slane %v1759_v18, 7  ;;  %vm1705_vm13 = vmor %vm1703_vm11, %vm1704_vm10 }
 0x257   : > { %11742 = vst [vmem:[#allocation120_spill] sm:$0xff] %v9497_v12  ;;  %v1972_v0 = vrot.slane %v1759_v18, 1  ;;  %v9509_v37 = vadd.f32 %v2954_v56, %v2825_v25  ;;  %v11800_v12 = vld [vmem:[#allocation23_spill] sm:$0xff] }
 0x258   : > { %11744 = vst [vmem:[#allocation122_spill] sm:$0xff] %v9514_v8  ;;  %v1702_v29 = vadd.f32 %v6881_v10, %v1701_v54  ;;  %v2527_v34 = vpack.c.b16 %v2452_v32, %v2449_v46  ;;  %v2528_v50 = vpack.c.b16 %v11482_v30, %v2450_v42  ;;  %v1879_v51 = vsel %vm1876_vm6, %v1873_v16, %v1874_v31  ;;  %v9532_v16 = vld [vmem:[%s11357_s4 + $0x1a8] sm:$0xff] }
 0x259   : > { %11743 = vst [vmem:[#allocation121_spill] sm:$0xff] %v9509_v37  ;;  %v1977_v36 = vsel %vm1974_vm7, %v1971_v49, %v1972_v0  ;;  %v2119_v56 = vpack.c.bf16 %v1759_v18, %v1879_v51  ;;  %4027 = vmatpush.bf16.msra.mxu0 %v9514_v8  ;;  %v11799_v8 = vld [vmem:[#allocation26_spill] sm:$0xff] }
 0x25a   : > { %v1706_v25 = vsel %vm1705_vm13, %v6881_v10, %v1702_v29  ;;  %v2118_v46 = vpack.c.bf16 %v1977_v36, %v1977_v36  ;;  %v9524_v42 = vpop.f32.mrf.mxu0  ;;  %11745 = vst [vmem:[#allocation123_spill] sm:$0xff] %v9532_v16  ;;  %v9534_v10 = vunpack.c.l.b16 %v2116_v61  ;;  %v6459_v61 = vld [vmem:[%s11357_s4 + $0xb8] sm:$0xff] }
 0x25b   : > { %2867 = vmatmul.bf16.gmra.mxu3 %v2527_v34  ;;  %v1711_v54 = vsel %vm1708_vm14, %v1710_v41, %v1706_v25  ;;  %v2455_v30 = vunpack.c.l.b16 %v2119_v56 }
 0x25c   : > { %2996 = vmatmul.bf16.gmra.mxu2 %v2528_v50  ;;  %v1760_v3 = vmul.f32 %v1711_v54, %v9352_v39  ;;  %11746 = vst [vmem:[#allocation124_spill] sm:$0xff] %v9534_v10  ;;  %v9536_v49 = vunpack.c.l.b16 %v2118_v46  ;;  %2926 = vmatmul.bf16.gmra.mxu0 %v8047_v23  ;;  %v9559_v29 = vpack.c.b16 %v9534_v10, %v9467_v60  ;;  %v11775_v10 = vld [vmem:[#allocation5_spill] sm:$0xff]  ;;  %v11782_v60 = vld [vmem:[#allocation7_spill] sm:$0xff] }
 0x25d   : > { %v9527_v52 = vpop.f32.mrf.mxu1  ;;  %v9541_v39 = vpack.c.b16 %v2455_v30, %v2452_v32  ;;  %4028 = vmatpush.bf16.msra.mxu0 %v9532_v16  ;;  %3689 = vmatpush.bf16.msra.mxu3 %v6459_v61  ;;  %v11795_v16 = vld [vmem:[#allocation14_spill] sm:$0xff] }
 0x25e   : > { %v2828_v51 = vpop.f32.mrf.mxu3  ;;  %11747 = vst [vmem:[#allocation125_spill] sm:$0xff] %v9536_v49  ;;  %v1827_v50 = vsel %vm1770_vm12, %v1760_v3, 0.0  ;;  %v2957_v34 = vpop.f32.mrf.mxu2  ;;  %3484 = vmatmul.bf16.gmra.mxu1 %v7963_v27 }
 0x25f   : > { %11748 = vst [vmem:[#allocation126_spill] sm:$0xff] %v9541_v39  ;;  %v1875_v18 = vrot.slane %v1827_v50, 7  ;;  %v9544_v5 = vadd.f32 %v2957_v34, %v2828_v51  ;;  %v1973_v32 = vrot.slane %v1827_v50, 1 }
 0x260   : > { %11751 = vst [vmem:[#allocation129_spill] sm:$0xff] %v9559_v29  ;;  %v2456_v29 = vunpack.c.h.b16 %v2119_v56 }
 0x261   : > { %11749 = vst [vmem:[#allocation127_spill] sm:$0xff] %v9544_v5  ;;  %v1878_v41 = vsel %vm1876_vm6, %v1874_v31, %v1875_v18  ;;  %v1975_v36 = vsel %vm1974_vm7, %v1973_v32, 0.0  ;;  %v1976_v25 = vsel %vm1974_vm7, %v1972_v0, %v1973_v32  ;;  %v1877_v46 = vsel %vm1876_vm6, %v1875_v18, 0.0  ;;  %4029 = vmatpush.bf16.msra.mxu0 %v9553_v21  ;;  %v9577_v0 = vld [vmem:[%s11357_s4 + $0x198] sm:$0xff] }
 0x262   : > { %v2121_v54 = vpack.c.bf16 %v1827_v50, %v1878_v41  ;;  %v2120_v3 = vpack.c.bf16 %v1976_v25, %v1976_v25  ;;  %v2122_v51 = vpack.c.bf16 %v1975_v36, %v1975_v36  ;;  %v2123_v34 = vpack.c.bf16 0.0, %v1877_v46  ;;  %v9569_v23 = vpop.f32.mrf.mxu0  ;;  %11752 = vst [vmem:[#allocation130_spill] sm:$0xff] %v9577_v0  ;;  %v9589_v46 = vld [vmem:[%s11357_s4 + $0x190] sm:$0xff] }
 0x263   : > { %11756 = vst [vmem:[#allocation134_spill] sm:$0xff] %v9589_v46 }
 0x264   : > { %v2458_v61 = vunpack.c.l.b16 %v2121_v54  ;;  %v2459_v39 = vunpack.c.h.b16 %v2121_v54  ;;  %v9579_v59 = vunpack.c.l.b16 %v2120_v3  ;;  %v9581_v18 = vunpack.c.l.b16 %v2122_v51 }
 0x265   : > { %v9572_v31 = vpop.f32.mrf.mxu1  ;;  %v3868_v32 = vunpack.c.l.b16 %v2123_v34  ;;  %4030 = vmatpush.bf16.msra.mxu0 %v9577_v0  ;;  %v11758_v51 = vunpack.c.h.b16 %v9492_v53  ;;  %v3869_v53 = vunpack.c.h.b16 %v2123_v34 }
 0x266   : > { %11753 = vst [vmem:[#allocation131_spill] sm:$0xff] %v9579_v59  ;;  %v2830_v50 = vpop.f32.mrf.mxu3  ;;  %v2959_v41 = vpop.f32.mrf.mxu2  ;;  %v2530_v36 = vpack.c.b16 %v2458_v61, %v2455_v30  ;;  %v2531_v56 = vpack.c.b16 %v2459_v39, %v2456_v29 }
 0x267   : > { %11754 = vst [vmem:[#allocation132_spill] sm:$0xff] %v9581_v18  ;;  %v9583_v25 = vadd.f32 %v2959_v41, %v2830_v50  ;;  %v9593_v3 = vpack.c.b16 %v3868_v32, %v2458_v61  ;;  %v9597_v5 = vpack.c.b16 %v2456_v29, %v11758_v51  ;;  %v9607_v41 = vld [vmem:[%s11357_s4 + $0x188] sm:$0xff]  ;;  %v6507_v32 = vld [vmem:[%s11357_s4 + $0x238] sm:$0xff] }
 0x268   : > { %11760 = vst [vmem:[#allocation137_spill] sm:$0xff] %v9607_v41  ;;  %4284 = vmatpush.bf16.msra.mxu2 %v6507_v32  ;;  %v6499_v51 = vld [vmem:[%s11357_s4 + $0x1f8] sm:$0xff]  ;;  %v11767_v32 = vld [vmem:[#allocation6_spill] sm:$0xff] }
 0x269   : > { %11755 = vst [vmem:[#allocation133_spill] sm:$0xff] %v9583_v25  ;;  %4031 = vmatpush.bf16.msra.mxu0 %v9589_v46  ;;  %4155 = vmatpush.bf16.msra.mxu1 %v6499_v51 }
 0x26a   : > { %11757 = vst [vmem:[#allocation135_spill] sm:$0xff] %v9593_v3  ;;  %v9599_v30 = vpop.f32.mrf.mxu0 }
 0x26b   : > { %11759 = vst [vmem:[#allocation136_spill] sm:$0xff] %v9597_v5  ;;  %2872 = vmatmul.bf16.gmra.mxu3 %v2530_v36  ;;  %v9620_v36 = vld [vmem:[%s11357_s4 + $0x180] sm:$0xff] }
 0x26c   : > { %3001 = vmatmul.bf16.gmra.mxu2 %v2531_v56  ;;  %2931 = vmatmul.bf16.gmra.mxu0 %v8141_v2  ;;  %11762 = vst [vmem:[#allocation139_spill] sm:$0xff] %v9620_v36  ;;  %v9622_v56 = vpack.c.b16 %v3869_v53, %v2459_v39  ;;  %v11765_v39 = vld [vmem:[#allocation2_spill] sm:$0xff]  ;;  %v11768_v2 = vld [vmem:[#allocation4_spill] sm:$0xff] }
 0x26d   : > { %v9602_v50 = vpop.f32.mrf.mxu1  ;;  %4032 = vmatpush.bf16.msra.mxu0 %v9607_v41  ;;  %v9638_v53 = vpack.c.b16 %v11765_v39, %v11765_v39  ;;  %v11783_v41 = vld [vmem:[#allocation56_spill] sm:$0xff] }
 0x26e   : > { %v2833_v54 = vpop.f32.mrf.mxu3  ;;  %v2962_v61 = vpop.f32.mrf.mxu2  ;;  %3489 = vmatmul.bf16.gmra.mxu1 %v8082_v44  ;;  %11763 = vst [vmem:[#allocation140_spill] sm:$0xff] %v9622_v56  ;;  %v11769_v56 = vpack.c.b16 %v11767_v32, %v11768_v2  ;;  %v11773_v2 = vld [vmem:[#allocation8_spill] sm:$0xff] }
 0x26f   : > { %v9611_v29 = vadd.f32 %v2962_v61, %v2833_v54  ;;  %11766 = vst [vmem:[#allocation2_spill] sm:$0xff] %v9638_v53 }
 0x271   : > { %11761 = vst [vmem:[#allocation138_spill] sm:$0xff] %v9611_v29  ;;  %4033 = vmatpush.bf16.msra.mxu0 %v9620_v36  ;;  %v11780_v36 = vld [vmem:[#allocation11_spill] sm:$0xff] }
 0x272   : > { %v9626_v34 = vpop.f32.mrf.mxu0 }
 0x275   : > { %v9629_v54 = vpop.f32.mrf.mxu1 }
 0x276   : > { %v2835_v61 = vpop.f32.mrf.mxu3  ;;  %v2964_v5 = vpop.f32.mrf.mxu2 }
 0x277   : > { %v9634_v3 = vadd.f32 %v2964_v5, %v2835_v61 }
 0x279   : > { %11764 = vst [vmem:[#allocation141_spill] sm:$0xff] %v9634_v3 }
 0x27a   : > { %v9644_v29 = vpop.f32.mrf.mxu0 }
 0x27b   : > { %3015 = vmatmul.bf16.vlgmr.msrb.gmra.mxu3 %v11769_v56 }
 0x27c   : > { %3568 = vmatmul.bf16.vlgmr.msrb.gmra.mxu2 %v9638_v53  ;;  %2936 = vmatmul.bf16.gmra.mxu0 %v8271_v62  ;;  %v11772_v53 = vld [vmem:[#allocation9_spill] sm:$0xff] }
 0x27d   : > { %v9646_v59 = vpop.f32.mrf.mxu1  ;;  %v11774_v3 = vpack.c.b16 %v11772_v53, %v11773_v2 }
 0x27e   : > { %v2838_v18 = vpop.f32.mrf.mxu3  ;;  %v2967_v25 = vpop.f32.mrf.mxu2  ;;  %3494 = vmatmul.bf16.gmra.mxu1 %v8198_v63 }
 0x27f   : > { %v9650_v5 = vadd.f32 %v2967_v25, %v2838_v18 }
 0x281   : > { %11770 = vst [vmem:[#allocation142_spill] sm:$0xff] %v9650_v5  ;;  %v11776_v5 = vld [vmem:[#allocation50_spill] sm:$0xff] }
 0x282   : > { %v9652_v51 = vpop.f32.mrf.mxu0 }
 0x285   : > { %v9654_v61 = vpop.f32.mrf.mxu1 }
 0x286   : > { %v2840_v39 = vpop.f32.mrf.mxu3  ;;  %v2969_v56 = vpop.f32.mrf.mxu2 }
 0x287   : > { %v9656_v32 = vadd.f32 %v2969_v56, %v2840_v39  ;;  %v6458_v39 = vld [vmem:[%s11357_s4 + $0xb0] sm:$0xff] }
 0x288   : > { %3690 = vmatpush.bf16.msra.mxu3 %v6458_v39 }
 0x289   : > { %11771 = vst [vmem:[#allocation143_spill] sm:$0xff] %v9656_v32  ;;  %v11779_v32 = vld [vmem:[#allocation13_spill] sm:$0xff] }
 0x28a   : > { %v9662_v49 = vpop.f32.mrf.mxu0 }
 0x28b   : > { %3020 = vmatmul.bf16.gmra.mxu3 %v11774_v3 }
 0x28c   : > { %3573 = vmatmul.bf16.gmra.mxu2 %v11775_v10  ;;  %4034 = vmatmul.bf16.vlgmr.msra.gmra.mxu0 %v7425_v4  ;;  %v11781_v4 = vpack.c.b16 %v11779_v32, %v11780_v36  ;;  %v6498_v32 = vld [vmem:[%s11357_s4 + $0x1f0] sm:$0xff] }
 0x28d   : > { %v9664_v62 = vpop.f32.mrf.mxu1  ;;  %4156 = vmatpush.bf16.msra.mxu1 %v6498_v32 }
 0x28e   : > { %v2843_v18 = vpop.f32.mrf.mxu3  ;;  %v2972_v25 = vpop.f32.mrf.mxu2  ;;  %3499 = vmatmul.bf16.gmra.mxu1 %v11776_v5 }
 0x28f   : > { %v9668_v37 = vadd.f32 %v2972_v25, %v2843_v18 }
 0x291   : > { %11777 = vst [vmem:[#allocation9_spill] sm:$0xff] %v9668_v37 }
 0x292   : > { %v9673_v3 = vpop.f32.mrf.mxu0 }
 0x295   : > { %v9675_v10 = vpop.f32.mrf.mxu1 }
 0x296   : > { %v2845_v53 = vpop.f32.mrf.mxu3  ;;  %v2974_v56 = vpop.f32.mrf.mxu2 }
 0x297   : > { %v9677_v2 = vadd.f32 %v2974_v56, %v2845_v53  ;;  %v6506_v53 = vld [vmem:[%s11357_s4 + $0x230] sm:$0xff] }
 0x298   : > { %4285 = vmatpush.bf16.msra.mxu2 %v6506_v53 }
 0x299   : > { %11778 = vst [vmem:[#allocation5_spill] sm:$0xff] %v9677_v2  ;;  %v11789_v2 = vld [vmem:[#allocation10_spill] sm:$0xff] }
 0x29a   : > { %v9683_v18 = vpop.f32.mrf.mxu0 }
 0x29b   : > { %3025 = vmatmul.bf16.gmra.mxu3 %v11781_v4 }
 0x29c   : > { %3578 = vmatmul.bf16.gmra.mxu2 %v11782_v60  ;;  %4039 = vmatmul.bf16.gmra.mxu0 %v7515_v26 }
 0x29d   : > { %v9685_v25 = vpop.f32.mrf.mxu1 }
 0x29e   : > { %v2848_v37 = vpop.f32.mrf.mxu3  ;;  %v2977_v39 = vpop.f32.mrf.mxu2  ;;  %3504 = vmatmul.bf16.gmra.mxu1 %v11783_v41 }
 0x29f   : > { %v9689_v46 = vadd.f32 %v2977_v39, %v2848_v37  ;;  %v11786_v37 = vld [vmem:[#allocation16_spill] sm:$0xff]  ;;  %v11787_v39 = vld [vmem:[#allocation17_spill] sm:$0xff] }
 0x2a1   : > { %11784 = vst [vmem:[#allocation50_spill] sm:$0xff] %v9689_v46  ;;  %v11788_v46 = vpack.c.b16 %v11786_v37, %v11787_v39  ;;  %v11792_v39 = vld [vmem:[#allocation19_spill] sm:$0xff] }
 0x2a2   : > { %v9694_v36 = vpop.f32.mrf.mxu0 }
 0x2a5   : > { %v9696_v60 = vpop.f32.mrf.mxu1 }
 0x2a6   : > { %v2850_v56 = vpop.f32.mrf.mxu3  ;;  %v2979_v4 = vpop.f32.mrf.mxu2 }
 0x2a7   : > { %v9701_v26 = vadd.f32 %v2979_v4, %v2850_v56 }
 0x2a9   : > { %11785 = vst [vmem:[#allocation13_spill] sm:$0xff] %v9701_v26  ;;  %v11793_v26 = vld [vmem:[#allocation18_spill] sm:$0xff] }
 0x2aa   : > { %v9707_v53 = vpop.f32.mrf.mxu0  ;;  %v11794_v14 = vpack.c.b16 %v11792_v39, %v11793_v26 }
 0x2ab   : > { %3030 = vmatmul.bf16.gmra.mxu3 %v11788_v46 }
 0x2ac   : > { %3583 = vmatmul.bf16.gmra.mxu2 %v11789_v2  ;;  %4044 = vmatmul.bf16.gmra.mxu0 %v7597_v43 }
 0x2ad   : > { %v9709_v0 = vpop.f32.mrf.mxu1 }
 0x2ae   : > { %v2853_v33 = vpop.f32.mrf.mxu3  ;;  %3509 = vmatmul.bf16.gmra.mxu1 %v8547_v38 }
 0x2af   : > { %v2982_v21 = vpop.f32.mrf.mxu2 }
 0x2b0   : > { %v9713_v22 = vadd.f32 %v2982_v21, %v2853_v33 }
 0x2b2   : > { %11790 = vst [vmem:[#allocation11_spill] sm:$0xff] %v9713_v22  ;;  %v9715_v32 = vpop.f32.mrf.mxu0 }
 0x2b5   : > { %v9717_v56 = vpop.f32.mrf.mxu1 }
 0x2b6   : > { %v2855_v4 = vpop.f32.mrf.mxu3 }
 0x2b7   : > { %v2984_v46 = vpop.f32.mrf.mxu2 }
 0x2b8   : > { %v9719_v37 = vadd.f32 %v2984_v46, %v2855_v4  ;;  %v6457_v4 = vld [vmem:[%s11357_s4 + $0xa8] sm:$0xff] }
 0x2b9   : > { %3691 = vmatpush.bf16.msra.mxu3 %v6457_v4 }
 0x2ba   : > { %11791 = vst [vmem:[#allocation7_spill] sm:$0xff] %v9719_v37  ;;  %v9725_v40 = vpop.f32.mrf.mxu0 }
 0x2bb   : > { %3035 = vmatmul.bf16.gmra.mxu3 %v11794_v14 }
 0x2bc   : > { %3588 = vmatmul.bf16.gmra.mxu2 %v11795_v16  ;;  %4049 = vmatmul.bf16.gmra.mxu0 %v7659_v6  ;;  %v11801_v6 = vpack.c.b16 %v11799_v8, %v11800_v12  ;;  %v6497_v8 = vld [vmem:[%s11357_s4 + $0x1e8] sm:$0xff] }
 0x2bd   : > { %v9727_v43 = vpop.f32.mrf.mxu1  ;;  %4157 = vmatpush.bf16.msra.mxu1 %v6497_v8 }
 0x2be   : > { %v2858_v33 = vpop.f32.mrf.mxu3  ;;  %3514 = vmatmul.bf16.gmra.mxu1 %v8659_v1 }
 0x2bf   : > { %v2987_v21 = vpop.f32.mrf.mxu2 }
 0x2c0   : > { %v9731_v22 = vadd.f32 %v2987_v21, %v2858_v33 }
 0x2c2   : > { %11796 = vst [vmem:[#allocation56_spill] sm:$0xff] %v9731_v22  ;;  %v9736_v14 = vpop.f32.mrf.mxu0 }
 0x2c5   : > { %v9738_v26 = vpop.f32.mrf.mxu1 }
 0x2c6   : > { %11797 = vst [vmem:[#allocation16_spill] sm:$0xff] %v9738_v26  ;;  %v2860_v46 = vpop.f32.mrf.mxu3 }
 0x2c7   : > { %v2989_v39 = vpop.f32.mrf.mxu2 }
 0x2c8   : > { %v9740_v37 = vadd.f32 %v2989_v39, %v2860_v46  ;;  %v6505_v46 = vld [vmem:[%s11357_s4 + $0x228] sm:$0xff] }
 0x2c9   : > { %4286 = vmatpush.bf16.msra.mxu2 %v6505_v46 }
 0x2ca   : > { %11798 = vst [vmem:[#allocation17_spill] sm:$0xff] %v9740_v37  ;;  %v9748_v21 = vpop.f32.mrf.mxu0 }
 0x2cb   : > { %3040 = vmatmul.bf16.gmra.mxu3 %v11801_v6 }
 0x2cc   : > { %3593 = vmatmul.bf16.gmra.mxu2 %v11802_v15  ;;  %4054 = vmatmul.bf16.gmra.mxu0 %v7807_v9 }
 0x2cd   : > { %v9746_v33 = vpop.f32.mrf.mxu1 }
 0x2ce   : > { %11803 = vst [vmem:[#allocation10_spill] sm:$0xff] %v9746_v33  ;;  %v2863_v22 = vpop.f32.mrf.mxu3  ;;  %3519 = vmatmul.bf16.gmra.mxu1 %v8763_v19 }
 0x2cf   : > { %v2992_v4 = vpop.f32.mrf.mxu2 }
 0x2d0   : > { %v9752_v24 = vadd.f32 %v2992_v4, %v2863_v22  ;;  %v11808_v22 = vld [vmem:[#allocation28_spill] sm:$0xff]  ;;  %v11809_v4 = vld [vmem:[#allocation29_spill] sm:$0xff] }
 0x2d2   : > { %11804 = vst [vmem:[#allocation19_spill] sm:$0xff] %v9752_v24  ;;  %v9762_v6 = vpop.f32.mrf.mxu0  ;;  %v11810_v24 = vpack.c.b16 %v11808_v22, %v11809_v4  ;;  %v11817_v4 = vld [vmem:[#allocation33_spill] sm:$0xff] }
 0x2d3   : > { %11806 = vst [vmem:[#allocation14_spill] sm:$0xff] %v9762_v6 }
 0x2d5   : > { %v9757_v12 = vpop.f32.mrf.mxu1 }
 0x2d6   : > { %11805 = vst [vmem:[#allocation18_spill] sm:$0xff] %v9757_v12  ;;  %v2865_v39 = vpop.f32.mrf.mxu3 }
 0x2d7   : > { %v2994_v37 = vpop.f32.mrf.mxu2 }
 0x2d8   : > { %v9764_v9 = vadd.f32 %v2994_v37, %v2865_v39 }
 0x2da   : > { %11807 = vst [vmem:[#allocation26_spill] sm:$0xff] %v9764_v9  ;;  %v9776_v6 = vpop.f32.mrf.mxu0  ;;  %v11818_v9 = vld [vmem:[#allocation32_spill] sm:$0xff] }
 0x2db   : > { %3045 = vmatmul.bf16.gmra.mxu3 %v11810_v24 }
 0x2dc   : > { %3598 = vmatmul.bf16.gmra.mxu2 %v11811_v20  ;;  %4059 = vmatmul.bf16.gmra.mxu0 %v7861_v45  ;;  %v11820_v20 = vld [vmem:[#allocation25_spill] sm:$0xff] }
 0x2dd   : > { %v9770_v46 = vpop.f32.mrf.mxu1 }
 0x2de   : > { %11812 = vst [vmem:[#allocation23_spill] sm:$0xff] %v9770_v46  ;;  %v2868_v12 = vpop.f32.mrf.mxu3  ;;  %3524 = vmatmul.bf16.gmra.mxu1 %v8859_v47  ;;  %v11819_v46 = vpack.c.b16 %v11817_v4, %v11818_v9 }
 0x2df   : > { %v2997_v33 = vpop.f32.mrf.mxu2 }
 0x2e0   : > { %v9774_v26 = vadd.f32 %v2997_v33, %v2868_v12 }
 0x2e2   : > { %11813 = vst [vmem:[#allocation15_spill] sm:$0xff] %v9774_v26  ;;  %v9782_v24 = vpop.f32.mrf.mxu0 }
 0x2e3   : > { %11816 = vst [vmem:[#allocation144_spill] sm:$0xff] %v9782_v24 }
 0x2e5   : > { %v9778_v37 = vpop.f32.mrf.mxu1 }
 0x2e6   : > { %11814 = vst [vmem:[#allocation28_spill] sm:$0xff] %v9778_v37  ;;  %v2870_v8 = vpop.f32.mrf.mxu3  ;;  %v11827_v37 = vld [vmem:[#allocation38_spill] sm:$0xff] }
 0x2e7   : > { %v2999_v39 = vpop.f32.mrf.mxu2 }
 0x2e8   : > { %v9780_v22 = vadd.f32 %v2999_v39, %v2870_v8  ;;  %v6456_v8 = vld [vmem:[%s11357_s4 + $0xa0] sm:$0xff] }
 0x2e9   : > { %3692 = vmatpush.bf16.msra.mxu3 %v6456_v8 }
 0x2ea   : > { %11815 = vst [vmem:[#allocation29_spill] sm:$0xff] %v9780_v22  ;;  %v9797_v39 = vpop.f32.mrf.mxu0 }
 0x2eb   : > { %3050 = vmatmul.bf16.gmra.mxu3 %v11819_v46  ;;  %11823 = vst [vmem:[#allocation145_spill] sm:$0xff] %v9797_v39 }
 0x2ec   : > { %3603 = vmatmul.bf16.gmra.mxu2 %v11820_v20  ;;  %4064 = vmatmul.bf16.gmra.mxu0 %v7963_v27  ;;  %v11829_v20 = vld [vmem:[#allocation27_spill] sm:$0xff] }
 0x2ed   : > { %v9788_v45 = vpop.f32.mrf.mxu1 }
 0x2ee   : > { %11821 = vst [vmem:[#allocation33_spill] sm:$0xff] %v9788_v45  ;;  %v2873_v33 = vpop.f32.mrf.mxu3  ;;  %3529 = vmatmul.bf16.gmra.mxu1 %v8954_v48  ;;  %v11826_v45 = vld [vmem:[#allocation39_spill] sm:$0xff] }
 0x2ef   : > { %v3002_v12 = vpop.f32.mrf.mxu2  ;;  %v11828_v27 = vpack.c.b16 %v11826_v45, %v11827_v37  ;;  %v6504_v37 = vld [vmem:[%s11357_s4 + $0x220] sm:$0xff] }
 0x2f0   : > { %v9792_v26 = vadd.f32 %v3002_v12, %v2873_v33  ;;  %v11830_v33 = vld [vmem:[#allocation34_spill] sm:$0xff]  ;;  %4287 = vmatpush.bf16.msra.mxu2 %v6504_v37  ;;  %v11836_v37 = vld [vmem:[#allocation40_spill] sm:$0xff] }
 0x2f1   : > { %v2888_v12 = vadd.f32 %v9524_v42, %v11830_v33  ;;  %v11832_v42 = vld [vmem:[#allocation35_spill] sm:$0xff] }
 0x2f2   : > { %11822 = vst [vmem:[#allocation32_spill] sm:$0xff] %v9792_v26  ;;  %v9811_v24 = vpop.f32.mrf.mxu0 }
 0x2f5   : > { %v9799_v9 = vpop.f32.mrf.mxu1 }
 0x2f6   : > { %11824 = vst [vmem:[#allocation146_spill] sm:$0xff] %v9799_v9  ;;  %v2875_v46 = vpop.f32.mrf.mxu3 }
 0x2f7   : > { %v3004_v4 = vpop.f32.mrf.mxu2 }
 0x2f8   : > { %v9801_v22 = vadd.f32 %v3004_v4, %v2875_v46  ;;  %v2890_v4 = vadd.f32 %v9569_v23, %v11832_v42  ;;  %v11838_v23 = vld [vmem:[#allocation31_spill] sm:$0xff]  ;;  %v11839_v42 = vld [vmem:[#allocation37_spill] sm:$0xff] }
 0x2fa   : > { %11825 = vst [vmem:[#allocation147_spill] sm:$0xff] %v9801_v22  ;;  %v9828_v22 = vpop.f32.mrf.mxu0 }
 0x2fb   : > { %3055 = vmatmul.bf16.gmra.mxu3 %v11828_v27 }
 0x2fc   : > { %3608 = vmatmul.bf16.gmra.mxu2 %v11829_v20  ;;  %4069 = vmatmul.bf16.gmra.mxu0 %v8082_v44  ;;  %v6496_v44 = vld [vmem:[%s11357_s4 + $0x1e0] sm:$0xff] }
 0x2fd   : > { %v9809_v26 = vpop.f32.mrf.mxu1  ;;  %4158 = vmatpush.bf16.msra.mxu1 %v6496_v44 }
 0x2fe   : > { %v3016_v8 = vpop.f32.mrf.mxu3  ;;  %3534 = vmatmul.bf16.gmra.mxu1 %v9056_v55 }
 0x2ff   : > { %v3017_v39 = vadd.f32 %v3016_v8, %v2888_v12  ;;  %v3569_v9 = vpop.f32.mrf.mxu2 }
 0x301   : > { %v3441_v45 = vadd.f32 %v9453_v11, %v3017_v39 }
 0x303   : > { %v9819_v46 = vadd.f32 %v3569_v9, %v3441_v45  ;;  %v11835_v9 = vld [vmem:[#allocation45_spill] sm:$0xff] }
 0x304   : > { %v11837_v45 = vpack.c.b16 %v11835_v9, %v11836_v37 }
 0x305   : > { %11831 = vst [vmem:[#allocation39_spill] sm:$0xff] %v9819_v46  ;;  %v9823_v27 = vpop.f32.mrf.mxu1  ;;  %v2893_v46 = vadd.f32 %v9599_v30, %v11839_v42 }
 0x306   : > { %11833 = vst [vmem:[#allocation38_spill] sm:$0xff] %v9823_v27  ;;  %v3018_v33 = vpop.f32.mrf.mxu3 }
 0x307   : > { %v3019_v12 = vadd.f32 %v3018_v33, %v2890_v4  ;;  %v3571_v8 = vpop.f32.mrf.mxu2 }
 0x309   : > { %v3443_v11 = vadd.f32 %v9490_v7, %v3019_v12  ;;  %v9844_v12 = vpop.f32.mrf.mxu0 }
 0x30b   : > { %v9831_v39 = vadd.f32 %v3571_v8, %v3443_v11  ;;  %3060 = vmatmul.bf16.gmra.mxu3 %v11837_v45  ;;  %v11840_v11 = vld [vmem:[#allocation41_spill] sm:$0xff] }
 0x30c   : > { %3613 = vmatmul.bf16.gmra.mxu2 %v11838_v23  ;;  %4074 = vmatmul.bf16.gmra.mxu0 %v8198_v63  ;;  %v2895_v9 = vadd.f32 %v9626_v34, %v11840_v11  ;;  %v11842_v63 = vld [vmem:[#allocation51_spill] sm:$0xff] }
 0x30d   : > { %11834 = vst [vmem:[#allocation27_spill] sm:$0xff] %v9831_v39  ;;  %v9839_v27 = vpop.f32.mrf.mxu1  ;;  %v11843_v39 = vpack.c.b16 %v8357_v57, %v11842_v63  ;;  %v6455_v57 = vld [vmem:[%s11357_s4 + $0x98] sm:$0xff] }
 0x30e   : > { %v3021_v4 = vpop.f32.mrf.mxu3  ;;  %3539 = vmatmul.bf16.gmra.mxu1 %v9163_v35  ;;  %3693 = vmatpush.bf16.msra.mxu3 %v6455_v57  ;;  %v11850_v57 = vld [vmem:[#allocation57_spill] sm:$0xff] }
 0x30f   : > { %v3022_v33 = vadd.f32 %v3021_v4, %v2893_v46  ;;  %v3574_v44 = vpop.f32.mrf.mxu2 }
 0x311   : > { %v3446_v7 = vadd.f32 %v9527_v52, %v3022_v33  ;;  %v11844_v52 = vld [vmem:[#allocation36_spill] sm:$0xff]  ;;  %v11845_v33 = vld [vmem:[#allocation46_spill] sm:$0xff] }
 0x313   : > { %v9846_v8 = vadd.f32 %v3574_v44, %v3446_v7  ;;  %v2898_v44 = vadd.f32 %v9644_v29, %v11845_v33  ;;  %v9861_v7 = vpop.f32.mrf.mxu0 }
 0x315   : > { %v9850_v37 = vpop.f32.mrf.mxu1 }
 0x316   : > { %v3023_v30 = vpop.f32.mrf.mxu3 }
 0x317   : > { %v3024_v45 = vadd.f32 %v3023_v30, %v2895_v9  ;;  %v3576_v42 = vpop.f32.mrf.mxu2 }
 0x319   : > { %v3448_v46 = vadd.f32 %v9572_v31, %v3024_v45  ;;  %v6495_v31 = vld [vmem:[%s11357_s4 + $0x1d8] sm:$0xff] }
 0x31a   : > { %4159 = vmatpush.bf16.msra.mxu1 %v6495_v31  ;;  %v11847_v45 = vld [vmem:[#allocation49_spill] sm:$0xff] }
 0x31b   : > { %v9853_v4 = vadd.f32 %v3576_v42, %v3448_v46  ;;  %3065 = vmatmul.bf16.gmra.mxu3 %v11843_v39  ;;  %v2900_v42 = vadd.f32 %v9652_v51, %v11847_v45  ;;  %v6494_v46 = vld [vmem:[%s11357_s4 + $0x1d0] sm:$0xff]  ;;  %v9883_v33 = vpop.f32.mrf.mxu0 }
 0x31c   : > { %3618 = vmatmul.bf16.gmra.mxu2 %v11844_v52  ;;  %4079 = vmatmul.bf16.gmra.mxu0 %v11776_v5  ;;  %v11849_v51 = vld [vmem:[#allocation60_spill] sm:$0xff] }
 0x31d   : > { %11841 = vst [vmem:[#allocation34_spill] sm:$0xff] %v9853_v4  ;;  %v9863_v34 = vpop.f32.mrf.mxu1  ;;  %v11851_v31 = vpack.c.b16 %v11849_v51, %v11850_v57  ;;  %v11853_v45 = vld [vmem:[#allocation52_spill] sm:$0xff]  ;;  %v11854_v51 = vld [vmem:[#allocation55_spill] sm:$0xff]  ;;  %v11856_v4 = vld [vmem:[#allocation61_spill] sm:$0xff] }
 0x31e   : > { %v3026_v11 = vpop.f32.mrf.mxu3  ;;  %3544 = vmatmul.bf16.gmra.mxu1 %v9262_v28 }
 0x31f   : > { %v3027_v9 = vadd.f32 %v3026_v11, %v2898_v44  ;;  %v3579_v30 = vpop.f32.mrf.mxu2  ;;  %4160 = vmatpush.bf16.msra.mxu1 %v6494_v46  ;;  %v6492_v46 = vld [vmem:[%s11357_s4 + $0x1c0] sm:$0xff] }
 0x321   : > { %v3451_v29 = vadd.f32 %v9602_v50, %v3027_v9  ;;  %v6493_v50 = vld [vmem:[%s11357_s4 + $0x1c8] sm:$0xff] }
 0x323   : > { %v9874_v39 = vadd.f32 %v3579_v30, %v3451_v29  ;;  %4161 = vmatpush.bf16.msra.mxu1 %v6493_v50  ;;  %v11852_v29 = vld [vmem:[#allocation42_spill] sm:$0xff]  ;;  %v9907_v50 = vpop.f32.mrf.mxu0 }
 0x325   : > { %11846 = vst [vmem:[#allocation35_spill] sm:$0xff] %v9874_v39  ;;  %v9878_v5 = vpop.f32.mrf.mxu1 }
 0x326   : > { %v3028_v63 = vpop.f32.mrf.mxu3 }
 0x327   : > { %v3029_v44 = vadd.f32 %v3028_v63, %v2900_v42  ;;  %v3581_v11 = vpop.f32.mrf.mxu2  ;;  %v2903_v42 = vadd.f32 %v9662_v49, %v11853_v45  ;;  %4162 = vmatpush.bf16.msra.mxu1 %v6492_v46 }
 0x329   : > { %v3453_v9 = vadd.f32 %v9629_v54, %v3029_v44 }
 0x32b   : > { %v9889_v30 = vadd.f32 %v3581_v11, %v3453_v9  ;;  %3070 = vmatmul.bf16.gmra.mxu3 %v11851_v31  ;;  %v6503_v11 = vld [vmem:[%s11357_s4 + $0x218] sm:$0xff]  ;;  %v9917_v46 = vpop.f32.mrf.mxu0 }
 0x32c   : > { %3623 = vmatmul.bf16.gmra.mxu2 %v11852_v29  ;;  %4084 = vmatmul.bf16.gmra.mxu0 %v11783_v41 }
 0x32d   : > { %11848 = vst [vmem:[#allocation45_spill] sm:$0xff] %v9889_v30  ;;  %v9897_v63 = vpop.f32.mrf.mxu1  ;;  %4288 = vmatpush.bf16.msra.mxu2 %v6503_v11 }
 0x32e   : > { %v3031_v39 = vpop.f32.mrf.mxu3  ;;  %3549 = vmatmul.bf16.gmra.mxu1 %v9382_v58 }
 0x32f   : > { %v3032_v54 = vadd.f32 %v3031_v39, %v2903_v42  ;;  %v3584_v44 = vpop.f32.mrf.mxu2  ;;  %v2905_v39 = vadd.f32 %v9673_v3, %v11854_v51 }
 0x331   : > { %v3456_v49 = vadd.f32 %v9646_v59, %v3032_v54  ;;  %v11857_v59 = vpack.c.b16 %v8593_v13, %v11856_v4  ;;  %v11858_v54 = vld [vmem:[#allocation53_spill] sm:$0xff]  ;;  %v11861_v13 = vld [vmem:[#allocation64_spill] sm:$0xff] }
 0x332   : > { %v2910_v4 = vadd.f32 %v9694_v36, %v11861_v13 }
 0x333   : > { %v9910_v9 = vadd.f32 %v3584_v44, %v3456_v49  ;;  %v11859_v44 = vld [vmem:[#allocation59_spill] sm:$0xff] }
 0x334   : > { %v2908_v3 = vadd.f32 %v9683_v18, %v11859_v44 }
 0x335   : > { %v9914_v57 = vpop.f32.mrf.mxu1 }
 0x336   : > { %v3033_v41 = vpop.f32.mrf.mxu3 }
 0x337   : > { %v3034_v31 = vadd.f32 %v3033_v41, %v2905_v39  ;;  %v3586_v45 = vpop.f32.mrf.mxu2 }
 0x339   : > { %v3458_v42 = vadd.f32 %v9654_v61, %v3034_v31  ;;  %v9936_v31 = vpop.f32.mrf.mxu0 }
 0x33b   : > { %v9919_v30 = vadd.f32 %v3586_v45, %v3458_v42  ;;  %3075 = vmatmul.bf16.gmra.mxu3 %v11857_v59 }
 0x33c   : > { %3628 = vmatmul.bf16.gmra.mxu2 %v11858_v54  ;;  %4089 = vmatmul.bf16.gmra.mxu0 %v8547_v38  ;;  %v11863_v38 = vld [vmem:[#allocation68_spill] sm:$0xff] }
 0x33d   : > { %11855 = vst [vmem:[#allocation40_spill] sm:$0xff] %v9919_v30  ;;  %v9927_v11 = vpop.f32.mrf.mxu1 }
 0x33e   : > { %v3036_v49 = vpop.f32.mrf.mxu3  ;;  %3554 = vmatmul.bf16.gmra.mxu1 %v9460_v17 }
 0x33f   : > { %v3037_v51 = vadd.f32 %v3036_v49, %v2908_v3  ;;  %v3589_v39 = vpop.f32.mrf.mxu2  ;;  %v11864_v49 = vld [vmem:[#allocation70_spill] sm:$0xff] }
 0x340   : > { %v11865_v30 = vpack.c.b16 %v11863_v38, %v11864_v49 }
 0x341   : > { %v3461_v61 = vadd.f32 %v9664_v62, %v3037_v51  ;;  %v11866_v62 = vld [vmem:[#allocation58_spill] sm:$0xff]  ;;  %v11867_v51 = vld [vmem:[#allocation67_spill] sm:$0xff] }
 0x342   : > { %v2913_v36 = vadd.f32 %v9707_v53, %v11867_v51  ;;  %v11869_v53 = vld [vmem:[#allocation69_spill] sm:$0xff] }
 0x343   : > { %v9932_v41 = vadd.f32 %v3589_v39, %v3461_v61  ;;  %v6454_v61 = vld [vmem:[%s11357_s4 + $0x90] sm:$0xff] }
 0x344   : > { %3694 = vmatpush.bf16.msra.mxu3 %v6454_v61  ;;  %v11871_v61 = vld [vmem:[#allocation78_spill] sm:$0xff] }
 0x345   : > { %11860 = vst [vmem:[#allocation31_spill] sm:$0xff] %v9932_v41  ;;  %v9938_v45 = vpop.f32.mrf.mxu1  ;;  %v11917_v41 = vld [vmem:[#allocation98_spill] sm:$0xff] }
 0x346   : > { %v3038_v18 = vpop.f32.mrf.mxu3 }
 0x347   : > { %v3039_v42 = vadd.f32 %v3038_v18, %v2910_v4  ;;  %v3591_v59 = vpop.f32.mrf.mxu2  ;;  %v9954_v4 = vpop.f32.mrf.mxu0 }
 0x349   : > { %v3463_v44 = vadd.f32 %v9675_v10, %v3039_v42 }
 0x34b   : > { %v9941_v3 = vadd.f32 %v3591_v59, %v3463_v44  ;;  %3080 = vmatmul.bf16.gmra.mxu3 %v11865_v30  ;;  %v2915_v59 = vadd.f32 %v9715_v32, %v11869_v53 }
 0x34c   : > { %3633 = vmatmul.bf16.gmra.mxu2 %v11866_v62  ;;  %4094 = vmatmul.bf16.gmra.mxu0 %v8659_v1 }
 0x34d   : > { %11862 = vst [vmem:[#allocation37_spill] sm:$0xff] %v9941_v3  ;;  %v9949_v39 = vpop.f32.mrf.mxu1 }
 0x34e   : > { %v3041_v13 = vpop.f32.mrf.mxu3  ;;  %4163 = vmatmul.bf16.vlgmr.msra.gmra.mxu1 %v11789_v2  ;;  %v11872_v2 = vld [vmem:[#allocation74_spill] sm:$0xff] }
 0x34f   : > { %v3042_v10 = vadd.f32 %v3041_v13, %v2913_v36  ;;  %v3594_v18 = vpop.f32.mrf.mxu2  ;;  %v9965_v3 = vpop.f32.mrf.mxu0  ;;  %v11873_v13 = vpack.c.b16 %v11871_v61, %v11872_v2 }
 0x351   : > { %v3466_v30 = vadd.f32 %v9685_v25, %v3042_v10  ;;  %v11874_v25 = vld [vmem:[#allocation62_spill] sm:$0xff]  ;;  %v11875_v10 = vld [vmem:[#allocation73_spill] sm:$0xff] }
 0x352   : > { %v2918_v32 = vadd.f32 %v9725_v40, %v11875_v10  ;;  %v11877_v40 = vld [vmem:[#allocation77_spill] sm:$0xff] }
 0x353   : > { %v9959_v42 = vadd.f32 %v3594_v18, %v3466_v30 }
 0x355   : > { %11868 = vst [vmem:[#allocation41_spill] sm:$0xff] %v9959_v42  ;;  %v9963_v44 = vpop.f32.mrf.mxu1 }
 0x356   : > { %v3043_v38 = vpop.f32.mrf.mxu3 }
 0x357   : > { %v3044_v49 = vadd.f32 %v3043_v38, %v2915_v59  ;;  %v3596_v51 = vpop.f32.mrf.mxu2 }
 0x359   : > { %v3468_v36 = vadd.f32 %v9696_v60, %v3044_v49  ;;  %v6502_v60 = vld [vmem:[%s11357_s4 + $0x210] sm:$0xff]  ;;  %v9984_v49 = vpop.f32.mrf.mxu0 }
 0x35a   : > { %4289 = vmatpush.bf16.msra.mxu2 %v6502_v60 }
 0x35b   : > { %v9968_v1 = vadd.f32 %v3596_v51, %v3468_v36  ;;  %3085 = vmatmul.bf16.gmra.mxu3 %v11873_v13  ;;  %v2920_v36 = vadd.f32 %v9736_v14, %v11877_v40 }
 0x35c   : > { %3638 = vmatmul.bf16.gmra.mxu2 %v11874_v25  ;;  %4099 = vmatmul.bf16.gmra.mxu0 %v8763_v19 }
 0x35d   : > { %11870 = vst [vmem:[#allocation51_spill] sm:$0xff] %v9968_v1  ;;  %v9976_v18 = vpop.f32.mrf.mxu1 }
 0x35e   : > { %v3046_v30 = vpop.f32.mrf.mxu3  ;;  %4168 = vmatmul.bf16.gmra.mxu1 %v11795_v16 }
 0x35f   : > { %v3047_v53 = vadd.f32 %v3046_v30, %v2918_v32  ;;  %v3599_v59 = vpop.f32.mrf.mxu2  ;;  %v11879_v32 = vld [vmem:[#allocation84_spill] sm:$0xff] }
 0x360   : > { %v11880_v30 = vld [vmem:[#allocation80_spill] sm:$0xff] }
 0x361   : > { %v3471_v38 = vadd.f32 %v9709_v0, %v3047_v53  ;;  %v11881_v0 = vpack.c.b16 %v11879_v32, %v11880_v30  ;;  %v11882_v53 = vld [vmem:[#allocation71_spill] sm:$0xff] }
 0x363   : > { %v9986_v51 = vadd.f32 %v3599_v59, %v3471_v38  ;;  %v11883_v59 = vld [vmem:[#allocation79_spill] sm:$0xff]  ;;  %v10001_v38 = vpop.f32.mrf.mxu0 }
 0x364   : > { %v2923_v60 = vadd.f32 %v9748_v21, %v11883_v59 }
 0x365   : > { %11876 = vst [vmem:[#allocation36_spill] sm:$0xff] %v9986_v51  ;;  %v9990_v61 = vpop.f32.mrf.mxu1 }
 0x366   : > { %v3048_v2 = vpop.f32.mrf.mxu3 }
 0x367   : > { %v3049_v19 = vadd.f32 %v3048_v2, %v2920_v36  ;;  %v3601_v13 = vpop.f32.mrf.mxu2 }
 0x369   : > { %v3473_v16 = vadd.f32 %v9717_v56, %v3049_v19 }
 0x36b   : > { %v9993_v10 = vadd.f32 %v3601_v13, %v3473_v16  ;;  %3090 = vmatmul.bf16.gmra.mxu3 %v11881_v0  ;;  %v11885_v13 = vld [vmem:[#allocation83_spill] sm:$0xff]  ;;  %v11886_v16 = vld [vmem:[#allocation14_spill] sm:$0xff]  ;;  %v10014_v0 = vpop.f32.mrf.mxu0 }
 0x36c   : > { %3643 = vmatmul.bf16.gmra.mxu2 %v11882_v53  ;;  %4104 = vmatmul.bf16.gmra.mxu0 %v8859_v47  ;;  %v2925_v32 = vadd.f32 %v11886_v16, %v11885_v13  ;;  %11887 = vst [vmem:[#allocation60_spill] sm:$0xff] %v10014_v0  ;;  %v11890_v47 = vld [vmem:[#allocation86_spill] sm:$0xff]  ;;  %v6453_v13 = vld [vmem:[%s11357_s4 + $0x88] sm:$0xff] }
 0x36d   : > { %11878 = vst [vmem:[#allocation46_spill] sm:$0xff] %v9993_v10  ;;  %v10003_v14 = vpop.f32.mrf.mxu1  ;;  %3695 = vmatpush.bf16.msra.mxu3 %v6453_v13 }
 0x36e   : > { %v3051_v40 = vpop.f32.mrf.mxu3  ;;  %4173 = vmatmul.bf16.gmra.mxu1 %v11802_v15  ;;  %v11891_v15 = vld [vmem:[#allocation88_spill] sm:$0xff] }
 0x36f   : > { %v3052_v36 = vadd.f32 %v3051_v40, %v2923_v60  ;;  %v3604_v2 = vpop.f32.mrf.mxu2  ;;  %v11888_v60 = vld [vmem:[#allocation16_spill] sm:$0xff]  ;;  %v11892_v1 = vpack.c.b16 %v11890_v47, %v11891_v15 }
 0x370   : > { %v11900_v47 = vld [vmem:[#allocation144_spill] sm:$0xff] }
 0x371   : > { %v3476_v56 = vadd.f32 %v9727_v43, %v3052_v36  ;;  %v11893_v43 = vld [vmem:[#allocation75_spill] sm:$0xff]  ;;  %v11894_v36 = vld [vmem:[#allocation85_spill] sm:$0xff] }
 0x373   : > { %v10008_v19 = vadd.f32 %v3604_v2, %v3476_v56  ;;  %v2928_v2 = vadd.f32 %v9776_v6, %v11894_v36  ;;  %v11899_v6 = vld [vmem:[#allocation87_spill] sm:$0xff] }
 0x374   : > { %v2930_v15 = vadd.f32 %v11900_v47, %v11899_v6 }
 0x375   : > { %11884 = vst [vmem:[#allocation49_spill] sm:$0xff] %v10008_v19  ;;  %v10012_v30 = vpop.f32.mrf.mxu1 }
 0x376   : > { %v3053_v21 = vpop.f32.mrf.mxu3 }
 0x377   : > { %v3054_v59 = vadd.f32 %v3053_v21, %v2925_v32  ;;  %v3606_v10 = vpop.f32.mrf.mxu2 }
 0x379   : > { %v3478_v40 = vadd.f32 %v11888_v60, %v3054_v59  ;;  %v11897_v59 = vld [vmem:[#allocation10_spill] sm:$0xff] }
 0x37b   : > { %v10017_v51 = vadd.f32 %v3606_v10, %v3478_v40  ;;  %3095 = vmatmul.bf16.gmra.mxu3 %v11892_v1  ;;  %v11895_v10 = vld [vmem:[#allocation20_spill] sm:$0xff]  ;;  %v10032_v1 = vpop.f32.mrf.mxu0 }
 0x37c   : > { %3648 = vmatmul.bf16.gmra.mxu2 %v11893_v43  ;;  %4109 = vmatmul.bf16.gmra.mxu0 %v8954_v48  ;;  %11896 = vst [vmem:[#allocation42_spill] sm:$0xff] %v10032_v1  ;;  %v11905_v1 = vld [vmem:[#allocation92_spill] sm:$0xff] }
 0x37d   : > { %11889 = vst [vmem:[#allocation57_spill] sm:$0xff] %v10017_v51  ;;  %v10025_v56 = vpop.f32.mrf.mxu1 }
 0x37e   : > { %v3056_v16 = vpop.f32.mrf.mxu3  ;;  %4178 = vmatmul.bf16.gmra.mxu1 %v11895_v10  ;;  %v11904_v10 = vld [vmem:[#allocation96_spill] sm:$0xff] }
 0x37f   : > { %v3057_v32 = vadd.f32 %v3056_v16, %v2928_v2  ;;  %v3609_v21 = vpop.f32.mrf.mxu2  ;;  %v11901_v16 = vld [vmem:[#allocation18_spill] sm:$0xff]  ;;  %v11906_v0 = vpack.c.b16 %v11904_v10, %v11905_v1  ;;  %v11911_v1 = vld [vmem:[#allocation23_spill] sm:$0xff] }
 0x381   : > { %v3481_v60 = vadd.f32 %v11897_v59, %v3057_v32  ;;  %v11907_v32 = vld [vmem:[#allocation81_spill] sm:$0xff] }
 0x382   : > { %v11909_v59 = vld [vmem:[#allocation145_spill] sm:$0xff] }
 0x383   : > { %v10035_v40 = vadd.f32 %v3609_v21, %v3481_v60  ;;  %v10042_v48 = vpop.f32.mrf.mxu0  ;;  %v11908_v21 = vld [vmem:[#allocation91_spill] sm:$0xff] }
 0x384   : > { %11902 = vst [vmem:[#allocation55_spill] sm:$0xff] %v10042_v48  ;;  %v2933_v60 = vadd.f32 %v11909_v59, %v11908_v21  ;;  %v11916_v48 = vld [vmem:[#allocation102_spill] sm:$0xff] }
 0x385   : > { %11898 = vst [vmem:[#allocation52_spill] sm:$0xff] %v10035_v40  ;;  %v10039_v36 = vpop.f32.mrf.mxu1 }
 0x386   : > { %v3058_v51 = vpop.f32.mrf.mxu3 }
 0x387   : > { %v3059_v19 = vadd.f32 %v3058_v51, %v2930_v15  ;;  %v3611_v2 = vpop.f32.mrf.mxu2 }
 0x389   : > { %v3483_v42 = vadd.f32 %v11901_v16, %v3059_v19  ;;  %v11910_v19 = vld [vmem:[#allocation25_spill] sm:$0xff]  ;;  %v11913_v16 = vld [vmem:[#allocation95_spill] sm:$0xff] }
 0x38a   : > { %v2935_v10 = vadd.f32 %v9811_v24, %v11913_v16 }
 0x38b   : > { %v10044_v13 = vadd.f32 %v3611_v2, %v3483_v42  ;;  %3100 = vmatmul.bf16.gmra.mxu3 %v11906_v0  ;;  %v6501_v42 = vld [vmem:[%s11357_s4 + $0x208] sm:$0xff]  ;;  %v10064_v21 = vpop.f32.mrf.mxu0 }
 0x38c   : > { %3653 = vmatmul.bf16.gmra.mxu2 %v11907_v32  ;;  %4114 = vmatmul.bf16.gmra.mxu0 %v9056_v55 }
 0x38d   : > { %11903 = vst [vmem:[#allocation61_spill] sm:$0xff] %v10044_v13  ;;  %v10052_v6 = vpop.f32.mrf.mxu1  ;;  %4290 = vmatpush.bf16.msra.mxu2 %v6501_v42  ;;  %v11920_v42 = vld [vmem:[#allocation97_spill] sm:$0xff] }
 0x38e   : > { %v3061_v47 = vpop.f32.mrf.mxu3  ;;  %4183 = vmatmul.bf16.gmra.mxu1 %v11910_v19  ;;  %v11914_v19 = vld [vmem:[#allocation28_spill] sm:$0xff]  ;;  %v2938_v24 = vadd.f32 %v9828_v22, %v11920_v42 }
 0x38f   : > { %v3062_v51 = vadd.f32 %v3061_v47, %v2933_v60  ;;  %v3614_v15 = vpop.f32.mrf.mxu2 }
 0x391   : > { %v3486_v0 = vadd.f32 %v11911_v1, %v3062_v51  ;;  %v11918_v51 = vpack.c.b16 %v11916_v48, %v11917_v41  ;;  %v11924_v48 = vld [vmem:[#allocation101_spill] sm:$0xff] }
 0x393   : > { %v10060_v2 = vadd.f32 %v3614_v15, %v3486_v0  ;;  %v11919_v15 = vld [vmem:[#allocation89_spill] sm:$0xff]  ;;  %v10079_v16 = vpop.f32.mrf.mxu0 }
 0x394   : > { %11921 = vst [vmem:[#allocation64_spill] sm:$0xff] %v10079_v16 }
 0x395   : > { %11912 = vst [vmem:[#allocation53_spill] sm:$0xff] %v10060_v2  ;;  %v10066_v59 = vpop.f32.mrf.mxu1 }
 0x396   : > { %v3063_v60 = vpop.f32.mrf.mxu3 }
 0x397   : > { %v3064_v55 = vadd.f32 %v3063_v60, %v2935_v10  ;;  %v3616_v47 = vpop.f32.mrf.mxu2 }
 0x399   : > { %v3488_v13 = vadd.f32 %v11914_v19, %v3064_v55 }
 0x39b   : > { %v10069_v40 = vadd.f32 %v3616_v47, %v3488_v13  ;;  %3105 = vmatmul.bf16.gmra.mxu3 %v11918_v51  ;;  %v11922_v13 = vld [vmem:[#allocation33_spill] sm:$0xff]  ;;  %v2940_v47 = vadd.f32 %v9844_v12, %v11924_v48  ;;  %v6452_v12 = vld [vmem:[%s11357_s4 + $0x80] sm:$0xff] }
 0x39c   : > { %3658 = vmatmul.bf16.gmra.mxu2 %v11919_v15  ;;  %4119 = vmatmul.bf16.gmra.mxu0 %v9163_v35  ;;  %v11927_v35 = vld [vmem:[#allocation105_spill] sm:$0xff] }
 0x39d   : > { %11915 = vst [vmem:[#allocation59_spill] sm:$0xff] %v10069_v40  ;;  %v10077_v1 = vpop.f32.mrf.mxu1  ;;  %v10090_v40 = vpop.f32.mrf.mxu0  ;;  %3696 = vmatpush.bf16.msra.mxu3 %v6452_v12 }
 0x39e   : > { %v3066_v0 = vpop.f32.mrf.mxu3  ;;  %4188 = vmatmul.bf16.gmra.mxu1 %v11829_v20  ;;  %v11928_v20 = vld [vmem:[#allocation106_spill] sm:$0xff] }
 0x39f   : > { %v3067_v10 = vadd.f32 %v3066_v0, %v2938_v24  ;;  %v3619_v60 = vpop.f32.mrf.mxu2  ;;  %v11925_v24 = vld [vmem:[#allocation146_spill] sm:$0xff]  ;;  %v11929_v16 = vpack.c.b16 %v11927_v35, %v11928_v20  ;;  %v11935_v35 = vld [vmem:[#allocation104_spill] sm:$0xff] }
 0x3a1   : > { %v3491_v55 = vadd.f32 %v11922_v13, %v3067_v10  ;;  %v11930_v10 = vld [vmem:[#allocation93_spill] sm:$0xff]  ;;  %v11931_v13 = vld [vmem:[#allocation103_spill] sm:$0xff] }
 0x3a3   : > { %v10084_v41 = vadd.f32 %v3619_v60, %v3491_v55 }
 0x3a5   : > { %11923 = vst [vmem:[#allocation68_spill] sm:$0xff] %v10084_v41  ;;  %v10088_v22 = vpop.f32.mrf.mxu1  ;;  %v11956_v41 = vld [vmem:[#allocation114_spill] sm:$0xff] }
 0x3a6   : > { %v3068_v19 = vpop.f32.mrf.mxu3 }
 0x3a7   : > { %v3069_v51 = vadd.f32 %v3068_v19, %v2940_v47  ;;  %v3621_v42 = vpop.f32.mrf.mxu2 }
 0x3a9   : > { %v3493_v0 = vadd.f32 %v11925_v24, %v3069_v51  ;;  %v10109_v51 = vpop.f32.mrf.mxu0  ;;  %v11934_v24 = vld [vmem:[#allocation122_spill] sm:$0xff] }
 0x3ab   : > { %v10093_v2 = vadd.f32 %v3621_v42, %v3493_v0  ;;  %3110 = vmatmul.bf16.gmra.mxu3 %v11929_v16  ;;  %v11932_v16 = vld [vmem:[#allocation120_spill] sm:$0xff] }
 0x3ac   : > { %3663 = vmatmul.bf16.gmra.mxu2 %v11930_v10  ;;  %4124 = vmatmul.bf16.gmra.mxu0 %v9262_v28  ;;  %v11936_v28 = vld [vmem:[#allocation38_spill] sm:$0xff] }
 0x3ad   : > { %11926 = vst [vmem:[#allocation70_spill] sm:$0xff] %v10093_v2  ;;  %v10105_v47 = vpop.f32.mrf.mxu1  ;;  %6667 = vmatpush.bf16.msrb.mxu3 %v11932_v16 }
 0x3ae   : > { %v3071_v60 = vpop.f32.mrf.mxu3  ;;  %4193 = vmatmul.bf16.gmra.mxu1 %v11838_v23  ;;  %v11937_v23 = vld [vmem:[#allocation123_spill] sm:$0xff] }
 0x3af   : > { %v3072_v55 = vadd.f32 %v3071_v60, %v11931_v13  ;;  %v3624_v48 = vpop.f32.mrf.mxu2 }
 0x3b1   : > { %v3496_v19 = vadd.f32 %v9809_v26, %v3072_v55  ;;  %6668 = vmatpush.bf16.msrb.mxu3 %v11934_v24  ;;  %v11939_v26 = vld [vmem:[#allocation112_spill] sm:$0xff]  ;;  %v11940_v55 = vld [vmem:[#allocation111_spill] sm:$0xff] }
 0x3b2   : > { %v11941_v16 = vpack.c.b16 %v11939_v26, %v11940_v55  ;;  %v11943_v24 = vld [vmem:[#allocation128_spill] sm:$0xff]  ;;  %v11947_v55 = vld [vmem:[#allocation134_spill] sm:$0xff] }
 0x3b3   : > { %v10111_v42 = vadd.f32 %v3624_v48, %v3496_v19  ;;  %v11942_v48 = vld [vmem:[#allocation99_spill] sm:$0xff]  ;;  %v10125_v19 = vpop.f32.mrf.mxu0 }
 0x3b5   : > { %11933 = vst [vmem:[#allocation58_spill] sm:$0xff] %v10111_v42  ;;  %6669 = vmatpush.bf16.msrb.mxu3 %v11937_v23  ;;  %v10117_v12 = vpop.f32.mrf.mxu1 }
 0x3b6   : > { %v3073_v0 = vpop.f32.mrf.mxu3 }
 0x3b7   : > { %v3074_v20 = vadd.f32 %v3073_v0, %v11935_v35  ;;  %v3626_v60 = vpop.f32.mrf.mxu2  ;;  %v11944_v35 = vld [vmem:[#allocation108_spill] sm:$0xff] }
 0x3b9   : > { %v3498_v13 = vadd.f32 %v11936_v28, %v3074_v20  ;;  %6670 = vmatpush.bf16.msrb.mxu3 %v11943_v24 }
 0x3bb   : > { %v10119_v2 = vadd.f32 %v3626_v60, %v3498_v13  ;;  %3115 = vmatmul.bf16.gmra.mxu3 %v11941_v16  ;;  %v6500_v60 = vld [vmem:[%s11357_s4 + $0x200] sm:$0xff]  ;;  %v10141_v24 = vpop.f32.mrf.mxu0 }
 0x3bc   : > { %3668 = vmatmul.bf16.gmra.mxu2 %v11942_v48  ;;  %4129 = vmatmul.bf16.gmra.mxu0 %v9382_v58  ;;  %v11945_v13 = vld [vmem:[#allocation130_spill] sm:$0xff] }
 0x3bd   : > { %11938 = vst [vmem:[#allocation67_spill] sm:$0xff] %v10119_v2  ;;  %6671 = vmatpush.bf16.msrb.mxu3 %v11945_v13  ;;  %4291 = vmatpush.bf16.msra.mxu2 %v6500_v60  ;;  %v10138_v26 = vpop.f32.mrf.mxu1  ;;  %v11948_v58 = vld [vmem:[#allocation110_spill] sm:$0xff]  ;;  %v11949_v2 = vld [vmem:[#allocation137_spill] sm:$0xff]  ;;  %v11952_v60 = vld [vmem:[#allocation115_spill] sm:$0xff] }
 0x3be   : > { %v3076_v0 = vpop.f32.mrf.mxu3  ;;  %4198 = vmatmul.bf16.gmra.mxu1 %v11844_v52  ;;  %v11955_v13 = vld [vmem:[#allocation139_spill] sm:$0xff] }
 0x3bf   : > { %v3077_v42 = vadd.f32 %v3076_v0, %v11944_v35  ;;  %v3629_v20 = vpop.f32.mrf.mxu2 }
 0x3c1   : > { %v3501_v28 = vadd.f32 %v9839_v27, %v3077_v42  ;;  %6672 = vmatpush.bf16.msrb.mxu3 %v11947_v55  ;;  %v11951_v42 = vld [vmem:[#allocation116_spill] sm:$0xff] }
 0x3c3   : > { %v10136_v23 = vadd.f32 %v3629_v20, %v3501_v28  ;;  %v11953_v20 = vpack.c.b16 %v11951_v42, %v11952_v60  ;;  %v11954_v28 = vld [vmem:[#allocation107_spill] sm:$0xff] }
 0x3c5   : > { %11946 = vst [vmem:[#allocation69_spill] sm:$0xff] %v10136_v23  ;;  %6673 = vmatpush.bf16.msrb.mxu3 %v11949_v2  ;;  %v10153_v23 = vpop.f32.mrf.mxu1 }
 0x3c6   : > { %v3078_v16 = vpop.f32.mrf.mxu3 }
 0x3c7   : > { %v3079_v52 = vadd.f32 %v3078_v16, %v11948_v58  ;;  %v3631_v0 = vpop.f32.mrf.mxu2 }
 0x3c9   : > { %v3503_v35 = vadd.f32 %v9850_v37, %v3079_v52  ;;  %6674 = vmatpush.bf16.msrb.mxu3 %v11955_v13  ;;  %v10158_v37 = vpop.f32.mrf.mxu0 }
 0x3ca   : > { %11957 = vst [vmem:[#allocation74_spill] sm:$0xff] %v10158_v37  ;;  %v11964_v37 = vld [vmem:[#allocation109_spill] sm:$0xff] }
 0x3cb   : > { %v10146_v27 = vadd.f32 %v3631_v0, %v3503_v35  ;;  %3120 = vmatmul.bf16.gmra.mxu3 %v11953_v20  ;;  %v11959_v35 = vld [vmem:[#allocation121_spill] sm:$0xff] }
 0x3cc   : > { %3673 = vmatmul.bf16.gmra.mxu2 %v11954_v28  ;;  %4134 = vmatmul.bf16.gmra.mxu0 %v9460_v17  ;;  %v11961_v17 = vld [vmem:[#allocation125_spill] sm:$0xff] }
 0x3cd   : > { %11950 = vst [vmem:[#allocation78_spill] sm:$0xff] %v10146_v27  ;;  %v10164_v20 = vpop.f32.mrf.mxu1 }
 0x3ce   : > { %v3081_v55 = vpop.f32.mrf.mxu3  ;;  %4203 = vmatmul.bf16.gmra.mxu1 %v11852_v29  ;;  %v11962_v29 = vld [vmem:[#allocation124_spill] sm:$0xff] }
 0x3cf   : > { %v3082_v16 = vadd.f32 %v3081_v55, %v11956_v41  ;;  %v3634_v58 = vpop.f32.mrf.mxu2  ;;  %v11963_v27 = vpack.c.b16 %v11961_v17, %v11962_v29 }
 0x3d1   : > { %v3506_v2 = vadd.f32 %v9863_v34, %v3082_v16  ;;  %v10167_v41 = vpop.f32.mrf.mxu0  ;;  %v11965_v16 = vld [vmem:[#allocation127_spill] sm:$0xff] }
 0x3d3   : > { %v10161_v52 = vadd.f32 %v3634_v58, %v3506_v2 }
 0x3d5   : > { %11958 = vst [vmem:[#allocation62_spill] sm:$0xff] %v10161_v52 }
 0x3d6   : > { %v3083_v0 = vpop.f32.mrf.mxu3 }
 0x3d7   : > { %v3084_v42 = vadd.f32 %v3083_v0, %v11959_v35  ;;  %v3636_v60 = vpop.f32.mrf.mxu2  ;;  %v11966_v0 = vld [vmem:[#allocation126_spill] sm:$0xff]  ;;  %v10179_v35 = vpop.f32.mrf.mxu1 }
 0x3d9   : > { %v3508_v13 = vadd.f32 %v9878_v5, %v3084_v42 }
 0x3db   : > { %v10169_v55 = vadd.f32 %v3636_v60, %v3508_v13  ;;  %3125 = vmatmul.bf16.gmra.mxu3 %v11963_v27  ;;  %v10183_v60 = vpop.f32.mrf.mxu0  ;;  %v11969_v27 = vld [vmem:[#allocation133_spill] sm:$0xff] }
 0x3dc   : > { %3678 = vmatmul.bf16.gmra.mxu2 %v11964_v37  ;;  %4139 = vmatmul.bf16.gmra.mxu0 %v11966_v0  ;;  %11968 = vst [vmem:[#allocation84_spill] sm:$0xff] %v10183_v60  ;;  %v11972_v0 = vld [vmem:[#allocation131_spill] sm:$0xff] }
 0x3dd   : > { %11960 = vst [vmem:[#allocation73_spill] sm:$0xff] %v10169_v55 }
 0x3de   : > { %v3086_v34 = vpop.f32.mrf.mxu3  ;;  %4208 = vmatmul.bf16.gmra.mxu1 %v11858_v54  ;;  %v11974_v54 = vld [vmem:[#allocation117_spill] sm:$0xff] }
 0x3df   : > { %v3087_v58 = vadd.f32 %v3086_v34, %v11965_v16  ;;  %v3639_v2 = vpop.f32.mrf.mxu2  ;;  %v11971_v16 = vld [vmem:[#allocation132_spill] sm:$0xff] }
 0x3e0   : > { %v11973_v17 = vpack.c.b16 %v11971_v16, %v11972_v0 }
 0x3e1   : > { %v3511_v5 = vadd.f32 %v9897_v63, %v3087_v58  ;;  %v10193_v63 = vpop.f32.mrf.mxu1 }
 0x3e3   : > { %v10181_v42 = vadd.f32 %v3639_v2, %v3511_v5  ;;  %v10195_v2 = vpop.f32.mrf.mxu0  ;;  %v11976_v5 = vld [vmem:[#allocation138_spill] sm:$0xff] }
 0x3e4   : > { %11975 = vst [vmem:[#allocation71_spill] sm:$0xff] %v10195_v2 }
 0x3e5   : > { %11967 = vst [vmem:[#allocation77_spill] sm:$0xff] %v10181_v42 }
 0x3e6   : > { %v3088_v13 = vpop.f32.mrf.mxu3 }
 0x3e7   : > { %v3089_v29 = vadd.f32 %v3088_v13, %v11969_v27  ;;  %v3641_v55 = vpop.f32.mrf.mxu2  ;;  %v11977_v13 = vld [vmem:[#allocation135_spill] sm:$0xff]  ;;  %v11979_v27 = vld [vmem:[#allocation141_spill] sm:$0xff] }
 0x3e9   : > { %v3513_v52 = vadd.f32 %v9914_v57, %v3089_v29 }
 0x3eb   : > { %v10187_v34 = vadd.f32 %v3641_v55, %v3513_v52  ;;  %3130 = vmatmul.bf16.gmra.mxu3 %v11973_v17  ;;  %v10203_v17 = vpop.f32.mrf.mxu1 }
 0x3ec   : > { %3683 = vmatmul.bf16.gmra.mxu2 %v11974_v54  ;;  %4144 = vmatmul.bf16.gmra.mxu0 %v11977_v13 }
 0x3ed   : > { %11970 = vst [vmem:[#allocation80_spill] sm:$0xff] %v10187_v34 }
 0x3ee   : > { %v3091_v58 = vpop.f32.mrf.mxu3  ;;  %4213 = vmatmul.bf16.gmra.mxu1 %v11866_v62  ;;  %v11983_v62 = vld [vmem:[#allocation142_spill] sm:$0xff] }
 0x3ef   : > { %v3092_v42 = vadd.f32 %v3091_v58, %v11976_v5  ;;  %v3644_v60 = vpop.f32.mrf.mxu2  ;;  %v11981_v58 = vld [vmem:[#allocation66_spill] sm:$0xff]  ;;  %v11982_v5 = vld [vmem:[#allocation12_spill] sm:$0xff] }
 0x3f1   : > { %v3516_v57 = vadd.f32 %v9927_v11, %v3092_v42 }
 0x3f3   : > { %v10201_v52 = vadd.f32 %v3644_v60, %v3516_v57  ;;  %v10213_v42 = vpop.f32.mrf.mxu1 }
 0x3f5   : > { %11978 = vst [vmem:[#allocation79_spill] sm:$0xff] %v10201_v52 }
 0x3f6   : > { %v3093_v55 = vpop.f32.mrf.mxu3 }
 0x3f7   : > { %v3094_v29 = vadd.f32 %v3093_v55, %v11979_v27  ;;  %v3646_v34 = vpop.f32.mrf.mxu2 }
 0x3f9   : > { %v3518_v16 = vadd.f32 %v9938_v45, %v3094_v29  ;;  %v11984_v45 = vld [vmem:[#allocation143_spill] sm:$0xff] }
 0x3fb   : > { %v10207_v0 = vadd.f32 %v3646_v34, %v3518_v16  ;;  %3697 = vmatmul.bf16.vlgmr.msra.gmra.mxu3 %v11981_v58  ;;  %v10220_v29 = vpop.f32.mrf.mxu1 }
 0x3fc   : > { %4292 = vmatmul.bf16.vlgmr.msra.gmra.mxu2 %v11982_v5 }
 0x3fd   : > { %11980 = vst [vmem:[#allocation83_spill] sm:$0xff] %v10207_v0 }
 0x3fe   : > { %v3096_v13 = vpop.f32.mrf.mxu3  ;;  %4218 = vmatmul.bf16.gmra.mxu1 %v11874_v25  ;;  %v11989_v25 = vld [vmem:[#allocation21_spill] sm:$0xff] }
 0x3ff   : > { %v3097_v2 = vadd.f32 %v3096_v13, %v11983_v62  ;;  %v3649_v11 = vpop.f32.mrf.mxu2  ;;  %v11986_v13 = vld [vmem:[#allocation4_spill] sm:$0xff]  ;;  %v11987_v62 = vld [vmem:[#allocation3_spill] sm:$0xff] }
 0x400   : > { %v11988_v52 = vpack.c.b16 %v11986_v13, %v11987_v62  ;;  %v11993_v62 = vld [vmem:[#allocation8_spill] sm:$0xff] }
 0x401   : > { %v3521_v60 = vadd.f32 %v9949_v39, %v3097_v2  ;;  %v11990_v39 = vld [vmem:[#allocation9_spill] sm:$0xff] }
 0x403   : > { %v10216_v57 = vadd.f32 %v3649_v11, %v3521_v60 }
 0x406   : > { %v3098_v55 = vpop.f32.mrf.mxu3 }
 0x407   : > { %v3099_v34 = vadd.f32 %v3098_v55, %v11984_v45  ;;  %v3651_v16 = vpop.f32.mrf.mxu2 }
 0x409   : > { %v3523_v27 = vadd.f32 %v9963_v44, %v3099_v34  ;;  %v10233_v44 = vpop.f32.mrf.mxu1  ;;  %v11991_v34 = vld [vmem:[#allocation5_spill] sm:$0xff] }
 0x40b   : > { %v10222_v0 = vadd.f32 %v3651_v16, %v3523_v27  ;;  %3702 = vmatmul.bf16.gmra.mxu3 %v11988_v52 }
 0x40c   : > { %4297 = vmatmul.bf16.gmra.mxu2 %v11989_v25 }
 0x40d   : > { %11985 = vst [vmem:[#allocation14_spill] sm:$0xff] %v10222_v0  ;;  %v11994_v0 = vld [vmem:[#allocation6_spill] sm:$0xff] }
 0x40e   : > { %v3101_v58 = vpop.f32.mrf.mxu3  ;;  %4223 = vmatmul.bf16.gmra.mxu1 %v11882_v53 }
 0x40f   : > { %v3102_v2 = vadd.f32 %v3101_v58, %v11990_v39  ;;  %v3654_v11 = vpop.f32.mrf.mxu2  ;;  %v11995_v58 = vpack.c.b16 %v11993_v62, %v11994_v0  ;;  %v11996_v39 = vld [vmem:[#allocation22_spill] sm:$0xff] }
 0x411   : > { %v3526_v60 = vadd.f32 %v9976_v18, %v3102_v2  ;;  %v10243_v18 = vpop.f32.mrf.mxu1  ;;  %v11997_v2 = vld [vmem:[#allocation50_spill] sm:$0xff] }
 0x413   : > { %v10231_v55 = vadd.f32 %v3654_v11, %v3526_v60 }
 0x416   : > { %v3103_v45 = vpop.f32.mrf.mxu3 }
 0x417   : > { %v3104_v16 = vadd.f32 %v3103_v45, %v11991_v34  ;;  %v3656_v27 = vpop.f32.mrf.mxu2 }
 0x419   : > { %v3528_v52 = vadd.f32 %v9990_v61, %v3104_v16  ;;  %v11998_v16 = vld [vmem:[#allocation13_spill] sm:$0xff]  ;;  %v10251_v0 = vpop.f32.mrf.mxu1 }
 0x41b   : > { %v10237_v13 = vadd.f32 %v3656_v27, %v3528_v52  ;;  %3707 = vmatmul.bf16.gmra.mxu3 %v11995_v58 }
 0x41c   : > { %4302 = vmatmul.bf16.gmra.mxu2 %v11996_v39 }
 0x41d   : > { %11992 = vst [vmem:[#allocation16_spill] sm:$0xff] %v10237_v13 }
 0x41e   : > { %v3106_v53 = vpop.f32.mrf.mxu3  ;;  %4228 = vmatmul.bf16.gmra.mxu1 %v11893_v43  ;;  %v12000_v43 = vld [vmem:[#allocation11_spill] sm:$0xff] }
 0x41f   : > { %v3107_v11 = vadd.f32 %v3106_v53, %v11997_v2  ;;  %v3659_v60 = vpop.f32.mrf.mxu2  ;;  %v11999_v53 = vld [vmem:[#allocation24_spill] sm:$0xff] }
 0x421   : > { %v3531_v45 = vadd.f32 %v10003_v14, %v3107_v11 }
 0x423   : > { %v10248_v34 = vadd.f32 %v3659_v60, %v3531_v45  ;;  %v10261_v60 = vpop.f32.mrf.mxu1 }
 0x426   : > { %v3108_v61 = vpop.f32.mrf.mxu3 }
 0x427   : > { %v3109_v27 = vadd.f32 %v3108_v61, %v11998_v16  ;;  %v3661_v52 = vpop.f32.mrf.mxu2 }
 0x429   : > { %v3533_v62 = vadd.f32 %v10012_v30, %v3109_v27  ;;  %v12002_v30 = vld [vmem:[#allocation7_spill] sm:$0xff] }
 0x42b   : > { %v10254_v58 = vadd.f32 %v3661_v52, %v3533_v62  ;;  %3712 = vmatmul.bf16.gmra.mxu3 %v11982_v5  ;;  %v12004_v62 = vld [vmem:[#allocation30_spill] sm:$0xff] }
 0x42c   : > { %4307 = vmatmul.bf16.gmra.mxu2 %v11999_v53 }
 0x42e   : > { %v3111_v2 = vpop.f32.mrf.mxu3  ;;  %4233 = vmatmul.bf16.gmra.mxu1 %v11907_v32 }
 0x42f   : > { %v3112_v13 = vadd.f32 %v3111_v2, %v12000_v43  ;;  %v3664_v14 = vpop.f32.mrf.mxu2  ;;  %v10271_v2 = vpop.f32.mrf.mxu1 }
 0x431   : > { %v3536_v11 = vadd.f32 %v10025_v56, %v3112_v13  ;;  %v12005_v56 = vld [vmem:[#allocation56_spill] sm:$0xff] }
 0x433   : > { %v10263_v45 = vadd.f32 %v3664_v14, %v3536_v11 }
 0x435   : > { %12001 = vst [vmem:[#allocation86_spill] sm:$0xff] %v10263_v45 }
 0x436   : > { %v3113_v61 = vpop.f32.mrf.mxu3 }
 0x437   : > { %v3114_v16 = vadd.f32 %v3113_v61, %v12002_v30  ;;  %v3666_v27 = vpop.f32.mrf.mxu2  ;;  %v12007_v30 = vld [vmem:[#allocation17_spill] sm:$0xff] }
 0x439   : > { %v3538_v5 = vadd.f32 %v10039_v36, %v3114_v16  ;;  %v10278_v36 = vpop.f32.mrf.mxu1 }
 0x43b   : > { %v10267_v52 = vadd.f32 %v3666_v27, %v3538_v5  ;;  %3717 = vmatmul.bf16.gmra.mxu3 %v11989_v25 }
 0x43c   : > { %4312 = vmatmul.bf16.gmra.mxu2 %v12004_v62 }
 0x43d   : > { %12003 = vst [vmem:[#allocation88_spill] sm:$0xff] %v10267_v52 }
 0x43e   : > { %v3116_v32 = vpop.f32.mrf.mxu3  ;;  %4238 = vmatmul.bf16.gmra.mxu1 %v11919_v15  ;;  %v12010_v15 = vld [vmem:[#allocation19_spill] sm:$0xff] }
 0x43f   : > { %v3117_v13 = vadd.f32 %v3116_v32, %v12005_v56  ;;  %v3669_v43 = vpop.f32.mrf.mxu2  ;;  %v12009_v32 = vld [vmem:[#allocation43_spill] sm:$0xff] }
 0x441   : > { %v3541_v14 = vadd.f32 %v10052_v6, %v3117_v13  ;;  %v10288_v13 = vpop.f32.mrf.mxu1 }
 0x443   : > { %v10276_v11 = vadd.f32 %v3669_v43, %v3541_v14 }
 0x445   : > { %12006 = vst [vmem:[#allocation75_spill] sm:$0xff] %v10276_v11 }
 0x446   : > { %v3118_v61 = vpop.f32.mrf.mxu3 }
 0x447   : > { %v3119_v16 = vadd.f32 %v3118_v61, %v12007_v30  ;;  %v3671_v25 = vpop.f32.mrf.mxu2 }
 0x449   : > { %v3543_v27 = vadd.f32 %v10066_v59, %v3119_v16  ;;  %v12012_v59 = vld [vmem:[#allocation26_spill] sm:$0xff] }
 0x44b   : > { %v10282_v5 = vadd.f32 %v3671_v25, %v3543_v27  ;;  %3722 = vmatmul.bf16.gmra.mxu3 %v11996_v39  ;;  %v10295_v25 = vpop.f32.mrf.mxu1 }
 0x44c   : > { %4317 = vmatmul.bf16.gmra.mxu2 %v12009_v32 }
 0x44d   : > { %12008 = vst [vmem:[#allocation85_spill] sm:$0xff] %v10282_v5 }
 0x44e   : > { %v3121_v56 = vpop.f32.mrf.mxu3  ;;  %4243 = vmatmul.bf16.gmra.mxu1 %v11930_v10 }
 0x44f   : > { %v3122_v52 = vadd.f32 %v3121_v56, %v12010_v15  ;;  %v3674_v6 = vpop.f32.mrf.mxu2  ;;  %v12014_v56 = vld [vmem:[#allocation44_spill] sm:$0xff]  ;;  %v12015_v15 = vld [vmem:[#allocation15_spill] sm:$0xff] }
 0x451   : > { %v3546_v43 = vadd.f32 %v10077_v1, %v3122_v52 }
 0x453   : > { %v10291_v14 = vadd.f32 %v3674_v6, %v3546_v43  ;;  %v10306_v43 = vpop.f32.mrf.mxu1 }
 0x455   : > { %12011 = vst [vmem:[#allocation20_spill] sm:$0xff] %v10291_v14 }
 0x456   : > { %v3123_v61 = vpop.f32.mrf.mxu3 }
 0x457   : > { %v3124_v30 = vadd.f32 %v3123_v61, %v12012_v59  ;;  %v3676_v16 = vpop.f32.mrf.mxu2  ;;  %v12017_v61 = vld [vmem:[#allocation29_spill] sm:$0xff] }
 0x459   : > { %v3548_v39 = vadd.f32 %v10088_v22, %v3124_v30 }
 0x45b   : > { %v10297_v27 = vadd.f32 %v3676_v16, %v3548_v39  ;;  %3727 = vmatmul.bf16.gmra.mxu3 %v11999_v53  ;;  %v12019_v39 = vld [vmem:[#allocation47_spill] sm:$0xff] }
 0x45c   : > { %4322 = vmatmul.bf16.gmra.mxu2 %v12014_v56 }
 0x45d   : > { %12013 = vst [vmem:[#allocation10_spill] sm:$0xff] %v10297_v27 }
 0x45e   : > { %v3126_v10 = vpop.f32.mrf.mxu3  ;;  %4248 = vmatmul.bf16.gmra.mxu1 %v11942_v48  ;;  %v10314_v48 = vpop.f32.mrf.mxu1 }
 0x45f   : > { %v3127_v5 = vadd.f32 %v3126_v10, %v12015_v15  ;;  %v3679_v1 = vpop.f32.mrf.mxu2 }
 0x461   : > { %v3551_v52 = vadd.f32 %v10105_v47, %v3127_v5  ;;  %v12020_v47 = vld [vmem:[#allocation32_spill] sm:$0xff] }
 0x463   : > { %v10304_v6 = vadd.f32 %v3679_v1, %v3551_v52 }
 0x465   : > { %12016 = vst [vmem:[#allocation87_spill] sm:$0xff] %v10304_v6 }
 0x466   : > { %v3128_v22 = vpop.f32.mrf.mxu3 }
 0x467   : > { %v3129_v59 = vadd.f32 %v3128_v22, %v12017_v61  ;;  %v3681_v30 = vpop.f32.mrf.mxu2 }
 0x469   : > { %v3553_v53 = vadd.f32 %v10117_v12, %v3129_v59  ;;  %v12022_v12 = vld [vmem:[#allocation147_spill] sm:$0xff] }
 0x46b   : > { %v10310_v16 = vadd.f32 %v3681_v30, %v3553_v53  ;;  %3732 = vmatmul.bf16.gmra.mxu3 %v12004_v62  ;;  %v10322_v30 = vpop.f32.mrf.mxu1 }
 0x46c   : > { %4327 = vmatmul.bf16.gmra.mxu2 %v12019_v39 }
 0x46d   : > { %12018 = vst [vmem:[#allocation144_spill] sm:$0xff] %v10310_v16 }
 0x46e   : > { %v3131_v10 = vpop.f32.mrf.mxu3  ;;  %4253 = vmatmul.bf16.gmra.mxu1 %v11954_v28  ;;  %v4165_v28 = vadd.f32 %v10164_v20, %v9861_v7  ;;  %v4167_v20 = vadd.f32 %v10179_v35, %v9883_v33 }
 0x46f   : > { %v3132_v5 = vadd.f32 %v3131_v10, %v12020_v47  ;;  %v3684_v15 = vpop.f32.mrf.mxu2  ;;  %v12024_v10 = vld [vmem:[#allocation54_spill] sm:$0xff]  ;;  %v12025_v47 = vld [vmem:[#allocation39_spill] sm:$0xff] }
 0x471   : > { %v3556_v1 = vadd.f32 %v10138_v26, %v3132_v5 }
 0x473   : > { %v10319_v52 = vadd.f32 %v3684_v15, %v3556_v1 }
 0x475   : > { %12021 = vst [vmem:[#allocation18_spill] sm:$0xff] %v10319_v52 }
 0x476   : > { %v3133_v22 = vpop.f32.mrf.mxu3 }
 0x477   : > { %v3134_v61 = vadd.f32 %v3133_v22, %v12022_v12  ;;  %v3686_v59 = vpop.f32.mrf.mxu2  ;;  %v10343_v12 = vpop.f32.mrf.mxu1 }
 0x479   : > { %v3558_v62 = vadd.f32 %v10153_v23, %v3134_v61  ;;  %v10336_v23 = vld [vmem:[%s11358_s5] ss:$0 sm:$0xff] }
 0x47b   : > { %v10325_v53 = vadd.f32 %v3686_v59, %v3558_v62  ;;  %3737 = vmatmul.bf16.gmra.mxu3 %v12009_v32  ;;  %v10341_v32 = vld [vmem:[%s11359_s6] ss:$0 sm:$0xff]  ;;  %v12026_v59 = vld [vmem:[#allocation27_spill] sm:$0xff] }
 0x47c   : > { %4332 = vmatmul.bf16.gmra.mxu2 %v12024_v10 }
 0x47d   : > { %12023 = vst [vmem:[#allocation96_spill] sm:$0xff] %v10325_v53 }
 0x47e   : > { %v3698_v26 = vpop.f32.mrf.mxu3  ;;  %4258 = vmatmul.bf16.gmra.mxu1 %v11964_v37 }
 0x47f   : > { %v3699_v5 = vadd.f32 %v3698_v26, %v12025_v47  ;;  %v4293_v15 = vpop.f32.mrf.mxu2 }
 0x480   : > { %v4294_v1 = vadd.f32 %v4293_v15, %v4165_v28 }
 0x482   : > { %v4413_v22 = vadd.f32 %v4294_v1, %v3699_v5  ;;  %v12027_v1 = vld [vmem:[#allocation63_spill] sm:$0xff] }
 0x484   : > { %v4465_v7 = vmul.f32 %v10336_v23, %v4413_v22  ;;  %v10356_v22 = vpop.f32.mrf.mxu1 }
 0x486   : > { %v10349_v37 = vadd.f32 %v10341_v32, %v4465_v7  ;;  %v3700_v61 = vpop.f32.mrf.mxu3 }
 0x487   : > { %v3701_v62 = vadd.f32 %v3700_v61, %v12026_v59  ;;  %v4295_v28 = vpop.f32.mrf.mxu2 }
 0x488   : > { %v6351_v26 = vmul.f32 -1.442695, %v10349_v37  ;;  %v4296_v47 = vadd.f32 %v4295_v28, %v4167_v20  ;;  %v4170_v20 = vadd.f32 %v10193_v63, %v9907_v50 }
 0x48a   : > { %6882 = vpow2.f32 %v6351_v26  ;;  %v4414_v5 = vadd.f32 %v4296_v47, %v3701_v62 }
 0x48b   : > { %3742 = vmatmul.bf16.gmra.mxu3 %v12014_v56 }
 0x48c   : > { %v4466_v15 = vmul.f32 %v10336_v23, %v4414_v5  ;;  %4337 = vmatmul.bf16.gmra.mxu2 %v12027_v1  ;;  %v10366_v47 = vpop.f32.mrf.mxu1 }
 0x48e   : > { %v10359_v33 = vadd.f32 %v10341_v32, %v4466_v15  ;;  %4263 = vmatmul.bf16.gmra.mxu1 %v11974_v54  ;;  %v3703_v56 = vpop.f32.mrf.mxu3  ;;  %v4172_v54 = vadd.f32 %v10203_v17, %v9917_v46 }
 0x48f   : > { %v4298_v59 = vpop.f32.mrf.mxu2  ;;  %v3704_v62 = vadd.f32 %v3703_v56, %v9846_v8  ;;  %v12028_v56 = vld [vmem:[#allocation34_spill] sm:$0xff] }
 0x490   : > { %v6883_v35 = vpop.eup %6882  ;;  %v6352_v7 = vmul.f32 -1.442695, %v10359_v33  ;;  %v4299_v28 = vadd.f32 %v4298_v59, %v4170_v20 }
 0x491   : > { %v4709_v61 = vadd.f32 1.0, %v6883_v35 }
 0x492   : > { %6884 = vpow2.f32 %v6352_v7  ;;  %v4415_v26 = vadd.f32 %v4299_v28, %v3704_v62  ;;  %v12029_v28 = vld [vmem:[#allocation65_spill] sm:$0xff] }
 0x493   : > { %6886 = vrcp.f32 %v4709_v61  ;;  %vm4762_vm7 = vweird.f32 %v4709_v61 }
 0x494   : > { %v4467_v15 = vmul.f32 %v10336_v23, %v4415_v26  ;;  %v10380_v6 = vpop.f32.mrf.mxu1 }
 0x496   : > { %v10372_v50 = vadd.f32 %v10341_v32, %v4467_v15  ;;  %v3705_v63 = vpop.f32.mrf.mxu3  ;;  %v12030_v15 = vld [vmem:[#allocation136_spill] sm:$0xff] }
 0x497   : > { %v4300_v7 = vpop.f32.mrf.mxu2  ;;  %v3706_v59 = vadd.f32 %v3705_v63, %v12028_v56 }
 0x498   : > { %v6885_v5 = vpop.eup %6884  ;;  %v6353_v20 = vmul.f32 -1.442695, %v10372_v50  ;;  %v4301_v62 = vadd.f32 %v4300_v7, %v4172_v54 }
 0x499   : > { %v6887_v53 = vpop.eup %6886  ;;  %v4710_v52 = vadd.f32 1.0, %v6885_v5 }
 0x49a   : > { %v4758_v35 = vmul.f32 %v6887_v53, %v4709_v61  ;;  %v4416_v46 = vadd.f32 %v4301_v62, %v3706_v59  ;;  %vm4763_vm6 = vweird.f32 %v6887_v53 }
 0x49b   : > { %6888 = vrcp.f32 %v4710_v52  ;;  %3747 = vmatmul.bf16.gmra.mxu3 %v12019_v39  ;;  %v4766_v39 = vand.u32 2147483647, %v4709_v61  ;;  %vm10385_vm12 = vmor %vm4762_vm7, %vm4763_vm6  ;;  %v4781_v27 = vand.u32 2147483647, %v4710_v52  ;;  %vm4777_vm1 = vweird.f32 %v4710_v52 }
 0x49c   : > { %v4759_v8 = vsub.f32 1.0, %v4758_v35  ;;  %4342 = vmatmul.bf16.gmra.mxu2 %v12029_v28  ;;  %6890 = vpow2.f32 %v6353_v20  ;;  %v4468_v5 = vmul.f32 %v10336_v23, %v4416_v46  ;;  %v4768_v35 = vand.u32 2147483648, %v4709_v61  ;;  %v10400_v45 = vpop.f32.mrf.mxu1 }
 0x49d   : > { %v4175_v20 = vadd.f32 %v10213_v42, %v9936_v31  ;;  %vm4767_vm15 = vcmp.eq.f32.partialorder %v4766_v39, 8.507059e+37  ;;  %vm4782_vm3 = vcmp.eq.f32.partialorder %v4781_v27, 8.507059e+37 }
 0x49e   : > { %v4760_v26 = vmul.f32 %v6887_v53, %v4759_v8  ;;  %4268 = vmatmul.bf16.gmra.mxu1 %v12030_v15  ;;  %v10383_v54 = vadd.f32 %v10341_v32, %v4468_v5  ;;  %v4769_v61 = vor.u32 1.1754944e-38, %v4768_v35  ;;  %v282_v5 = vld [vmem:[%s7172_s22 + $0xc] sm:$0xff]   ;;  %v3708_v14 = vpop.f32.mrf.mxu3 }
 0x49f   : > { %v4303_v11 = vpop.f32.mrf.mxu2  ;;  %v5525_v35 = vunpack.c.l.bf16 %v282_v5  ;;  %v5526_v7 = vunpack.c.h.bf16 %v282_v5 }
 0x4a0   : > { %v4761_v17 = vadd.f32 %v6887_v53, %v4760_v26  ;;  %v6354_v62 = vmul.f32 -1.442695, %v10383_v54  ;;  %v4783_v26 = vand.u32 2147483648, %v4710_v52  ;;  %v4304_v39 = vadd.f32 %v4303_v11, %v4175_v20 }
 0x4a1   : > { %v6889_v16 = vpop.eup %6888 }
 0x4a2   : > { %v4773_v63 = vmul.f32 %v6889_v16, %v4710_v52  ;;  %v6891_v8 = vpop.eup %6890  ;;  %v4765_v56 = vsel %vm10385_vm12, %v6887_v53, %v4761_v17  ;;  %vm4778_vm0 = vweird.f32 %v6889_v16  ;;  %6892 = vpow2.f32 %v6354_v62  ;;  %v12033_v53 = vld [vmem:[#allocation35_spill] sm:$0xff] }
 0x4a3   : > { %v10394_v46 = vadd.f32 1.0, %v6891_v8  ;;  %v4770_v31 = vsel %vm4767_vm15, %v4769_v61, %v4765_v56  ;;  %v3709_v17 = vadd.f32 %v3708_v14, %v12033_v53  ;;  %vm4779_vm2 = vmor %vm4777_vm1, %vm4778_vm0  ;;  %v12034_v14 = vld [vmem:[#allocation72_spill] sm:$0xff] }
 0x4a4   : > { %v4774_v59 = vsub.f32 1.0, %v4773_v63  ;;  %v4784_v63 = vor.u32 1.1754944e-38, %v4783_v26  ;;  %v5477_v8 = vmul.f32 %v4770_v31, %v10349_v37 }
 0x4a5   : > { %6894 = vrcp.f32 %v10394_v46  ;;  %v4417_v62 = vadd.f32 %v4304_v39, %v3709_v17  ;;  %v12035_v17 = vld [vmem:[#allocation45_spill] sm:$0xff]  ;;  %vm4792_vm8 = vweird.f32 %v10394_v46 }
 0x4a6   : > { %v4775_v15 = vmul.f32 %v6889_v16, %v4774_v59  ;;  %v5573_v37 = vadd.f32 %v5525_v35, %v5477_v8  ;;  %v12036_v35 = vld [vmem:[#allocation140_spill] sm:$0xff]  ;;  %v4798_v8 = vand.u32 2147483648, %v10394_v46 }
 0x4a7   : > { %v4469_v11 = vmul.f32 %v10336_v23, %v4417_v62  ;;  %v4305_v31 = vpop.f32.mrf.mxu2  ;;  %v4180_v62 = vadd.f32 %v10233_v44, %v9965_v3 }
 0x4a8   : > { %v4776_v42 = vadd.f32 %v6889_v16, %v4775_v15  ;;  %v6893_v61 = vpop.eup %6892  ;;  %v3710_v15 = vpop.f32.mrf.mxu3 }
 0x4a9   : > { %v10407_v26 = vadd.f32 1.0, %v6893_v61  ;;  %v10411_v5 = vadd.f32 %v10341_v32, %v4469_v11  ;;  %v3711_v39 = vadd.f32 %v3710_v15, %v12035_v17 }
 0x4aa   : > { %v4780_v59 = vsel %vm4779_vm2, %v6889_v16, %v4776_v42 }
 0x4ab   : > { %v4785_v56 = vsel %vm4782_vm3, %v4784_v63, %v4780_v59  ;;  %3752 = vmatmul.bf16.gmra.mxu3 %v12024_v10  ;;  %v6895_v20 = vpop.eup %6894  ;;  %v4177_v10 = vadd.f32 %v10220_v29, %v9954_v4  ;;  %6896 = vrcp.f32 %v10407_v26  ;;  %v6355_v53 = vmul.f32 -1.442695, %v10411_v5 }
 0x4ac   : > { %v5478_v52 = vmul.f32 %v4785_v56, %v10359_v33  ;;  %4347 = vmatmul.bf16.gmra.mxu2 %v12034_v14  ;;  %v4788_v27 = vmul.f32 %v6895_v20, %v10394_v46  ;;  %vm4793_vm5 = vweird.f32 %v6895_v20  ;;  %v10428_v56 = vpop.f32.mrf.mxu1  ;;  %vm4807_vm11 = vweird.f32 %v10407_v26 }
 0x4ad   : > { %v4306_v63 = vadd.f32 %v4305_v31, %v4177_v10  ;;  %6898 = vpow2.f32 %v6355_v53  ;;  %vm10434_vm9 = vmor %vm4792_vm8, %vm4793_vm5 }
 0x4ae   : > { %v5574_v16 = vadd.f32 %v5526_v7, %v5478_v52  ;;  %v4789_v42 = vsub.f32 1.0, %v4788_v27  ;;  %4273 = vmatmul.bf16.gmra.mxu1 %v12036_v35  ;;  %v4796_v52 = vand.u32 2147483647, %v10394_v46  ;;  %v4799_v46 = vor.u32 1.1754944e-38, %v4798_v8  ;;  %v284_v35 = vld [vmem:[%s7172_s22 + $0x14] sm:$0xff]  }
 0x4af   : > { %v4418_v4 = vadd.f32 %v4306_v63, %v3711_v39  ;;  %v4182_v8 = vadd.f32 %v10243_v18, %v9984_v49 }
 0x4b0   : > { %v6511_v33 = vpack.c.bf16 %v5574_v16, %v5573_v37  ;;  %v4790_v7 = vmul.f32 %v6895_v20, %v4789_v42  ;;  %v3713_v37 = vpop.f32.mrf.mxu3  ;;  %v4308_v16 = vpop.f32.mrf.mxu2  ;;  %v4813_v42 = vand.u32 2147483648, %v10407_v26  ;;  %vm4797_vm4 = vcmp.eq.f32.partialorder %v4796_v52, 8.507059e+37 }
 0x4b1   : > { %v6897_v59 = vpop.eup %6896  ;;  %v4470_v61 = vmul.f32 %v10336_v23, %v4418_v4  ;;  %v3714_v3 = vadd.f32 %v3713_v37, %v9910_v9  ;;  %v4309_v44 = vadd.f32 %v4308_v16, %v4180_v62  ;;  %v4811_v9 = vand.u32 2147483647, %v10407_v26 }
 0x4b2   : > { %6512 = vst [vmem:[%s10418_s8] sm:$0xff] %v6511_v33   ;;  %v4791_v29 = vadd.f32 %v6895_v20, %v4790_v7  ;;  %v4803_v11 = vmul.f32 %v6897_v59, %v10407_v26  ;;  %vm4808_vm10 = vweird.f32 %v6897_v59  ;;  %v5527_v62 = vunpack.c.l.bf16 %v284_v35 }
 0x4b3   : > { %v10439_v15 = vadd.f32 %v10341_v32, %v4470_v61  ;;  %v6899_v31 = vpop.eup %6898  ;;  %v4419_v39 = vadd.f32 %v4309_v44, %v3714_v3  ;;  %vm4809_vm13 = vmor %vm4807_vm11, %vm4808_vm10  ;;  %v4814_v61 = vor.u32 1.1754944e-38, %v4813_v42  ;;  %v5528_v52 = vunpack.c.h.bf16 %v284_v35  ;;  %v12040_v3 = vld [vmem:[#allocation40_spill] sm:$0xff] }
 0x4b4   : > { %v4795_v10 = vsel %vm10434_vm9, %v6895_v20, %v4791_v29  ;;  %v4804_v33 = vsub.f32 1.0, %v4803_v11  ;;  %v10445_v53 = vadd.f32 1.0, %v6899_v31  ;;  %v12039_v29 = vld [vmem:[#allocation76_spill] sm:$0xff]  ;;  %vm4812_vm14 = vcmp.eq.f32.partialorder %v4811_v9, 8.507059e+37 }
 0x4b5   : > { %v6356_v17 = vmul.f32 -1.442695, %v10439_v15  ;;  %v4800_v7 = vsel %vm4797_vm4, %v4799_v46, %v4795_v10  ;;  %v4471_v4 = vmul.f32 %v10336_v23, %v4419_v39  ;;  %v10462_v10 = vpop.f32.mrf.mxu1  ;;  %v12041_v46 = vld [vmem:[#allocation2_spill] sm:$0xff] }
 0x4b6   : > { %v4805_v63 = vmul.f32 %v6897_v59, %v4804_v33  ;;  %6900 = vrcp.f32 %v10445_v53  ;;  %v5479_v11 = vmul.f32 %v4800_v7, %v10372_v50  ;;  %vm4822_vm7 = vweird.f32 %v10445_v53 }
 0x4b7   : > { %6902 = vpow2.f32 %v6356_v17 }
 0x4b8   : > { %v4806_v20 = vadd.f32 %v6897_v59, %v4805_v63  ;;  %v3715_v26 = vpop.f32.mrf.mxu3  ;;  %v4310_v16 = vpop.f32.mrf.mxu2  ;;  %v5575_v42 = vadd.f32 %v5527_v62, %v5479_v11 }
 0x4b9   : > { %v3716_v44 = vadd.f32 %v3715_v26, %v12040_v3  ;;  %v4311_v31 = vadd.f32 %v4310_v16, %v4182_v8  ;;  %v4828_v3 = vand.u32 2147483648, %v10445_v53 }
 0x4ba   : > { %v4810_v37 = vsel %vm4809_vm13, %v6897_v59, %v4806_v20 }
 0x4bb   : > { %3757 = vmatmul.bf16.gmra.mxu3 %v12027_v1  ;;  %v10459_v1 = vadd.f32 %v10341_v32, %v4471_v4  ;;  %v4815_v27 = vsel %vm4812_vm14, %v4814_v61, %v4810_v37  ;;  %v4420_v59 = vadd.f32 %v4311_v31, %v3716_v44  ;;  %v12042_v61 = vld [vmem:[#allocation31_spill] sm:$0xff] }
 0x4bc   : > { %4352 = vmatmul.bf16.gmra.mxu2 %v12039_v29  ;;  %v5480_v49 = vmul.f32 %v4815_v27, %v10383_v54  ;;  %v6901_v50 = vpop.eup %6900  ;;  %v4185_v54 = vadd.f32 %v10251_v0, %v10001_v38  ;;  %v4826_v0 = vand.u32 2147483647, %v10445_v53 }
 0x4bd   : > { %v6357_v18 = vmul.f32 -1.442695, %v10459_v1  ;;  %v6903_v33 = vpop.eup %6902  ;;  %v4818_v39 = vmul.f32 %v6901_v50, %v10445_v53  ;;  %v4472_v63 = vmul.f32 %v10336_v23, %v4420_v59  ;;  %vm4823_vm6 = vweird.f32 %v6901_v50  ;;  %v286_v53 = vld [vmem:[%s7172_s22 + $0x1c] sm:$0xff]  }
 0x4be   : > { %4278 = vmatmul.bf16.gmra.mxu1 %v12041_v46  ;;  %v5576_v17 = vadd.f32 %v5528_v52, %v5480_v49  ;;  %v4714_v35 = vadd.f32 1.0, %v6903_v33  ;;  %vm10484_vm12 = vmor %vm4822_vm7, %vm4823_vm6  ;;  %v12046_v46 = vld [vmem:[#allocation60_spill] sm:$0xff]  ;;  %vm4827_vm15 = vcmp.eq.f32.partialorder %v4826_v0, 8.507059e+37  ;;  %v5530_v0 = vunpack.c.h.bf16 %v286_v53 }
 0x4bf   : > { %6904 = vpow2.f32 %v6357_v18  ;;  %v4819_v7 = vsub.f32 1.0, %v4818_v39  ;;  %v10473_v4 = vadd.f32 %v10341_v32, %v4472_v63  ;;  %v12045_v18 = vld [vmem:[#allocation82_spill] sm:$0xff]  ;;  %v4187_v59 = vadd.f32 %v10261_v60, %v12046_v46 }
 0x4c0   : > { %v6516_v9 = vpack.c.bf16 %v5576_v17, %v5575_v42  ;;  %6906 = vrcp.f32 %v4714_v35  ;;  %v3718_v8 = vpop.f32.mrf.mxu3  ;;  %v4313_v62 = vpop.f32.mrf.mxu2  ;;  %v4829_v17 = vor.u32 1.1754944e-38, %v4828_v3  ;;  %vm4837_vm1 = vweird.f32 %v4714_v35 }
 0x4c1   : > { %v4820_v20 = vmul.f32 %v6901_v50, %v4819_v7  ;;  %v3719_v52 = vadd.f32 %v3718_v8, %v12042_v61  ;;  %v4314_v11 = vadd.f32 %v4313_v62, %v4185_v54  ;;  %v6358_v26 = vmul.f32 -1.442695, %v10473_v4 }
 0x4c2   : > { %6628 = vst [vmem:[%s10418_s8 + $0x8] sm:$0xff] %v6516_v9   ;;  %v4843_v7 = vand.u32 2147483648, %v4714_v35 }
 0x4c3   : > { %v4821_v16 = vadd.f32 %v6901_v50, %v4820_v20  ;;  %v4421_v38 = vadd.f32 %v4314_v11, %v3719_v52  ;;  %6908 = vpow2.f32 %v6358_v26  ;;  %v12047_v20 = vld [vmem:[#allocation37_spill] sm:$0xff]  ;;  %v5529_v11 = vunpack.c.l.bf16 %v286_v53 }
 0x4c5   : > { %v6905_v37 = vpop.eup %6904  ;;  %v4825_v33 = vsel %vm10484_vm12, %v6901_v50, %v4821_v16  ;;  %v4473_v42 = vmul.f32 %v10336_v23, %v4421_v38 }
 0x4c6   : > { %v10477_v27 = vadd.f32 1.0, %v6905_v37  ;;  %v6907_v44 = vpop.eup %6906  ;;  %v4830_v61 = vsel %vm4827_vm15, %v4829_v17, %v4825_v33 }
 0x4c7   : > { %v4833_v49 = vmul.f32 %v6907_v44, %v4714_v35  ;;  %v10496_v54 = vadd.f32 %v10341_v32, %v4473_v42  ;;  %vm4838_vm0 = vweird.f32 %v6907_v44  ;;  %v5481_v31 = vmul.f32 %v4830_v61, %v10411_v5  ;;  %v12048_v42 = vld [vmem:[#allocation42_spill] sm:$0xff] }
 0x4c8   : > { %6910 = vrcp.f32 %v10477_v27  ;;  %v3720_v63 = vpop.f32.mrf.mxu3  ;;  %v4315_v9 = vpop.f32.mrf.mxu2  ;;  %vm4839_vm2 = vmor %vm4837_vm1, %vm4838_vm0  ;;  %v4190_v17 = vadd.f32 %v10271_v2, %v12048_v42  ;;  %vm4852_vm8 = vweird.f32 %v10477_v27 }
 0x4c9   : > { %v4834_v39 = vsub.f32 1.0, %v4833_v49  ;;  %v3721_v8 = vadd.f32 %v3720_v63, %v12047_v20  ;;  %v4316_v62 = vadd.f32 %v4315_v9, %v4187_v59  ;;  %v6909_v60 = vpop.eup %6908  ;;  %v6359_v26 = vmul.f32 -1.442695, %v10496_v54 }
 0x4ca   : > { %v10501_v37 = vadd.f32 1.0, %v6909_v60  ;;  %v4844_v49 = vor.u32 1.1754944e-38, %v4843_v7  ;;  %v5577_v9 = vadd.f32 %v5529_v11, %v5481_v31  ;;  %v12049_v7 = vld [vmem:[#allocation41_spill] sm:$0xff]  ;;  %v4858_v60 = vand.u32 2147483648, %v10477_v27  ;;  %v12052_v31 = vld [vmem:[#allocation55_spill] sm:$0xff] }
 0x4cb   : > { %3762 = vmatmul.bf16.gmra.mxu3 %v12029_v28  ;;  %v4841_v28 = vand.u32 2147483647, %v4714_v35  ;;  %v4835_v52 = vmul.f32 %v6907_v44, %v4834_v39  ;;  %v4422_v16 = vadd.f32 %v4316_v62, %v3721_v8  ;;  %v4856_v11 = vand.u32 2147483647, %v10477_v27 }
 0x4cc   : > { %4357 = vmatmul.bf16.gmra.mxu2 %v12045_v18  ;;  %6912 = vrcp.f32 %v10501_v37  ;;  %v4859_v42 = vor.u32 1.1754944e-38, %v4858_v60  ;;  %vm4867_vm11 = vweird.f32 %v10501_v37 }
 0x4cd   : > { %v4836_v38 = vadd.f32 %v6907_v44, %v4835_v52  ;;  %vm4842_vm3 = vcmp.eq.f32.partialorder %v4841_v28, 8.507059e+37  ;;  %6914 = vpow2.f32 %v6359_v26  ;;  %v4474_v33 = vmul.f32 %v10336_v23, %v4422_v16 }
 0x4ce   : > { %v10499_v50 = vpop.eup %6910  ;;  %vm4857_vm4 = vcmp.eq.f32.partialorder %v4856_v11, 8.507059e+37 }
 0x4cf   : > { %v4848_v3 = vmul.f32 %v10499_v50, %v10477_v27  ;;  %v4840_v46 = vsel %vm4839_vm2, %v6907_v44, %v4836_v38  ;;  %v10514_v5 = vadd.f32 %v10341_v32, %v4474_v33  ;;  %vm4853_vm5 = vweird.f32 %v10499_v50  ;;  %v288_v33 = vld [vmem:[%s7172_s22 + $0x24] sm:$0xff]  }
 0x4d0   : > { %v4845_v35 = vsel %vm4842_vm3, %v4844_v49, %v4840_v46  ;;  %v3723_v28 = vpop.f32.mrf.mxu3  ;;  %v4318_v63 = vpop.f32.mrf.mxu2  ;;  %vm10524_vm9 = vmor %vm4852_vm8, %vm4853_vm5  ;;  %v4192_v49 = vadd.f32 %v10278_v36, %v12052_v31 }
 0x4d1   : > { %v4849_v59 = vsub.f32 1.0, %v4848_v3  ;;  %v5482_v53 = vmul.f32 %v4845_v35, %v10439_v15  ;;  %v3724_v44 = vadd.f32 %v3723_v28, %v12049_v7  ;;  %v4319_v20 = vadd.f32 %v4318_v63, %v4190_v17  ;;  %v12054_v28 = vld [vmem:[#allocation51_spill] sm:$0xff] }
 0x4d2   : > { %v6360_v2 = vmul.f32 -1.442695, %v10514_v5  ;;  %v6913_v15 = vpop.eup %6912  ;;  %v4871_v17 = vand.u32 2147483647, %v10501_v37  ;;  %v4873_v35 = vand.u32 2147483648, %v10501_v37  ;;  %v5531_v7 = vunpack.c.l.bf16 %v288_v33 }
 0x4d3   : > { %v4850_v39 = vmul.f32 %v10499_v50, %v4849_v59  ;;  %v5578_v8 = vadd.f32 %v5530_v0, %v5482_v53  ;;  %v4423_v61 = vadd.f32 %v4319_v20, %v3724_v44  ;;  %v6915_v52 = vpop.eup %6914  ;;  %v4863_v16 = vmul.f32 %v6913_v15, %v10501_v37  ;;  %v12053_v59 = vld [vmem:[#allocation90_spill] sm:$0xff] }
 0x4d4   : > { %v10528_v0 = vadd.f32 1.0, %v6915_v52  ;;  %6916 = vpow2.f32 %v6360_v2  ;;  %vm4868_vm10 = vweird.f32 %v6913_v15  ;;  %vm4872_vm14 = vcmp.eq.f32.partialorder %v4871_v17, 8.507059e+37  ;;  %v12055_v17 = vld [vmem:[#allocation36_spill] sm:$0xff] }
 0x4d5   : > { %v4851_v62 = vadd.f32 %v10499_v50, %v4850_v39  ;;  %v6521_v26 = vpack.c.bf16 %v5578_v8, %v5577_v9  ;;  %v4475_v3 = vmul.f32 %v10336_v23, %v4423_v61  ;;  %v4864_v46 = vsub.f32 1.0, %v4863_v16  ;;  %vm4869_vm13 = vmor %vm4867_vm11, %vm4868_vm10 }
 0x4d6   : > { %6918 = vrcp.f32 %v10528_v0  ;;  %v5532_v2 = vunpack.c.h.bf16 %v288_v33  ;;  %vm4882_vm7 = vweird.f32 %v10528_v0 }
 0x4d7   : > { %6629 = vst [vmem:[%s10418_s8 + $0x10] sm:$0xff] %v6521_v26   ;;  %v4855_v27 = vsel %vm10524_vm9, %v10499_v50, %v4851_v62  ;;  %v10544_v36 = vadd.f32 %v10341_v32, %v4475_v3  ;;  %v4874_v62 = vor.u32 1.1754944e-38, %v4873_v35 }
 0x4d8   : > { %v3725_v53 = vpop.f32.mrf.mxu3  ;;  %v4320_v39 = vpop.f32.mrf.mxu2  ;;  %v4860_v50 = vsel %vm4857_vm4, %v4859_v42, %v4855_v27 }
 0x4d9   : > { %v3726_v63 = vadd.f32 %v3725_v53, %v12054_v28  ;;  %v4321_v9 = vadd.f32 %v4320_v39, %v4192_v49  ;;  %v6361_v20 = vmul.f32 -1.442695, %v10544_v36  ;;  %v5483_v61 = vmul.f32 %v4860_v50, %v10459_v1 }
 0x4da   : > { %v6917_v8 = vpop.eup %6916  ;;  %v4195_v1 = vadd.f32 %v10288_v13, %v10064_v21  ;;  %v4886_v50 = vand.u32 2147483647, %v10528_v0  ;;  %v4888_v28 = vand.u32 2147483648, %v10528_v0 }
 0x4db   : > { %3767 = vmatmul.bf16.gmra.mxu3 %v12034_v14  ;;  %v4865_v14 = vmul.f32 %v6913_v15, %v4864_v46  ;;  %v4424_v60 = vadd.f32 %v4321_v9, %v3726_v63  ;;  %v10550_v26 = vadd.f32 1.0, %v6917_v8  ;;  %6920 = vpow2.f32 %v6361_v20 }
 0x4dc   : > { %4362 = vmatmul.bf16.gmra.mxu2 %v12053_v59  ;;  %v6919_v11 = vpop.eup %6918  ;;  %vm4887_vm15 = vcmp.eq.f32.partialorder %v4886_v50, 8.507059e+37 }
 0x4dd   : > { %v4866_v44 = vadd.f32 %v6913_v15, %v4865_v14  ;;  %v4476_v38 = vmul.f32 %v10336_v23, %v4424_v60  ;;  %v4878_v3 = vmul.f32 %v6919_v11, %v10528_v0  ;;  %6922 = vrcp.f32 %v10550_v26 }
 0x4de   : > { %vm4883_vm6 = vweird.f32 %v6919_v11  ;;  %v4889_v60 = vor.u32 1.1754944e-38, %v4888_v28  ;;  %vm4897_vm1 = vweird.f32 %v10550_v26 }
 0x4df   : > { %v4870_v52 = vsel %vm4869_vm13, %v6913_v15, %v4866_v44  ;;  %v10557_v31 = vadd.f32 %v10341_v32, %v4476_v38  ;;  %v5579_v15 = vadd.f32 %v5531_v7, %v5483_v61  ;;  %v4879_v27 = vsub.f32 1.0, %v4878_v3  ;;  %vm10569_vm12 = vmor %vm4882_vm7, %vm4883_vm6 }
 0x4e0   : > { %v4875_v16 = vsel %vm4872_vm14, %v4874_v62, %v4870_v52  ;;  %v3728_v46 = vpop.f32.mrf.mxu3  ;;  %v4323_v33 = vpop.f32.mrf.mxu2  ;;  %v12058_v62 = vld [vmem:[#allocation94_spill] sm:$0xff]  ;;  %v290_v52 = vld [vmem:[%s7172_s22 + $0x2c] sm:$0xff]   ;;  %v4903_v38 = vand.u32 2147483648, %v10550_v26 }
 0x4e1   : > { %v5484_v37 = vmul.f32 %v4875_v16, %v10473_v4  ;;  %v6362_v42 = vmul.f32 -1.442695, %v10557_v31  ;;  %v3729_v4 = vadd.f32 %v3728_v46, %v12055_v17  ;;  %v6921_v35 = vpop.eup %6920  ;;  %v4880_v53 = vmul.f32 %v6919_v11, %v4879_v27 }
 0x4e2   : > { %v4324_v39 = vadd.f32 %v4323_v33, %v4195_v1  ;;  %v10565_v21 = vadd.f32 1.0, %v6921_v35  ;;  %v4901_v16 = vand.u32 2147483647, %v10550_v26  ;;  %v5533_v17 = vunpack.c.l.bf16 %v290_v52 }
 0x4e3   : > { %v5580_v49 = vadd.f32 %v5532_v2, %v5484_v37  ;;  %6924 = vpow2.f32 %v6362_v42  ;;  %v6923_v13 = vpop.eup %6922  ;;  %v4881_v63 = vadd.f32 %v6919_v11, %v4880_v53  ;;  %v12059_v2 = vld [vmem:[#allocation64_spill] sm:$0xff]  ;;  %v4904_v53 = vor.u32 1.1754944e-38, %v4903_v38 }
 0x4e4   : > { %v4425_v9 = vadd.f32 %v4324_v39, %v3729_v4  ;;  %v4893_v44 = vmul.f32 %v6923_v13, %v10550_v26  ;;  %6926 = vrcp.f32 %v10565_v21  ;;  %v4197_v0 = vadd.f32 %v10295_v25, %v12059_v2 }
 0x4e5   : > { %v6526_v14 = vpack.c.bf16 %v5580_v49, %v5579_v15  ;;  %v4885_v20 = vsel %vm10569_vm12, %v6919_v11, %v4881_v63  ;;  %vm4898_vm0 = vweird.f32 %v6923_v13  ;;  %v12060_v49 = vld [vmem:[#allocation46_spill] sm:$0xff]  ;;  %vm4902_vm3 = vcmp.eq.f32.partialorder %v4901_v16, 8.507059e+37 }
 0x4e6   : > { %v4477_v8 = vmul.f32 %v10336_v23, %v4425_v9  ;;  %v4894_v61 = vsub.f32 1.0, %v4893_v44  ;;  %v4890_v1 = vsel %vm4887_vm15, %v4889_v60, %v4885_v20  ;;  %vm4899_vm2 = vmor %vm4897_vm1, %vm4898_vm0  ;;  %v5534_v28 = vunpack.c.h.bf16 %v290_v52  ;;  %v12061_v60 = vld [vmem:[#allocation49_spill] sm:$0xff] }
 0x4e7   : > { %6630 = vst [vmem:[%s10418_s8 + $0x18] sm:$0xff] %v6526_v14   ;;  %v5485_v14 = vmul.f32 %v4890_v1, %v10496_v54  ;;  %v4200_v26 = vadd.f32 %v10306_v43, %v10090_v40  ;;  %vm4912_vm8 = vweird.f32 %v10565_v21  ;;  %v4918_v40 = vand.u32 2147483648, %v10565_v21 }
 0x4e8   : > { %v3730_v11 = vpop.f32.mrf.mxu3  ;;  %v4325_v37 = vpop.f32.mrf.mxu2  ;;  %v4895_v15 = vmul.f32 %v6923_v13, %v4894_v61 }
 0x4e9   : > { %v6925_v3 = vpop.eup %6924  ;;  %v3731_v27 = vadd.f32 %v3730_v11, %v12060_v49  ;;  %v4326_v25 = vadd.f32 %v4325_v37, %v4197_v0  ;;  %v5581_v44 = vadd.f32 %v5533_v17, %v5485_v14  ;;  %v4916_v37 = vand.u32 2147483647, %v10565_v21  ;;  %v12064_v14 = vld [vmem:[#allocation100_spill] sm:$0xff] }
 0x4ea   : > { %v10589_v46 = vadd.f32 1.0, %v6925_v3  ;;  %v6927_v42 = vpop.eup %6926  ;;  %v4896_v4 = vadd.f32 %v6923_v13, %v4895_v15 }
 0x4eb   : > { %3772 = vmatmul.bf16.gmra.mxu3 %v12039_v29  ;;  %v10586_v29 = vadd.f32 %v10341_v32, %v4477_v8  ;;  %v4426_v35 = vadd.f32 %v4326_v25, %v3731_v27  ;;  %v4908_v39 = vmul.f32 %v6927_v42, %v10565_v21  ;;  %vm4913_vm5 = vweird.f32 %v6927_v42  ;;  %v292_v27 = vld [vmem:[%s7172_s22 + $0x34] sm:$0xff]  }
 0x4ec   : > { %4367 = vmatmul.bf16.gmra.mxu2 %v12058_v62  ;;  %6928 = vrcp.f32 %v10589_v46  ;;  %v4900_v50 = vsel %vm4899_vm2, %v6923_v13, %v4896_v4  ;;  %vm10610_vm9 = vmor %vm4912_vm8, %vm4913_vm5  ;;  %v4919_v21 = vor.u32 1.1754944e-38, %v4918_v40  ;;  %v4931_v4 = vand.u32 2147483647, %v10589_v46 }
 0x4ed   : > { %v6363_v33 = vmul.f32 -1.442695, %v10586_v29  ;;  %v4905_v63 = vsel %vm4902_vm3, %v4904_v53, %v4900_v50  ;;  %v4909_v9 = vsub.f32 1.0, %v4908_v39  ;;  %v4478_v7 = vmul.f32 %v10336_v23, %v4426_v35 }
 0x4ee   : > { %v5486_v54 = vmul.f32 %v4905_v63, %v10514_v5  ;;  %v4933_v35 = vand.u32 2147483648, %v10589_v46  ;;  %vm4917_vm4 = vcmp.eq.f32.partialorder %v4916_v37, 8.507059e+37  ;;  %vm4927_vm11 = vweird.f32 %v10589_v46 }
 0x4ef   : > { %6930 = vpow2.f32 %v6363_v33  ;;  %v4910_v20 = vmul.f32 %v6927_v42, %v4909_v9  ;;  %v10602_v8 = vadd.f32 %v10341_v32, %v4478_v7  ;;  %vm4932_vm14 = vcmp.eq.f32.partialorder %v4931_v4, 8.507059e+37 }
 0x4f0   : > { %v3733_v2 = vpop.f32.mrf.mxu3  ;;  %v4328_v0 = vpop.f32.mrf.mxu2  ;;  %v5582_v13 = vadd.f32 %v5534_v28, %v5486_v54 }
 0x4f1   : > { %v3734_v61 = vadd.f32 %v3733_v2, %v12061_v60  ;;  %v4329_v52 = vadd.f32 %v4328_v0, %v4200_v26  ;;  %v4911_v38 = vadd.f32 %v6927_v42, %v4910_v20  ;;  %v6364_v43 = vmul.f32 -1.442695, %v10602_v8  ;;  %v12065_v26 = vld [vmem:[#allocation57_spill] sm:$0xff] }
 0x4f2   : > { %v6929_v16 = vpop.eup %6928  ;;  %v6531_v11 = vpack.c.bf16 %v5582_v13, %v5581_v44  ;;  %v4934_v20 = vor.u32 1.1754944e-38, %v4933_v35  ;;  %v5536_v2 = vunpack.c.h.bf16 %v292_v27 }
 0x4f3   : > { %v4923_v3 = vmul.f32 %v6929_v16, %v10589_v46  ;;  %v4427_v1 = vadd.f32 %v4329_v52, %v3734_v61  ;;  %6932 = vpow2.f32 %v6364_v43  ;;  %v4915_v25 = vsel %vm10610_vm9, %v6927_v42, %v4911_v38 }
 0x4f4   : > { %6631 = vst [vmem:[%s10418_s8 + $0x20] sm:$0xff] %v6531_v11   ;;  %vm4928_vm10 = vweird.f32 %v6929_v16  ;;  %v4202_v42 = vadd.f32 %v10314_v48, %v10109_v51  ;;  %v4920_v50 = vsel %vm4917_vm4, %v4919_v21, %v4915_v25  ;;  %v4205_v43 = vadd.f32 %v10322_v30, %v10125_v19  ;;  %v12066_v25 = vld [vmem:[#allocation52_spill] sm:$0xff] }
 0x4f5   : > { %v6931_v5 = vpop.eup %6930  ;;  %v4924_v33 = vsub.f32 1.0, %v4923_v3  ;;  %v4479_v17 = vmul.f32 %v10336_v23, %v4427_v1  ;;  %vm4929_vm13 = vmor %vm4927_vm11, %vm4928_vm10  ;;  %v5487_v13 = vmul.f32 %v4920_v50, %v10544_v36 }
 0x4f6   : > { %v10614_v49 = vadd.f32 1.0, %v6931_v5 }
 0x4f7   : > { %v4925_v53 = vmul.f32 %v6929_v16, %v4924_v33  ;;  %v10627_v39 = vadd.f32 %v10341_v32, %v4479_v17 }
 0x4f8   : > { %6934 = vrcp.f32 %v10614_v49  ;;  %v3735_v28 = vpop.f32.mrf.mxu3  ;;  %v4330_v63 = vpop.f32.mrf.mxu2  ;;  %v4948_v35 = vand.u32 2147483648, %v10614_v49  ;;  %vm4942_vm7 = vweird.f32 %v10614_v49 }
 0x4f9   : > { %v4926_v9 = vadd.f32 %v6929_v16, %v4925_v53  ;;  %v6365_v7 = vmul.f32 -1.442695, %v10627_v39  ;;  %v3736_v54 = vadd.f32 %v3735_v28, %v12065_v26  ;;  %v6933_v44 = vpop.eup %6932  ;;  %v4331_v0 = vadd.f32 %v4330_v63, %v4202_v42  ;;  %v294_v28 = vld [vmem:[%s7172_s22 + $0x3c] sm:$0xff]  }
 0x4fa   : > { %v10635_v48 = vadd.f32 1.0, %v6933_v44  ;;  %v4946_v42 = vand.u32 2147483647, %v10614_v49  ;;  %v12069_v26 = vld [vmem:[#allocation113_spill] sm:$0xff] }
 0x4fb   : > { %3777 = vmatmul.bf16.gmra.mxu3 %v12045_v18  ;;  %v5535_v18 = vunpack.c.l.bf16 %v292_v27  ;;  %v4930_v51 = vsel %vm4929_vm13, %v6929_v16, %v4926_v9  ;;  %6936 = vpow2.f32 %v6365_v7  ;;  %v4428_v52 = vadd.f32 %v4331_v0, %v3736_v54 }
 0x4fc   : > { %4372 = vmatmul.bf16.gmra.mxu2 %v12064_v14  ;;  %v4935_v61 = vsel %vm4932_vm14, %v4934_v20, %v4930_v51  ;;  %6938 = vrcp.f32 %v10635_v48  ;;  %v4949_v54 = vor.u32 1.1754944e-38, %v4948_v35  ;;  %v4961_v44 = vand.u32 2147483647, %v10635_v48 }
 0x4fd   : > { %v5488_v46 = vmul.f32 %v4935_v61, %v10557_v31  ;;  %v4480_v40 = vmul.f32 %v10336_v23, %v4428_v52  ;;  %v5583_v5 = vadd.f32 %v5535_v18, %v5487_v13  ;;  %v10646_v31 = vpop.f32.mrf.mxu0  ;;  %v4963_v20 = vand.u32 2147483648, %v10635_v48  ;;  %v12070_v61 = vld [vmem:[#allocation61_spill] sm:$0xff] }
 0x4fe   : > { %v6935_v60 = vpop.eup %6934  ;;  %vm4947_vm15 = vcmp.eq.f32.partialorder %v4946_v42, 8.507059e+37  ;;  %vm4957_vm1 = vweird.f32 %v10635_v48  ;;  %vm4962_vm3 = vcmp.eq.f32.partialorder %v4961_v44, 8.507059e+37 }
 0x4ff   : > { %v4938_v38 = vmul.f32 %v6935_v60, %v10614_v49  ;;  %v5584_v36 = vadd.f32 %v5536_v2, %v5488_v46  ;;  %v10644_v11 = vadd.f32 %v10341_v32, %v4480_v40  ;;  %vm4943_vm6 = vweird.f32 %v6935_v60 }
 0x500   : > { %v3738_v37 = vpop.f32.mrf.mxu3  ;;  %v4333_v3 = vpop.f32.mrf.mxu2  ;;  %vm10658_vm12 = vmor %vm4942_vm7, %vm4943_vm6  ;;  %v4207_v49 = vadd.f32 %v10343_v12, %v10141_v24  ;;  %v5538_v12 = vunpack.c.h.bf16 %v294_v28 }
 0x501   : > { %v4939_v16 = vsub.f32 1.0, %v4938_v38  ;;  %v6937_v1 = vpop.eup %6936  ;;  %v6536_v15 = vpack.c.bf16 %v5584_v36, %v5583_v5  ;;  %v3739_v33 = vadd.f32 %v3738_v37, %v12066_v25  ;;  %v4334_v17 = vadd.f32 %v4333_v3, %v4205_v43 }
 0x502   : > { %v10649_v19 = vadd.f32 1.0, %v6937_v1  ;;  %v6366_v30 = vmul.f32 -1.442695, %v10644_v11  ;;  %v6939_v21 = vpop.eup %6938 }
 0x503   : > { %v4940_v27 = vmul.f32 %v6935_v60, %v4939_v16  ;;  %6632 = vst [vmem:[%s10418_s8 + $0x28] sm:$0xff] %v6536_v15   ;;  %v4429_v53 = vadd.f32 %v4334_v17, %v3739_v33  ;;  %v4953_v50 = vmul.f32 %v6939_v21, %v10635_v48  ;;  %vm4958_vm0 = vweird.f32 %v6939_v21  ;;  %v10691_v17 = vld [vmem:[%s11359_s6] ss:$0 sm:$0xff] }
 0x504   : > { %6940 = vrcp.f32 %v10649_v19  ;;  %vm4959_vm2 = vmor %vm4957_vm1, %vm4958_vm0  ;;  %vm4972_vm8 = vweird.f32 %v10649_v19 }
 0x505   : > { %v4941_v4 = vadd.f32 %v6935_v60, %v4940_v27  ;;  %6942 = vpow2.f32 %v6366_v30  ;;  %v4954_v9 = vsub.f32 1.0, %v4953_v50  ;;  %v4481_v7 = vmul.f32 %v10336_v23, %v4429_v53  ;;  %v10678_v5 = vpop.f32.mrf.mxu0  ;;  %v12071_v30 = vld [vmem:[#allocation74_spill] sm:$0xff]  ;;  %v12072_v50 = vld [vmem:[#allocation53_spill] sm:$0xff] }
 0x507   : > { %v4945_v63 = vsel %vm10658_vm12, %v6935_v60, %v4941_v4  ;;  %v4955_v2 = vmul.f32 %v6939_v21, %v4954_v9  ;;  %v5537_v60 = vunpack.c.l.bf16 %v294_v28  ;;  %v4978_v9 = vand.u32 2147483648, %v10649_v19 }
 0x508   : > { %v3740_v0 = vpop.f32.mrf.mxu3  ;;  %v4335_v13 = vpop.f32.mrf.mxu2  ;;  %v4950_v51 = vsel %vm4947_vm15, %v4949_v54, %v4945_v63 }
 0x509   : > { %v3741_v52 = vadd.f32 %v3740_v0, %v12070_v61  ;;  %v4336_v46 = vadd.f32 %v4335_v13, %v4207_v49  ;;  %v4956_v24 = vadd.f32 %v6939_v21, %v4955_v2  ;;  %v5489_v37 = vmul.f32 %v4950_v51, %v10586_v29  ;;  %v10701_v49 = vpop.f32.mrf.mxu1 }
 0x50a   : > { %v6941_v38 = vpop.eup %6940 }
 0x50b   : > { %3782 = vmatmul.bf16.gmra.mxu3 %v12053_v59  ;;  %v10673_v59 = vadd.f32 %v10341_v32, %v4481_v7  ;;  %v6943_v43 = vpop.eup %6942  ;;  %v4964_v32 = vor.u32 1.1754944e-38, %v4963_v20  ;;  %v4968_v36 = vmul.f32 %v6941_v38, %v10649_v19  ;;  %v4430_v16 = vadd.f32 %v4336_v46, %v3741_v52  ;;  %v12075_v52 = vld [vmem:[#allocation118_spill] sm:$0xff] }
 0x50c   : > { %4377 = vmatmul.bf16.gmra.mxu2 %v12069_v26  ;;  %v4960_v3 = vsel %vm4959_vm2, %v6939_v21, %v4956_v24  ;;  %v10683_v1 = vadd.f32 1.0, %v6943_v43  ;;  %v4210_v21 = vadd.f32 %v10356_v22, %v12071_v30  ;;  %v5585_v4 = vadd.f32 %v5537_v60, %v5489_v37  ;;  %v10722_v60 = vld [vmem:[%s11358_s5] ss:$0 sm:$0xff]  ;;  %v296_v24 = vld [vmem:[%s7172_s22 + $0x44] sm:$0xff]  }
 0x50d   : > { %v6367_v40 = vmul.f32 -1.442695, %v10673_v59  ;;  %v4965_v48 = vsel %vm4962_vm3, %v4964_v32, %v4960_v3  ;;  %v4969_v15 = vsub.f32 1.0, %v4968_v36  ;;  %v4482_v27 = vmul.f32 %v10336_v23, %v4430_v16  ;;  %v10712_v0 = vpop.f32.mrf.mxu0  ;;  %v12076_v3 = vld [vmem:[#allocation59_spill] sm:$0xff] }
 0x50e   : > { %v5490_v25 = vmul.f32 %v4965_v48, %v10602_v8  ;;  %vm4973_vm5 = vweird.f32 %v6941_v38  ;;  %v4976_v22 = vand.u32 2147483647, %v10649_v19  ;;  %v4979_v19 = vor.u32 1.1754944e-38, %v4978_v9 }
 0x50f   : > { %6944 = vpow2.f32 %v6367_v40  ;;  %v4970_v33 = vmul.f32 %v6941_v38, %v4969_v15  ;;  %v10694_v29 = vadd.f32 %v10691_v17, %v4482_v27  ;;  %vm10708_vm9 = vmor %vm4972_vm8, %vm4973_vm5  ;;  %v4212_v46 = vadd.f32 %v10366_v47, %v10167_v41 }
 0x510   : > { %6946 = vrcp.f32 %v10683_v1  ;;  %v5586_v35 = vadd.f32 %v5538_v12, %v5490_v25  ;;  %v3743_v53 = vpop.f32.mrf.mxu3  ;;  %v4338_v23 = vpop.f32.mrf.mxu2  ;;  %vm4977_vm4 = vcmp.eq.f32.partialorder %v4976_v22, 8.507059e+37  ;;  %v4991_v40 = vand.u32 2147483647, %v10683_v1 }
 0x511   : > { %v4971_v8 = vadd.f32 %v6941_v38, %v4970_v33  ;;  %v6368_v42 = vmul.f32 -1.442695, %v10694_v29  ;;  %v3744_v18 = vadd.f32 %v3743_v53, %v12072_v50  ;;  %v4339_v7 = vadd.f32 %v4338_v23, %v4210_v21  ;;  %v10742_v53 = vpop.f32.mrf.mxu1 }
 0x512   : > { %v6541_v63 = vpack.c.bf16 %v5586_v35, %v5585_v4  ;;  %v5539_v25 = vunpack.c.l.bf16 %v296_v24  ;;  %vm4987_vm11 = vweird.f32 %v10683_v1  ;;  %vm4992_vm14 = vcmp.eq.f32.partialorder %v4991_v40, 8.507059e+37 }
 0x513   : > { %6948 = vpow2.f32 %v6368_v42  ;;  %v4431_v2 = vadd.f32 %v4339_v7, %v3744_v18  ;;  %v4975_v13 = vsel %vm10708_vm9, %v6941_v38, %v4971_v8  ;;  %v5540_v8 = vunpack.c.h.bf16 %v296_v24 }
 0x514   : > { %6633 = vst [vmem:[%s10418_s8 + $0x30] sm:$0xff] %v6541_v63   ;;  %v4980_v12 = vsel %vm4977_vm4, %v4979_v19, %v4975_v13  ;;  %v12078_v13 = vld [vmem:[#allocation68_spill] sm:$0xff] }
 0x515   : > { %v6945_v28 = vpop.eup %6944  ;;  %v4483_v61 = vmul.f32 %v10722_v60, %v4431_v2  ;;  %v5491_v21 = vmul.f32 %v4980_v12, %v10627_v39 }
 0x516   : > { %v10705_v54 = vadd.f32 1.0, %v6945_v28  ;;  %v6947_v44 = vpop.eup %6946  ;;  %v12077_v28 = vld [vmem:[#allocation84_spill] sm:$0xff] }
 0x517   : > { %v4983_v51 = vmul.f32 %v6947_v44, %v10683_v1  ;;  %v10732_v43 = vadd.f32 %v10691_v17, %v4483_v61  ;;  %vm4988_vm10 = vweird.f32 %v6947_v44  ;;  %v4215_v39 = vadd.f32 %v10380_v6, %v12077_v28  ;;  %v12083_v28 = vld [vmem:[#allocation70_spill] sm:$0xff] }
 0x518   : > { %6950 = vrcp.f32 %v10705_v54  ;;  %v3745_v32 = vpop.f32.mrf.mxu3  ;;  %v4340_v36 = vpop.f32.mrf.mxu2  ;;  %vm4989_vm13 = vmor %vm4987_vm11, %vm4988_vm10  ;;  %v5587_v9 = vadd.f32 %v5539_v25, %v5491_v21  ;;  %vm5002_vm7 = vweird.f32 %v10705_v54  ;;  %v5008_v6 = vand.u32 2147483648, %v10705_v54  ;;  %v12081_v25 = vld [vmem:[#allocation119_spill] sm:$0xff] }
 0x519   : > { %v4984_v38 = vsub.f32 1.0, %v4983_v51  ;;  %v6949_v16 = vpop.eup %6948  ;;  %v3746_v48 = vadd.f32 %v3745_v32, %v12076_v3  ;;  %v4341_v15 = vadd.f32 %v4340_v36, %v4212_v46  ;;  %v6369_v47 = vmul.f32 -1.442695, %v10732_v43  ;;  %v12082_v21 = vld [vmem:[#allocation71_spill] sm:$0xff] }
 0x51a   : > { %v10735_v41 = vadd.f32 1.0, %v6949_v16  ;;  %v5006_v12 = vand.u32 2147483647, %v10705_v54  ;;  %v298_v16 = vld [vmem:[%s7172_s22 + $0x4c] sm:$0xff]  }
 0x51b   : > { %3787 = vmatmul.bf16.gmra.mxu3 %v12058_v62  ;;  %v4993_v62 = vand.u32 2147483648, %v10683_v1  ;;  %v4985_v37 = vmul.f32 %v6947_v44, %v4984_v38  ;;  %v4432_v30 = vadd.f32 %v4341_v15, %v3746_v48  ;;  %v10745_v1 = vpop.f32.mrf.mxu0 }
 0x51c   : > { %4382 = vmatmul.bf16.gmra.mxu2 %v12075_v52  ;;  %6952 = vrcp.f32 %v10735_v41  ;;  %v5021_v15 = vand.u32 2147483647, %v10735_v41  ;;  %vm5007_vm15 = vcmp.eq.f32.partialorder %v5006_v12, 8.507059e+37  ;;  %vm5017_vm1 = vweird.f32 %v10735_v41 }
 0x51d   : > { %v4986_v33 = vadd.f32 %v6947_v44, %v4985_v37  ;;  %v4994_v4 = vor.u32 1.1754944e-38, %v4993_v62  ;;  %6954 = vpow2.f32 %v6369_v47  ;;  %v4484_v18 = vmul.f32 %v10722_v60, %v4432_v30 }
 0x51e   : > { %v6951_v27 = vpop.eup %6950  ;;  %v5023_v47 = vand.u32 2147483648, %v10735_v41  ;;  %vm5022_vm3 = vcmp.eq.f32.partialorder %v5021_v15, 8.507059e+37 }
 0x51f   : > { %v4998_v35 = vmul.f32 %v6951_v27, %v10705_v54  ;;  %v4990_v23 = vsel %vm4989_vm13, %v6947_v44, %v4986_v33  ;;  %v10751_v22 = vadd.f32 %v10691_v17, %v4484_v18  ;;  %vm5003_vm6 = vweird.f32 %v6951_v27  ;;  %v10775_v33 = vpop.f32.mrf.mxu1 }
 0x520   : > { %v4995_v42 = vsel %vm4992_vm14, %v4994_v4, %v4990_v23  ;;  %v3748_v44 = vpop.f32.mrf.mxu3  ;;  %v4343_v20 = vpop.f32.mrf.mxu2  ;;  %vm10759_vm12 = vmor %vm5002_vm7, %vm5003_vm6  ;;  %v5009_v54 = vor.u32 1.1754944e-38, %v5008_v6 }
 0x521   : > { %v4999_v50 = vsub.f32 1.0, %v4998_v35  ;;  %v5492_v63 = vmul.f32 %v4995_v42, %v10644_v11  ;;  %v3749_v51 = vadd.f32 %v3748_v44, %v12078_v13  ;;  %v4344_v19 = vadd.f32 %v4343_v20, %v4215_v39 }
 0x522   : > { %v6953_v61 = vpop.eup %6952  ;;  %v6370_v11 = vmul.f32 -1.442695, %v10751_v22  ;;  %v5541_v35 = vunpack.c.l.bf16 %v298_v16 }
 0x523   : > { %v5000_v7 = vmul.f32 %v6951_v27, %v4999_v50  ;;  %v5588_v2 = vadd.f32 %v5540_v8, %v5492_v63  ;;  %v6955_v38 = vpop.eup %6954  ;;  %v5013_v40 = vmul.f32 %v6953_v61, %v10735_v41  ;;  %v4433_v62 = vadd.f32 %v4344_v19, %v3749_v51  ;;  %v10782_v42 = vpop.f32.mrf.mxu0 }
 0x524   : > { %v10763_v36 = vadd.f32 1.0, %v6955_v38  ;;  %6956 = vpow2.f32 %v6370_v11  ;;  %vm5018_vm0 = vweird.f32 %v6953_v61  ;;  %v4220_v11 = vadd.f32 %v10428_v56, %v10646_v31 }
 0x525   : > { %v5001_v46 = vadd.f32 %v6951_v27, %v5000_v7  ;;  %v6546_v24 = vpack.c.bf16 %v5588_v2, %v5587_v9  ;;  %v5014_v3 = vsub.f32 1.0, %v5013_v40  ;;  %v4485_v48 = vmul.f32 %v10722_v60, %v4433_v62  ;;  %vm5019_vm2 = vmor %vm5017_vm1, %vm5018_vm0 }
 0x526   : > { %6958 = vrcp.f32 %v10763_v36  ;;  %v5024_v9 = vor.u32 1.1754944e-38, %v5023_v47  ;;  %v5542_v7 = vunpack.c.h.bf16 %v298_v16  ;;  %vm5032_vm8 = vweird.f32 %v10763_v36 }
 0x527   : > { %6634 = vst [vmem:[%s10418_s8 + $0x38] sm:$0xff] %v6546_v24   ;;  %v5005_v37 = vsel %vm10759_vm12, %v6951_v27, %v5001_v46  ;;  %v5015_v30 = vmul.f32 %v6953_v61, %v5014_v3  ;;  %v10778_v27 = vadd.f32 %v10691_v17, %v4485_v48 }
 0x528   : > { %v5010_v4 = vsel %vm5007_vm15, %v5009_v54, %v5005_v37  ;;  %v3750_v23 = vpop.f32.mrf.mxu3  ;;  %v4345_v8 = vpop.f32.mrf.mxu2  ;;  %v12084_v37 = vld [vmem:[#allocation58_spill] sm:$0xff] }
 0x529   : > { %v5016_v50 = vadd.f32 %v6953_v61, %v5015_v30  ;;  %v6371_v18 = vmul.f32 -1.442695, %v10778_v27  ;;  %v3751_v39 = vadd.f32 %v3750_v23, %v12083_v28  ;;  %v5038_v30 = vand.u32 2147483648, %v10763_v36  ;;  %v300_v23 = vld [vmem:[%s7172_s22 + $0x54] sm:$0xff]  }
 0x52a   : > { %v6957_v63 = vpop.eup %6956  ;;  %v12087_v28 = vld [vmem:[#allocation129_spill] sm:$0xff] }
 0x52b   : > { %3792 = vmatmul.bf16.gmra.mxu3 %v12064_v14  ;;  %v4217_v14 = vadd.f32 %v10400_v45, %v12082_v21  ;;  %v5493_v45 = vmul.f32 %v5010_v4, %v10673_v59  ;;  %v5020_v20 = vsel %vm5019_vm2, %v6953_v61, %v5016_v50  ;;  %v10788_v2 = vadd.f32 1.0, %v6957_v63  ;;  %v10805_v15 = vpop.f32.mrf.mxu0 }
 0x52c   : > { %4387 = vmatmul.bf16.gmra.mxu2 %v12081_v25  ;;  %6960 = vpow2.f32 %v6371_v18  ;;  %v6959_v13 = vpop.eup %6958  ;;  %v5025_v51 = vsel %vm5022_vm3, %v5024_v9, %v5020_v20 }
 0x52d   : > { %v4346_v44 = vadd.f32 %v4345_v8, %v4217_v14  ;;  %v5494_v41 = vmul.f32 %v5025_v51, %v10694_v29  ;;  %v5028_v46 = vmul.f32 %v6959_v13, %v10763_v36  ;;  %6962 = vrcp.f32 %v10788_v2  ;;  %v10799_v29 = vpop.f32.mrf.mxu1  ;;  %v12088_v51 = vld [vmem:[#allocation67_spill] sm:$0xff] }
 0x52e   : > { %v5589_v38 = vadd.f32 %v5541_v35, %v5493_v45  ;;  %vm5033_vm5 = vweird.f32 %v6959_v13  ;;  %v5036_v14 = vand.u32 2147483647, %v10763_v36  ;;  %v4222_v36 = vadd.f32 %v10462_v10, %v10678_v5 }
 0x52f   : > { %v4434_v19 = vadd.f32 %v4346_v44, %v3751_v39  ;;  %v5590_v59 = vadd.f32 %v5542_v7, %v5494_v41  ;;  %v5029_v61 = vsub.f32 1.0, %v5028_v46  ;;  %vm10813_vm9 = vmor %vm5032_vm8, %vm5033_vm5  ;;  %v5039_v39 = vor.u32 1.1754944e-38, %v5038_v30 }
 0x530   : > { %v3753_v12 = vpop.f32.mrf.mxu3  ;;  %v4348_v40 = vpop.f32.mrf.mxu2  ;;  %v5051_v63 = vand.u32 2147483647, %v10788_v2  ;;  %v5053_v9 = vand.u32 2147483648, %v10788_v2  ;;  %vm5037_vm4 = vcmp.eq.f32.partialorder %v5036_v14, 8.507059e+37  ;;  %vm5047_vm11 = vweird.f32 %v10788_v2 }
 0x531   : > { %v4486_v6 = vmul.f32 %v10722_v60, %v4434_v19  ;;  %v6551_v32 = vpack.c.bf16 %v5590_v59, %v5589_v38  ;;  %v5030_v16 = vmul.f32 %v6959_v13, %v5029_v61  ;;  %v3754_v3 = vadd.f32 %v3753_v12, %v12084_v37 }
 0x532   : > { %v6961_v62 = vpop.eup %6960  ;;  %v4349_v48 = vadd.f32 %v4348_v40, %v4220_v11  ;;  %v5544_v5 = vunpack.c.h.bf16 %v300_v23  ;;  %vm5052_vm14 = vcmp.eq.f32.partialorder %v5051_v63, 8.507059e+37  ;;  %v5054_v59 = vor.u32 1.1754944e-38, %v5053_v9 }
 0x533   : > { %v10797_v24 = vadd.f32 %v10691_v17, %v4486_v6  ;;  %v10802_v56 = vadd.f32 1.0, %v6961_v62  ;;  %v6963_v54 = vpop.eup %6962  ;;  %6635 = vst [vmem:[%s10418_s8 + $0x40] sm:$0xff] %v6551_v32   ;;  %v5031_v47 = vadd.f32 %v6959_v13, %v5030_v16 }
 0x534   : > { %v4435_v21 = vadd.f32 %v4349_v48, %v3754_v3  ;;  %v5043_v4 = vmul.f32 %v6963_v54, %v10788_v2  ;;  %vm5048_vm10 = vweird.f32 %v6963_v54  ;;  %v10840_v2 = vpop.f32.mrf.mxu0 }
 0x535   : > { %v6372_v31 = vmul.f32 -1.442695, %v10797_v24  ;;  %6964 = vrcp.f32 %v10802_v56  ;;  %v5035_v8 = vsel %vm10813_vm9, %v6959_v13, %v5031_v47  ;;  %v5543_v13 = vunpack.c.l.bf16 %v300_v23  ;;  %v10833_v38 = vpop.f32.mrf.mxu1  ;;  %vm5049_vm13 = vmor %vm5047_vm11, %vm5048_vm10  ;;  %v12089_v23 = vld [vmem:[#allocation69_spill] sm:$0xff] }
 0x536   : > { %v5044_v50 = vsub.f32 1.0, %v5043_v4  ;;  %v4487_v18 = vmul.f32 %v10722_v60, %v4435_v21  ;;  %v5040_v20 = vsel %vm5037_vm4, %v5039_v39, %v5035_v8  ;;  %vm5062_vm7 = vweird.f32 %v10802_v56 }
 0x537   : > { %6966 = vpow2.f32 %v6372_v31  ;;  %v5495_v40 = vmul.f32 %v5040_v20, %v10732_v43  ;;  %v4225_v43 = vadd.f32 %v10701_v49, %v10712_v0  ;;  %v5066_v49 = vand.u32 2147483647, %v10802_v56 }
 0x538   : > { %v5045_v7 = vmul.f32 %v6963_v54, %v5044_v50  ;;  %v3755_v44 = vpop.f32.mrf.mxu3  ;;  %v4350_v45 = vpop.f32.mrf.mxu2 }
 0x539   : > { %v3756_v19 = vadd.f32 %v3755_v44, %v12088_v51  ;;  %v4351_v41 = vadd.f32 %v4350_v45, %v4222_v36  ;;  %v12093_v51 = vld [vmem:[#allocation125_spill] sm:$0xff]  ;;  %vm5067_vm15 = vcmp.eq.f32.partialorder %v5066_v49, 8.507059e+37 }
 0x53a   : > { %v5046_v10 = vadd.f32 %v6963_v54, %v5045_v7 }
 0x53b   : > { %3797 = vmatmul.bf16.gmra.mxu3 %v12069_v26  ;;  %v10828_v26 = vadd.f32 %v10691_v17, %v4487_v18  ;;  %v6965_v46 = vpop.eup %6964  ;;  %v4436_v12 = vadd.f32 %v4351_v41, %v3756_v19  ;;  %v5068_v18 = vand.u32 2147483648, %v10802_v56 }
 0x53c   : > { %4392 = vmatmul.bf16.gmra.mxu2 %v12087_v28  ;;  %v5058_v61 = vmul.f32 %v6965_v46, %v10802_v56  ;;  %v5050_v62 = vsel %vm5049_vm13, %v6963_v54, %v5046_v10  ;;  %v5591_v54 = vadd.f32 %v5543_v13, %v5495_v40  ;;  %vm5063_vm6 = vweird.f32 %v6965_v46  ;;  %v12092_v13 = vld [vmem:[#allocation131_spill] sm:$0xff]  ;;  %v10873_v41 = vpop.f32.mrf.mxu0 }
 0x53d   : > { %v6373_v6 = vmul.f32 -1.442695, %v10828_v26  ;;  %v6967_v11 = vpop.eup %6966  ;;  %v5055_v16 = vsel %vm5052_vm14, %v5054_v59, %v5050_v62  ;;  %v4488_v3 = vmul.f32 %v10722_v60, %v4436_v12  ;;  %vm10858_vm12 = vmor %vm5062_vm7, %vm5063_vm6  ;;  %v10862_v7 = vpop.f32.mrf.mxu1  ;;  %v5069_v56 = vor.u32 1.1754944e-38, %v5068_v18 }
 0x53e   : > { %v10838_v32 = vadd.f32 1.0, %v6967_v11  ;;  %v5059_v37 = vsub.f32 1.0, %v5058_v61  ;;  %v5496_v48 = vmul.f32 %v5055_v16, %v10751_v22  ;;  %v12094_v19 = vpack.c.b16 %v12092_v13, %v12093_v51  ;;  %v12095_v16 = vld [vmem:[#allocation78_spill] sm:$0xff] }
 0x53f   : > { %6968 = vpow2.f32 %v6373_v6  ;;  %v10846_v47 = vadd.f32 %v10691_v17, %v4488_v3  ;;  %v4227_v10 = vadd.f32 %v10742_v53, %v10745_v1 }
 0x540   : > { %6970 = vrcp.f32 %v10838_v32  ;;  %v5060_v31 = vmul.f32 %v6965_v46, %v5059_v37  ;;  %v5592_v30 = vadd.f32 %v5544_v5, %v5496_v48  ;;  %v3758_v21 = vpop.f32.mrf.mxu3  ;;  %v4353_v14 = vpop.f32.mrf.mxu2  ;;  %v302_v5 = vld [vmem:[%s7172_s22 + $0x5c] sm:$0xff]   ;;  %v5081_v11 = vand.u32 2147483647, %v10838_v32 }
 0x541   : > { %v6374_v35 = vmul.f32 -1.442695, %v10846_v47  ;;  %v3759_v22 = vadd.f32 %v3758_v21, %v12089_v23  ;;  %v4354_v36 = vadd.f32 %v4353_v14, %v4225_v43  ;;  %vm5077_vm1 = vweird.f32 %v10838_v32 }
 0x542   : > { %v5061_v4 = vadd.f32 %v6965_v46, %v5060_v31  ;;  %v6556_v50 = vpack.c.bf16 %v5592_v30, %v5591_v54  ;;  %v5545_v31 = vunpack.c.l.bf16 %v302_v5  ;;  %vm5082_vm3 = vcmp.eq.f32.partialorder %v5081_v11, 8.507059e+37 }
 0x543   : > { %6972 = vpow2.f32 %v6374_v35  ;;  %v4437_v9 = vadd.f32 %v4354_v36, %v3759_v22  ;;  %v5546_v35 = vunpack.c.h.bf16 %v302_v5 }
 0x544   : > { %6636 = vst [vmem:[%s10418_s8 + $0x48] sm:$0xff] %v6556_v50   ;;  %v5065_v44 = vsel %vm10858_vm12, %v6965_v46, %v5061_v4 }
 0x545   : > { %v6969_v8 = vpop.eup %6968  ;;  %v4489_v20 = vmul.f32 %v10722_v60, %v4437_v9  ;;  %v5070_v6 = vsel %vm5067_vm15, %v5069_v56, %v5065_v44  ;;  %v10894_v50 = vpop.f32.mrf.mxu1 }
 0x546   : > { %v10855_v0 = vadd.f32 1.0, %v6969_v8  ;;  %v6971_v39 = vpop.eup %6970  ;;  %v5497_v30 = vmul.f32 %v5070_v6, %v10778_v27  ;;  %v10900_v9 = vpop.f32.mrf.mxu0 }
 0x547   : > { %v5073_v45 = vmul.f32 %v6971_v39, %v10838_v32  ;;  %v10881_v59 = vadd.f32 %v10691_v17, %v4489_v20  ;;  %vm5078_vm0 = vweird.f32 %v6971_v39 }
 0x548   : > { %6974 = vrcp.f32 %v10855_v0  ;;  %v3760_v61 = vpop.f32.mrf.mxu3  ;;  %v4355_v12 = vpop.f32.mrf.mxu2  ;;  %vm5079_vm2 = vmor %vm5077_vm1, %vm5078_vm0  ;;  %v5593_v18 = vadd.f32 %v5545_v31, %v5497_v30  ;;  %vm5092_vm8 = vweird.f32 %v10855_v0 }
 0x549   : > { %v5074_v46 = vsub.f32 1.0, %v5073_v45  ;;  %v6973_v40 = vpop.eup %6972  ;;  %v3761_v37 = vadd.f32 %v3760_v61, %v12095_v16  ;;  %v4356_v3 = vadd.f32 %v4355_v12, %v4227_v10  ;;  %v6375_v1 = vmul.f32 -1.442695, %v10881_v59  ;;  %v12096_v45 = vld [vmem:[#allocation62_spill] sm:$0xff]  ;;  %v12100_v61 = vld [vmem:[#allocation48_spill] sm:$0xff] }
 0x54a   : > { %v10884_v53 = vadd.f32 1.0, %v6973_v40  ;;  %v5096_v10 = vand.u32 2147483647, %v10855_v0  ;;  %v304_v40 = vld [vmem:[%s7172_s22 + $0x64] sm:$0xff]  }
 0x54b   : > { %3802 = vmatmul.bf16.gmra.mxu3 %v12075_v52  ;;  %v5083_v52 = vand.u32 2147483648, %v10838_v32  ;;  %v5075_v62 = vmul.f32 %v6971_v39, %v5074_v46  ;;  %v4438_v54 = vadd.f32 %v4356_v3, %v3761_v37  ;;  %v4230_v32 = vadd.f32 %v10775_v33, %v10782_v42 }
 0x54c   : > { %4397 = vmatmul.bf16.gmra.mxu2 %v12094_v19  ;;  %6976 = vrcp.f32 %v10884_v53  ;;  %v5111_v3 = vand.u32 2147483647, %v10884_v53  ;;  %vm5097_vm4 = vcmp.eq.f32.partialorder %v5096_v10, 8.507059e+37  ;;  %v5547_v30 = vunpack.c.l.bf16 %v304_v40 }
 0x54d   : > { %v5076_v43 = vadd.f32 %v6971_v39, %v5075_v62  ;;  %v5084_v21 = vor.u32 1.1754944e-38, %v5083_v52  ;;  %6978 = vpow2.f32 %v6375_v1  ;;  %v4490_v8 = vmul.f32 %v10722_v60, %v4438_v54  ;;  %v12099_v52 = vld [vmem:[#allocation132_spill] sm:$0xff] }
 0x54e   : > { %v6975_v48 = vpop.eup %6974  ;;  %v3875_v12 = vpack.c.b16 %v12100_v61, %v12099_v52  ;;  %v5113_v1 = vand.u32 2147483648, %v10884_v53  ;;  %vm5107_vm11 = vweird.f32 %v10884_v53  ;;  %vm5112_vm14 = vcmp.eq.f32.partialorder %v5111_v3, 8.507059e+37 }
 0x54f   : > { %v5088_v14 = vmul.f32 %v6975_v48, %v10855_v0  ;;  %v5080_v4 = vsel %vm5079_vm2, %v6971_v39, %v5076_v43  ;;  %v10898_v49 = vadd.f32 %v10691_v17, %v4490_v8  ;;  %vm5093_vm5 = vweird.f32 %v6975_v48 }
 0x550   : > { %v5085_v23 = vsel %vm5082_vm3, %v5084_v21, %v5080_v4  ;;  %v3763_v39 = vpop.f32.mrf.mxu3  ;;  %v4358_v63 = vpop.f32.mrf.mxu2  ;;  %vm10908_vm9 = vmor %vm5092_vm8, %vm5093_vm5 }
 0x551   : > { %v5089_v22 = vsub.f32 1.0, %v5088_v14  ;;  %v5498_v27 = vmul.f32 %v5085_v23, %v10797_v24  ;;  %v3764_v56 = vadd.f32 %v3763_v39, %v12096_v45  ;;  %v4359_v20 = vadd.f32 %v4358_v63, %v4230_v32  ;;  %v10930_v14 = vpop.f32.mrf.mxu1  ;;  %v12101_v23 = vld [vmem:[#allocation73_spill] sm:$0xff] }
 0x552   : > { %v6977_v33 = vpop.eup %6976  ;;  %v5098_v24 = vand.u32 2147483648, %v10855_v0  ;;  %v6376_v13 = vmul.f32 -1.442695, %v10898_v49  ;;  %v5114_v32 = vor.u32 1.1754944e-38, %v5113_v1 }
 0x553   : > { %v5090_v36 = vmul.f32 %v6975_v48, %v5089_v22  ;;  %v5594_v44 = vadd.f32 %v5546_v35, %v5498_v27  ;;  %v6979_v51 = vpop.eup %6978  ;;  %v5103_v46 = vmul.f32 %v6977_v33, %v10884_v53  ;;  %v4439_v5 = vadd.f32 %v4359_v20, %v3764_v56 }
 0x554   : > { %v10912_v11 = vadd.f32 1.0, %v6979_v51  ;;  %6980 = vpow2.f32 %v6376_v13  ;;  %v5099_v37 = vor.u32 1.1754944e-38, %v5098_v24  ;;  %vm5108_vm10 = vweird.f32 %v6977_v33 }
 0x555   : > { %v5091_v42 = vadd.f32 %v6975_v48, %v5090_v36  ;;  %v6561_v19 = vpack.c.bf16 %v5594_v44, %v5593_v18  ;;  %v5104_v16 = vsub.f32 1.0, %v5103_v46  ;;  %v4491_v0 = vmul.f32 %v10722_v60, %v4439_v5  ;;  %vm5109_vm13 = vmor %vm5107_vm11, %vm5108_vm10  ;;  %v12102_v5 = vld [vmem:[#allocation77_spill] sm:$0xff] }
 0x556   : > { %6982 = vrcp.f32 %v10912_v11  ;;  %v5548_v27 = vunpack.c.h.bf16 %v304_v40  ;;  %vm5122_vm7 = vweird.f32 %v10912_v11 }
 0x557   : > { %6637 = vst [vmem:[%s10418_s8 + $0x50] sm:$0xff] %v6561_v19   ;;  %v5095_v62 = vsel %vm10908_vm9, %v6975_v48, %v5091_v42  ;;  %v5105_v31 = vmul.f32 %v6977_v33, %v5104_v16  ;;  %v10926_v43 = vadd.f32 %v10691_v17, %v4491_v0  ;;  %v4232_v48 = vadd.f32 %v10799_v29, %v10805_v15  ;;  %v10935_v29 = vpop.f32.mrf.mxu0 }
 0x558   : > { %v5100_v54 = vsel %vm5097_vm4, %v5099_v37, %v5095_v62  ;;  %v4360_v21 = vpop.f32.mrf.mxu2  ;;  %v4235_v42 = vadd.f32 %v10833_v38, %v10840_v2  ;;  %v5128_v62 = vand.u32 2147483648, %v10912_v11  ;;  %v5126_v0 = vand.u32 2147483647, %v10912_v11 }
 0x559   : > { %v5106_v4 = vadd.f32 %v6977_v33, %v5105_v31  ;;  %v6377_v35 = vmul.f32 -1.442695, %v10926_v43  ;;  %v4361_v18 = vadd.f32 %v4360_v21, %v4232_v48  ;;  %v5499_v15 = vmul.f32 %v5100_v54, %v10828_v26  ;;  %v306_v31 = vld [vmem:[%s7172_s22 + $0x6c] sm:$0xff]  }
 0x55a   : > { %v6981_v8 = vpop.eup %6980  ;;  %v5129_v21 = vor.u32 1.1754944e-38, %v5128_v62  ;;  %vm5127_vm15 = vcmp.eq.f32.partialorder %v5126_v0, 8.507059e+37  ;;  %v12107_v62 = vld [vmem:[#allocation79_spill] sm:$0xff] }
 0x55b   : > { %3807 = vmatmul.bf16.gmra.mxu3 %v12081_v25  ;;  %v3765_v25 = vpop.f32.mrf.mxu3  ;;  %v5110_v36 = vsel %vm5109_vm13, %v6977_v33, %v5106_v4  ;;  %v10938_v39 = vadd.f32 1.0, %v6981_v8  ;;  %6984 = vpow2.f32 %v6377_v35  ;;  %v5595_v24 = vadd.f32 %v5547_v30, %v5499_v15  ;;  %v12105_v30 = vld [vmem:[#allocation66_spill] sm:$0xff] }
 0x55c   : > { %4402 = vmatmul.bf16.gmra.mxu2 %v3875_v12  ;;  %v3766_v22 = vadd.f32 %v3765_v25, %v12101_v23  ;;  %v6983_v63 = vpop.eup %6982  ;;  %v5115_v53 = vsel %vm5112_vm14, %v5114_v32, %v5110_v36  ;;  %v10953_v12 = vpop.f32.mrf.mxu1  ;;  %v4237_v25 = vadd.f32 %v10862_v7, %v10873_v41  ;;  %v5550_v41 = vunpack.c.h.bf16 %v306_v31 }
 0x55d   : > { %v5500_v45 = vmul.f32 %v5115_v53, %v10846_v47  ;;  %v5118_v56 = vmul.f32 %v6983_v63, %v10912_v11  ;;  %6986 = vrcp.f32 %v10938_v39  ;;  %vm5123_vm6 = vweird.f32 %v6983_v63 }
 0x55e   : > { %v4440_v44 = vadd.f32 %v4361_v18, %v3766_v22  ;;  %vm10963_vm12 = vmor %vm5122_vm7, %vm5123_vm6  ;;  %v5141_v4 = vand.u32 2147483647, %v10938_v39  ;;  %v5143_v35 = vand.u32 2147483648, %v10938_v39  ;;  %v12106_v18 = vld [vmem:[#allocation80_spill] sm:$0xff]  ;;  %vm5137_vm1 = vweird.f32 %v10938_v39 }
 0x55f   : > { %v5596_v26 = vadd.f32 %v5548_v27, %v5500_v45  ;;  %v5119_v33 = vsub.f32 1.0, %v5118_v56  ;;  %v10961_v3 = vpop.f32.mrf.mxu0  ;;  %v5549_v27 = vunpack.c.l.bf16 %v306_v31 }
 0x560   : > { %v4492_v20 = vmul.f32 %v10722_v60, %v4440_v44  ;;  %v4363_v19 = vpop.f32.mrf.mxu2  ;;  %vm5142_vm3 = vcmp.eq.f32.partialorder %v5141_v4, 8.507059e+37  ;;  %v5144_v45 = vor.u32 1.1754944e-38, %v5143_v35 }
 0x561   : > { %v6985_v10 = vpop.eup %6984  ;;  %v6566_v47 = vpack.c.bf16 %v5596_v26, %v5595_v24  ;;  %v5120_v46 = vmul.f32 %v6983_v63, %v5119_v33  ;;  %v4364_v52 = vadd.f32 %v4363_v19, %v4235_v42 }
 0x562   : > { %v10947_v13 = vadd.f32 %v10691_v17, %v4492_v20  ;;  %v10950_v61 = vadd.f32 1.0, %v6985_v10 }
 0x563   : > { %v3768_v51 = vpop.f32.mrf.mxu3  ;;  %v6987_v2 = vpop.eup %6986  ;;  %6638 = vst [vmem:[%s10418_s8 + $0x58] sm:$0xff] %v6566_v47   ;;  %v5121_v40 = vadd.f32 %v6983_v63, %v5120_v46 }
 0x564   : > { %v3769_v6 = vadd.f32 %v3768_v51, %v12102_v5  ;;  %v6378_v38 = vmul.f32 -1.442695, %v10947_v13  ;;  %v5133_v37 = vmul.f32 %v6987_v2, %v10938_v39  ;;  %6988 = vrcp.f32 %v10950_v61  ;;  %v10987_v33 = vpop.f32.mrf.mxu1 }
 0x565   : > { %v5125_v48 = vsel %vm10963_vm12, %v6983_v63, %v5121_v40  ;;  %vm5138_vm0 = vweird.f32 %v6987_v2  ;;  %v5158_v1 = vand.u32 2147483648, %v10950_v61  ;;  %vm5152_vm8 = vweird.f32 %v10950_v61 }
 0x566   : > { %v4441_v16 = vadd.f32 %v4364_v52, %v3769_v6  ;;  %6990 = vpow2.f32 %v6378_v38  ;;  %v5134_v54 = vsub.f32 1.0, %v5133_v37  ;;  %v5130_v32 = vsel %vm5127_vm15, %v5129_v21, %v5125_v48  ;;  %vm5139_vm2 = vmor %vm5137_vm1, %vm5138_vm0 }
 0x567   : > { %v5501_v42 = vmul.f32 %v5130_v32, %v10881_v59  ;;  %v10992_v47 = vpop.f32.mrf.mxu0  ;;  %v4240_v59 = vadd.f32 %v10894_v50, %v10900_v9  ;;  %v5156_v50 = vand.u32 2147483647, %v10950_v61  ;;  %v5159_v21 = vor.u32 1.1754944e-38, %v5158_v1 }
 0x568   : > { %v4493_v11 = vmul.f32 %v10722_v60, %v4441_v16  ;;  %v5135_v23 = vmul.f32 %v6987_v2, %v5134_v54  ;;  %v4365_v8 = vpop.f32.mrf.mxu2 }
 0x569   : > { %v4366_v36 = vadd.f32 %v4365_v8, %v4237_v25  ;;  %v5597_v6 = vadd.f32 %v5549_v27, %v5501_v42  ;;  %vm5157_vm4 = vcmp.eq.f32.partialorder %v5156_v50, 8.507059e+37 }
 0x56a   : > { %v6989_v63 = vpop.eup %6988  ;;  %v5136_v7 = vadd.f32 %v6987_v2, %v5135_v23 }
 0x56b   : > { %3812 = vmatmul.bf16.gmra.mxu3 %v12087_v28  ;;  %v10978_v28 = vadd.f32 %v10691_v17, %v4493_v11  ;;  %v3770_v22 = vpop.f32.mrf.mxu3  ;;  %v5148_v56 = vmul.f32 %v6989_v63, %v10950_v61  ;;  %vm5153_vm5 = vweird.f32 %v6989_v63  ;;  %v4242_v61 = vadd.f32 %v10930_v14, %v10935_v29  ;;  %v12108_v14 = vld [vmem:[#allocation83_spill] sm:$0xff] }
 0x56c   : > { %4407 = vmatmul.bf16.gmra.mxu2 %v12105_v30  ;;  %v3771_v15 = vadd.f32 %v3770_v22, %v12106_v18  ;;  %v6991_v44 = vpop.eup %6990  ;;  %v5140_v24 = vsel %vm5139_vm2, %v6987_v2, %v5136_v7  ;;  %vm5154_vm9 = vmor %vm5152_vm8, %vm5153_vm5  ;;  %v11013_v35 = vpop.f32.mrf.mxu1  ;;  %v308_v22 = vld [vmem:[%s7172_s22 + $0x74] sm:$0xff]  }
 0x56d   : > { %v6379_v53 = vmul.f32 -1.442695, %v10978_v28  ;;  %v10985_v26 = vadd.f32 1.0, %v6991_v44  ;;  %v5145_v51 = vsel %vm5142_vm3, %v5144_v45, %v5140_v24  ;;  %v5149_v39 = vsub.f32 1.0, %v5148_v56 }
 0x56e   : > { %v4442_v20 = vadd.f32 %v4366_v36, %v3771_v15  ;;  %v5502_v10 = vmul.f32 %v5145_v51, %v10898_v49  ;;  %v5551_v56 = vunpack.c.l.bf16 %v308_v22 }
 0x56f   : > { %6992 = vpow2.f32 %v6379_v53  ;;  %v5150_v46 = vmul.f32 %v6989_v63, %v5149_v39  ;;  %v5171_v32 = vand.u32 2147483647, %v10985_v26  ;;  %v5173_v27 = vand.u32 2147483648, %v10985_v26 }
 0x570   : > { %v4494_v19 = vmul.f32 %v10722_v60, %v4442_v20  ;;  %6994 = vrcp.f32 %v10985_v26  ;;  %v5598_v52 = vadd.f32 %v5550_v41, %v5502_v10  ;;  %v4368_v2 = vpop.f32.mrf.mxu2  ;;  %vm5167_vm11 = vweird.f32 %v10985_v26 }
 0x571   : > { %v5151_v40 = vadd.f32 %v6989_v63, %v5150_v46  ;;  %v4369_v31 = vadd.f32 %v4368_v2, %v4240_v59  ;;  %v5174_v51 = vor.u32 1.1754944e-38, %v5173_v27  ;;  %vm5172_vm14 = vcmp.eq.f32.partialorder %v5171_v32, 8.507059e+37  ;;  %v11065_v27 = vld [vmem:[%s11359_s6] ss:$0 sm:$0xff] }
 0x572   : > { %v10995_v5 = vadd.f32 %v10691_v17, %v4494_v19  ;;  %v6571_v37 = vpack.c.bf16 %v5598_v52, %v5597_v6  ;;  %v5552_v10 = vunpack.c.h.bf16 %v308_v22 }
 0x573   : > { %v3773_v38 = vpop.f32.mrf.mxu3  ;;  %v5155_v11 = vsel %vm5154_vm9, %v6989_v63, %v5151_v40  ;;  %v11021_v63 = vpop.f32.mrf.mxu0 }
 0x574   : > { %v6380_v49 = vmul.f32 -1.442695, %v10995_v5  ;;  %v3774_v16 = vadd.f32 %v3773_v38, %v12107_v62  ;;  %6639 = vst [vmem:[%s10418_s8 + $0x60] sm:$0xff] %v6571_v37   ;;  %v5160_v8 = vsel %vm5157_vm4, %v5159_v21, %v5155_v11  ;;  %v11038_v62 = vpop.f32.mrf.mxu1  ;;  %v310_v21 = vld [vmem:[%s7172_s22 + $0x7c] sm:$0xff]  }
 0x575   : > { %v6993_v0 = vpop.eup %6992  ;;  %v5503_v24 = vmul.f32 %v5160_v8, %v10926_v43 }
 0x576   : > { %v11004_v9 = vadd.f32 1.0, %v6993_v0  ;;  %6996 = vpow2.f32 %v6380_v49  ;;  %v6995_v48 = vpop.eup %6994  ;;  %v4443_v54 = vadd.f32 %v4369_v31, %v3774_v16 }
 0x577   : > { %v5163_v25 = vmul.f32 %v6995_v48, %v10985_v26  ;;  %vm5168_vm10 = vweird.f32 %v6995_v48  ;;  %v4245_v26 = vadd.f32 %v10953_v12, %v10961_v3  ;;  %v5599_v43 = vadd.f32 %v5551_v56, %v5503_v24 }
 0x578   : > { %6998 = vrcp.f32 %v11004_v9  ;;  %v4495_v4 = vmul.f32 %v10722_v60, %v4443_v54  ;;  %v4370_v15 = vpop.f32.mrf.mxu2  ;;  %vm5169_vm13 = vmor %vm5167_vm11, %vm5168_vm10  ;;  %vm5182_vm7 = vweird.f32 %v11004_v9 }
 0x579   : > { %v5164_v23 = vsub.f32 1.0, %v5163_v25  ;;  %v4371_v41 = vadd.f32 %v4370_v15, %v4242_v61 }
 0x57a   : > { %v11019_v18 = vadd.f32 %v10691_v17, %v4495_v4 }
 0x57b   : > { %4149 = vmatmul.bf16.vlgmr.msrb.gmra.mxu3 %v12105_v30  ;;  %v3775_v30 = vpop.f32.mrf.mxu3  ;;  %v5165_v7 = vmul.f32 %v6995_v48, %v5164_v23  ;;  %v11044_v31 = vpop.f32.mrf.mxu0 }
 0x57c   : > { %v6997_v36 = vpop.eup %6996  ;;  %v3776_v29 = vadd.f32 %v3775_v30, %v12108_v14  ;;  %v6381_v44 = vmul.f32 -1.442695, %v11019_v18 }
 0x57d   : > { %v11024_v53 = vadd.f32 1.0, %v6997_v36  ;;  %v5166_v20 = vadd.f32 %v6995_v48, %v5165_v7  ;;  %v5553_v36 = vunpack.c.l.bf16 %v310_v21 }
 0x57e   : > { %v6999_v45 = vpop.eup %6998  ;;  %v4444_v42 = vadd.f32 %v4371_v41, %v3776_v29 }
 0x57f   : > { %v5178_v39 = vmul.f32 %v6999_v45, %v11004_v9  ;;  %7000 = vrcp.f32 %v11024_v53  ;;  %v5170_v19 = vsel %vm5169_vm13, %v6995_v48, %v5166_v20  ;;  %vm5183_vm6 = vweird.f32 %v6999_v45 }
 0x580   : > { %7002 = vpow2.f32 %v6381_v44  ;;  %v5175_v46 = vsel %vm5172_vm14, %v5174_v51, %v5170_v19  ;;  %v4496_v6 = vmul.f32 %v10722_v60, %v4444_v42  ;;  %v4373_v49 = vpop.f32.mrf.mxu2  ;;  %v5186_v48 = vand.u32 2147483647, %v11004_v9  ;;  %vm11048_vm12 = vmor %vm5182_vm7, %vm5183_vm6  ;;  %v12111_v44 = vld [vmem:[#allocation14_spill] sm:$0xff]  ;;  %v11075_v51 = vpop.f32.mrf.mxu1 }
 0x581   : > { %v5179_v59 = vsub.f32 1.0, %v5178_v39  ;;  %v5504_v52 = vmul.f32 %v5175_v46, %v10947_v13  ;;  %v4374_v37 = vadd.f32 %v4373_v49, %v4245_v26  ;;  %v5188_v13 = vand.u32 2147483648, %v11004_v9  ;;  %v11088_v26 = vld [vmem:[%s11358_s5] ss:$0 sm:$0xff] }
 0x582   : > { %v11036_v2 = vadd.f32 %v10691_v17, %v4496_v6  ;;  %v5201_v9 = vand.u32 2147483647, %v11024_v53  ;;  %v5203_v8 = vand.u32 2147483648, %v11024_v53  ;;  %vm5187_vm15 = vcmp.eq.f32.partialorder %v5186_v48, 8.507059e+37 }
 0x583   : > { %v5180_v38 = vmul.f32 %v6999_v45, %v5179_v59  ;;  %v3778_v40 = vpop.f32.mrf.mxu3  ;;  %v5600_v16 = vadd.f32 %v5552_v10, %v5504_v52  ;;  %v5189_v22 = vor.u32 1.1754944e-38, %v5188_v13  ;;  %vm5197_vm1 = vweird.f32 %v11024_v53  ;;  %v11080_v46 = vpop.f32.mrf.mxu0 }
 0x584   : > { %v3779_v0 = vadd.f32 %v3778_v40, %v10216_v57  ;;  %v6382_v17 = vmul.f32 -1.442695, %v11036_v2  ;;  %vm5202_vm3 = vcmp.eq.f32.partialorder %v5201_v9, 8.507059e+37  ;;  %v5204_v20 = vor.u32 1.1754944e-38, %v5203_v8 }
 0x585   : > { %v7001_v1 = vpop.eup %7000  ;;  %v5181_v12 = vadd.f32 %v6999_v45, %v5180_v38  ;;  %v6576_v50 = vpack.c.bf16 %v5600_v16, %v5599_v43  ;;  %v5554_v42 = vunpack.c.h.bf16 %v310_v21  ;;  %v4250_v52 = vadd.f32 %v11013_v35, %v11021_v63  ;;  %v312_v21 = vld [vmem:[%s7172_s22 + $0x84] sm:$0xff]  }
 0x586   : > { %v7003_v3 = vpop.eup %7002  ;;  %v5193_v54 = vmul.f32 %v7001_v1, %v11024_v53  ;;  %v4445_v57 = vadd.f32 %v4374_v37, %v3779_v0  ;;  %7004 = vpow2.f32 %v6382_v17  ;;  %vm5198_vm0 = vweird.f32 %v7001_v1 }
 0x587   : > { %v11052_v25 = vadd.f32 1.0, %v7003_v3  ;;  %6640 = vst [vmem:[%s10418_s8 + $0x68] sm:$0xff] %v6576_v50   ;;  %v5185_v4 = vsel %vm11048_vm12, %v6999_v45, %v5181_v12  ;;  %vm5199_vm2 = vmor %vm5197_vm1, %vm5198_vm0 }
 0x588   : > { %v5194_v61 = vsub.f32 1.0, %v5193_v54  ;;  %v4497_v23 = vmul.f32 %v10722_v60, %v4445_v57  ;;  %v4247_v60 = vadd.f32 %v10987_v33, %v10992_v47  ;;  %v5190_v15 = vsel %vm5187_vm15, %v5189_v22, %v5185_v4  ;;  %v4375_v14 = vpop.f32.mrf.mxu2 }
 0x589   : > { %7006 = vrcp.f32 %v11052_v25  ;;  %v5505_v33 = vmul.f32 %v5190_v15, %v10978_v28  ;;  %v5218_v50 = vand.u32 2147483648, %v11052_v25  ;;  %vm5212_vm8 = vweird.f32 %v11052_v25 }
 0x58a   : > { %v5195_v32 = vmul.f32 %v7001_v1, %v5194_v61  ;;  %v11068_v30 = vadd.f32 %v11065_v27, %v4497_v23  ;;  %v4376_v24 = vadd.f32 %v4375_v14, %v4247_v60  ;;  %v5216_v54 = vand.u32 2147483647, %v11052_v25 }
 0x58b   : > { %v3780_v7 = vpop.f32.mrf.mxu3  ;;  %v5601_v43 = vadd.f32 %v5553_v36, %v5505_v33  ;;  %v11116_v22 = vpop.f32.mrf.mxu0  ;;  %v5219_v9 = vor.u32 1.1754944e-38, %v5218_v50 }
 0x58c   : > { %v5196_v29 = vadd.f32 %v7001_v1, %v5195_v32  ;;  %v6383_v41 = vmul.f32 -1.442695, %v11068_v30  ;;  %v3781_v45 = vadd.f32 %v3780_v7, %v12111_v44  ;;  %v7005_v56 = vpop.eup %7004  ;;  %vm5217_vm4 = vcmp.eq.f32.partialorder %v5216_v54, 8.507059e+37 }
 0x58d   : > { %v11078_v39 = vadd.f32 1.0, %v7005_v56 }
 0x58e   : > { %v5200_v47 = vsel %vm5199_vm2, %v7001_v1, %v5196_v29  ;;  %7008 = vpow2.f32 %v6383_v41  ;;  %v4446_v10 = vadd.f32 %v4376_v24, %v3781_v45  ;;  %v5555_v29 = vunpack.c.l.bf16 %v312_v21  ;;  %v12114_v41 = vld [vmem:[#allocation16_spill] sm:$0xff] }
 0x58f   : > { %v7007_v19 = vpop.eup %7006  ;;  %v5205_v53 = vsel %vm5202_vm3, %v5204_v20, %v5200_v47  ;;  %7010 = vrcp.f32 %v11078_v39  ;;  %v5231_v8 = vand.u32 2147483647, %v11078_v39  ;;  %v5233_v32 = vand.u32 2147483648, %v11078_v39 }
 0x590   : > { %v5506_v59 = vmul.f32 %v5205_v53, %v10995_v5  ;;  %v5208_v6 = vmul.f32 %v7007_v19, %v11052_v25  ;;  %v4498_v28 = vmul.f32 %v11088_v26, %v4446_v10  ;;  %v4378_v16 = vpop.f32.mrf.mxu2  ;;  %vm5213_vm5 = vweird.f32 %v7007_v19 }
 0x591   : > { %v4379_v13 = vadd.f32 %v4378_v16, %v4250_v52  ;;  %vm11108_vm9 = vmor %vm5212_vm8, %vm5213_vm5  ;;  %v4252_v25 = vadd.f32 %v11038_v62, %v11044_v31  ;;  %vm5227_vm11 = vweird.f32 %v11078_v39  ;;  %v5556_v31 = vunpack.c.h.bf16 %v312_v21 }
 0x592   : > { %v5602_v38 = vadd.f32 %v5554_v42, %v5506_v59  ;;  %v5209_v40 = vsub.f32 1.0, %v5208_v6  ;;  %v11094_v5 = vadd.f32 %v11065_v27, %v4498_v28  ;;  %vm5232_vm14 = vcmp.eq.f32.partialorder %v5231_v8, 8.507059e+37 }
 0x593   : > { %v3783_v49 = vpop.f32.mrf.mxu3  ;;  %v5234_v24 = vor.u32 1.1754944e-38, %v5233_v32 }
 0x594   : > { %v7009_v0 = vpop.eup %7008  ;;  %v6581_v37 = vpack.c.bf16 %v5602_v38, %v5601_v43  ;;  %v5210_v1 = vmul.f32 %v7007_v19, %v5209_v40  ;;  %v3784_v12 = vadd.f32 %v3783_v49, %v10231_v55  ;;  %v6384_v35 = vmul.f32 -1.442695, %v11094_v5  ;;  %v11106_v55 = vpop.f32.mrf.mxu1 }
 0x595   : > { %v11097_v17 = vadd.f32 1.0, %v7009_v0  ;;  %v7011_v63 = vpop.eup %7010  ;;  %v4257_v21 = vadd.f32 %v11106_v55, %v11116_v22 }
 0x596   : > { %6641 = vst [vmem:[%s10418_s8 + $0x70] sm:$0xff] %v6581_v37   ;;  %v5211_v3 = vadd.f32 %v7007_v19, %v5210_v1  ;;  %v4447_v48 = vadd.f32 %v4379_v13, %v3784_v12  ;;  %v5223_v57 = vmul.f32 %v7011_v63, %v11078_v39  ;;  %vm5228_vm10 = vweird.f32 %v7011_v63  ;;  %v4130_v37 = vpop.f32.mrf.mxu0 }
 0x597   : > { %7012 = vrcp.f32 %v11097_v17  ;;  %vm5229_vm13 = vmor %vm5227_vm11, %vm5228_vm10  ;;  %vm5242_vm7 = vweird.f32 %v11097_v17 }
 0x598   : > { %7014 = vpow2.f32 %v6384_v35  ;;  %v5215_v4 = vsel %vm11108_vm9, %v7007_v19, %v5211_v3  ;;  %v5224_v61 = vsub.f32 1.0, %v5223_v57  ;;  %v4499_v23 = vmul.f32 %v11088_v26, %v4447_v48  ;;  %v4380_v7 = vpop.f32.mrf.mxu2 }
 0x599   : > { %v5220_v14 = vsel %vm5217_vm4, %v5219_v9, %v5215_v4  ;;  %v4381_v45 = vadd.f32 %v4380_v7, %v4252_v25  ;;  %v314_v4 = vld [vmem:[%s7172_s22 + $0x8c] sm:$0xff]  }
 0x59a   : > { %v5225_v60 = vmul.f32 %v7011_v63, %v5224_v61  ;;  %v11123_v15 = vadd.f32 %v11065_v27, %v4499_v23  ;;  %v5507_v19 = vmul.f32 %v5220_v14, %v11019_v18  ;;  %v4255_v18 = vadd.f32 %v11075_v51, %v11080_v46 }
 0x59b   : > { %v3785_v36 = vpop.f32.mrf.mxu3  ;;  %v5246_v51 = vand.u32 2147483647, %v11097_v17 }
 0x59c   : > { %v3786_v44 = vadd.f32 %v3785_v36, %v12114_v41  ;;  %v5226_v62 = vadd.f32 %v7011_v63, %v5225_v60  ;;  %v6385_v20 = vmul.f32 -1.442695, %v11123_v15  ;;  %v11135_v52 = vpop.f32.mrf.mxu1  ;;  %v5603_v40 = vadd.f32 %v5555_v29, %v5507_v19 }
 0x59d   : > { %v7013_v56 = vpop.eup %7012  ;;  %vm5247_vm15 = vcmp.eq.f32.partialorder %v5246_v51, 8.507059e+37 }
 0x59e   : > { %v7015_v42 = vpop.eup %7014  ;;  %v5238_v33 = vmul.f32 %v7013_v56, %v11097_v17  ;;  %v4448_v47 = vadd.f32 %v4381_v45, %v3786_v44  ;;  %v5230_v53 = vsel %vm5229_vm13, %v7011_v63, %v5226_v62  ;;  %7016 = vpow2.f32 %v6385_v20  ;;  %v4132_v44 = vpop.f32.mrf.mxu0 }
 0x59f   : > { %v11130_v10 = vadd.f32 1.0, %v7015_v42  ;;  %v5235_v59 = vsel %vm5232_vm14, %v5234_v24, %v5230_v53  ;;  %vm5243_vm6 = vweird.f32 %v7013_v56  ;;  %v5248_v63 = vand.u32 2147483648, %v11097_v17 }
 0x5a0   : > { %v5239_v6 = vsub.f32 1.0, %v5238_v33  ;;  %v4500_v39 = vmul.f32 %v11088_v26, %v4448_v47  ;;  %v5508_v28 = vmul.f32 %v5235_v59, %v11036_v2  ;;  %v4383_v0 = vpop.f32.mrf.mxu2  ;;  %vm5244_vm12 = vmor %vm5242_vm7, %vm5243_vm6  ;;  %v5557_v45 = vunpack.c.l.bf16 %v314_v4 }
 0x5a1   : > { %7018 = vrcp.f32 %v11130_v10  ;;  %v4384_v3 = vadd.f32 %v4383_v0, %v4255_v18  ;;  %v5249_v57 = vor.u32 1.1754944e-38, %v5248_v63  ;;  %v5261_v23 = vand.u32 2147483647, %v11130_v10  ;;  %v12115_v18 = vld [vmem:[#allocation86_spill] sm:$0xff] }
 0x5a2   : > { %v5240_v43 = vmul.f32 %v7013_v56, %v5239_v6  ;;  %v11138_v38 = vadd.f32 %v11065_v27, %v4500_v39  ;;  %v5604_v49 = vadd.f32 %v5556_v31, %v5508_v28  ;;  %v5263_v25 = vand.u32 2147483648, %v11130_v10 }
 0x5a3   : > { %v3788_v16 = vpop.f32.mrf.mxu3  ;;  %vm5257_vm1 = vweird.f32 %v11130_v10  ;;  %vm5262_vm3 = vcmp.eq.f32.partialorder %v5261_v23, 8.507059e+37  ;;  %v5558_v24 = vunpack.c.h.bf16 %v314_v4  ;;  %v4260_v53 = vadd.f32 %v11135_v52, %v4130_v37 }
 0x5a4   : > { %v5241_v1 = vadd.f32 %v7013_v56, %v5240_v43  ;;  %v6386_v2 = vmul.f32 -1.442695, %v11138_v38  ;;  %v3789_v12 = vadd.f32 %v3788_v16, %v10248_v34  ;;  %v7017_v13 = vpop.eup %7016  ;;  %v6586_v35 = vpack.c.bf16 %v5604_v49, %v5603_v40  ;;  %v11161_v36 = vpop.f32.mrf.mxu1 }
 0x5a5   : > { %v11147_v46 = vadd.f32 1.0, %v7017_v13  ;;  %v5264_v20 = vor.u32 1.1754944e-38, %v5263_v25  ;;  %v4262_v4 = vadd.f32 %v11161_v36, %v4132_v44 }
 0x5a6   : > { %7020 = vpow2.f32 %v6386_v2  ;;  %6642 = vst [vmem:[%s10418_s8 + $0x78] sm:$0xff] %v6586_v35   ;;  %v4449_v48 = vadd.f32 %v4384_v3, %v3789_v12  ;;  %v5245_v54 = vsel %vm5244_vm12, %v7013_v56, %v5241_v1  ;;  %v4135_v51 = vpop.f32.mrf.mxu0 }
 0x5a7   : > { %v7019_v50 = vpop.eup %7018  ;;  %7022 = vrcp.f32 %v11147_v46  ;;  %v5250_v61 = vsel %vm5247_vm15, %v5249_v57, %v5245_v54  ;;  %vm5272_vm8 = vweird.f32 %v11147_v46  ;;  %v5276_v12 = vand.u32 2147483647, %v11147_v46 }
 0x5a8   : > { %v5253_v34 = vmul.f32 %v7019_v50, %v11130_v10  ;;  %v4501_v11 = vmul.f32 %v11088_v26, %v4449_v48  ;;  %v4385_v32 = vpop.f32.mrf.mxu2  ;;  %vm5258_vm0 = vweird.f32 %v7019_v50  ;;  %v5509_v31 = vmul.f32 %v5250_v61, %v11068_v30 }
 0x5a9   : > { %v4386_v22 = vadd.f32 %v4385_v32, %v4257_v21  ;;  %vm5259_vm2 = vmor %vm5257_vm1, %vm5258_vm0  ;;  %vm5277_vm4 = vcmp.eq.f32.partialorder %v5276_v12, 8.507059e+37 }
 0x5aa   : > { %v5254_v17 = vsub.f32 1.0, %v5253_v34  ;;  %v11159_v9 = vadd.f32 %v11065_v27, %v4501_v11  ;;  %v5605_v59 = vadd.f32 %v5557_v45, %v5509_v31 }
 0x5ab   : > { %v3790_v8 = vpop.f32.mrf.mxu3 }
 0x5ac   : > { %v7021_v60 = vpop.eup %7020  ;;  %v5255_v7 = vmul.f32 %v7019_v50, %v5254_v17  ;;  %v3791_v55 = vadd.f32 %v3790_v8, %v10254_v58  ;;  %v6387_v29 = vmul.f32 -1.442695, %v11159_v9  ;;  %v4264_v1 = vpop.f32.mrf.mxu1 }
 0x5ad   : > { %v11164_v14 = vadd.f32 1.0, %v7021_v60  ;;  %v7023_v41 = vpop.eup %7022 }
 0x5ae   : > { %v5256_v56 = vadd.f32 %v7019_v50, %v5255_v7  ;;  %v4450_v62 = vadd.f32 %v4386_v22, %v3791_v55  ;;  %v5268_v42 = vmul.f32 %v7023_v41, %v11147_v46  ;;  %vm5273_vm5 = vweird.f32 %v7023_v41  ;;  %v12118_v7 = vld [vmem:[#allocation88_spill] sm:$0xff] }
 0x5af   : > { %7024 = vrcp.f32 %v11164_v14  ;;  %vm11183_vm9 = vmor %vm5272_vm8, %vm5273_vm5  ;;  %v5291_v57 = vand.u32 2147483647, %v11164_v14  ;;  %v5293_v11 = vand.u32 2147483648, %v11164_v14  ;;  %vm5287_vm11 = vweird.f32 %v11164_v14 }
 0x5b0   : > { %v5260_v58 = vsel %vm5259_vm2, %v7019_v50, %v5256_v56  ;;  %7026 = vpow2.f32 %v6387_v29  ;;  %v5269_v47 = vsub.f32 1.0, %v5268_v42  ;;  %v4502_v19 = vmul.f32 %v11088_v26, %v4450_v62  ;;  %v4388_v28 = vpop.f32.mrf.mxu2  ;;  %v316_v50 = vld [vmem:[%s7172_s22 + $0x94] sm:$0xff]  }
 0x5b1   : > { %v5265_v33 = vsel %vm5262_vm3, %v5264_v20, %v5260_v58  ;;  %v4389_v49 = vadd.f32 %v4388_v28, %v4260_v53  ;;  %v5559_v23 = vunpack.c.l.bf16 %v316_v50  ;;  %vm5292_vm14 = vcmp.eq.f32.partialorder %v5291_v57, 8.507059e+37 }
 0x5b2   : > { %v5510_v10 = vmul.f32 %v5265_v33, %v11094_v5  ;;  %v5270_v30 = vmul.f32 %v7023_v41, %v5269_v47  ;;  %v11175_v6 = vadd.f32 %v11065_v27, %v4502_v19  ;;  %v5278_v5 = vand.u32 2147483648, %v11147_v46  ;;  %v4137_v33 = vpop.f32.mrf.mxu0 }
 0x5b3   : > { %v3793_v39 = vpop.f32.mrf.mxu3  ;;  %v5294_v29 = vor.u32 1.1754944e-38, %v5293_v11  ;;  %v4265_v47 = vadd.f32 %v4264_v1, %v4135_v51 }
 0x5b4   : > { %v5606_v43 = vadd.f32 %v5558_v24, %v5510_v10  ;;  %v3794_v40 = vadd.f32 %v3793_v39, %v12115_v18  ;;  %v5271_v0 = vadd.f32 %v7023_v41, %v5270_v30  ;;  %v6388_v52 = vmul.f32 -1.442695, %v11175_v6 }
 0x5b5   : > { %v7025_v16 = vpop.eup %7024  ;;  %v5279_v46 = vor.u32 1.1754944e-38, %v5278_v5 }
 0x5b6   : > { %v7027_v37 = vpop.eup %7026  ;;  %v6591_v2 = vpack.c.bf16 %v5606_v43, %v5605_v59  ;;  %v5283_v13 = vmul.f32 %v7025_v16, %v11164_v14  ;;  %v4451_v35 = vadd.f32 %v4389_v49, %v3794_v40  ;;  %7028 = vpow2.f32 %v6388_v52  ;;  %v4266_v14 = vpop.f32.mrf.mxu1  ;;  %v12119_v43 = vld [vmem:[#allocation75_spill] sm:$0xff] }
 0x5b7   : > { %v11187_v3 = vadd.f32 1.0, %v7027_v37  ;;  %v5275_v48 = vsel %vm11183_vm9, %v7023_v41, %v5271_v0  ;;  %vm5288_vm10 = vweird.f32 %v7025_v16  ;;  %v5560_v41 = vunpack.c.h.bf16 %v316_v50 }
 0x5b8   : > { %6643 = vst [vmem:[%s10418_s8 + $0x80] sm:$0xff] %v6591_v2   ;;  %v5284_v54 = vsub.f32 1.0, %v5283_v13  ;;  %v4503_v34 = vmul.f32 %v11088_v26, %v4451_v35  ;;  %v5280_v61 = vsel %vm5277_vm4, %v5279_v46, %v5275_v48  ;;  %v4390_v8 = vpop.f32.mrf.mxu2  ;;  %vm5289_vm13 = vmor %vm5287_vm11, %vm5288_vm10  ;;  %v318_v13 = vld [vmem:[%s7172_s22 + $0x9c] sm:$0xff]   ;;  %v4267_v50 = vadd.f32 %v4266_v14, %v4137_v33 }
 0x5b9   : > { %7030 = vrcp.f32 %v11187_v3  ;;  %v4391_v45 = vadd.f32 %v4390_v8, %v4262_v4  ;;  %v5511_v56 = vmul.f32 %v5280_v61, %v11123_v15  ;;  %v5308_v52 = vand.u32 2147483648, %v11187_v3 }
 0x5ba   : > { %v5285_v21 = vmul.f32 %v7025_v16, %v5284_v54  ;;  %v11198_v17 = vadd.f32 %v11065_v27, %v4503_v34  ;;  %vm5302_vm7 = vweird.f32 %v11187_v3  ;;  %v5306_v1 = vand.u32 2147483647, %v11187_v3  ;;  %v4140_v4 = vpop.f32.mrf.mxu0 }
 0x5bb   : > { %v3795_v25 = vpop.f32.mrf.mxu3  ;;  %v5607_v15 = vadd.f32 %v5559_v23, %v5511_v56  ;;  %v5309_v54 = vor.u32 1.1754944e-38, %v5308_v52  ;;  %v5561_v23 = vunpack.c.l.bf16 %v318_v13 }
 0x5bc   : > { %v5286_v32 = vadd.f32 %v7025_v16, %v5285_v21  ;;  %v6389_v60 = vmul.f32 -1.442695, %v11198_v17  ;;  %v3796_v55 = vadd.f32 %v3795_v25, %v12118_v7  ;;  %v7029_v22 = vpop.eup %7028  ;;  %vm5307_vm15 = vcmp.eq.f32.partialorder %v5306_v1, 8.507059e+37  ;;  %v12122_v25 = vld [vmem:[#allocation85_spill] sm:$0xff] }
 0x5bd   : > { %v11205_v44 = vadd.f32 1.0, %v7029_v22 }
 0x5be   : > { %v5290_v36 = vsel %vm5289_vm13, %v7025_v16, %v5286_v32  ;;  %7032 = vpow2.f32 %v6389_v60  ;;  %v4452_v20 = vadd.f32 %v4391_v45, %v3796_v55  ;;  %v4269_v48 = vpop.f32.mrf.mxu1  ;;  %v5562_v55 = vunpack.c.h.bf16 %v318_v13 }
 0x5bf   : > { %v7031_v62 = vpop.eup %7030  ;;  %v5295_v31 = vsel %vm5292_vm14, %v5294_v29, %v5290_v36  ;;  %7034 = vrcp.f32 %v11205_v44  ;;  %v5323_v34 = vand.u32 2147483648, %v11205_v44  ;;  %vm5317_vm1 = vweird.f32 %v11205_v44 }
 0x5c0   : > { %v5512_v42 = vmul.f32 %v5295_v31, %v11138_v38  ;;  %v5298_v58 = vmul.f32 %v7031_v62, %v11187_v3  ;;  %v4504_v24 = vmul.f32 %v11088_v26, %v4452_v20  ;;  %v4393_v30 = vpop.f32.mrf.mxu2  ;;  %vm5303_vm6 = vweird.f32 %v7031_v62 }
 0x5c1   : > { %v4394_v40 = vadd.f32 %v4393_v30, %v4265_v47  ;;  %vm11224_vm12 = vmor %vm5302_vm7, %vm5303_vm6  ;;  %v5321_v3 = vand.u32 2147483647, %v11205_v44  ;;  %v4270_v33 = vadd.f32 %v4269_v48, %v4140_v4 }
 0x5c2   : > { %v5608_v19 = vadd.f32 %v5560_v41, %v5512_v42  ;;  %v5299_v53 = vsub.f32 1.0, %v5298_v58  ;;  %v11212_v10 = vadd.f32 %v11065_v27, %v4504_v24  ;;  %v5324_v41 = vor.u32 1.1754944e-38, %v5323_v34 }
 0x5c3   : > { %v3798_v59 = vpop.f32.mrf.mxu3  ;;  %vm5322_vm3 = vcmp.eq.f32.partialorder %v5321_v3, 8.507059e+37 }
 0x5c4   : > { %v7033_v39 = vpop.eup %7032  ;;  %v6596_v28 = vpack.c.bf16 %v5608_v19, %v5607_v15  ;;  %v5300_v38 = vmul.f32 %v7031_v62, %v5299_v53  ;;  %v3799_v18 = vadd.f32 %v3798_v59, %v12119_v43  ;;  %v6390_v16 = vmul.f32 -1.442695, %v11212_v10 }
 0x5c5   : > { %v11215_v49 = vadd.f32 1.0, %v7033_v39  ;;  %v7035_v0 = vpop.eup %7034  ;;  %v12123_v39 = vld [vmem:[#allocation20_spill] sm:$0xff] }
 0x5c6   : > { %6644 = vst [vmem:[%s10418_s8 + $0x88] sm:$0xff] %v6596_v28   ;;  %v5301_v5 = vadd.f32 %v7031_v62, %v5300_v38  ;;  %v4453_v37 = vadd.f32 %v4394_v40, %v3799_v18  ;;  %v5313_v2 = vmul.f32 %v7035_v0, %v11205_v44  ;;  %vm5318_vm0 = vweird.f32 %v7035_v0  ;;  %v4271_v53 = vpop.f32.mrf.mxu1  ;;  %v4142_v40 = vpop.f32.mrf.mxu0 }
 0x5c7   : > { %7036 = vrcp.f32 %v11215_v49  ;;  %vm5319_vm2 = vmor %vm5317_vm1, %vm5318_vm0  ;;  %v5338_v43 = vand.u32 2147483648, %v11215_v49  ;;  %vm5332_vm8 = vweird.f32 %v11215_v49  ;;  %v4272_v13 = vadd.f32 %v4271_v53, %v4142_v40 }
 0x5c8   : > { %7038 = vpow2.f32 %v6390_v16  ;;  %v5305_v35 = vsel %vm11224_vm12, %v7031_v62, %v5301_v5  ;;  %v5314_v63 = vsub.f32 1.0, %v5313_v2  ;;  %v4505_v51 = vmul.f32 %v11088_v26, %v4453_v37  ;;  %v4395_v21 = vpop.f32.mrf.mxu2 }
 0x5c9   : > { %v5310_v61 = vsel %vm5307_vm15, %v5309_v54, %v5305_v35  ;;  %v4396_v32 = vadd.f32 %v4395_v21, %v4267_v50  ;;  %v5336_v16 = vand.u32 2147483647, %v11215_v49  ;;  %v5339_v2 = vor.u32 1.1754944e-38, %v5338_v43 }
 0x5ca   : > { %v5315_v46 = vmul.f32 %v7035_v0, %v5314_v63  ;;  %v11235_v57 = vadd.f32 %v11065_v27, %v4505_v51  ;;  %v5513_v36 = vmul.f32 %v5310_v61, %v11159_v9  ;;  %v320_v63 = vld [vmem:[%s7172_s22 + $0xa4] sm:$0xff]  }
 0x5cb   : > { %v3800_v11 = vpop.f32.mrf.mxu3  ;;  %vm5337_vm4 = vcmp.eq.f32.partialorder %v5336_v16, 8.507059e+37 }
 0x5cc   : > { %v3801_v8 = vadd.f32 %v3800_v11, %v12122_v25  ;;  %v5316_v7 = vadd.f32 %v7035_v0, %v5315_v46  ;;  %v6391_v22 = vmul.f32 -1.442695, %v11235_v57  ;;  %v5609_v47 = vadd.f32 %v5561_v23, %v5513_v36  ;;  %v12124_v11 = vld [vmem:[#allocation10_spill] sm:$0xff] }
 0x5cd   : > { %v7037_v60 = vpop.eup %7036 }
 0x5ce   : > { %v7039_v29 = vpop.eup %7038  ;;  %v5328_v45 = vmul.f32 %v7037_v60, %v11215_v49  ;;  %v4454_v56 = vadd.f32 %v4396_v32, %v3801_v8  ;;  %v5320_v62 = vsel %vm5319_vm2, %v7035_v0, %v5316_v7  ;;  %7040 = vpow2.f32 %v6391_v22  ;;  %v4274_v8 = vpop.f32.mrf.mxu1 }
 0x5cf   : > { %v11243_v31 = vadd.f32 1.0, %v7039_v29  ;;  %v5325_v20 = vsel %vm5322_vm3, %v5324_v41, %v5320_v62  ;;  %vm5333_vm5 = vweird.f32 %v7037_v60  ;;  %v5563_v32 = vunpack.c.l.bf16 %v320_v63  ;;  %v4145_v41 = vpop.f32.mrf.mxu0 }
 0x5d0   : > { %v5329_v14 = vsub.f32 1.0, %v5328_v45  ;;  %v4506_v44 = vmul.f32 %v11088_v26, %v4454_v56  ;;  %v5514_v42 = vmul.f32 %v5325_v20, %v11175_v6  ;;  %v4398_v19 = vpop.f32.mrf.mxu2  ;;  %vm5334_vm9 = vmor %vm5332_vm8, %vm5333_vm5  ;;  %v5564_v56 = vunpack.c.h.bf16 %v320_v63 }
 0x5d1   : > { %7042 = vrcp.f32 %v11243_v31  ;;  %v4399_v18 = vadd.f32 %v4398_v19, %v4270_v33  ;;  %v5351_v51 = vand.u32 2147483647, %v11243_v31  ;;  %v5353_v50 = vand.u32 2147483648, %v11243_v31 }
 0x5d2   : > { %v5330_v58 = vmul.f32 %v7037_v60, %v5329_v14  ;;  %v11249_v24 = vadd.f32 %v11065_v27, %v4506_v44  ;;  %v5610_v15 = vadd.f32 %v5562_v55, %v5514_v42  ;;  %vm5347_vm11 = vweird.f32 %v11243_v31 }
 0x5d3   : > { %v3803_v9 = vpop.f32.mrf.mxu3  ;;  %v5354_v22 = vor.u32 1.1754944e-38, %v5353_v50  ;;  %vm5352_vm14 = vcmp.eq.f32.partialorder %v5351_v51, 8.507059e+37  ;;  %v4275_v14 = vadd.f32 %v4274_v8, %v4145_v41 }
 0x5d4   : > { %v5331_v59 = vadd.f32 %v7037_v60, %v5330_v58  ;;  %v6392_v30 = vmul.f32 -1.442695, %v11249_v24  ;;  %v3804_v28 = vadd.f32 %v3803_v9, %v12123_v39  ;;  %v7041_v6 = vpop.eup %7040  ;;  %v6601_v38 = vpack.c.bf16 %v5610_v15, %v5609_v47  ;;  %v12125_v15 = vld [vmem:[#allocation87_spill] sm:$0xff] }
 0x5d5   : > { %v11256_v0 = vadd.f32 1.0, %v7041_v6 }
 0x5d6   : > { %7044 = vpow2.f32 %v6392_v30  ;;  %6645 = vst [vmem:[%s10418_s8 + $0x90] sm:$0xff] %v6601_v38   ;;  %v4455_v52 = vadd.f32 %v4399_v18, %v3804_v28  ;;  %v5335_v37 = vsel %vm5334_vm9, %v7037_v60, %v5331_v59  ;;  %v4276_v16 = vpop.f32.mrf.mxu1 }
 0x5d7   : > { %v7043_v5 = vpop.eup %7042  ;;  %7046 = vrcp.f32 %v11256_v0  ;;  %v5340_v49 = vsel %vm5337_vm4, %v5339_v2, %v5335_v37  ;;  %vm5362_vm7 = vweird.f32 %v11256_v0  ;;  %v5366_v6 = vand.u32 2147483647, %v11256_v0 }
 0x5d8   : > { %v5343_v1 = vmul.f32 %v7043_v5, %v11243_v31  ;;  %v4507_v12 = vmul.f32 %v11088_v26, %v4455_v52  ;;  %v4400_v3 = vpop.f32.mrf.mxu2  ;;  %vm5348_vm10 = vweird.f32 %v7043_v5  ;;  %v5515_v55 = vmul.f32 %v5340_v49, %v11198_v17 }
 0x5d9   : > { %v4401_v4 = vadd.f32 %v4400_v3, %v4272_v13  ;;  %vm5349_vm13 = vmor %vm5347_vm11, %vm5348_vm10  ;;  %v4147_v13 = vpop.f32.mrf.mxu0  ;;  %vm5367_vm15 = vcmp.eq.f32.partialorder %v5366_v6, 8.507059e+37 }
 0x5da   : > { %v5344_v35 = vsub.f32 1.0, %v5343_v1  ;;  %v11266_v48 = vadd.f32 %v11065_v27, %v4507_v12  ;;  %v5611_v44 = vadd.f32 %v5563_v32, %v5515_v55  ;;  %v4277_v49 = vadd.f32 %v4276_v16, %v4147_v13 }
 0x5db   : > { %v3805_v54 = vpop.f32.mrf.mxu3 }
 0x5dc   : > { %v7045_v34 = vpop.eup %7044  ;;  %v5345_v46 = vmul.f32 %v7043_v5, %v5344_v35  ;;  %v3806_v21 = vadd.f32 %v3805_v54, %v12124_v11  ;;  %v6393_v23 = vmul.f32 -1.442695, %v11266_v48  ;;  %v12128_v11 = vld [vmem:[#allocation144_spill] sm:$0xff] }
 0x5dd   : > { %v11269_v61 = vadd.f32 1.0, %v7045_v34  ;;  %v7047_v25 = vpop.eup %7046 }
 0x5de   : > { %v5346_v60 = vadd.f32 %v7043_v5, %v5345_v46  ;;  %v4456_v7 = vadd.f32 %v4401_v4, %v3806_v21  ;;  %v5358_v29 = vmul.f32 %v7047_v25, %v11256_v0  ;;  %vm5363_vm6 = vweird.f32 %v7047_v25 }
 0x5df   : > { %7048 = vrcp.f32 %v11269_v61  ;;  %vm11287_vm12 = vmor %vm5362_vm7, %vm5363_vm6  ;;  %v5381_v2 = vand.u32 2147483647, %v11269_v61  ;;  %v5383_v12 = vand.u32 2147483648, %v11269_v61  ;;  %vm5377_vm1 = vweird.f32 %v11269_v61 }
 0x5e0   : > { %v5350_v45 = vsel %vm5349_vm13, %v7043_v5, %v5346_v60  ;;  %7050 = vpow2.f32 %v6393_v23  ;;  %v5359_v62 = vsub.f32 1.0, %v5358_v29  ;;  %v4508_v20 = vmul.f32 %v11088_v26, %v4456_v7  ;;  %v4403_v33 = vpop.f32.mrf.mxu2  ;;  %v322_v5 = vld [vmem:[%s7172_s22 + $0xac] sm:$0xff]  }
 0x5e1   : > { %v5355_v36 = vsel %vm5352_vm14, %v5354_v22, %v5350_v45  ;;  %v4404_v19 = vadd.f32 %v4403_v33, %v4275_v14  ;;  %v5565_v50 = vunpack.c.l.bf16 %v322_v5  ;;  %vm5382_vm3 = vcmp.eq.f32.partialorder %v5381_v2, 8.507059e+37 }
 0x5e2   : > { %v5516_v31 = vmul.f32 %v5355_v36, %v11212_v10  ;;  %v5360_v17 = vmul.f32 %v7047_v25, %v5359_v62  ;;  %v11279_v42 = vadd.f32 %v11065_v27, %v4508_v20  ;;  %v5368_v10 = vand.u32 2147483648, %v11256_v0 }
 0x5e3   : > { %v3808_v58 = vpop.f32.mrf.mxu3  ;;  %v5384_v23 = vor.u32 1.1754944e-38, %v5383_v12 }
 0x5e4   : > { %v5612_v47 = vadd.f32 %v5564_v56, %v5516_v31  ;;  %v3809_v9 = vadd.f32 %v3808_v58, %v12125_v15  ;;  %v5361_v59 = vadd.f32 %v7047_v25, %v5360_v17  ;;  %v6394_v30 = vmul.f32 -1.442695, %v11279_v42 }
 0x5e5   : > { %v7049_v53 = vpop.eup %7048  ;;  %v5369_v0 = vor.u32 1.1754944e-38, %v5368_v10 }
 0x5e6   : > { %v7051_v39 = vpop.eup %7050  ;;  %v6606_v28 = vpack.c.bf16 %v5612_v47, %v5611_v44  ;;  %v5373_v38 = vmul.f32 %v7049_v53, %v11269_v61  ;;  %v4457_v43 = vadd.f32 %v4404_v19, %v3809_v9  ;;  %7052 = vpow2.f32 %v6394_v30  ;;  %v324_v30 = vld [vmem:[%s7172_s22 + $0xb4] sm:$0xff]  }
 0x5e7   : > { %v11291_v40 = vadd.f32 1.0, %v7051_v39  ;;  %v5365_v52 = vsel %vm11287_vm12, %v7047_v25, %v5361_v59  ;;  %vm5378_vm0 = vweird.f32 %v7049_v53  ;;  %v5566_v25 = vunpack.c.h.bf16 %v322_v5 }
 0x5e8   : > { %6646 = vst [vmem:[%s10418_s8 + $0x98] sm:$0xff] %v6606_v28   ;;  %v5374_v37 = vsub.f32 1.0, %v5373_v38  ;;  %v4509_v1 = vmul.f32 %v11088_v26, %v4457_v43  ;;  %v5370_v51 = vsel %vm5367_vm15, %v5369_v0, %v5365_v52  ;;  %v4405_v3 = vpop.f32.mrf.mxu2  ;;  %vm5379_vm2 = vmor %vm5377_vm1, %vm5378_vm0  ;;  %v5567_v16 = vunpack.c.l.bf16 %v324_v30 }
 0x5e9   : > { %7054 = vrcp.f32 %v11291_v40  ;;  %v4406_v8 = vadd.f32 %v4405_v3, %v4277_v49  ;;  %v5517_v32 = vmul.f32 %v5370_v51, %v11235_v57  ;;  %v5398_v47 = vand.u32 2147483648, %v11291_v40  ;;  %v4279_v49 = vpop.f32.mrf.mxu1 }
 0x5ea   : > { %v5375_v35 = vmul.f32 %v7049_v53, %v5374_v37  ;;  %v11302_v63 = vadd.f32 %v11065_v27, %v4509_v1  ;;  %vm5392_vm8 = vweird.f32 %v11291_v40  ;;  %v5396_v15 = vand.u32 2147483647, %v11291_v40 }
 0x5eb   : > { %v3810_v54 = vpop.f32.mrf.mxu3  ;;  %v5613_v56 = vadd.f32 %v5565_v50, %v5517_v32  ;;  %v5399_v59 = vor.u32 1.1754944e-38, %v5398_v47  ;;  %v5568_v52 = vunpack.c.h.bf16 %v324_v30 }
 0x5ec   : > { %v5376_v34 = vadd.f32 %v7049_v53, %v5375_v35  ;;  %v6395_v46 = vmul.f32 -1.442695, %v11302_v63  ;;  %v3811_v21 = vadd.f32 %v3810_v54, %v12128_v11  ;;  %v7053_v4 = vpop.eup %7052  ;;  %vm5397_vm4 = vcmp.eq.f32.partialorder %v5396_v15, 8.507059e+37 }
 0x5ed   : > { %v4752_v7 = vadd.f32 1.0, %v7053_v4 }
 0x5ee   : > { %v5380_v60 = vsel %vm5379_vm2, %v7049_v53, %v5376_v34  ;;  %7056 = vpow2.f32 %v6395_v46  ;;  %v4458_v29 = vadd.f32 %v4406_v8, %v3811_v21 }
 0x5ef   : > { %v7055_v55 = vpop.eup %7054  ;;  %v5385_v22 = vsel %vm5382_vm3, %v5384_v23, %v5380_v60  ;;  %7058 = vrcp.f32 %v4752_v7  ;;  %v5413_v10 = vand.u32 2147483648, %v4752_v7  ;;  %v5411_v28 = vand.u32 2147483647, %v4752_v7 }
 0x5f0   : > { %v5518_v61 = vmul.f32 %v5385_v22, %v11249_v24  ;;  %v5388_v41 = vmul.f32 %v7055_v55, %v11291_v40  ;;  %v4510_v45 = vmul.f32 %v11088_v26, %v4458_v29  ;;  %vm5393_vm5 = vweird.f32 %v7055_v55  ;;  %v4408_v3 = vpop.f32.mrf.mxu2 }
 0x5f1   : > { %vm5394_vm9 = vmor %vm5392_vm8, %vm5393_vm5  ;;  %vm5407_vm11 = vweird.f32 %v4752_v7  ;;  %v5414_v5 = vor.u32 1.1754944e-38, %v5413_v10  ;;  %vm5412_vm14 = vcmp.eq.f32.partialorder %v5411_v28, 8.507059e+37 }
 0x5f2   : > { %v5614_v36 = vadd.f32 %v5566_v25, %v5518_v61  ;;  %v5389_v62 = vsub.f32 1.0, %v5388_v41  ;;  %v11312_v20 = vadd.f32 %v11065_v27, %v4510_v45 }
 0x5f3   : > { %v3813_v57 = vpop.f32.mrf.mxu3 }
 0x5f4   : > { %v7057_v14 = vpop.eup %7056  ;;  %v6611_v31 = vpack.c.bf16 %v5614_v36, %v5613_v56  ;;  %v5390_v44 = vmul.f32 %v7055_v55, %v5389_v62  ;;  %v6396_v24 = vmul.f32 -1.442695, %v11312_v20  ;;  %v4281_v56 = vpop.f32.mrf.mxu1  ;;  %v326_v62 = vld [vmem:[%s7172_s22 + $0xbc] sm:$0xff]  }
 0x5f5   : > { %v11314_v17 = vadd.f32 1.0, %v7057_v14  ;;  %v7059_v58 = vpop.eup %7058 }
 0x5f6   : > { %6647 = vst [vmem:[%s10418_s8 + $0xa0] sm:$0xff] %v6611_v31   ;;  %v5391_v33 = vadd.f32 %v7055_v55, %v5390_v44  ;;  %v5403_v9 = vmul.f32 %v7059_v58, %v4752_v7  ;;  %vm5408_vm10 = vweird.f32 %v7059_v58 }
 0x5f7   : > { %7060 = vrcp.f32 %v11314_v17  ;;  %vm5409_vm13 = vmor %vm5407_vm11, %vm5408_vm10  ;;  %v5426_v8 = vand.u32 2147483647, %v11314_v17  ;;  %vm5422_vm7 = vweird.f32 %v11314_v17 }
 0x5f8   : > { %7062 = vpow2.f32 %v6396_v24  ;;  %v5395_v19 = vsel %vm5394_vm9, %v7055_v55, %v5391_v33  ;;  %v5404_v53 = vsub.f32 1.0, %v5403_v9  ;;  %v5569_v9 = vunpack.c.l.bf16 %v326_v62 }
 0x5f9   : > { %v5400_v38 = vsel %vm5397_vm4, %v5399_v59, %v5395_v19  ;;  %vm5427_vm15 = vcmp.eq.f32.partialorder %v5426_v8, 8.507059e+37 }
 0x5fa   : > { %v5405_v39 = vmul.f32 %v7059_v58, %v5404_v53  ;;  %v5519_v1 = vmul.f32 %v5400_v38, %v11266_v48  ;;  %v12129_v48 = vld [vmem:[#allocation18_spill] sm:$0xff]  ;;  %v5570_v53 = vunpack.c.h.bf16 %v326_v62 }
 0x5fb   : > { %v3815_v6 = vpop.f32.mrf.mxu3  ;;  %v3814_v4 = vadd.f32 %v3813_v57, %v12129_v48 }
 0x5fc   : > { %v5406_v18 = vadd.f32 %v7059_v58, %v5405_v39  ;;  %v5615_v50 = vadd.f32 %v5567_v16, %v5519_v1 }
 0x5fd   : > { %v7061_v43 = vpop.eup %7060 }
 0x5fe   : > { %v7063_v40 = vpop.eup %7062  ;;  %v5418_v37 = vmul.f32 %v7061_v43, %v11314_v17  ;;  %v5410_v0 = vsel %vm5409_vm13, %v7059_v58, %v5406_v18  ;;  %vm5423_vm6 = vweird.f32 %v7061_v43  ;;  %v4410_v58 = vpop.f32.mrf.mxu2 }
 0x5ff   : > { %v4754_v2 = vadd.f32 1.0, %v7063_v40  ;;  %v5415_v12 = vsel %vm5412_vm14, %v5414_v5, %v5410_v0  ;;  %vm11331_vm12 = vmor %vm5422_vm7, %vm5423_vm6 }
 0x600   : > { %v5419_v13 = vsub.f32 1.0, %v5418_v37  ;;  %v5520_v35 = vmul.f32 %v5415_v12, %v11279_v42  ;;  %v5428_v42 = vand.u32 2147483648, %v11314_v17  ;;  %v12132_v17 = vld [vmem:[#allocation96_spill] sm:$0xff] }
 0x601   : > { %7064 = vrcp.f32 %v4754_v2  ;;  %v5441_v41 = vand.u32 2147483647, %v4754_v2  ;;  %v5443_v45 = vand.u32 2147483648, %v4754_v2  ;;  %v3816_v24 = vadd.f32 %v3815_v6, %v12132_v17 }
 0x602   : > { %v5420_v51 = vmul.f32 %v7061_v43, %v5419_v13  ;;  %v5616_v54 = vadd.f32 %v5568_v52, %v5520_v35  ;;  %v5429_v61 = vor.u32 1.1754944e-38, %v5428_v42  ;;  %vm5437_vm1 = vweird.f32 %v4754_v2 }
 0x603   : > { %v4150_v34 = vpop.f32.mrf.mxu3  ;;  %vm5442_vm3 = vcmp.eq.f32.partialorder %v5441_v41, 8.507059e+37  ;;  %v5444_v19 = vor.u32 1.1754944e-38, %v5443_v45 }
 0x604   : > { %v4280_v46 = vadd.f32 %v4279_v49, %v4150_v34  ;;  %v6616_v11 = vpack.c.bf16 %v5616_v54, %v5615_v50  ;;  %v5421_v21 = vadd.f32 %v7061_v43, %v5420_v51  ;;  %v328_v34 = vld [vmem:[%s7172_s22 + $0xc4] sm:$0xff]  }
 0x605   : > { %v5572_v42 = vunpack.c.h.bf16 %v328_v34 }
 0x606   : > { %v4409_v23 = vadd.f32 %v4408_v3, %v4280_v46  ;;  %6648 = vst [vmem:[%s10418_s8 + $0xa8] sm:$0xff] %v6616_v11   ;;  %v5425_v55 = vsel %vm11331_vm12, %v7061_v43, %v5421_v21  ;;  %v7084_v43 = vld [vmem:[%s11359_s6] ss:$0 sm:$0xff] }
 0x607   : > { %v7065_v25 = vpop.eup %7064  ;;  %v5430_v44 = vsel %vm5427_vm15, %v5429_v61, %v5425_v55 }
 0x608   : > { %v5433_v32 = vmul.f32 %v7065_v25, %v4754_v2  ;;  %v4459_v60 = vadd.f32 %v4409_v23, %v3814_v4  ;;  %vm5438_vm0 = vweird.f32 %v7065_v25  ;;  %v5521_v59 = vmul.f32 %v5430_v44, %v11302_v63 }
 0x609   : > { %vm5439_vm2 = vmor %vm5437_vm1, %vm5438_vm0  ;;  %v5571_v4 = vunpack.c.l.bf16 %v328_v34 }
 0x60a   : > { %v5434_v22 = vsub.f32 1.0, %v5433_v32  ;;  %v4511_v29 = vmul.f32 %v11088_v26, %v4459_v60  ;;  %v5617_v6 = vadd.f32 %v5569_v9, %v5521_v59 }
 0x60b   : > { %v4152_v36 = vpop.f32.mrf.mxu3 }
 0x60c   : > { %v5435_v57 = vmul.f32 %v7065_v25, %v5434_v22  ;;  %v4563_v14 = vadd.f32 %v11065_v27, %v4511_v29  ;;  %v4282_v31 = vadd.f32 %v4281_v56, %v4152_v36 }
 0x60e   : > { %v5436_v33 = vadd.f32 %v7065_v25, %v5435_v57  ;;  %v6397_v47 = vmul.f32 -1.442695, %v4563_v14  ;;  %v4411_v15 = vadd.f32 %v4410_v58, %v4282_v31 }
 0x610   : > { %v5440_v10 = vsel %vm5439_vm2, %v7065_v25, %v5436_v33  ;;  %7066 = vpow2.f32 %v6397_v47  ;;  %v4460_v27 = vadd.f32 %v4411_v15, %v3816_v24 }
 0x611   : > { %v5445_v30 = vsel %vm5442_vm3, %v5444_v19, %v5440_v10 }
 0x612   : > { %v5522_v39 = vmul.f32 %v5445_v30, %v11312_v20  ;;  %v4512_v28 = vmul.f32 %v11088_v26, %v4460_v27 }
 0x614   : > { %v5618_v38 = vadd.f32 %v5570_v53, %v5522_v39  ;;  %v4564_v18 = vadd.f32 %v7084_v43, %v4512_v28 }
 0x616   : > { %v7067_v40 = vpop.eup %7066  ;;  %v6621_v16 = vpack.c.bf16 %v5618_v38, %v5617_v6  ;;  %v6398_v5 = vmul.f32 -1.442695, %v4564_v18 }
 0x617   : > { %v4755_v52 = vadd.f32 1.0, %v7067_v40 }
 0x618   : > { %6649 = vst [vmem:[%s10418_s8 + $0xb0] sm:$0xff] %v6621_v16   ;;  %7068 = vpow2.f32 %v6398_v5 }
 0x619   : > { %7070 = vrcp.f32 %v4755_v52  ;;  %v5458_v13 = vand.u32 2147483648, %v4755_v52  ;;  %vm5452_vm8 = vweird.f32 %v4755_v52  ;;  %v5456_v35 = vand.u32 2147483647, %v4755_v52 }
 0x61b   : > { %v5459_v54 = vor.u32 1.1754944e-38, %v5458_v13  ;;  %vm5457_vm4 = vcmp.eq.f32.partialorder %v5456_v35, 8.507059e+37 }
 0x61e   : > { %v7069_v63 = vpop.eup %7068 }
 0x61f   : > { %v7071_v37 = vpop.eup %7070  ;;  %v4756_v1 = vadd.f32 1.0, %v7069_v63 }
 0x620   : > { %v5448_v20 = vmul.f32 %v7071_v37, %v4755_v52  ;;  %vm5453_vm5 = vweird.f32 %v7071_v37 }
 0x621   : > { %7072 = vrcp.f32 %v4756_v1  ;;  %vm5454_vm9 = vmor %vm5452_vm8, %vm5453_vm5  ;;  %v5473_v3 = vand.u32 2147483648, %v4756_v1  ;;  %v5471_v11 = vand.u32 2147483647, %v4756_v1  ;;  %vm5467_vm11 = vweird.f32 %v4756_v1 }
 0x622   : > { %v5449_v26 = vsub.f32 1.0, %v5448_v20 }
 0x623   : > { %v5474_v23 = vor.u32 1.1754944e-38, %v5473_v3  ;;  %vm5472_vm14 = vcmp.eq.f32.partialorder %v5471_v11, 8.507059e+37 }
 0x624   : > { %v5450_v0 = vmul.f32 %v7071_v37, %v5449_v26 }
 0x626   : > { %v5451_v2 = vadd.f32 %v7071_v37, %v5450_v0 }
 0x627   : > { %v7073_v12 = vpop.eup %7072 }
 0x628   : > { %v5463_v49 = vmul.f32 %v7073_v12, %v4756_v1  ;;  %v5455_v51 = vsel %vm5454_vm9, %v7071_v37, %v5451_v2  ;;  %vm5468_vm10 = vweird.f32 %v7073_v12 }
 0x629   : > { %v5460_v21 = vsel %vm5457_vm4, %v5459_v54, %v5455_v51  ;;  %vm5469_vm13 = vmor %vm5467_vm11, %vm5468_vm10 }
 0x62a   : > { %v5464_v50 = vsub.f32 1.0, %v5463_v49  ;;  %v5523_v25 = vmul.f32 %v5460_v21, %v4563_v14 }
 0x62c   : > { %v5465_v46 = vmul.f32 %v7073_v12, %v5464_v50  ;;  %v5619_v7 = vadd.f32 %v5571_v4, %v5523_v25 }
 0x62e   : > { %v5466_v48 = vadd.f32 %v7073_v12, %v5465_v46 }
 0x630   : > { %v5470_v8 = vsel %vm5469_vm13, %v7073_v12, %v5466_v48 }
 0x631   : > { %v5475_v32 = vsel %vm5472_vm14, %v5474_v23, %v5470_v8 }
 0x632   : > { %v5524_v60 = vmul.f32 %v5475_v32, %v4564_v18 }
 0x634   : > { %v5620_v55 = vadd.f32 %v5572_v42, %v5524_v60 }
 0x636   : > { %v6626_v22 = vpack.c.bf16 %v5620_v55, %v5619_v7 }
 0x638   : > { %6650 = vst [vmem:[%s10418_s8 + $0xb8] sm:$0xff] %v6626_v22  }
 0x639 PF: > { %s17_s24 = sadd.s32 1, %s7091_s24  }
 0x63a   : > { %p14_p4 = scmp.ge.s32.totalorder %s17_s24, 4  }
 0x63c   :  { %16 = sbr.rel (!%p14_p4) target bundleno = 1 (0x1), region = 80 }

</bundles_post_ra>
